<compile_context>
chip_gen: v6e
topology: v6e:2x2x1
jax: 0.10.0
libtpu: 0.0.40
codegen_flags: <defaults>
</compile_context>

<pallas_src>
import functools

import jax
import jax.numpy as jnp
from jax.experimental import pallas as pl
from jax.experimental.pallas import tpu as pltpu

LANE = 128  # channel dims are padded to a multiple of the 128-wide lane axis


def _round_up(x, m):
    return (x + m - 1) // m * m


def _pad_to(a, shape):
    return jnp.pad(a, [(0, t - s) for s, t in zip(a.shape, shape)])


# ----------------------------------------------------------------------------
# Pallas kernels
# ----------------------------------------------------------------------------
def _accumulate_taps(x_ref, w_ref, acc_ref):
    """acc = sum_t patch_t(x) @ w[t]  (bf16 operands, f32 MXU accumulation).

    x_ref : (1, H+2, W+2, Cin) bf16 -- one zero-padded image (NHWC).
    w_ref : (9, Cin, Cout)     bf16 -- 3x3 taps, (di-major, dj-minor) order.
    acc_ref: (H*W, Cout)       f32  -- VMEM scratch accumulator.
    """
    h = x_ref.shape[1] - 2
    w = x_ref.shape[2] - 2
    cin = x_ref.shape[3]
    # Static 9-tap loop, fully unrolled at trace time.
    for di in range(3):
        for dj in range(3):
            t = 3 * di + dj
            patch = x_ref[:, di:di + h, dj:dj + w, :].reshape(h * w, cin)
            contrib = jnp.dot(patch, w_ref[t],
                              preferred_element_type=jnp.float32)
            if t == 0:
                acc_ref[...] = contrib
            else:
                acc_ref[...] += contrib


def _conv3x3_relu_kernel(x_ref, w_ref, b_ref, o_ref, acc_ref):
    """o = relu(conv3x3(x) + b) for one image; lane-dense bf16 output."""
    h = x_ref.shape[1] - 2
    w = x_ref.shape[2] - 2
    cout = o_ref.shape[3]
    _accumulate_taps(x_ref, w_ref, acc_ref)
    y = jnp.maximum(acc_ref[...] + b_ref[...], 0.0)           # f32 epilogue
    o_ref[...] = y.reshape(1, h, w, cout).astype(o_ref.dtype)  # aligned store


def _conv3x3_relu_gap_kernel(x_ref, w_ref, b_ref, o_ref, acc_ref):
    """o = mean_{h,w} relu(conv3x3(x) + b): GAP fused into the conv epilogue."""
    h = x_ref.shape[1] - 2
    w = x_ref.shape[2] - 2
    _accumulate_taps(x_ref, w_ref, acc_ref)
    y = jnp.maximum(acc_ref[...] + b_ref[...], 0.0)            # (H*W, Cout) f32
    pooled = jnp.sum(y, axis=0, keepdims=True) * (1.0 / (h * w))
    o_ref[...] = pooled.reshape(1, 1, -1)


# ----------------------------------------------------------------------------
# pallas_call wrappers
# ----------------------------------------------------------------------------
def _conv_call(kernel, x_pad, w, b, out_shape, out_block, out_index_map):
    n, hp, wp, cin = x_pad.shape
    cout = w.shape[-1]
    h, wd = hp - 2, wp - 2
    return pl.pallas_call(
        kernel,
        out_shape=out_shape,
        grid_spec=pltpu.PrefetchScalarGridSpec(
            num_scalar_prefetch=0,
            grid=(n,),  # one image per grid step; "parallel" -> both v7x TCs
            in_specs=[
                pl.BlockSpec((1, hp, wp, cin), lambda i: (i, 0, 0, 0)),
                pl.BlockSpec((9, cin, cout), lambda i: (0, 0, 0)),   # resident
                pl.BlockSpec((1, cout), lambda i: (0, 0)),           # bias row
            ],
            out_specs=pl.BlockSpec(out_block, out_index_map),
            scratch_shapes=[pltpu.VMEM((h * wd, cout), jnp.float32)],
        ),
        compiler_params=pltpu.CompilerParams(
            dimension_semantics=("parallel",),
            vmem_limit_bytes=48 * 1024 * 1024,  # headroom under v7x's 64 MiB
        ),
    )(x_pad, w, b)


def conv3x3_relu(x_pad, w, b):
    """x_pad: (N, H+2, W+2, Cin) bf16 -> relu(conv3x3(x)+b): (N, H, W, Cout) bf16."""
    n, hp, wp, _ = x_pad.shape
    cout = w.shape[-1]
    h, wd = hp - 2, wp - 2
    return _conv_call(
        _conv3x3_relu_kernel, x_pad, w, b,
        out_shape=jax.ShapeDtypeStruct((n, h, wd, cout), jnp.bfloat16),
        out_block=(1, h, wd, cout),
        out_index_map=lambda i: (i, 0, 0, 0))


def conv3x3_relu_gap(x_pad, w, b):
    """x_pad: (N, H+2, W+2, Cin) bf16 -> pooled features (N, 1, Cout) f32."""
    n = x_pad.shape[0]
    cout = w.shape[-1]
    return _conv_call(
        _conv3x3_relu_gap_kernel, x_pad, w, b,
        out_shape=jax.ShapeDtypeStruct((n, 1, cout), jnp.float32),
        out_block=(1, 1, cout),
        out_index_map=lambda i: (i, 0, 0))


# ----------------------------------------------------------------------------
# BackboneWithoutClassifier.forward
# ----------------------------------------------------------------------------
@functools.partial(jax.jit, static_argnames=("hidden_channels", "out_features"))
def backbone_without_classifier(x_nchw, params, *, hidden_channels, out_features):
    """forward(x) = backbone(x); returns (N, out_features) f32 features."""
    n, c, h, w = x_nchw.shape
    cin_p = _round_up(c, LANE)
    ch_p = _round_up(hidden_channels, LANE)
    co_p = _round_up(out_features, LANE)

    # Lane-dense, bf16 weights for the MXU; bias kept f32 for the epilogue.
    w1 = _pad_to(params["w1"].astype(jnp.bfloat16), (9, cin_p, ch_p))
    b1 = _pad_to(params["b1"], (ch_p,)).reshape(1, ch_p)
    w2 = _pad_to(params["w2"].astype(jnp.bfloat16), (9, ch_p, co_p))
    b2 = _pad_to(params["b2"], (co_p,)).reshape(1, co_p)

    # NCHW -> NHWC, bf16 cast, lane-dense channel pad, +1 spatial zero pad
    # ('same' conv).  Single fused XLA pass over the small input tensor;
    # no im2col blow-up anywhere.
    x = jnp.transpose(x_nchw, (0, 2, 3, 1)).astype(jnp.bfloat16)
    x = jnp.pad(x, ((0, 0), (1, 1), (1, 1), (0, cin_p - c)))

    # conv1 + ReLU: 9-tap MXU accumulation, bf16 lane-dense output.
    y1 = conv3x3_relu(x, w1, b1)                       # (N, H, W, ch_p) bf16
    # Zero 'same' pad for conv2 (cheap; could be folded into conv1's epilogue
    # as an offset store for a further small HBM-traffic cut).
    y1 = jnp.pad(y1, ((0, 0), (1, 1), (1, 1), (0, 0)))

    # conv2 + ReLU + global average pool fused in one Pallas kernel.
    feats = conv3x3_relu_gap(y1, w2, b2)               # (N, 1, co_p) f32
    return feats[:, 0, :out_features]


# ----------------------------------------------------------------------------
# Synthetic backbone parameters (3x3 taps stored as (9, Cin, Cout))
# ----------------------------------------------------------------------------
def init_backbone_params(key, in_channels, hidden_channels, out_features):
    k1, k2, k3, k4 = jax.random.split(key, 4)
    w1 = jax.random.normal(k1, (9, in_channels, hidden_channels), jnp.float32)
    w1 = w1 / jnp.sqrt(9.0 * in_channels)
    b1 = 0.01 * jax.random.normal(k2, (hidden_channels,), jnp.float32)
    w2 = jax.random.normal(k3, (9, hidden_channels, out_features), jnp.float32)
    w2 = w2 / jnp.sqrt(9.0 * hidden_channels)
    b2 = 0.01 * jax.random.normal(k4, (out_features,), jnp.float32)
    return {"w1": w1, "b1": b1, "w2": w2, "b2": b2}


# ----------------------------------------------------------------------------
# Pure-JAX reference (same bf16 casts, f32 accumulation) for validation
# ----------------------------------------------------------------------------
def _ref_conv3x3_relu(x_bf16, w_bf16, b_f32):
    n, h, w, _ = x_bf16.shape
    cout = w_bf16.shape[-1]
    xp = jnp.pad(x_bf16, ((0, 0), (1, 1), (1, 1), (0, 0)))
    acc = jnp.zeros((n, h, w, cout), jnp.float32)
    for di in range(3):
        for dj in range(3):
            t = 3 * di + dj
            patch = xp[:, di:di + h, dj:dj + w, :].astype(jnp.float32)
            acc = acc + jnp.einsum("nhwc,cf->nhwf", patch,
                                   w_bf16[t].astype(jnp.float32))
    return jnp.maximum(acc + b_f32, 0.0)


@jax.jit
def _ref_forward(x_nchw, params):
    x = jnp.transpose(x_nchw, (0, 2, 3, 1)).astype(jnp.bfloat16)
    y1 = _ref_conv3x3_relu(x, params["w1"].astype(jnp.bfloat16), params["b1"])
    y1 = y1.astype(jnp.bfloat16)
    y2 = _ref_conv3x3_relu(y1, params["w2"].astype(jnp.bfloat16), params["b2"])
    return jnp.mean(y2, axis=(1, 2))


# ----------------------------------------------------------------------------
# Demo / smoke test
# ----------------------------------------------------------------------------
if __name__ == "__main__":
    key = jax.random.PRNGKey(0)
    k_x, k_p = jax.random.split(key)

    batch, in_ch, spatial = 2, 4, 16
    hidden_ch, out_features = 16, 32

    x = jax.random.normal(k_x, (batch, in_ch, spatial, spatial), jnp.float32)
    params = init_backbone_params(k_p, in_ch, hidden_ch, out_features)

    feats = backbone_without_classifier(
        x, params, hidden_channels=hidden_ch, out_features=out_features)
    feats = jax.block_until_ready(feats)

    assert feats.shape == (batch, out_features), feats.shape
    assert feats.dtype == jnp.float32, feats.dtype

    ref = jax.block_until_ready(_ref_forward(x, params))
    max_err = float(jnp.max(jnp.abs(feats - ref)))
    assert max_err < 1e-2, f"mismatch vs reference: max abs err = {max_err}"

    print("KERNEL_OK")
</pallas_src>

<mosaic_0001>
module attributes {stable_mosaic.version = 11 : i64} {
  func.func @_conv3x3_relu_kernel(%arg0: i32, %arg1: memref<1x18x18x128xbf16, #tpu.memory_space<vmem>>, %arg2: memref<9x128x128xbf16, #tpu.memory_space<vmem>>, %arg3: memref<1x128xf32, #tpu.memory_space<vmem>>, %arg4: memref<1x16x16x128xbf16, #tpu.memory_space<vmem>>, %arg5: memref<256x128xf32, #tpu.memory_space<vmem>>) attributes {dimension_semantics = [#tpu.dimension_semantics<parallel>], iteration_bounds = array<i64: 2>, scalar_prefetch = 0 : i64, scratch_operands = 1 : i64, tpu.core_type = #tpu.core_type<tc>, window_params = [{transform_indices = @transform_0, window_bounds = array<i64: 1, 18, 18, 128>}, {pipeline_mode = #tpu.pipeline_mode<synchronous>, transform_indices = @transform_1, window_bounds = array<i64: 9, 128, 128>}, {pipeline_mode = #tpu.pipeline_mode<synchronous>, transform_indices = @transform_2, window_bounds = array<i64: 1, 128>}, {transform_indices = @transform_3, window_bounds = array<i64: 1, 16, 16, 128>}]} {
    %c0 = arith.constant 0 : index
    %c0_0 = arith.constant 0 : index
    %c0_1 = arith.constant 0 : index
    %c0_2 = arith.constant 0 : index
    %0 = vector.load %arg1[%c0, %c0_0, %c0_1, %c0_2] : memref<1x18x18x128xbf16, #tpu.memory_space<vmem>>, vector<1x16x16x128xbf16>
    %1 = vector.shape_cast %0 : vector<1x16x16x128xbf16> to vector<256x128xbf16>
    %c0_3 = arith.constant 0 : index
    %c0_4 = arith.constant 0 : index
    %c0_5 = arith.constant 0 : index
    %2 = vector.load %arg2[%c0_3, %c0_4, %c0_5] : memref<9x128x128xbf16, #tpu.memory_space<vmem>>, vector<1x128x128xbf16>
    %3 = vector.shape_cast %2 : vector<1x128x128xbf16> to vector<128x128xbf16>
    %cst = arith.constant dense<0.000000e+00> : vector<256x128xf32>
    %4 = tpu.matmul %1, %3, %cst {dimension_numbers = #tpu.dot_dimension_numbers<[1], [0], [0], [1], [0, 0, 1, 1], [], []>} : vector<256x128xbf16>, vector<128x128xbf16>, vector<256x128xf32> -> vector<256x128xf32>
    %c0_6 = arith.constant 0 : index
    %c0_7 = arith.constant 0 : index
    %5 = vector.load %arg5[%c0_6, %c0_7] : memref<256x128xf32, #tpu.memory_space<vmem>>, vector<256x128xf32>
    tpu.vector_store %arg5[%c0_6, %c0_7], %4 {strides = array<i32>} : memref<256x128xf32, #tpu.memory_space<vmem>>, vector<256x128xf32>,
    %c0_8 = arith.constant 0 : index
    %c0_9 = arith.constant 0 : index
    %c1 = arith.constant 1 : index
    %c0_10 = arith.constant 0 : index
    %6 = vector.load %arg1[%c0_8, %c0_9, %c1, %c0_10] : memref<1x18x18x128xbf16, #tpu.memory_space<vmem>>, vector<1x16x16x128xbf16>
    %7 = vector.shape_cast %6 : vector<1x16x16x128xbf16> to vector<256x128xbf16>
    %c1_11 = arith.constant 1 : index
    %c0_12 = arith.constant 0 : index
    %c0_13 = arith.constant 0 : index
    %8 = vector.load %arg2[%c1_11, %c0_12, %c0_13] : memref<9x128x128xbf16, #tpu.memory_space<vmem>>, vector<1x128x128xbf16>
    %9 = vector.shape_cast %8 : vector<1x128x128xbf16> to vector<128x128xbf16>
    %cst_14 = arith.constant dense<0.000000e+00> : vector<256x128xf32>
    %10 = tpu.matmul %7, %9, %cst_14 {dimension_numbers = #tpu.dot_dimension_numbers<[1], [0], [0], [1], [0, 0, 1, 1], [], []>} : vector<256x128xbf16>, vector<128x128xbf16>, vector<256x128xf32> -> vector<256x128xf32>
    %c0_15 = arith.constant 0 : index
    %c0_16 = arith.constant 0 : index
    %11 = vector.load %arg5[%c0_15, %c0_16] : memref<256x128xf32, #tpu.memory_space<vmem>>, vector<256x128xf32>
    %12 = arith.addf %11, %10 : vector<256x128xf32>
    %c0_17 = arith.constant 0 : index
    %c0_18 = arith.constant 0 : index
    %13 = vector.load %arg5[%c0_17, %c0_18] : memref<256x128xf32, #tpu.memory_space<vmem>>, vector<256x128xf32>
    tpu.vector_store %arg5[%c0_17, %c0_18], %12 {strides = array<i32>} : memref<256x128xf32, #tpu.memory_space<vmem>>, vector<256x128xf32>,
    %c0_19 = arith.constant 0 : index
    %c0_20 = arith.constant 0 : index
    %c2 = arith.constant 2 : index
    %c0_21 = arith.constant 0 : index
    %14 = vector.load %arg1[%c0_19, %c0_20, %c2, %c0_21] : memref<1x18x18x128xbf16, #tpu.memory_space<vmem>>, vector<1x16x16x128xbf16>
    %15 = vector.shape_cast %14 : vector<1x16x16x128xbf16> to vector<256x128xbf16>
    %c2_22 = arith.constant 2 : index
    %c0_23 = arith.constant 0 : index
    %c0_24 = arith.constant 0 : index
    %16 = vector.load %arg2[%c2_22, %c0_23, %c0_24] : memref<9x128x128xbf16, #tpu.memory_space<vmem>>, vector<1x128x128xbf16>
    %17 = vector.shape_cast %16 : vector<1x128x128xbf16> to vector<128x128xbf16>
    %cst_25 = arith.constant dense<0.000000e+00> : vector<256x128xf32>
    %18 = tpu.matmul %15, %17, %cst_25 {dimension_numbers = #tpu.dot_dimension_numbers<[1], [0], [0], [1], [0, 0, 1, 1], [], []>} : vector<256x128xbf16>, vector<128x128xbf16>, vector<256x128xf32> -> vector<256x128xf32>
    %c0_26 = arith.constant 0 : index
    %c0_27 = arith.constant 0 : index
    %19 = vector.load %arg5[%c0_26, %c0_27] : memref<256x128xf32, #tpu.memory_space<vmem>>, vector<256x128xf32>
    %20 = arith.addf %19, %18 : vector<256x128xf32>
    %c0_28 = arith.constant 0 : index
    %c0_29 = arith.constant 0 : index
    %21 = vector.load %arg5[%c0_28, %c0_29] : memref<256x128xf32, #tpu.memory_space<vmem>>, vector<256x128xf32>
    tpu.vector_store %arg5[%c0_28, %c0_29], %20 {strides = array<i32>} : memref<256x128xf32, #tpu.memory_space<vmem>>, vector<256x128xf32>,
    %c0_30 = arith.constant 0 : index
    %c1_31 = arith.constant 1 : index
    %c0_32 = arith.constant 0 : index
    %c0_33 = arith.constant 0 : index
    %22 = vector.load %arg1[%c0_30, %c1_31, %c0_32, %c0_33] : memref<1x18x18x128xbf16, #tpu.memory_space<vmem>>, vector<1x16x16x128xbf16>
    %23 = vector.shape_cast %22 : vector<1x16x16x128xbf16> to vector<256x128xbf16>
    %c3 = arith.constant 3 : index
    %c0_34 = arith.constant 0 : index
    %c0_35 = arith.constant 0 : index
    %24 = vector.load %arg2[%c3, %c0_34, %c0_35] : memref<9x128x128xbf16, #tpu.memory_space<vmem>>, vector<1x128x128xbf16>
    %25 = vector.shape_cast %24 : vector<1x128x128xbf16> to vector<128x128xbf16>
    %cst_36 = arith.constant dense<0.000000e+00> : vector<256x128xf32>
    %26 = tpu.matmul %23, %25, %cst_36 {dimension_numbers = #tpu.dot_dimension_numbers<[1], [0], [0], [1], [0, 0, 1, 1], [], []>} : vector<256x128xbf16>, vector<128x128xbf16>, vector<256x128xf32> -> vector<256x128xf32>
    %c0_37 = arith.constant 0 : index
    %c0_38 = arith.constant 0 : index
    %27 = vector.load %arg5[%c0_37, %c0_38] : memref<256x128xf32, #tpu.memory_space<vmem>>, vector<256x128xf32>
    %28 = arith.addf %27, %26 : vector<256x128xf32>
    %c0_39 = arith.constant 0 : index
    %c0_40 = arith.constant 0 : index
    %29 = vector.load %arg5[%c0_39, %c0_40] : memref<256x128xf32, #tpu.memory_space<vmem>>, vector<256x128xf32>
    tpu.vector_store %arg5[%c0_39, %c0_40], %28 {strides = array<i32>} : memref<256x128xf32, #tpu.memory_space<vmem>>, vector<256x128xf32>,
    %c0_41 = arith.constant 0 : index
    %c1_42 = arith.constant 1 : index
    %c1_43 = arith.constant 1 : index
    %c0_44 = arith.constant 0 : index
    %30 = vector.load %arg1[%c0_41, %c1_42, %c1_43, %c0_44] : memref<1x18x18x128xbf16, #tpu.memory_space<vmem>>, vector<1x16x16x128xbf16>
    %31 = vector.shape_cast %30 : vector<1x16x16x128xbf16> to vector<256x128xbf16>
    %c4 = arith.constant 4 : index
    %c0_45 = arith.constant 0 : index
    %c0_46 = arith.constant 0 : index
    %32 = vector.load %arg2[%c4, %c0_45, %c0_46] : memref<9x128x128xbf16, #tpu.memory_space<vmem>>, vector<1x128x128xbf16>
    %33 = vector.shape_cast %32 : vector<1x128x128xbf16> to vector<128x128xbf16>
    %cst_47 = arith.constant dense<0.000000e+00> : vector<256x128xf32>
    %34 = tpu.matmul %31, %33, %cst_47 {dimension_numbers = #tpu.dot_dimension_numbers<[1], [0], [0], [1], [0, 0, 1, 1], [], []>} : vector<256x128xbf16>, vector<128x128xbf16>, vector<256x128xf32> -> vector<256x128xf32>
    %c0_48 = arith.constant 0 : index
    %c0_49 = arith.constant 0 : index
    %35 = vector.load %arg5[%c0_48, %c0_49] : memref<256x128xf32, #tpu.memory_space<vmem>>, vector<256x128xf32>
    %36 = arith.addf %35, %34 : vector<256x128xf32>
    %c0_50 = arith.constant 0 : index
    %c0_51 = arith.constant 0 : index
    %37 = vector.load %arg5[%c0_50, %c0_51] : memref<256x128xf32, #tpu.memory_space<vmem>>, vector<256x128xf32>
    tpu.vector_store %arg5[%c0_50, %c0_51], %36 {strides = array<i32>} : memref<256x128xf32, #tpu.memory_space<vmem>>, vector<256x128xf32>,
    %c0_52 = arith.constant 0 : index
    %c1_53 = arith.constant 1 : index
    %c2_54 = arith.constant 2 : index
    %c0_55 = arith.constant 0 : index
    %38 = vector.load %arg1[%c0_52, %c1_53, %c2_54, %c0_55] : memref<1x18x18x128xbf16, #tpu.memory_space<vmem>>, vector<1x16x16x128xbf16>
    %39 = vector.shape_cast %38 : vector<1x16x16x128xbf16> to vector<256x128xbf16>
    %c5 = arith.constant 5 : index
    %c0_56 = arith.constant 0 : index
    %c0_57 = arith.constant 0 : index
    %40 = vector.load %arg2[%c5, %c0_56, %c0_57] : memref<9x128x128xbf16, #tpu.memory_space<vmem>>, vector<1x128x128xbf16>
    %41 = vector.shape_cast %40 : vector<1x128x128xbf16> to vector<128x128xbf16>
    %cst_58 = arith.constant dense<0.000000e+00> : vector<256x128xf32>
    %42 = tpu.matmul %39, %41, %cst_58 {dimension_numbers = #tpu.dot_dimension_numbers<[1], [0], [0], [1], [0, 0, 1, 1], [], []>} : vector<256x128xbf16>, vector<128x128xbf16>, vector<256x128xf32> -> vector<256x128xf32>
    %c0_59 = arith.constant 0 : index
    %c0_60 = arith.constant 0 : index
    %43 = vector.load %arg5[%c0_59, %c0_60] : memref<256x128xf32, #tpu.memory_space<vmem>>, vector<256x128xf32>
    %44 = arith.addf %43, %42 : vector<256x128xf32>
    %c0_61 = arith.constant 0 : index
    %c0_62 = arith.constant 0 : index
    %45 = vector.load %arg5[%c0_61, %c0_62] : memref<256x128xf32, #tpu.memory_space<vmem>>, vector<256x128xf32>
    tpu.vector_store %arg5[%c0_61, %c0_62], %44 {strides = array<i32>} : memref<256x128xf32, #tpu.memory_space<vmem>>, vector<256x128xf32>,
    %c0_63 = arith.constant 0 : index
    %c2_64 = arith.constant 2 : index
    %c0_65 = arith.constant 0 : index
    %c0_66 = arith.constant 0 : index
    %46 = vector.load %arg1[%c0_63, %c2_64, %c0_65, %c0_66] : memref<1x18x18x128xbf16, #tpu.memory_space<vmem>>, vector<1x16x16x128xbf16>
    %47 = vector.shape_cast %46 : vector<1x16x16x128xbf16> to vector<256x128xbf16>
    %c6 = arith.constant 6 : index
    %c0_67 = arith.constant 0 : index
    %c0_68 = arith.constant 0 : index
    %48 = vector.load %arg2[%c6, %c0_67, %c0_68] : memref<9x128x128xbf16, #tpu.memory_space<vmem>>, vector<1x128x128xbf16>
    %49 = vector.shape_cast %48 : vector<1x128x128xbf16> to vector<128x128xbf16>
    %cst_69 = arith.constant dense<0.000000e+00> : vector<256x128xf32>
    %50 = tpu.matmul %47, %49, %cst_69 {dimension_numbers = #tpu.dot_dimension_numbers<[1], [0], [0], [1], [0, 0, 1, 1], [], []>} : vector<256x128xbf16>, vector<128x128xbf16>, vector<256x128xf32> -> vector<256x128xf32>
    %c0_70 = arith.constant 0 : index
    %c0_71 = arith.constant 0 : index
    %51 = vector.load %arg5[%c0_70, %c0_71] : memref<256x128xf32, #tpu.memory_space<vmem>>, vector<256x128xf32>
    %52 = arith.addf %51, %50 : vector<256x128xf32>
    %c0_72 = arith.constant 0 : index
    %c0_73 = arith.constant 0 : index
    %53 = vector.load %arg5[%c0_72, %c0_73] : memref<256x128xf32, #tpu.memory_space<vmem>>, vector<256x128xf32>
    tpu.vector_store %arg5[%c0_72, %c0_73], %52 {strides = array<i32>} : memref<256x128xf32, #tpu.memory_space<vmem>>, vector<256x128xf32>,
    %c0_74 = arith.constant 0 : index
    %c2_75 = arith.constant 2 : index
    %c1_76 = arith.constant 1 : index
    %c0_77 = arith.constant 0 : index
    %54 = vector.load %arg1[%c0_74, %c2_75, %c1_76, %c0_77] : memref<1x18x18x128xbf16, #tpu.memory_space<vmem>>, vector<1x16x16x128xbf16>
    %55 = vector.shape_cast %54 : vector<1x16x16x128xbf16> to vector<256x128xbf16>
    %c7 = arith.constant 7 : index
    %c0_78 = arith.constant 0 : index
    %c0_79 = arith.constant 0 : index
    %56 = vector.load %arg2[%c7, %c0_78, %c0_79] : memref<9x128x128xbf16, #tpu.memory_space<vmem>>, vector<1x128x128xbf16>
    %57 = vector.shape_cast %56 : vector<1x128x128xbf16> to vector<128x128xbf16>
    %cst_80 = arith.constant dense<0.000000e+00> : vector<256x128xf32>
    %58 = tpu.matmul %55, %57, %cst_80 {dimension_numbers = #tpu.dot_dimension_numbers<[1], [0], [0], [1], [0, 0, 1, 1], [], []>} : vector<256x128xbf16>, vector<128x128xbf16>, vector<256x128xf32> -> vector<256x128xf32>
    %c0_81 = arith.constant 0 : index
    %c0_82 = arith.constant 0 : index
    %59 = vector.load %arg5[%c0_81, %c0_82] : memref<256x128xf32, #tpu.memory_space<vmem>>, vector<256x128xf32>
    %60 = arith.addf %59, %58 : vector<256x128xf32>
    %c0_83 = arith.constant 0 : index
    %c0_84 = arith.constant 0 : index
    %61 = vector.load %arg5[%c0_83, %c0_84] : memref<256x128xf32, #tpu.memory_space<vmem>>, vector<256x128xf32>
    tpu.vector_store %arg5[%c0_83, %c0_84], %60 {strides = array<i32>} : memref<256x128xf32, #tpu.memory_space<vmem>>, vector<256x128xf32>,
    %c0_85 = arith.constant 0 : index
    %c2_86 = arith.constant 2 : index
    %c2_87 = arith.constant 2 : index
    %c0_88 = arith.constant 0 : index
    %62 = vector.load %arg1[%c0_85, %c2_86, %c2_87, %c0_88] : memref<1x18x18x128xbf16, #tpu.memory_space<vmem>>, vector<1x16x16x128xbf16>
    %63 = vector.shape_cast %62 : vector<1x16x16x128xbf16> to vector<256x128xbf16>
    %c8 = arith.constant 8 : index
    %c0_89 = arith.constant 0 : index
    %c0_90 = arith.constant 0 : index
    %64 = vector.load %arg2[%c8, %c0_89, %c0_90] : memref<9x128x128xbf16, #tpu.memory_space<vmem>>, vector<1x128x128xbf16>
    %65 = vector.shape_cast %64 : vector<1x128x128xbf16> to vector<128x128xbf16>
    %cst_91 = arith.constant dense<0.000000e+00> : vector<256x128xf32>
    %66 = tpu.matmul %63, %65, %cst_91 {dimension_numbers = #tpu.dot_dimension_numbers<[1], [0], [0], [1], [0, 0, 1, 1], [], []>} : vector<256x128xbf16>, vector<128x128xbf16>, vector<256x128xf32> -> vector<256x128xf32>
    %c0_92 = arith.constant 0 : index
    %c0_93 = arith.constant 0 : index
    %67 = vector.load %arg5[%c0_92, %c0_93] : memref<256x128xf32, #tpu.memory_space<vmem>>, vector<256x128xf32>
    %68 = arith.addf %67, %66 : vector<256x128xf32>
    %c0_94 = arith.constant 0 : index
    %c0_95 = arith.constant 0 : index
    %69 = vector.load %arg5[%c0_94, %c0_95] : memref<256x128xf32, #tpu.memory_space<vmem>>, vector<256x128xf32>
    tpu.vector_store %arg5[%c0_94, %c0_95], %68 {strides = array<i32>} : memref<256x128xf32, #tpu.memory_space<vmem>>, vector<256x128xf32>,
    %c0_96 = arith.constant 0 : index
    %c0_97 = arith.constant 0 : index
    %70 = vector.load %arg5[%c0_96, %c0_97] : memref<256x128xf32, #tpu.memory_space<vmem>>, vector<256x128xf32>
    %c0_98 = arith.constant 0 : index
    %c0_99 = arith.constant 0 : index
    %71 = vector.load %arg3[%c0_98, %c0_99] : memref<1x128xf32, #tpu.memory_space<vmem>>, vector<1x128xf32>
    %72 = vector.broadcast %71 : vector<1x128xf32> to vector<256x128xf32>
    %73 = arith.addf %70, %72 : vector<256x128xf32>
    %cst_100 = arith.constant 0.000000e+00 : f32
    %74 = vector.broadcast %cst_100 : f32 to vector<256x128xf32>
    %75 = arith.maximumf %73, %74 : vector<256x128xf32>
    %76 = vector.shape_cast %75 : vector<256x128xf32> to vector<1x16x16x128xf32>
    %77 = arith.truncf %76 : vector<1x16x16x128xf32> to vector<1x16x16x128xbf16>
    %c0_101 = arith.constant 0 : index
    %c0_102 = arith.constant 0 : index
    %c0_103 = arith.constant 0 : index
    %c0_104 = arith.constant 0 : index
    %78 = vector.load %arg4[%c0_101, %c0_102, %c0_103, %c0_104] : memref<1x16x16x128xbf16, #tpu.memory_space<vmem>>, vector<1x16x16x128xbf16>
    tpu.vector_store %arg4[%c0_101, %c0_102, %c0_103, %c0_104], %77 {strides = array<i32>} : memref<1x16x16x128xbf16, #tpu.memory_space<vmem>>, vector<1x16x16x128xbf16>,
    return
  }
  func.func @transform_0(%arg0: i32) -> (i32, i32, i32, i32) {
    %c0_i32 = arith.constant 0 : i32
    %c0_i32_0 = arith.constant 0 : i32
    %c0_i32_1 = arith.constant 0 : i32
    %c0_i32_2 = arith.constant 0 : i32
    return %arg0, %c0_i32, %c0_i32_0, %c0_i32_1 : i32, i32, i32, i32
  }
  func.func @transform_1(%arg0: i32) -> (i32, i32, i32) {
    %c0_i32 = arith.constant 0 : i32
    %c0_i32_0 = arith.constant 0 : i32
    %c0_i32_1 = arith.constant 0 : i32
    %c0_i32_2 = arith.constant 0 : i32
    return %c0_i32, %c0_i32_0, %c0_i32_1 : i32, i32, i32
  }
  func.func @transform_2(%arg0: i32) -> (i32, i32) {
    %c0_i32 = arith.constant 0 : i32
    %c0_i32_0 = arith.constant 0 : i32
    %c0_i32_1 = arith.constant 0 : i32
    return %c0_i32, %c0_i32_0 : i32, i32
  }
  func.func @transform_3(%arg0: i32) -> (i32, i32, i32, i32) {
    %c0_i32 = arith.constant 0 : i32
    %c0_i32_0 = arith.constant 0 : i32
    %c0_i32_1 = arith.constant 0 : i32
    %c0_i32_2 = arith.constant 0 : i32
    return %arg0, %c0_i32, %c0_i32_0, %c0_i32_1 : i32, i32, i32, i32
  }
}

module attributes {stable_mosaic.version = 11 : i64} {
  func.func @_conv3x3_relu_gap_kernel(%arg0: i32, %arg1: memref<1x18x18x128xbf16, #tpu.memory_space<vmem>>, %arg2: memref<9x128x128xbf16, #tpu.memory_space<vmem>>, %arg3: memref<1x128xf32, #tpu.memory_space<vmem>>, %arg4: memref<1x1x128xf32, #tpu.memory_space<vmem>>, %arg5: memref<256x128xf32, #tpu.memory_space<vmem>>) attributes {dimension_semantics = [#tpu.dimension_semantics<parallel>], iteration_bounds = array<i64: 2>, scalar_prefetch = 0 : i64, scratch_operands = 1 : i64, tpu.core_type = #tpu.core_type<tc>, window_params = [{transform_indices = @transform_0, window_bounds = array<i64: 1, 18, 18, 128>}, {pipeline_mode = #tpu.pipeline_mode<synchronous>, transform_indices = @transform_1, window_bounds = array<i64: 9, 128, 128>}, {pipeline_mode = #tpu.pipeline_mode<synchronous>, transform_indices = @transform_2, window_bounds = array<i64: 1, 128>}, {transform_indices = @transform_3, window_bounds = array<i64: 1, 1, 128>}]} {
    %c0 = arith.constant 0 : index
    %c0_0 = arith.constant 0 : index
    %c0_1 = arith.constant 0 : index
    %c0_2 = arith.constant 0 : index
    %0 = vector.load %arg1[%c0, %c0_0, %c0_1, %c0_2] : memref<1x18x18x128xbf16, #tpu.memory_space<vmem>>, vector<1x16x16x128xbf16>
    %1 = vector.shape_cast %0 : vector<1x16x16x128xbf16> to vector<256x128xbf16>
    %c0_3 = arith.constant 0 : index
    %c0_4 = arith.constant 0 : index
    %c0_5 = arith.constant 0 : index
    %2 = vector.load %arg2[%c0_3, %c0_4, %c0_5] : memref<9x128x128xbf16, #tpu.memory_space<vmem>>, vector<1x128x128xbf16>
    %3 = vector.shape_cast %2 : vector<1x128x128xbf16> to vector<128x128xbf16>
    %cst = arith.constant dense<0.000000e+00> : vector<256x128xf32>
    %4 = tpu.matmul %1, %3, %cst {dimension_numbers = #tpu.dot_dimension_numbers<[1], [0], [0], [1], [0, 0, 1, 1], [], []>} : vector<256x128xbf16>, vector<128x128xbf16>, vector<256x128xf32> -> vector<256x128xf32>
    %c0_6 = arith.constant 0 : index
    %c0_7 = arith.constant 0 : index
    %5 = vector.load %arg5[%c0_6, %c0_7] : memref<256x128xf32, #tpu.memory_space<vmem>>, vector<256x128xf32>
    tpu.vector_store %arg5[%c0_6, %c0_7], %4 {strides = array<i32>} : memref<256x128xf32, #tpu.memory_space<vmem>>, vector<256x128xf32>,
    %c0_8 = arith.constant 0 : index
    %c0_9 = arith.constant 0 : index
    %c1 = arith.constant 1 : index
    %c0_10 = arith.constant 0 : index
    %6 = vector.load %arg1[%c0_8, %c0_9, %c1, %c0_10] : memref<1x18x18x128xbf16, #tpu.memory_space<vmem>>, vector<1x16x16x128xbf16>
    %7 = vector.shape_cast %6 : vector<1x16x16x128xbf16> to vector<256x128xbf16>
    %c1_11 = arith.constant 1 : index
    %c0_12 = arith.constant 0 : index
    %c0_13 = arith.constant 0 : index
    %8 = vector.load %arg2[%c1_11, %c0_12, %c0_13] : memref<9x128x128xbf16, #tpu.memory_space<vmem>>, vector<1x128x128xbf16>
    %9 = vector.shape_cast %8 : vector<1x128x128xbf16> to vector<128x128xbf16>
    %cst_14 = arith.constant dense<0.000000e+00> : vector<256x128xf32>
    %10 = tpu.matmul %7, %9, %cst_14 {dimension_numbers = #tpu.dot_dimension_numbers<[1], [0], [0], [1], [0, 0, 1, 1], [], []>} : vector<256x128xbf16>, vector<128x128xbf16>, vector<256x128xf32> -> vector<256x128xf32>
    %c0_15 = arith.constant 0 : index
    %c0_16 = arith.constant 0 : index
    %11 = vector.load %arg5[%c0_15, %c0_16] : memref<256x128xf32, #tpu.memory_space<vmem>>, vector<256x128xf32>
    %12 = arith.addf %11, %10 : vector<256x128xf32>
    %c0_17 = arith.constant 0 : index
    %c0_18 = arith.constant 0 : index
    %13 = vector.load %arg5[%c0_17, %c0_18] : memref<256x128xf32, #tpu.memory_space<vmem>>, vector<256x128xf32>
    tpu.vector_store %arg5[%c0_17, %c0_18], %12 {strides = array<i32>} : memref<256x128xf32, #tpu.memory_space<vmem>>, vector<256x128xf32>,
    %c0_19 = arith.constant 0 : index
    %c0_20 = arith.constant 0 : index
    %c2 = arith.constant 2 : index
    %c0_21 = arith.constant 0 : index
    %14 = vector.load %arg1[%c0_19, %c0_20, %c2, %c0_21] : memref<1x18x18x128xbf16, #tpu.memory_space<vmem>>, vector<1x16x16x128xbf16>
    %15 = vector.shape_cast %14 : vector<1x16x16x128xbf16> to vector<256x128xbf16>
    %c2_22 = arith.constant 2 : index
    %c0_23 = arith.constant 0 : index
    %c0_24 = arith.constant 0 : index
    %16 = vector.load %arg2[%c2_22, %c0_23, %c0_24] : memref<9x128x128xbf16, #tpu.memory_space<vmem>>, vector<1x128x128xbf16>
    %17 = vector.shape_cast %16 : vector<1x128x128xbf16> to vector<128x128xbf16>
    %cst_25 = arith.constant dense<0.000000e+00> : vector<256x128xf32>
    %18 = tpu.matmul %15, %17, %cst_25 {dimension_numbers = #tpu.dot_dimension_numbers<[1], [0], [0], [1], [0, 0, 1, 1], [], []>} : vector<256x128xbf16>, vector<128x128xbf16>, vector<256x128xf32> -> vector<256x128xf32>
    %c0_26 = arith.constant 0 : index
    %c0_27 = arith.constant 0 : index
    %19 = vector.load %arg5[%c0_26, %c0_27] : memref<256x128xf32, #tpu.memory_space<vmem>>, vector<256x128xf32>
    %20 = arith.addf %19, %18 : vector<256x128xf32>
    %c0_28 = arith.constant 0 : index
    %c0_29 = arith.constant 0 : index
    %21 = vector.load %arg5[%c0_28, %c0_29] : memref<256x128xf32, #tpu.memory_space<vmem>>, vector<256x128xf32>
    tpu.vector_store %arg5[%c0_28, %c0_29], %20 {strides = array<i32>} : memref<256x128xf32, #tpu.memory_space<vmem>>, vector<256x128xf32>,
    %c0_30 = arith.constant 0 : index
    %c1_31 = arith.constant 1 : index
    %c0_32 = arith.constant 0 : index
    %c0_33 = arith.constant 0 : index
    %22 = vector.load %arg1[%c0_30, %c1_31, %c0_32, %c0_33] : memref<1x18x18x128xbf16, #tpu.memory_space<vmem>>, vector<1x16x16x128xbf16>
    %23 = vector.shape_cast %22 : vector<1x16x16x128xbf16> to vector<256x128xbf16>
    %c3 = arith.constant 3 : index
    %c0_34 = arith.constant 0 : index
    %c0_35 = arith.constant 0 : index
    %24 = vector.load %arg2[%c3, %c0_34, %c0_35] : memref<9x128x128xbf16, #tpu.memory_space<vmem>>, vector<1x128x128xbf16>
    %25 = vector.shape_cast %24 : vector<1x128x128xbf16> to vector<128x128xbf16>
    %cst_36 = arith.constant dense<0.000000e+00> : vector<256x128xf32>
    %26 = tpu.matmul %23, %25, %cst_36 {dimension_numbers = #tpu.dot_dimension_numbers<[1], [0], [0], [1], [0, 0, 1, 1], [], []>} : vector<256x128xbf16>, vector<128x128xbf16>, vector<256x128xf32> -> vector<256x128xf32>
    %c0_37 = arith.constant 0 : index
    %c0_38 = arith.constant 0 : index
    %27 = vector.load %arg5[%c0_37, %c0_38] : memref<256x128xf32, #tpu.memory_space<vmem>>, vector<256x128xf32>
    %28 = arith.addf %27, %26 : vector<256x128xf32>
    %c0_39 = arith.constant 0 : index
    %c0_40 = arith.constant 0 : index
    %29 = vector.load %arg5[%c0_39, %c0_40] : memref<256x128xf32, #tpu.memory_space<vmem>>, vector<256x128xf32>
    tpu.vector_store %arg5[%c0_39, %c0_40], %28 {strides = array<i32>} : memref<256x128xf32, #tpu.memory_space<vmem>>, vector<256x128xf32>,
    %c0_41 = arith.constant 0 : index
    %c1_42 = arith.constant 1 : index
    %c1_43 = arith.constant 1 : index
    %c0_44 = arith.constant 0 : index
    %30 = vector.load %arg1[%c0_41, %c1_42, %c1_43, %c0_44] : memref<1x18x18x128xbf16, #tpu.memory_space<vmem>>, vector<1x16x16x128xbf16>
    %31 = vector.shape_cast %30 : vector<1x16x16x128xbf16> to vector<256x128xbf16>
    %c4 = arith.constant 4 : index
    %c0_45 = arith.constant 0 : index
    %c0_46 = arith.constant 0 : index
    %32 = vector.load %arg2[%c4, %c0_45, %c0_46] : memref<9x128x128xbf16, #tpu.memory_space<vmem>>, vector<1x128x128xbf16>
    %33 = vector.shape_cast %32 : vector<1x128x128xbf16> to vector<128x128xbf16>
    %cst_47 = arith.constant dense<0.000000e+00> : vector<256x128xf32>
    %34 = tpu.matmul %31, %33, %cst_47 {dimension_numbers = #tpu.dot_dimension_numbers<[1], [0], [0], [1], [0, 0, 1, 1], [], []>} : vector<256x128xbf16>, vector<128x128xbf16>, vector<256x128xf32> -> vector<256x128xf32>
    %c0_48 = arith.constant 0 : index
    %c0_49 = arith.constant 0 : index
    %35 = vector.load %arg5[%c0_48, %c0_49] : memref<256x128xf32, #tpu.memory_space<vmem>>, vector<256x128xf32>
    %36 = arith.addf %35, %34 : vector<256x128xf32>
    %c0_50 = arith.constant 0 : index
    %c0_51 = arith.constant 0 : index
    %37 = vector.load %arg5[%c0_50, %c0_51] : memref<256x128xf32, #tpu.memory_space<vmem>>, vector<256x128xf32>
    tpu.vector_store %arg5[%c0_50, %c0_51], %36 {strides = array<i32>} : memref<256x128xf32, #tpu.memory_space<vmem>>, vector<256x128xf32>,
    %c0_52 = arith.constant 0 : index
    %c1_53 = arith.constant 1 : index
    %c2_54 = arith.constant 2 : index
    %c0_55 = arith.constant 0 : index
    %38 = vector.load %arg1[%c0_52, %c1_53, %c2_54, %c0_55] : memref<1x18x18x128xbf16, #tpu.memory_space<vmem>>, vector<1x16x16x128xbf16>
    %39 = vector.shape_cast %38 : vector<1x16x16x128xbf16> to vector<256x128xbf16>
    %c5 = arith.constant 5 : index
    %c0_56 = arith.constant 0 : index
    %c0_57 = arith.constant 0 : index
    %40 = vector.load %arg2[%c5, %c0_56, %c0_57] : memref<9x128x128xbf16, #tpu.memory_space<vmem>>, vector<1x128x128xbf16>
    %41 = vector.shape_cast %40 : vector<1x128x128xbf16> to vector<128x128xbf16>
    %cst_58 = arith.constant dense<0.000000e+00> : vector<256x128xf32>
    %42 = tpu.matmul %39, %41, %cst_58 {dimension_numbers = #tpu.dot_dimension_numbers<[1], [0], [0], [1], [0, 0, 1, 1], [], []>} : vector<256x128xbf16>, vector<128x128xbf16>, vector<256x128xf32> -> vector<256x128xf32>
    %c0_59 = arith.constant 0 : index
    %c0_60 = arith.constant 0 : index
    %43 = vector.load %arg5[%c0_59, %c0_60] : memref<256x128xf32, #tpu.memory_space<vmem>>, vector<256x128xf32>
    %44 = arith.addf %43, %42 : vector<256x128xf32>
    %c0_61 = arith.constant 0 : index
    %c0_62 = arith.constant 0 : index
    %45 = vector.load %arg5[%c0_61, %c0_62] : memref<256x128xf32, #tpu.memory_space<vmem>>, vector<256x128xf32>
    tpu.vector_store %arg5[%c0_61, %c0_62], %44 {strides = array<i32>} : memref<256x128xf32, #tpu.memory_space<vmem>>, vector<256x128xf32>,
    %c0_63 = arith.constant 0 : index
    %c2_64 = arith.constant 2 : index
    %c0_65 = arith.constant 0 : index
    %c0_66 = arith.constant 0 : index
    %46 = vector.load %arg1[%c0_63, %c2_64, %c0_65, %c0_66] : memref<1x18x18x128xbf16, #tpu.memory_space<vmem>>, vector<1x16x16x128xbf16>
    %47 = vector.shape_cast %46 : vector<1x16x16x128xbf16> to vector<256x128xbf16>
    %c6 = arith.constant 6 : index
    %c0_67 = arith.constant 0 : index
    %c0_68 = arith.constant 0 : index
    %48 = vector.load %arg2[%c6, %c0_67, %c0_68] : memref<9x128x128xbf16, #tpu.memory_space<vmem>>, vector<1x128x128xbf16>
    %49 = vector.shape_cast %48 : vector<1x128x128xbf16> to vector<128x128xbf16>
    %cst_69 = arith.constant dense<0.000000e+00> : vector<256x128xf32>
    %50 = tpu.matmul %47, %49, %cst_69 {dimension_numbers = #tpu.dot_dimension_numbers<[1], [0], [0], [1], [0, 0, 1, 1], [], []>} : vector<256x128xbf16>, vector<128x128xbf16>, vector<256x128xf32> -> vector<256x128xf32>
    %c0_70 = arith.constant 0 : index
    %c0_71 = arith.constant 0 : index
    %51 = vector.load %arg5[%c0_70, %c0_71] : memref<256x128xf32, #tpu.memory_space<vmem>>, vector<256x128xf32>
    %52 = arith.addf %51, %50 : vector<256x128xf32>
    %c0_72 = arith.constant 0 : index
    %c0_73 = arith.constant 0 : index
    %53 = vector.load %arg5[%c0_72, %c0_73] : memref<256x128xf32, #tpu.memory_space<vmem>>, vector<256x128xf32>
    tpu.vector_store %arg5[%c0_72, %c0_73], %52 {strides = array<i32>} : memref<256x128xf32, #tpu.memory_space<vmem>>, vector<256x128xf32>,
    %c0_74 = arith.constant 0 : index
    %c2_75 = arith.constant 2 : index
    %c1_76 = arith.constant 1 : index
    %c0_77 = arith.constant 0 : index
    %54 = vector.load %arg1[%c0_74, %c2_75, %c1_76, %c0_77] : memref<1x18x18x128xbf16, #tpu.memory_space<vmem>>, vector<1x16x16x128xbf16>
    %55 = vector.shape_cast %54 : vector<1x16x16x128xbf16> to vector<256x128xbf16>
    %c7 = arith.constant 7 : index
    %c0_78 = arith.constant 0 : index
    %c0_79 = arith.constant 0 : index
    %56 = vector.load %arg2[%c7, %c0_78, %c0_79] : memref<9x128x128xbf16, #tpu.memory_space<vmem>>, vector<1x128x128xbf16>
    %57 = vector.shape_cast %56 : vector<1x128x128xbf16> to vector<128x128xbf16>
    %cst_80 = arith.constant dense<0.000000e+00> : vector<256x128xf32>
    %58 = tpu.matmul %55, %57, %cst_80 {dimension_numbers = #tpu.dot_dimension_numbers<[1], [0], [0], [1], [0, 0, 1, 1], [], []>} : vector<256x128xbf16>, vector<128x128xbf16>, vector<256x128xf32> -> vector<256x128xf32>
    %c0_81 = arith.constant 0 : index
    %c0_82 = arith.constant 0 : index
    %59 = vector.load %arg5[%c0_81, %c0_82] : memref<256x128xf32, #tpu.memory_space<vmem>>, vector<256x128xf32>
    %60 = arith.addf %59, %58 : vector<256x128xf32>
    %c0_83 = arith.constant 0 : index
    %c0_84 = arith.constant 0 : index
    %61 = vector.load %arg5[%c0_83, %c0_84] : memref<256x128xf32, #tpu.memory_space<vmem>>, vector<256x128xf32>
    tpu.vector_store %arg5[%c0_83, %c0_84], %60 {strides = array<i32>} : memref<256x128xf32, #tpu.memory_space<vmem>>, vector<256x128xf32>,
    %c0_85 = arith.constant 0 : index
    %c2_86 = arith.constant 2 : index
    %c2_87 = arith.constant 2 : index
    %c0_88 = arith.constant 0 : index
    %62 = vector.load %arg1[%c0_85, %c2_86, %c2_87, %c0_88] : memref<1x18x18x128xbf16, #tpu.memory_space<vmem>>, vector<1x16x16x128xbf16>
    %63 = vector.shape_cast %62 : vector<1x16x16x128xbf16> to vector<256x128xbf16>
    %c8 = arith.constant 8 : index
    %c0_89 = arith.constant 0 : index
    %c0_90 = arith.constant 0 : index
    %64 = vector.load %arg2[%c8, %c0_89, %c0_90] : memref<9x128x128xbf16, #tpu.memory_space<vmem>>, vector<1x128x128xbf16>
    %65 = vector.shape_cast %64 : vector<1x128x128xbf16> to vector<128x128xbf16>
    %cst_91 = arith.constant dense<0.000000e+00> : vector<256x128xf32>
    %66 = tpu.matmul %63, %65, %cst_91 {dimension_numbers = #tpu.dot_dimension_numbers<[1], [0], [0], [1], [0, 0, 1, 1], [], []>} : vector<256x128xbf16>, vector<128x128xbf16>, vector<256x128xf32> -> vector<256x128xf32>
    %c0_92 = arith.constant 0 : index
    %c0_93 = arith.constant 0 : index
    %67 = vector.load %arg5[%c0_92, %c0_93] : memref<256x128xf32, #tpu.memory_space<vmem>>, vector<256x128xf32>
    %68 = arith.addf %67, %66 : vector<256x128xf32>
    %c0_94 = arith.constant 0 : index
    %c0_95 = arith.constant 0 : index
    %69 = vector.load %arg5[%c0_94, %c0_95] : memref<256x128xf32, #tpu.memory_space<vmem>>, vector<256x128xf32>
    tpu.vector_store %arg5[%c0_94, %c0_95], %68 {strides = array<i32>} : memref<256x128xf32, #tpu.memory_space<vmem>>, vector<256x128xf32>,
    %c0_96 = arith.constant 0 : index
    %c0_97 = arith.constant 0 : index
    %70 = vector.load %arg5[%c0_96, %c0_97] : memref<256x128xf32, #tpu.memory_space<vmem>>, vector<256x128xf32>
    %c0_98 = arith.constant 0 : index
    %c0_99 = arith.constant 0 : index
    %71 = vector.load %arg3[%c0_98, %c0_99] : memref<1x128xf32, #tpu.memory_space<vmem>>, vector<1x128xf32>
    %72 = vector.broadcast %71 : vector<1x128xf32> to vector<256x128xf32>
    %73 = arith.addf %70, %72 : vector<256x128xf32>
    %cst_100 = arith.constant 0.000000e+00 : f32
    %74 = vector.broadcast %cst_100 : f32 to vector<256x128xf32>
    %75 = arith.maximumf %73, %74 : vector<256x128xf32>
    %cst_101 = arith.constant dense<0.000000e+00> : vector<128xf32>
    %76 = vector.multi_reduction <add>, %75, %cst_101 [0] : vector<256x128xf32> to vector<128xf32>
    %77 = vector.shape_cast %76 : vector<128xf32> to vector<1x128xf32>
    %cst_102 = arith.constant 3.906250e-03 : f32
    %78 = vector.broadcast %cst_102 : f32 to vector<1x128xf32>
    %79 = arith.mulf %77, %78 : vector<1x128xf32>
    %80 = vector.shape_cast %79 : vector<1x128xf32> to vector<1x1x128xf32>
    %c0_103 = arith.constant 0 : index
    %c0_104 = arith.constant 0 : index
    %c0_105 = arith.constant 0 : index
    %81 = vector.load %arg4[%c0_103, %c0_104, %c0_105] : memref<1x1x128xf32, #tpu.memory_space<vmem>>, vector<1x1x128xf32>
    tpu.vector_store %arg4[%c0_103, %c0_104, %c0_105], %80 {strides = array<i32>} : memref<1x1x128xf32, #tpu.memory_space<vmem>>, vector<1x1x128xf32>,
    return
  }
  func.func @transform_0(%arg0: i32) -> (i32, i32, i32, i32) {
    %c0_i32 = arith.constant 0 : i32
    %c0_i32_0 = arith.constant 0 : i32
    %c0_i32_1 = arith.constant 0 : i32
    %c0_i32_2 = arith.constant 0 : i32
    return %arg0, %c0_i32, %c0_i32_0, %c0_i32_1 : i32, i32, i32, i32
  }
  func.func @transform_1(%arg0: i32) -> (i32, i32, i32) {
    %c0_i32 = arith.constant 0 : i32
    %c0_i32_0 = arith.constant 0 : i32
    %c0_i32_1 = arith.constant 0 : i32
    %c0_i32_2 = arith.constant 0 : i32
    return %c0_i32, %c0_i32_0, %c0_i32_1 : i32, i32, i32
  }
  func.func @transform_2(%arg0: i32) -> (i32, i32) {
    %c0_i32 = arith.constant 0 : i32
    %c0_i32_0 = arith.constant 0 : i32
    %c0_i32_1 = arith.constant 0 : i32
    return %c0_i32, %c0_i32_0 : i32, i32
  }
  func.func @transform_3(%arg0: i32) -> (i32, i32, i32) {
    %c0_i32 = arith.constant 0 : i32
    %c0_i32_0 = arith.constant 0 : i32
    %c0_i32_1 = arith.constant 0 : i32
    return %arg0, %c0_i32, %c0_i32_0 : i32, i32, i32
  }
}

</mosaic_0001>

<bundles_post_ra>
// kernel: backbone_without_classifier.3
= control target key start
LH: loop header
LB: loop body
LE: loop exit
PB: predicated region body
PF: predicated region fallthrough
CT: control target
= control target key end

     0   :  { %8 = vsyncpa [#allocation4], 0  ;;  %s9349_s0 = inlined_call_operand.vmem [shape: bf16[2,18,18,128], index: 0, kind: input, shape index: {}]   ;;  %s9350_s1 = inlined_call_operand.vmem [shape: bf16[9,128,128], index: 1, kind: input, shape index: {}]   ;;  %s9351_s2 = inlined_call_operand.vmem [shape: f32[1,128], index: 2, kind: input, shape index: {}]   ;;  %s9352_s3 = inlined_call_operand.hbm [shape: f32[2,1,128], index: 3, kind: output, shape index: {}]  }
   0x1   :  { %10 = vsyncpa [#allocation4 + $0x1], 0  ;;  %s7472_s12 = smov 0   ;;  %s7474_s13 = smov 0  }
   0x2   :  { %s7476_s14 = smov 0   ;;  %s7478_s15 = smov 0  }
   0x3 LB: > { %s7493_s16 = sadd.s32 4294967295, %s7449_s15   ;;  %s5908_s17 = sadd.s32 4294967294, %s7449_s15   ;;  %s7449_s15 = sphi %s7478_s15, %s9463_s15   ;;  %s7445_s14 = sphi %s7476_s14, %s9462_s14   ;;  %s7441_s13 = sphi %s7474_s13, %s9461_s13   ;;  %s7437_s12 = sphi %s7472_s12, %s9460_s12  }
   0x4   : > { %s7497_s18 = sadd.s32 1, %s7449_s15   ;;  %s91_s19 = sadd.s32 1, %s7445_s14 }
   0x5   : > { %s88_s20 = ssub.s32 %s7449_s15, %s7497_s18  ;;  %p101_p0 = scmp.ne.s32.totalorder %s7445_s14, %s7441_s13 }
   0x6   : > { %p89_p1 = scmp.eq.s32.totalorder %s88_s20, 0  ;;  %p102_p2 = scmp.eq.s32.totalorder %s7493_s16, 1 }
   0x7   : > { %p107_p3 = scmp.ne.s32.totalorder %s7441_s13, %s7437_s12  ;;  %p108_p4 = scmp.eq.s32.totalorder %s5908_s17, 1 }
   0x8   : > { %s7508_s21 = scalar_select %p89_p1, %s7445_s14, %s91_s19  }
   0x9   : > { %p7510_p5 = por %p102_p2, %p101_p0  ;;  %p7514_p6 = por %p108_p4, %p107_p3 }
   0xa   : > { %p5911_p7 = scmp.ge.s32.totalorder %s7449_s15, 1  ;;  %p140_p8 = scmp.lt.s32.totalorder %s7449_s15, 3 }
   0xc   : > { %p141_p9 = pnand %p5911_p7, %p140_p8 }
   0xe   : > { %144 = sbr.rel (%p141_p9) target bundleno = 632 (0x278), region = 32 }
  0x13   : > { %v7269_v0 = vld [vmem:[%s9350_s1 + $0x38] sm:$0xff]   ;;  %p163_p10 = scmp.lt.s32.totalorder %s7493_s16, 1  ;;  %v7270_v1 = vld [vmem:[%s9350_s1 + $0x30] sm:$0xff]   ;;  %v7271_v2 = vld [vmem:[%s9350_s1 + $0x28] sm:$0xff]   ;;  %vm1471_vm0 = vcmask 1042432   ;;  %vm1472_vm1 = vcmask 1046532  }
  0x14   : > { %6781 = vmatprep.subr.bf16.mxu0 %v7269_v0  ;;  %7213 = vmatprep.subr.bf16.mxu1 %v7269_v0  ;;  %v7272_v3 = vld [vmem:[%s9350_s1 + $0x20] sm:$0xff]   ;;  %v7273_v6 = vld [vmem:[%s9350_s1 + $0x18] sm:$0xff]   ;;  %v7274_v7 = vld [vmem:[%s9350_s1 + $0x10] sm:$0xff]   ;;  %vm602_vm2 = vsmask.f32 3328  ;;  %s161_s11 = sand.u32 1, %s7441_s13  }
  0x15   : > { %s164_s28 = scalar_select %p163_p10, %s7493_s16, 1  ;;  %6782 = vmatpush3.bf16.msra.mxu0 %v7269_v0  ;;  %7221 = vmatpush3.bf16.msra.mxu1 %v7269_v0  ;;  %v7275_v8 = vld [vmem:[%s9350_s1 + $0x8] sm:$0xff]   ;;  %v7276_v9 = vld [vmem:[%s9350_s1] sm:$0xff]   ;;  %v7281_v10 = vld [vmem:[%s9350_s1 + $0x78] sm:$0xff]   ;;  %vm603_vm3 = vsmask.f32 7440 }
  0x16   : > { %6783 = vmatprep.subr.bf16.mxu0 %v7270_v1  ;;  %7214 = vmatprep.subr.bf16.mxu1 %v7270_v1  ;;  %v7282_v12 = vld [vmem:[%s9350_s1 + $0xb8] sm:$0xff]   ;;  %v7283_v14 = vld [vmem:[%s9350_s1 + $0x70] sm:$0xff]   ;;  %v7289_v18 = vld [vmem:[%s9350_s1 + $0x68] sm:$0xff]   ;;  %s6562_s17 = sshll.u32 %s7493_s16, 4  ;;  %s162_s19 = scalar_lea.vmem [#allocation3], %s161_s11 }
  0x17   : > { %s7229_s4 = smul.u32 216, %s164_s28  ;;  %v7284_v15 = vld [vmem:[%s9350_s1 + $0xb0] sm:$0xff]   ;;  %v7290_v20 = vld [vmem:[%s9350_s1 + $0xa8] sm:$0xff]   ;;  %v7291_v22 = vld [vmem:[%s9350_s1 + $0x60] sm:$0xff]   ;;  %s5853_s20 = sshll.u32 %s162_s19, 4  ;;  %s5854_s20 = int_to_ptr.vmem [resolvable:$true] %s5853_s20 }
  0x18   : > { %v7292_v23 = vld [vmem:[%s9350_s1 + $0xa0] sm:$0xff]   ;;  %v7591_v31 = vld [vmem:[%s9350_s1 + $0x58] sm:$0xff]   ;;  %vm7605_vm4 = vmor %vm1471_vm0, %vm1472_vm1  ;;  %s5851_s26 = scalar_lea.hbm %s9352_s3, %s6562_s17  ;;  %s5841_s27 = scalar_lea.sflag [#allocation4], %s161_s11 }
  0x19   : > { %s7534_s7 = scalar_lea.vmem %s9349_s0, %s7229_s4  ;;  %6784 = vmatpush3.bf16.msra.mxu0 %v7270_v1  ;;  %7222 = vmatpush3.bf16.msra.mxu1 %v7270_v1  ;;  %v7596_v32 = vld [vmem:[%s9350_s1 + $0x98] sm:$0xff]   ;;  %v7615_v54 = vld [vmem:[%s9350_s1 + $0x50] sm:$0xff]   ;;  %vm7624_vm5 = vmor %vm602_vm2, %vm603_vm3  ;;  %s7389_s28 = scalar_lea.vmem %s5854_s20, 16 }
  0x1a   : > { %6785 = vmatprep.subr.bf16.mxu0 %v7271_v2  ;;  %7215 = vmatprep.subr.bf16.mxu1 %v7271_v2  ;;  %v7277_v4 = vld [vmem:[%s7534_s7] sm:$0xff]   ;;  %v7279_v11 = vld [vmem:[%s7534_s7 + $0xc] sm:$0xff]   ;;  %v7285_v16 = vld [vmem:[%s7534_s7 + $0x18] sm:$0xff]   ;;  %p7390_p11 = scmp.ne.s32.totalorder %s5854_s20, %s7389_s28  ;;  %s7451_s29 = smov [#allocation3]  }
  0x1b   : > { %v7278_v5 = vld [vmem:[%s7534_s7 + $0x60] sm:$0xff]   ;;  %6797 = vmatprep.mubr.bf16.mxu0 %v7277_v4  ;;  %v7280_v13 = vld [vmem:[%s7534_s7 + $0x6c] sm:$0xff]   ;;  %v7286_v17 = vld [vmem:[%s7534_s7 + $0x78] sm:$0xff]   ;;  %s7393_s30 = sshll.u32 %s7451_s29, 4  ;;  %s7394_s30 = int_to_ptr.vmem [resolvable:$false] %s7393_s30 }
  0x1c   : > { %6813 = vmatprep.mubr.bf16.mxu1 %v7278_v5  ;;  %v7287_v19 = vld [vmem:[%s7534_s7 + $0x24] sm:$0xff]   ;;  %v7293_v24 = vld [vmem:[%s7534_s7 + $0x30] sm:$0xff]   ;;  %v554_v26 = vld [vmem:[%s7534_s7] sm:$0xf]  ;;  %p7391_p12 = pnand %p7390_p11, %p7510_p5  ;;  %s7395_s16 = scalar_lea.vmem %s7394_s30, 32 }
  0x1d   : > { %6786 = vmatpush3.bf16.msra.mxu0 %v7271_v2  ;;  %7223 = vmatpush3.bf16.msra.mxu1 %v7271_v2  ;;  %v7288_v21 = vld [vmem:[%s7534_s7 + $0x84] sm:$0xff]   ;;  %v7294_v25 = vld [vmem:[%s7534_s7 + $0x90] sm:$0xff]   ;;  %v606_v29 = vshrl.u32 %v554_v26, 16  ;;  %v609_v30 = vshll.u32 %v554_v26, 16  ;;  %v1375_v36 = vld [vmem:[%s7534_s7] sm:$0xe]  ;;  %p7396_p0 = scmp.lt.s32.totalorder %s5854_s20, %s7394_s30  ;;  %p7397_p1 = scmp.lt.s32.totalorder %s7395_s16, %s7389_s28 }
  0x1e   : > { %6787 = vmatprep.subr.bf16.mxu0 %v7272_v3  ;;  %7216 = vmatprep.subr.bf16.mxu1 %v7272_v3  ;;  %v555_v27 = vld [vmem:[%s7534_s7 + $0x4] sm:$0xf]  ;;  %v556_v28 = vld [vmem:[%s7534_s7 + $0x8] sm:$0x1]  ;;  %v7295_v41 = vld [vmem:[%s7534_s7 + $0x3c] sm:$0xff]   ;;  %v5977_v47 = vrot.slane %v1375_v36, 9  ;;  %p7392_p13 = pneg %p7391_p12 }
  0x1f   : > { %v615_v33 = vshll.u32 %v555_v27, 16  ;;  %v619_v34 = vshrl.u32 %v555_v27, 16  ;;  %v625_v35 = vshll.u32 %v556_v28, 16  ;;  %v608_v37 = vrot.slane %v606_v29, 4  ;;  %v1376_v39 = vld [vmem:[%s7534_s7 + $0x4] sm:$0xf]  ;;  %p7398_p2 = por %p7397_p1, %p7396_p0 }
  0x20   : > { %v611_v38 = vrot.slane %v609_v30, 5  ;;  %v1377_v40 = vld [vmem:[%s7534_s7 + $0x8] sm:$0x1]  ;;  %v7296_v42 = vld [vmem:[%s7534_s7 + $0x9c] sm:$0xff]   ;;  %v557_v48 = vld [vmem:[%s7534_s7 + $0xc] sm:$0xf] }
  0x21   : > { %6788 = vmatpush3.bf16.msra.mxu0 %v7272_v3  ;;  %7224 = vmatpush3.bf16.msra.mxu1 %v7272_v3  ;;  %v617_v43 = vrot.slane %v615_v33, 5  ;;  %v621_v44 = vrot.slane %v619_v34, 4  ;;  %v627_v45 = vrot.slane %v625_v35, 5  ;;  %v1476_v50 = vrot.slane %v1376_v39, 5  ;;  %v558_v52 = vld [vmem:[%s7534_s7 + $0x10] sm:$0xf]  ;;  %p7399_p3 = pnand %p7398_p2, %p7392_p13 }
  0x22   : > { %6789 = vmatprep.subr.bf16.mxu0 %v7273_v6  ;;  %7217 = vmatprep.subr.bf16.mxu1 %v7273_v6  ;;  %v612_v49 = vor.u32 %v611_v38, %v608_v37  ;;  %v1479_v51 = vrot.slane %v1377_v40, 5  ;;  %v559_v53 = vld [vmem:[%s7534_s7 + $0x14] sm:$0x1]  ;;  %v630_v58 = vshrl.u32 %v557_v48, 16  ;;  %v633_v59 = vshll.u32 %v557_v48, 16  ;;  %v7301_v62 = vld [vmem:[%s7534_s7 + $0x48] sm:$0xff]  }
  0x23   : > { %v7620_v55 = vld [vmem:[%s9350_s1 + $0x90] sm:$0xff]   ;;  %v622_v57 = vor.u32 %v621_v44, %v617_v43  ;;  %v639_v60 = vshll.u32 %v558_v52, 16  ;;  %v1378_v61 = vld [vmem:[%s7534_s7 + $0xc] sm:$0xe]  ;;  %v7633_v1 = vsel %vm7605_vm4, %v5977_v47, %v1476_v50  ;;  %v1478_v2 = vrot.slane %v1476_v50, 4  ;;  %v7307_v38 = vld [vmem:[%s9350_s1 + $0x40] sm:$0xff]  }
  0x24   : > { %v7302_v63 = vld [vmem:[%s7534_s7 + $0xa8] sm:$0xff]   ;;  %v613_v0 = vrot.slane %v612_v49, 4  ;;  %v643_v3 = vshrl.u32 %v558_v52, 16  ;;  %v1379_v4 = vld [vmem:[%s7534_s7 + $0x10] sm:$0xf]  ;;  %v7303_v26 = vld [vmem:[%s7534_s7 + $0x54] sm:$0xff]  }
  0x25   : > { %6790 = vmatpush3.bf16.msra.mxu0 %v7273_v6  ;;  %7225 = vmatpush3.bf16.msra.mxu1 %v7273_v6  ;;  %v623_v5 = vrot.slane %v622_v57, 4  ;;  %v632_v6 = vrot.slane %v630_v58, 4  ;;  %v562_v29 = vld [vmem:[%s7534_s7 + $0x20] sm:$0x1]  ;;  %v1381_v37 = vld [vmem:[%s7534_s7 + $0x18] sm:$0xe] }
  0x26   : > { %6791 = vmatprep.subr.bf16.mxu0 %v7274_v7  ;;  %7218 = vmatprep.subr.bf16.mxu1 %v7274_v7  ;;  %v673_v48 = vshll.u32 %v562_v29, 16  ;;  %v1383_v49 = vld [vmem:[%s7534_s7 + $0x20] sm:$0x1]  ;;  %v563_v50 = vld [vmem:[%s7534_s7 + $0x24] sm:$0xf] }
  0x27   : > { %v564_v57 = vld [vmem:[%s7534_s7 + $0x28] sm:$0xf]  ;;  %v565_v58 = vld [vmem:[%s7534_s7 + $0x2c] sm:$0x1]  ;;  %v566_v29 = vld [vmem:[%s7534_s7 + $0x30] sm:$0xf] }
  0x29   : > { %6792 = vmatpush3.bf16.msra.mxu0 %v7274_v7  ;;  %7226 = vmatpush3.bf16.msra.mxu1 %v7274_v7  ;;  %v635_v7 = vrot.slane %v633_v59, 5  ;;  %v675_v59 = vrot.slane %v673_v48, 5 }
  0x2a   : > { %6793 = vmatprep.subr.bf16.mxu0 %v7275_v8  ;;  %7219 = vmatprep.subr.bf16.mxu1 %v7275_v8 }
  0x2d   : > { %6794 = vmatpush3.bf16.msra.mxu0 %v7275_v8  ;;  %7227 = vmatpush3.bf16.msra.mxu1 %v7275_v8  ;;  %v641_v8 = vrot.slane %v639_v60, 5  ;;  %v5979_v60 = vrot.slane %v1381_v37, 9 }
  0x2e   : > { %6795 = vmatprep.subr.bf16.mxu0 %v7276_v9  ;;  %7220 = vmatprep.subr.bf16.mxu1 %v7276_v9 }
  0x31   : > { %6796 = vmatpush3.bf16.msra.mxu0 %v7276_v9  ;;  %7228 = vmatpush3.bf16.msra.mxu1 %v7276_v9  ;;  %v1380_v9 = vld [vmem:[%s7534_s7 + $0x14] sm:$0x1] }
  0x32   : > { %6829 = vmatprep.subr.bf16.mxu1 %v7281_v10  ;;  %6877 = vmatprep.subr.bf16.mxu0 %v7282_v12  ;;  %v1486_v28 = vrot.slane %v1380_v9, 5  ;;  %v687_v9 = vshll.u32 %v564_v57, 16 }
  0x34   : > { %6798 = vmatmul.mubr.bf16.vlgmr.msra.gmra.mxu0 %v7279_v11  ;;  %6814 = vmatmul.mubr.bf16.vlgmr.msra.gmra.mxu1 %v7280_v13  ;;  %v7643_v11 = vsel %vm7605_vm4, %v1478_v2, %v1479_v51  ;;  %v649_v13 = vshll.u32 %v559_v53, 16  ;;  %v7308_v51 = vld [vmem:[%s9350_s1 + $0x80] sm:$0xff]  }
  0x35   : > { %6830 = vmatpush3.bf16.msra.mxu1 %v7281_v10  ;;  %6878 = vmatpush3.bf16.msra.mxu0 %v7282_v12  ;;  %v618_v10 = vsel %vm7624_vm5, %v613_v0, %v617_v43  ;;  %v645_v12 = vrot.slane %v643_v3, 4  ;;  %v1382_v43 = vld [vmem:[%s7534_s7 + $0x1c] sm:$0xf]  ;;  %v678_v3 = vshrl.u32 %v563_v50, 16 }
  0x36   : > { %6831 = vmatprep.subr.bf16.mxu1 %v7283_v14  ;;  %6879 = vmatprep.subr.bf16.mxu0 %v7284_v15 }
  0x37   : > { %6801 = vmatprep.mubr.bf16.mxu0 %v7285_v16  ;;  %6817 = vmatprep.mubr.bf16.mxu1 %v7286_v17  ;;  %v628_v16 = vsel %vm7624_vm5, %v623_v5, %v627_v45  ;;  %v6009_v17 = vcombine.low %v7633_v1, %v7643_v11  ;;  %v1385_v5 = vld [vmem:[%s7534_s7 + $0x28] sm:$0xf] }
  0x39   : > { %6832 = vmatpush3.bf16.msra.mxu1 %v7283_v14  ;;  %6880 = vmatpush3.bf16.msra.mxu0 %v7284_v15  ;;  %v7648_v14 = vld [vmem:[%s9350_s1 + $0x48] sm:$0xff]  }
  0x3a   : > { %6833 = vmatprep.subr.bf16.mxu1 %v7289_v18  ;;  %6881 = vmatprep.subr.bf16.mxu0 %v7290_v20  ;;  %v7653_v15 = vld [vmem:[%s9350_s1 + $0x88] sm:$0xff]  }
  0x3c   : > { %6802 = vmatmul.mubr.bf16.gmra.mxu0 %v7287_v19  ;;  %6818 = vmatmul.mubr.bf16.gmra.mxu1 %v7288_v21  ;;  %v5978_v19 = vrot.slane %v1378_v61, 9  ;;  %v646_v21 = vor.u32 %v645_v12, %v641_v8  ;;  %v1490_v61 = vrot.slane %v1382_v43, 5  ;;  %v1386_v12 = vld [vmem:[%s7534_s7 + $0x2c] sm:$0x1] }
  0x3d   : > { %6834 = vmatpush3.bf16.msra.mxu1 %v7289_v18  ;;  %6882 = vmatpush3.bf16.msra.mxu0 %v7290_v20  ;;  %v636_v18 = vor.u32 %v635_v7, %v632_v6  ;;  %v7661_v20 = vcombine.low %v618_v10, %v628_v16  ;;  %v7309_v6 = vld [vmem:[%s9350_s1 + $0xf8] sm:$0xff]   ;;  %v691_v10 = vshrl.u32 %v564_v57, 16  ;;  %v680_v16 = vrot.slane %v678_v3, 4 }
  0x3e   : > { %6835 = vmatprep.subr.bf16.mxu1 %v7291_v22  ;;  %6883 = vmatprep.subr.bf16.mxu0 %v7292_v23  ;;  %v647_v33 = vrot.slane %v646_v21, 4  ;;  %v1491_v7 = vsel %vm7605_vm4, %v5979_v60, %v1490_v61  ;;  %v689_v21 = vrot.slane %v687_v9, 5  ;;  %v570_v60 = vld [vmem:[%s7534_s7 + $0x40] sm:$0xf] }
  0x3f   : > { %6805 = vmatprep.mubr.bf16.mxu0 %v7293_v24  ;;  %6821 = vmatprep.mubr.bf16.mxu1 %v7294_v25  ;;  %v560_v24 = vld [vmem:[%s7534_s7 + $0x18] sm:$0xf]  ;;  %v561_v25 = vld [vmem:[%s7534_s7 + $0x1c] sm:$0xf]  ;;  %v637_v27 = vrot.slane %v636_v18, 4 }
  0x40   : > { %v654_v30 = vshrl.u32 %v560_v24, 16  ;;  %v663_v36 = vshll.u32 %v561_v25, 16  ;;  %v1391_v9 = vld [vmem:[%s7534_s7 + $0x40] sm:$0xf] }
  0x41   : > { %6836 = vmatpush3.bf16.msra.mxu1 %v7291_v22  ;;  %6884 = vmatpush3.bf16.msra.mxu0 %v7292_v23  ;;  %v651_v22 = vrot.slane %v649_v13, 5  ;;  %v1483_v23 = vrot.slane %v1379_v4, 5  ;;  %v642_v39 = vsel %vm7624_vm5, %v637_v27, %v641_v8  ;;  %v681_v4 = vshll.u32 %v563_v50, 16  ;;  %v7310_v13 = vld [vmem:[%s9350_s1 + $0x138] sm:$0xff]   ;;  %v7313_v50 = vld [vmem:[%s9350_s1 + $0xe8] sm:$0xff]  }
  0x42   : > { %6837 = vmatprep.subr.bf16.mxu1 %v7591_v31  ;;  %6885 = vmatprep.subr.bf16.mxu0 %v7596_v32  ;;  %v656_v40 = vrot.slane %v654_v30, 4  ;;  %v665_v47 = vrot.slane %v663_v36, 5  ;;  %v1492_v8 = vrot.slane %v1490_v61, 4  ;;  %v567_v30 = vld [vmem:[%s7534_s7 + $0x34] sm:$0xf]  ;;  %v705_v36 = vshll.u32 %v566_v29, 16 }
  0x43   : > { %v7672_v34 = vsel %vm7605_vm4, %v5978_v19, %v1483_v23  ;;  %v1485_v35 = vrot.slane %v1483_v23, 4  ;;  %v652_v44 = vsel %vm7624_vm5, %v647_v33, %v651_v22  ;;  %v683_v18 = vrot.slane %v681_v4, 5  ;;  %v568_v33 = vld [vmem:[%s7534_s7 + $0x38] sm:$0x1]  ;;  %v571_v61 = vld [vmem:[%s7534_s7 + $0x44] sm:$0x1] }
  0x44   : > { %6806 = vmatmul.mubr.bf16.gmra.mxu0 %v7295_v41  ;;  %6822 = vmatmul.mubr.bf16.gmra.mxu1 %v7296_v42  ;;  %v667_v42 = vshrl.u32 %v561_v25, 16  ;;  %v7696_v52 = vcombine.low %v642_v39, %v652_v44  ;;  %v693_v22 = vrot.slane %v691_v10, 4  ;;  %v697_v23 = vshll.u32 %v565_v58, 16  ;;  %v1390_v4 = vld [vmem:[%s7534_s7 + $0x3c] sm:$0xe] }
  0x45   : > { %6838 = vmatpush3.bf16.msra.mxu1 %v7591_v31  ;;  %6886 = vmatpush3.bf16.msra.mxu0 %v7596_v32  ;;  %v657_v31 = vshll.u32 %v560_v24, 16  ;;  %v7304_v32 = vld [vmem:[%s7534_s7 + $0xb4] sm:$0xff]   ;;  %v7687_v45 = vsel %vm7605_vm4, %v1485_v35, %v1486_v28  ;;  %v702_v35 = vshrl.u32 %v566_v29, 16  ;;  %v715_v48 = vshrl.u32 %v567_v30, 16 }
  0x46   : > { %6839 = vmatprep.subr.bf16.mxu1 %v7615_v54  ;;  %6887 = vmatprep.subr.bf16.mxu0 %v7620_v55  ;;  %v6010_v53 = vcombine.low %v7672_v34, %v7687_v45  ;;  %v694_v1 = vor.u32 %v693_v22, %v689_v21  ;;  %v699_v11 = vrot.slane %v697_v23, 5  ;;  %v7311_v28 = vld [vmem:[%s9350_s1 + $0xf0] sm:$0xff]   ;;  %v7315_v22 = vld [vmem:[%s9350_s1 + $0xe0] sm:$0xff]   ;;  %v7783_v29 = vld [vmem:[%s9350_s1 + $0x118] sm:$0xff]  }
  0x47   : > { %6809 = vmatprep.mubr.bf16.mxu0 %v7301_v62  ;;  %6825 = vmatprep.mubr.bf16.mxu1 %v7302_v63  ;;  %v659_v41 = vrot.slane %v657_v31, 5  ;;  %v1493_v62 = vrot.slane %v1383_v49, 5  ;;  %v1384_v63 = vld [vmem:[%s7534_s7 + $0x24] sm:$0xe]  ;;  %v704_v44 = vrot.slane %v702_v35, 4 }
  0x48   : > { %v5980_v27 = vrot.slane %v1384_v63, 9  ;;  %v695_v37 = vrot.slane %v694_v1, 4  ;;  %v1388_v49 = vld [vmem:[%s7534_s7 + $0x34] sm:$0xf]  ;;  %v572_v35 = vld [vmem:[%s7534_s7 + $0x48] sm:$0xf] }
  0x49   : > { %6840 = vmatpush3.bf16.msra.mxu1 %v7615_v54  ;;  %6888 = vmatpush3.bf16.msra.mxu0 %v7620_v55  ;;  %v660_v54 = vor.u32 %v659_v41, %v656_v40  ;;  %v669_v55 = vrot.slane %v667_v42, 4  ;;  %v1494_v19 = vsel %vm7605_vm4, %v1492_v8, %v1493_v62  ;;  %v7312_v40 = vld [vmem:[%s9350_s1 + $0x130] sm:$0xff]   ;;  %v711_v41 = vshll.u32 %v567_v30, 16  ;;  %v7314_v62 = vld [vmem:[%s9350_s1 + $0x128] sm:$0xff]  }
  0x4a   : > { %6841 = vmatprep.subr.bf16.mxu1 %v7648_v14  ;;  %6889 = vmatprep.subr.bf16.mxu0 %v7653_v15  ;;  %v6011_v25 = vcombine.low %v1491_v7, %v1494_v19  ;;  %v1387_v42 = vld [vmem:[%s7534_s7 + $0x30] sm:$0xe] }
  0x4b   : > { %v661_v0 = vrot.slane %v660_v54, 4  ;;  %v670_v2 = vor.u32 %v669_v55, %v665_v47  ;;  %v713_v45 = vrot.slane %v711_v41, 5  ;;  %v569_v54 = vld [vmem:[%s7534_s7 + $0x3c] sm:$0xf]  ;;  %v753_v41 = vshll.u32 %v572_v35, 16 }
  0x4c   : > { %6810 = vmatmul.mubr.bf16.gmra.mxu0 %v7303_v26  ;;  %6826 = vmatmul.mubr.bf16.gmra.mxu1 %v7304_v32  ;;  %v684_v26 = vor.u32 %v683_v18, %v680_v16  ;;  %v1500_v32 = vrot.slane %v1386_v12, 5  ;;  %v726_v7 = vshrl.u32 %v569_v54, 16  ;;  %v729_v8 = vshll.u32 %v569_v54, 16 }
  0x4d   : > { %6842 = vmatpush3.bf16.msra.mxu1 %v7648_v14  ;;  %6890 = vmatpush3.bf16.msra.mxu0 %v7653_v15  ;;  %v666_v14 = vsel %vm7624_vm5, %v661_v0, %v665_v47  ;;  %v671_v15 = vrot.slane %v670_v2, 4  ;;  %v707_v47 = vrot.slane %v705_v36, 5  ;;  %v5981_v0 = vrot.slane %v1387_v42, 9  ;;  %v573_v36 = vld [vmem:[%s7534_s7 + $0x4c] sm:$0xf] }
  0x4e   : > { %6843 = vmatprep.subr.bf16.mxu1 %v7307_v38  ;;  %6891 = vmatprep.subr.bf16.mxu0 %v7308_v51  ;;  %v685_v31 = vrot.slane %v684_v26, 4  ;;  %v1504_v2 = vrot.slane %v1388_v49, 5  ;;  %v728_v19 = vrot.slane %v726_v7, 4  ;;  %v745_v26 = vshll.u32 %v571_v61, 16 }
  0x4f   : > { %6845 = vmatprep.mubr.bf16.mxu1 %v7661_v20  ;;  %6893 = vmatprep.mubr.bf16.mxu0 %v6009_v17  ;;  %v676_v24 = vsel %vm7624_vm5, %v671_v15, %v675_v59  ;;  %v1497_v17 = vrot.slane %v1385_v5, 5  ;;  %v708_v58 = vor.u32 %v707_v47, %v704_v44  ;;  %v717_v59 = vrot.slane %v715_v48, 4  ;;  %v1392_v15 = vld [vmem:[%s7534_s7 + $0x44] sm:$0x1]  ;;  %v1393_v48 = vld [vmem:[%s7534_s7 + $0x48] sm:$0xe] }
  0x50   : > { %v5955_v20 = vcombine.low %v666_v14, %v676_v24  ;;  %v690_v43 = vsel %vm7624_vm5, %v685_v31, %v689_v21  ;;  %v1505_v10 = vsel %vm7605_vm4, %v5981_v0, %v1504_v2  ;;  %v1506_v12 = vrot.slane %v1504_v2, 4  ;;  %v576_v0 = vld [vmem:[%s7534_s7 + $0x58] sm:$0xf]  ;;  %v577_v2 = vld [vmem:[%s7534_s7 + $0x5c] sm:$0x1] }
  0x51   : > { %6844 = vmatpush3.bf16.msra.mxu1 %v7307_v38  ;;  %6892 = vmatpush3.bf16.msra.mxu0 %v7308_v51  ;;  %v1498_v38 = vsel %vm7605_vm4, %v5980_v27, %v1497_v17  ;;  %v1499_v39 = vrot.slane %v1497_v17, 4  ;;  %v700_v51 = vsel %vm7624_vm5, %v695_v37, %v699_v11  ;;  %v709_v5 = vrot.slane %v708_v58, 4  ;;  %v7316_v27 = vld [vmem:[%s9350_s1 + $0x120] sm:$0xff]   ;;  %v1395_v58 = vld [vmem:[%s7534_s7 + $0x50] sm:$0x1] }
  0x52   : > { %6925 = vmatprep.subr.bf16.mxu1 %v7309_v6  ;;  %6973 = vmatprep.subr.bf16.mxu0 %v7310_v13  ;;  %v5956_v55 = vcombine.low %v690_v43, %v700_v51  ;;  %v739_v14 = vshrl.u32 %v570_v60, 16  ;;  %v731_v21 = vrot.slane %v729_v8, 5  ;;  %v5982_v17 = vrot.slane %v1390_v4, 9  ;;  %v1396_v8 = vld [vmem:[%s7534_s7 + $0x54] sm:$0xe] }
  0x53   : > { %v1501_v34 = vsel %vm7605_vm4, %v1499_v39, %v1500_v32  ;;  %v714_v16 = vsel %vm7624_vm5, %v709_v5, %v713_v45  ;;  %v747_v32 = vrot.slane %v745_v26, 5  ;;  %v574_v39 = vld [vmem:[%s7534_s7 + $0x50] sm:$0x1]  ;;  %v759_v47 = vshll.u32 %v573_v36, 16  ;;  %v7321_v26 = vld [vmem:[%s9350_s1 + $0xc8] sm:$0xff]  }
  0x54   : > { %6846 = vmatmul.mubr.bf16.vlgmr.msra.gmra.mxu1 %v7696_v52  ;;  %6894 = vmatmul.mubr.bf16.vlgmr.msra.gmra.mxu0 %v6010_v53  ;;  %v721_v52 = vshll.u32 %v568_v33, 16  ;;  %v1389_v53 = vld [vmem:[%s7534_s7 + $0x38] sm:$0x1]  ;;  %v6012_v57 = vcombine.low %v1498_v38, %v1501_v34  ;;  %v732_v11 = vor.u32 %v731_v21, %v728_v19  ;;  %v1511_v33 = vrot.slane %v1391_v9, 5  ;;  %v1398_v21 = vld [vmem:[%s7534_s7 + $0x5c] sm:$0x1] }
  0x55   : > { %6926 = vmatpush3.bf16.msra.mxu1 %v7309_v6  ;;  %6974 = vmatpush3.bf16.msra.mxu0 %v7310_v13  ;;  %v1507_v3 = vrot.slane %v1389_v53, 5  ;;  %v718_v6 = vor.u32 %v717_v59, %v713_v45  ;;  %v735_v13 = vshll.u32 %v570_v60, 16  ;;  %v1514_v38 = vrot.slane %v1392_v15, 5  ;;  %v1394_v45 = vld [vmem:[%s7534_s7 + $0x4c] sm:$0xf] }
  0x56   : > { %6849 = vmatprep.mubr.bf16.mxu1 %v5955_v20  ;;  %6897 = vmatprep.mubr.bf16.mxu0 %v6011_v25  ;;  %v723_v63 = vrot.slane %v721_v52, 5  ;;  %v741_v25 = vrot.slane %v739_v14, 4  ;;  %v733_v37 = vrot.slane %v732_v11, 4  ;;  %v1512_v43 = vsel %vm7605_vm4, %v5982_v17, %v1511_v33  ;;  %v7319_v52 = vld [vmem:[%s9350_s1 + $0xd0] sm:$0xff]   ;;  %v1397_v14 = vld [vmem:[%s7534_s7 + $0x58] sm:$0xf] }
  0x57   : > { %6927 = vmatprep.subr.bf16.mxu1 %v7311_v28  ;;  %6975 = vmatprep.subr.bf16.mxu0 %v7312_v40  ;;  %v719_v18 = vrot.slane %v718_v6, 4  ;;  %v1508_v23 = vsel %vm7605_vm4, %v1506_v12, %v1507_v3  ;;  %v737_v24 = vrot.slane %v735_v13, 5  ;;  %v1513_v44 = vrot.slane %v1511_v33, 4  ;;  %v575_v59 = vld [vmem:[%s7534_s7 + $0x54] sm:$0xf]  ;;  %v7322_v17 = vld [vmem:[%s9350_s1 + $0x108] sm:$0xff]  }
  0x58   : > { %v6013_v1 = vcombine.low %v1505_v10, %v1508_v23  ;;  %v755_v51 = vrot.slane %v753_v41, 5  ;;  %v763_v34 = vshrl.u32 %v573_v36, 16  ;;  %v7320_v3 = vld [vmem:[%s9350_s1 + $0x110] sm:$0xff]   ;;  %v5983_v5 = vrot.slane %v1393_v48, 9  ;;  %v7837_v33 = vld [vmem:[%s9350_s1 + $0x100] sm:$0xff]  }
  0x59   : > { %6928 = vmatpush3.bf16.msra.mxu1 %v7311_v28  ;;  %6976 = vmatpush3.bf16.msra.mxu0 %v7312_v40  ;;  %v724_v20 = vsel %vm7624_vm5, %v719_v18, %v723_v63  ;;  %v7778_v28 = vld [vmem:[%s9350_s1 + $0xd8] sm:$0xff]   ;;  %v742_v31 = vor.u32 %v741_v25, %v737_v24  ;;  %v750_v40 = vshrl.u32 %v572_v35, 16  ;;  %v738_v49 = vsel %vm7624_vm5, %v733_v37, %v737_v24 }
  0x5a   : > { %6929 = vmatprep.subr.bf16.mxu1 %v7313_v50  ;;  %6977 = vmatprep.subr.bf16.mxu0 %v7314_v62  ;;  %v5957_v30 = vcombine.low %v714_v16, %v724_v20  ;;  %v1515_v54 = vsel %vm7605_vm4, %v1513_v44, %v1514_v38  ;;  %v765_v63 = vrot.slane %v763_v34, 4  ;;  %v1518_v6 = vrot.slane %v1394_v45, 5  ;;  %v1399_v34 = vld [vmem:[%s7534_s7 + $0x60] sm:$0xe] }
  0x5b   : > { %v743_v42 = vrot.slane %v742_v31, 4  ;;  %v6014_v61 = vcombine.low %v1512_v43, %v1515_v54  ;;  %v1521_v7 = vrot.slane %v1395_v58, 5  ;;  %v774_v12 = vshrl.u32 %v575_v59, 16  ;;  %v580_v43 = vld [vmem:[%s7534_s7 + $0x68] sm:$0x1] }
  0x5c   : > { %6850 = vmatmul.mubr.bf16.gmra.mxu1 %v5956_v55  ;;  %6898 = vmatmul.mubr.bf16.gmra.mxu0 %v6012_v57  ;;  %v761_v55 = vrot.slane %v759_v47, 5  ;;  %v769_v57 = vshll.u32 %v574_v39, 16  ;;  %v777_v13 = vshll.u32 %v575_v59, 16  ;;  %v1519_v15 = vsel %vm7605_vm4, %v5983_v5, %v1518_v6  ;;  %v578_v39 = vld [vmem:[%s7534_s7 + $0x60] sm:$0xf] }
  0x5d   : > { %6930 = vmatpush3.bf16.msra.mxu1 %v7313_v50  ;;  %6978 = vmatpush3.bf16.msra.mxu0 %v7314_v62  ;;  %v752_v50 = vrot.slane %v750_v40, 4  ;;  %v748_v53 = vsel %vm7624_vm5, %v743_v42, %v747_v32  ;;  %v1520_v16 = vrot.slane %v1518_v6, 4  ;;  %v783_v18 = vshll.u32 %v576_v0, 16  ;;  %v7832_v32 = vld [vmem:[%s9350_s1 + $0xc0] sm:$0xff]   ;;  %v582_v5 = vld [vmem:[%s7534_s7 + $0x70] sm:$0xf] }
  0x5e   : > { %6901 = vmatprep.mubr.bf16.mxu0 %v6013_v1  ;;  %6931 = vmatprep.subr.bf16.mxu1 %v7315_v22  ;;  %v5958_v60 = vcombine.low %v738_v49, %v748_v53  ;;  %v771_v4 = vrot.slane %v769_v57, 5  ;;  %v766_v10 = vor.u32 %v765_v63, %v761_v55  ;;  %v787_v19 = vshrl.u32 %v576_v0, 16  ;;  %v579_v40 = vld [vmem:[%s7534_s7 + $0x64] sm:$0xf]  ;;  %v7851_v57 = vld [vmem:[%s9350_s1 + $0x178] sm:$0xff]  }
  0x5f   : > { %6853 = vmatprep.mubr.bf16.mxu1 %v5957_v30  ;;  %6979 = vmatprep.subr.bf16.mxu0 %v7316_v27  ;;  %v756_v62 = vor.u32 %v755_v51, %v752_v50  ;;  %v776_v24 = vrot.slane %v774_v12, 4  ;;  %v779_v25 = vrot.slane %v777_v13, 5  ;;  %v785_v20 = vrot.slane %v783_v18, 5  ;;  %v581_v63 = vld [vmem:[%s7534_s7 + $0x6c] sm:$0xf] }
  0x60   : > { %v767_v23 = vrot.slane %v766_v10, 4  ;;  %v789_v1 = vrot.slane %v787_v19, 4  ;;  %v793_v11 = vshll.u32 %v577_v2, 16  ;;  %v5984_v31 = vrot.slane %v1396_v8, 9  ;;  %v583_v6 = vld [vmem:[%s7534_s7 + $0x74] sm:$0x1] }
  0x61   : > { %6932 = vmatpush3.bf16.msra.mxu1 %v7315_v22  ;;  %6980 = vmatpush3.bf16.msra.mxu0 %v7316_v27  ;;  %v757_v9 = vrot.slane %v756_v62, 4  ;;  %v1522_v27 = vsel %vm7605_vm4, %v1520_v16, %v1521_v7  ;;  %v780_v30 = vor.u32 %v779_v25, %v776_v24  ;;  %v1525_v38 = vrot.slane %v1397_v14, 5  ;;  %v1401_v62 = vld [vmem:[%s7534_s7 + $0x68] sm:$0x1]  ;;  %v7866_v7 = vld [vmem:[%s9350_s1 + $0x1b8] sm:$0xff]  }
  0x62   : > { %6933 = vmatprep.subr.bf16.mxu1 %v7778_v28  ;;  %6981 = vmatprep.subr.bf16.mxu0 %v7783_v29  ;;  %v790_v36 = vor.u32 %v789_v1, %v785_v20  ;;  %v795_v37 = vrot.slane %v793_v11, 5  ;;  %v1528_v42 = vrot.slane %v1398_v21, 5  ;;  %v798_v44 = vshrl.u32 %v578_v39, 16  ;;  %v1402_v13 = vld [vmem:[%s7534_s7 + $0x6c] sm:$0xe] }
  0x63   : > { %v762_v22 = vsel %vm7624_vm5, %v757_v9, %v761_v55  ;;  %v781_v41 = vrot.slane %v780_v30, 4  ;;  %v801_v47 = vshll.u32 %v578_v39, 16  ;;  %v1526_v49 = vsel %vm7605_vm4, %v5984_v31, %v1525_v38  ;;  %v1400_v55 = vld [vmem:[%s7534_s7 + $0x64] sm:$0xf]  ;;  %v1403_v19 = vld [vmem:[%s7534_s7 + $0x70] sm:$0xf] }
  0x64   : > { %6854 = vmatmul.mubr.bf16.gmra.mxu1 %v5958_v60  ;;  %6902 = vmatmul.mubr.bf16.gmra.mxu0 %v6014_v61  ;;  %v791_v48 = vrot.slane %v790_v36, 4  ;;  %v1527_v50 = vrot.slane %v1525_v38, 4  ;;  %v807_v51 = vshll.u32 %v579_v40, 16  ;;  %v811_v54 = vshrl.u32 %v579_v40, 16  ;;  %v1404_v25 = vld [vmem:[%s7534_s7 + $0x74] sm:$0x1] }
  0x65   : > { %6934 = vmatpush3.bf16.msra.mxu1 %v7778_v28  ;;  %6982 = vmatpush3.bf16.msra.mxu0 %v7783_v29  ;;  %v772_v28 = vsel %vm7624_vm5, %v767_v23, %v771_v4  ;;  %v6015_v29 = vcombine.low %v1519_v15, %v1522_v27  ;;  %v786_v45 = vsel %vm7624_vm5, %v781_v41, %v785_v20  ;;  %v803_v53 = vrot.slane %v801_v47, 5  ;;  %v584_v39 = vld [vmem:[%s7534_s7 + $0x78] sm:$0xf]  ;;  %v585_v40 = vld [vmem:[%s7534_s7 + $0x7c] sm:$0xf] }
  0x66   : > { %6935 = vmatprep.subr.bf16.mxu1 %v7319_v52  ;;  %6983 = vmatprep.subr.bf16.mxu0 %v7320_v3  ;;  %v5959_v35 = vcombine.low %v762_v22, %v772_v28  ;;  %v796_v58 = vsel %vm7624_vm5, %v791_v48, %v795_v37  ;;  %v1529_v59 = vsel %vm7605_vm4, %v1527_v50, %v1528_v42  ;;  %v809_v60 = vrot.slane %v807_v51, 5 }
  0x67   : > { %6905 = vmatprep.mubr.bf16.mxu0 %v6015_v29  ;;  %v817_v61 = vshll.u32 %v580_v43, 16  ;;  %v5960_v0 = vcombine.low %v786_v45, %v796_v58  ;;  %v6016_v2 = vcombine.low %v1526_v49, %v1529_v59  ;;  %v813_v4 = vrot.slane %v811_v54, 4  ;;  %v586_v43 = vld [vmem:[%s7534_s7 + $0x80] sm:$0x1] }
  0x68   : > { %6857 = vmatprep.mubr.bf16.mxu1 %v5959_v35  ;;  %v5985_v9 = vrot.slane %v1399_v34, 9  ;;  %v1532_v10 = vrot.slane %v1400_v55, 5  ;;  %v1535_v12 = vrot.slane %v1401_v62, 5  ;;  %v822_v16 = vshrl.u32 %v581_v63, 16  ;;  %v1405_v34 = vld [vmem:[%s7534_s7 + $0x78] sm:$0xe] }
  0x69   : > { %6936 = vmatpush3.bf16.msra.mxu1 %v7319_v52  ;;  %6984 = vmatpush3.bf16.msra.mxu0 %v7320_v3  ;;  %v800_v52 = vrot.slane %v798_v44, 4  ;;  %v819_v8 = vrot.slane %v817_v61, 5  ;;  %v814_v15 = vor.u32 %v813_v4, %v809_v60  ;;  %v825_v18 = vshll.u32 %v581_v63, 16  ;;  %v1406_v55 = vld [vmem:[%s7534_s7 + $0x7c] sm:$0xf] }
  0x6a   : > { %6937 = vmatprep.subr.bf16.mxu1 %v7321_v26  ;;  %6985 = vmatprep.subr.bf16.mxu0 %v7322_v17  ;;  %v1533_v21 = vsel %vm7605_vm4, %v5985_v9, %v1532_v10  ;;  %v1534_v22 = vrot.slane %v1532_v10, 4  ;;  %v831_v23 = vshll.u32 %v582_v5, 16  ;;  %v835_v24 = vshrl.u32 %v582_v5, 16  ;;  %v1407_v62 = vld [vmem:[%s7534_s7 + $0x80] sm:$0x1] }
  0x6b   : > { %v804_v3 = vor.u32 %v803_v53, %v800_v52  ;;  %v815_v27 = vrot.slane %v814_v15, 4  ;;  %v824_v20 = vrot.slane %v822_v16, 4  ;;  %v827_v1 = vrot.slane %v825_v18, 5  ;;  %v587_v63 = vld [vmem:[%s7534_s7 + $0x84] sm:$0xf] }
  0x6c   : > { %6858 = vmatmul.mubr.bf16.gmra.mxu1 %v5960_v0  ;;  %6906 = vmatmul.mubr.bf16.gmra.mxu0 %v6016_v2  ;;  %v1536_v11 = vsel %vm7605_vm4, %v1534_v22, %v1535_v12  ;;  %v837_v28 = vrot.slane %v835_v24, 4  ;;  %v841_v29 = vshll.u32 %v583_v6, 16  ;;  %v1539_v38 = vrot.slane %v1403_v19, 5  ;;  %v588_v5 = vld [vmem:[%s7534_s7 + $0x88] sm:$0xf] }
  0x6d   : > { %6938 = vmatpush3.bf16.msra.mxu1 %v7321_v26  ;;  %6986 = vmatpush3.bf16.msra.mxu0 %v7322_v17  ;;  %v805_v14 = vrot.slane %v804_v3, 4  ;;  %v833_v17 = vrot.slane %v831_v23, 5  ;;  %v820_v30 = vsel %vm7624_vm5, %v815_v27, %v819_v8  ;;  %v6017_v31 = vcombine.low %v1533_v21, %v1536_v11  ;;  %v589_v6 = vld [vmem:[%s7534_s7 + $0x8c] sm:$0x1]  ;;  %v1409_v19 = vld [vmem:[%s7534_s7 + $0x88] sm:$0xf] }
  0x6e   : > { %6939 = vmatprep.subr.bf16.mxu1 %v7832_v32  ;;  %6987 = vmatprep.subr.bf16.mxu0 %v7837_v33  ;;  %v843_v37 = vrot.slane %v841_v29, 5  ;;  %v1542_v42 = vrot.slane %v1404_v25, 5  ;;  %v846_v44 = vshrl.u32 %v584_v39, 16  ;;  %v849_v47 = vshll.u32 %v584_v39, 16  ;;  %v1410_v25 = vld [vmem:[%s7534_s7 + $0x8c] sm:$0x1] }
  0x6f   : > { %v810_v26 = vsel %vm7624_vm5, %v805_v14, %v809_v60  ;;  %v838_v36 = vor.u32 %v837_v28, %v833_v17  ;;  %6909 = vmatprep.mubr.bf16.mxu0 %v6017_v31  ;;  %v1541_v50 = vrot.slane %v1539_v38, 4  ;;  %v855_v51 = vshll.u32 %v585_v40, 16  ;;  %v590_v39 = vld [vmem:[%s7534_s7 + $0x90] sm:$0xf] }
  0x70   : > { %v5961_v35 = vcombine.low %v810_v26, %v820_v30  ;;  %v848_v52 = vrot.slane %v846_v44, 4  ;;  %v851_v53 = vrot.slane %v849_v47, 5  ;;  %v859_v54 = vshrl.u32 %v585_v40, 16  ;;  %v591_v40 = vld [vmem:[%s7534_s7 + $0x94] sm:$0xf] }
  0x71   : > { %6940 = vmatpush3.bf16.msra.mxu1 %v7832_v32  ;;  %6988 = vmatpush3.bf16.msra.mxu0 %v7837_v33  ;;  %v828_v32 = vor.u32 %v827_v1, %v824_v20  ;;  %v5986_v33 = vrot.slane %v1402_v13, 9  ;;  %v839_v48 = vrot.slane %v838_v36, 4  ;;  %v1543_v59 = vsel %vm7605_vm4, %v1541_v50, %v1542_v42  ;;  %v1408_v13 = vld [vmem:[%s7534_s7 + $0x84] sm:$0xe] }
  0x72   : > { %7021 = vmatprep.subr.bf16.mxu1 %v7851_v57  ;;  %7069 = vmatprep.subr.bf16.mxu0 %v7866_v7  ;;  %v857_v60 = vrot.slane %v855_v51, 5  ;;  %v865_v61 = vshll.u32 %v586_v43, 16  ;;  %v852_v3 = vor.u32 %v851_v53, %v848_v52  ;;  %v861_v4 = vrot.slane %v859_v54, 4  ;;  %v592_v43 = vld [vmem:[%s7534_s7 + $0x98] sm:$0x1] }
  0x73   : > { %v829_v41 = vrot.slane %v828_v32, 4  ;;  %6861 = vmatprep.mubr.bf16.mxu1 %v5961_v35  ;;  %v1540_v49 = vsel %vm7605_vm4, %v5986_v33, %v1539_v38  ;;  %v844_v58 = vsel %vm7624_vm5, %v839_v48, %v843_v37  ;;  %v5987_v9 = vrot.slane %v1405_v34, 9  ;;  %v1411_v34 = vld [vmem:[%s7534_s7 + $0x90] sm:$0xe] }
  0x74   : > { %v6018_v2 = vcombine.low %v1540_v49, %v1543_v59  ;;  %v867_v8 = vrot.slane %v865_v61, 5  ;;  %v1546_v10 = vrot.slane %v1406_v55, 5  ;;  %v1549_v12 = vrot.slane %v1407_v62, 5  ;;  %v1412_v55 = vld [vmem:[%s7534_s7 + $0x94] sm:$0xf] }
  0x75   : > { %v834_v45 = vsel %vm7624_vm5, %v829_v41, %v833_v17  ;;  %v853_v14 = vrot.slane %v852_v3, 4  ;;  %v862_v15 = vor.u32 %v861_v4, %v857_v60  ;;  %v870_v16 = vshrl.u32 %v587_v63, 16  ;;  %v1413_v62 = vld [vmem:[%s7534_s7 + $0x98] sm:$0x1] }
  0x76   : > { %v5962_v0 = vcombine.low %v834_v45, %v844_v58  ;;  %6910 = vmatmul.mubr.bf16.gmra.mxu0 %v6018_v2  ;;  %v873_v18 = vshll.u32 %v587_v63, 16  ;;  %v1547_v21 = vsel %vm7605_vm4, %v5987_v9, %v1546_v10  ;;  %v1548_v22 = vrot.slane %v1546_v10, 4  ;;  %v593_v63 = vld [vmem:[%s7534_s7 + $0x9c] sm:$0xf] }
  0x77   : > { %v879_v23 = vshll.u32 %v588_v5, 16  ;;  %v883_v24 = vshrl.u32 %v588_v5, 16  ;;  %v858_v26 = vsel %vm7624_vm5, %v853_v14, %v857_v60  ;;  %v863_v27 = vrot.slane %v862_v15, 4  ;;  %v594_v5 = vld [vmem:[%s7534_s7 + $0xa0] sm:$0xf] }
  0x78   : > { %6862 = vmatmul.mubr.bf16.gmra.mxu1 %v5962_v0  ;;  %v872_v20 = vrot.slane %v870_v16, 4  ;;  %v875_v1 = vrot.slane %v873_v18, 5  ;;  %v1550_v11 = vsel %vm7605_vm4, %v1548_v22, %v1549_v12  ;;  %v889_v29 = vshll.u32 %v589_v6, 16  ;;  %v595_v6 = vld [vmem:[%s7534_s7 + $0xa4] sm:$0x1] }
  0x79   : > { %v881_v17 = vrot.slane %v879_v23, 5  ;;  %v885_v28 = vrot.slane %v883_v24, 4  ;;  %v868_v30 = vsel %vm7624_vm5, %v863_v27, %v867_v8  ;;  %v6019_v31 = vcombine.low %v1547_v21, %v1550_v11 }
  0x7a   : > { %v876_v32 = vor.u32 %v875_v1, %v872_v20  ;;  %v5988_v33 = vrot.slane %v1408_v13, 9  ;;  %v5963_v35 = vcombine.low %v858_v26, %v868_v30  ;;  %v891_v37 = vrot.slane %v889_v29, 5  ;;  %v1414_v13 = vld [vmem:[%s7534_s7 + $0x9c] sm:$0xe] }
  0x7b   : > { %v886_v36 = vor.u32 %v885_v28, %v881_v17  ;;  %v1553_v38 = vrot.slane %v1409_v19, 5  ;;  %6913 = vmatprep.mubr.bf16.mxu0 %v6019_v31  ;;  %v1556_v42 = vrot.slane %v1410_v25, 5  ;;  %v894_v44 = vshrl.u32 %v590_v39, 16  ;;  %v1415_v19 = vld [vmem:[%s7534_s7 + $0xa0] sm:$0xf] }
  0x7c   : > { %v877_v41 = vrot.slane %v876_v32, 4  ;;  %v897_v47 = vshll.u32 %v590_v39, 16  ;;  %6865 = vmatprep.mubr.bf16.mxu1 %v5963_v35  ;;  %v903_v51 = vshll.u32 %v591_v40, 16  ;;  %v907_v54 = vshrl.u32 %v591_v40, 16  ;;  %v1416_v25 = vld [vmem:[%s7534_s7 + $0xa4] sm:$0x1] }
  0x7d   : > { %v887_v48 = vrot.slane %v886_v36, 4  ;;  %v1554_v49 = vsel %vm7605_vm4, %v5988_v33, %v1553_v38  ;;  %v1555_v50 = vrot.slane %v1553_v38, 4  ;;  %v896_v52 = vrot.slane %v894_v44, 4  ;;  %v596_v39 = vld [vmem:[%s7534_s7 + $0xa8] sm:$0xf] }
  0x7e   : > { %v882_v45 = vsel %vm7624_vm5, %v877_v41, %v881_v17  ;;  %v899_v53 = vrot.slane %v897_v47, 5  ;;  %v905_v60 = vrot.slane %v903_v51, 5  ;;  %v913_v61 = vshll.u32 %v592_v43, 16  ;;  %v597_v40 = vld [vmem:[%s7534_s7 + $0xac] sm:$0xf] }
  0x7f   : > { %v892_v58 = vsel %vm7624_vm5, %v887_v48, %v891_v37  ;;  %v1557_v59 = vsel %vm7605_vm4, %v1555_v50, %v1556_v42  ;;  %v909_v4 = vrot.slane %v907_v54, 4  ;;  %v5989_v9 = vrot.slane %v1411_v34, 9  ;;  %v598_v43 = vld [vmem:[%s7534_s7 + $0xb0] sm:$0x1]  ;;  %v1417_v34 = vld [vmem:[%s7534_s7 + $0xa8] sm:$0xe] }
  0x80   : > { %v5964_v0 = vcombine.low %v882_v45, %v892_v58  ;;  %v6020_v2 = vcombine.low %v1554_v49, %v1557_v59  ;;  %v900_v3 = vor.u32 %v899_v53, %v896_v52  ;;  %v915_v8 = vrot.slane %v913_v61, 5 }
  0x81   : > { %v1560_v10 = vrot.slane %v1412_v55, 5  ;;  %v1563_v12 = vrot.slane %v1413_v62, 5  ;;  %v910_v15 = vor.u32 %v909_v4, %v905_v60  ;;  %v918_v16 = vshrl.u32 %v593_v63, 16  ;;  %v1418_v55 = vld [vmem:[%s7534_s7 + $0xac] sm:$0xf] }
  0x82   : > { %6866 = vmatmul.mubr.bf16.gmra.mxu1 %v5964_v0  ;;  %6914 = vmatmul.mubr.bf16.gmra.mxu0 %v6020_v2  ;;  %v901_v14 = vrot.slane %v900_v3, 4  ;;  %v921_v18 = vshll.u32 %v593_v63, 16  ;;  %v927_v23 = vshll.u32 %v594_v5, 16  ;;  %v931_v24 = vshrl.u32 %v594_v5, 16  ;;  %v1419_v62 = vld [vmem:[%s7534_s7 + $0xb0] sm:$0x1] }
  0x83   : > { %v1561_v21 = vsel %vm7605_vm4, %v5989_v9, %v1560_v10  ;;  %v1562_v22 = vrot.slane %v1560_v10, 4  ;;  %v911_v27 = vrot.slane %v910_v15, 4  ;;  %v920_v20 = vrot.slane %v918_v16, 4  ;;  %v599_v63 = vld [vmem:[%s7534_s7 + $0xb4] sm:$0xf] }
  0x84   : > { %v906_v26 = vsel %vm7624_vm5, %v901_v14, %v905_v60  ;;  %v923_v1 = vrot.slane %v921_v18, 5  ;;  %v929_v17 = vrot.slane %v927_v23, 5  ;;  %v933_v28 = vrot.slane %v931_v24, 4  ;;  %v600_v5 = vld [vmem:[%s7534_s7 + $0xb8] sm:$0xf] }
  0x85   : > { %v1564_v11 = vsel %vm7605_vm4, %v1562_v22, %v1563_v12  ;;  %v937_v29 = vshll.u32 %v595_v6, 16  ;;  %v916_v30 = vsel %vm7624_vm5, %v911_v27, %v915_v8  ;;  %v5990_v33 = vrot.slane %v1414_v13, 9  ;;  %v601_v6 = vld [vmem:[%s7534_s7 + $0xbc] sm:$0x1]  ;;  %v1420_v13 = vld [vmem:[%s7534_s7 + $0xb4] sm:$0xe] }
  0x86   : > { %v6021_v31 = vcombine.low %v1561_v21, %v1564_v11  ;;  %v924_v32 = vor.u32 %v923_v1, %v920_v20  ;;  %v5965_v35 = vcombine.low %v906_v26, %v916_v30  ;;  %v934_v36 = vor.u32 %v933_v28, %v929_v17 }
  0x87   : > { %v939_v37 = vrot.slane %v937_v29, 5  ;;  %v1567_v38 = vrot.slane %v1415_v19, 5  ;;  %v1570_v42 = vrot.slane %v1416_v25, 5  ;;  %v942_v44 = vshrl.u32 %v596_v39, 16  ;;  %v1421_v19 = vld [vmem:[%s7534_s7 + $0xb8] sm:$0xf] }
  0x88   : > { %6917 = vmatprep.mubr.bf16.mxu0 %v6021_v31  ;;  %v925_v41 = vrot.slane %v924_v32, 4  ;;  %v945_v47 = vshll.u32 %v596_v39, 16  ;;  %6869 = vmatprep.mubr.bf16.mxu1 %v5965_v35  ;;  %v935_v48 = vrot.slane %v934_v36, 4  ;;  %v951_v51 = vshll.u32 %v597_v40, 16  ;;  %v1422_v25 = vld [vmem:[%s7534_s7 + $0xbc] sm:$0x1] }
  0x89   : > { %v1568_v49 = vsel %vm7605_vm4, %v5990_v33, %v1567_v38  ;;  %v1569_v50 = vrot.slane %v1567_v38, 4  ;;  %v944_v52 = vrot.slane %v942_v44, 4  ;;  %v955_v54 = vshrl.u32 %v597_v40, 16 }
  0x8a   : > { %v930_v45 = vsel %vm7624_vm5, %v925_v41, %v929_v17  ;;  %v947_v53 = vrot.slane %v945_v47, 5  ;;  %v940_v58 = vsel %vm7624_vm5, %v935_v48, %v939_v37  ;;  %v953_v60 = vrot.slane %v951_v51, 5  ;;  %v6105_v41 = vld [vmem:[%s7534_s7 + $0xc] sm:$0xf]  ;;  %v6107_v48 = vld [vmem:[%s7534_s7 + $0x14] sm:$0x1] }
  0x8b   : > { %v1571_v59 = vsel %vm7605_vm4, %v1569_v50, %v1570_v42  ;;  %v961_v61 = vshll.u32 %v598_v43, 16  ;;  %v5966_v0 = vcombine.low %v930_v45, %v940_v58  ;;  %v957_v4 = vrot.slane %v955_v54, 4  ;;  %v6106_v42 = vld [vmem:[%s7534_s7 + $0x10] sm:$0xf] }
  0x8c   : > { %v6022_v2 = vcombine.low %v1568_v49, %v1571_v59  ;;  %v948_v3 = vor.u32 %v947_v53, %v944_v52  ;;  %v5991_v9 = vrot.slane %v1417_v34, 9  ;;  %v1574_v10 = vrot.slane %v1418_v55, 5  ;;  %v7325_v51 = vld [vmem:[%s7534_s7 + $0xc] sm:$0xff]   ;;  %v6108_v59 = vld [vmem:[%s7534_s7 + $0x18] sm:$0xf] }
  0x8d   : > { %v963_v8 = vrot.slane %v961_v61, 5  ;;  %v1577_v12 = vrot.slane %v1419_v62, 5  ;;  %6870 = vmatmul.mubr.bf16.gmra.mxu1 %v5966_v0  ;;  %v958_v15 = vor.u32 %v957_v4, %v953_v60  ;;  %v966_v16 = vshrl.u32 %v599_v63, 16  ;;  %v6109_v0 = vld [vmem:[%s7534_s7 + $0x1c] sm:$0xf] }
  0x8e   : > { %6918 = vmatmul.mubr.bf16.gmra.mxu0 %v6022_v2  ;;  %v949_v14 = vrot.slane %v948_v3, 4  ;;  %v969_v18 = vshll.u32 %v599_v63, 16  ;;  %v1575_v21 = vsel %vm7605_vm4, %v5991_v9, %v1574_v10  ;;  %v1576_v22 = vrot.slane %v1574_v10, 4  ;;  %v6110_v2 = vld [vmem:[%s7534_s7 + $0x20] sm:$0x1] }
  0x8f   : > { %v975_v23 = vshll.u32 %v600_v5, 16  ;;  %v979_v24 = vshrl.u32 %v600_v5, 16  ;;  %v959_v27 = vrot.slane %v958_v15, 4  ;;  %v968_v20 = vrot.slane %v966_v16, 4 }
  0x90   : > { %v954_v26 = vsel %vm7624_vm5, %v949_v14, %v953_v60  ;;  %v971_v1 = vrot.slane %v969_v18, 5  ;;  %v1578_v11 = vsel %vm7605_vm4, %v1576_v22, %v1577_v12  ;;  %v985_v29 = vshll.u32 %v601_v6, 16  ;;  %v7326_v18 = vld [vmem:[%s7534_s7 + $0x18] sm:$0xff]  }
  0x91   : > { %v977_v17 = vrot.slane %v975_v23, 5  ;;  %v981_v28 = vrot.slane %v979_v24, 4  ;;  %v964_v30 = vsel %vm7624_vm5, %v959_v27, %v963_v8  ;;  %v6023_v31 = vcombine.low %v1575_v21, %v1578_v11 }
  0x92   : > { %v972_v32 = vor.u32 %v971_v1, %v968_v20  ;;  %v5992_v33 = vrot.slane %v1420_v13, 9  ;;  %v5967_v35 = vcombine.low %v954_v26, %v964_v30  ;;  %v987_v37 = vrot.slane %v985_v29, 5  ;;  %v6112_v20 = vld [vmem:[%s7534_s7 + $0x28] sm:$0xf]  ;;  %v6113_v1 = vld [vmem:[%s7534_s7 + $0x2c] sm:$0x1] }
  0x93   : > { %v982_v36 = vor.u32 %v981_v28, %v977_v17  ;;  %v1581_v38 = vrot.slane %v1421_v19, 5  ;;  %6921 = vmatprep.mubr.bf16.mxu0 %v6023_v31  ;;  %v1584_v40 = vrot.slane %v1422_v25, 5  ;;  %v2472_v49 = vshrl.u32 %v6105_v41, 16  ;;  %v6111_v25 = vld [vmem:[%s7534_s7 + $0x24] sm:$0xf] }
  0x94   : > { %v973_v39 = vrot.slane %v972_v32, 4  ;;  %6873 = vmatprep.mubr.bf16.mxu1 %v5967_v35  ;;  %v2475_v34 = vshll.u32 %v6105_v41, 16  ;;  %v2481_v45 = vshll.u32 %v6106_v42, 16  ;;  %v2485_v52 = vshrl.u32 %v6106_v42, 16  ;;  %v7329_v30 = vld [vmem:[%s7534_s7 + $0x24] sm:$0xff]  }
  0x95   : > { %v983_v43 = vrot.slane %v982_v36, 4  ;;  %v1582_v44 = vsel %vm7605_vm4, %v5992_v33, %v1581_v38  ;;  %v1583_v47 = vrot.slane %v1581_v38, 4  ;;  %v2474_v55 = vrot.slane %v2472_v49, 4  ;;  %v7331_v38 = vld [vmem:[%s9350_s1 + $0x170] sm:$0xff]  }
  0x96   : > { %v978_v50 = vsel %vm7624_vm5, %v973_v39, %v977_v17  ;;  %v2491_v58 = vshll.u32 %v6107_v48, 16  ;;  %v2477_v62 = vrot.slane %v2475_v34, 5  ;;  %v2483_v63 = vrot.slane %v2481_v45, 5  ;;  %v6115_v49 = vld [vmem:[%s7534_s7 + $0x34] sm:$0xf]  ;;  %v7335_v45 = vld [vmem:[%s9350_s1 + $0x168] sm:$0xff]  }
  0x97   : > { %v988_v53 = vsel %vm7624_vm5, %v983_v43, %v987_v37  ;;  %v1585_v54 = vsel %vm7605_vm4, %v1583_v47, %v1584_v40  ;;  %v2487_v3 = vrot.slane %v2485_v52, 4  ;;  %v2496_v5 = vshrl.u32 %v6108_v59, 16  ;;  %v6114_v43 = vld [vmem:[%s7534_s7 + $0x30] sm:$0xf] }
  0x98   : > { %v5968_v60 = vcombine.low %v978_v50, %v988_v53  ;;  %v6024_v61 = vcombine.low %v1582_v44, %v1585_v54  ;;  %v2493_v4 = vrot.slane %v2491_v58, 5  ;;  %v2499_v6 = vshll.u32 %v6108_v59, 16  ;;  %v7332_v44 = vld [vmem:[%s9350_s1 + $0x1b0] sm:$0xff]   ;;  %v6116_v50 = vld [vmem:[%s7534_s7 + $0x38] sm:$0x1] }
  0x99   : > { %v2478_v8 = vor.u32 %v2477_v62, %v2474_v55  ;;  %v2505_v9 = vshll.u32 %v6109_v0, 16  ;;  %v2509_v10 = vshrl.u32 %v6109_v0, 16  ;;  %v2515_v12 = vshll.u32 %v6110_v2, 16  ;;  %v7330_v59 = vld [vmem:[%s7534_s7 + $0x30] sm:$0xff]  }
  0x9a   : > { %6874 = vmatmul.mubr.bf16.gmra.mxu1 %v5968_v60  ;;  %6922 = vmatmul.mubr.bf16.gmra.mxu0 %v6024_v61  ;;  %v2488_v13 = vor.u32 %v2487_v3, %v2483_v63  ;;  %v2498_v14 = vrot.slane %v2496_v5, 4  ;;  %v2501_v15 = vrot.slane %v2499_v6, 5  ;;  %v2520_v11 = vshrl.u32 %v6111_v25, 16  ;;  %v7333_v3 = vld [vmem:[%s7534_s7 + $0x3c] sm:$0xff]   ;;  %v7336_v6 = vld [vmem:[%s9350_s1 + $0x1a8] sm:$0xff]  }
  0x9b   : > { %6941 = vmatprep.mubr.bf16.mxu1 %v7325_v51  ;;  %v2479_v16 = vrot.slane %v2478_v8, 4  ;;  %v2507_v19 = vrot.slane %v2505_v9, 5  ;;  %v2511_v21 = vrot.slane %v2509_v10, 4  ;;  %v2517_v24 = vrot.slane %v2515_v12, 5  ;;  %v6117_v10 = vld [vmem:[%s7534_s7 + $0x3c] sm:$0xf] }
  0x9c   : > { %v2489_v22 = vrot.slane %v2488_v13, 4  ;;  %v2502_v23 = vor.u32 %v2501_v15, %v2498_v14  ;;  %v2523_v17 = vshll.u32 %v6111_v25, 16  ;;  %v2529_v31 = vshll.u32 %v6112_v20, 16  ;;  %v6118_v12 = vld [vmem:[%s7534_s7 + $0x40] sm:$0xf] }
  0x9d   : > { %v2484_v26 = vsel %vm7624_vm5, %v2479_v16, %v2483_v63  ;;  %v2512_v27 = vor.u32 %v2511_v21, %v2507_v19  ;;  %v2533_v32 = vshrl.u32 %v6112_v20, 16  ;;  %v2522_v36 = vrot.slane %v2520_v11, 4  ;;  %v6119_v16 = vld [vmem:[%s7534_s7 + $0x44] sm:$0x1]  ;;  %v6121_v20 = vld [vmem:[%s7534_s7 + $0x4c] sm:$0xf] }
  0x9e   : > { %v2494_v28 = vsel %vm7624_vm5, %v2489_v22, %v2493_v4  ;;  %v2503_v29 = vrot.slane %v2502_v23, 4  ;;  %v2525_v37 = vrot.slane %v2523_v17, 5  ;;  %v2531_v40 = vrot.slane %v2529_v31, 5  ;;  %v7334_v31 = vld [vmem:[%s7534_s7 + $0x48] sm:$0xff]  }
  0x9f   : > { %v6169_v33 = vcombine.low %v2484_v26, %v2494_v28  ;;  %v2513_v35 = vrot.slane %v2512_v27, 4  ;;  %v2535_v41 = vrot.slane %v2533_v32, 4  ;;  %v2539_v42 = vshll.u32 %v6113_v1, 16  ;;  %v6120_v27 = vld [vmem:[%s7534_s7 + $0x48] sm:$0xf] }
  0xa0   : > { %v2508_v39 = vsel %vm7624_vm5, %v2503_v29, %v2507_v19  ;;  %v2526_v48 = vor.u32 %v2525_v37, %v2522_v36  ;;  %v2544_v51 = vshrl.u32 %v6114_v43, 16  ;;  %v2547_v34 = vshll.u32 %v6114_v43, 16  ;;  %v6122_v29 = vld [vmem:[%s7534_s7 + $0x50] sm:$0x1]  ;;  %v7340_v36 = vld [vmem:[%s9350_s1 + $0x1a0] sm:$0xff]  }
  0xa1   : > { %6989 = vmatprep.mubr.bf16.mxu0 %v6169_v33  ;;  %v2518_v47 = vsel %vm7624_vm5, %v2513_v35, %v2517_v24  ;;  %v2536_v53 = vor.u32 %v2535_v41, %v2531_v40  ;;  %v2541_v54 = vrot.slane %v2539_v42, 5  ;;  %v2553_v55 = vshll.u32 %v6115_v49, 16  ;;  %v7343_v41 = vld [vmem:[%s9350_s1 + $0x158] sm:$0xff]  }
  0xa2   : > { %6942 = vmatmul.mubr.bf16.vlgmr.msra.gmra.mxu1 %v7326_v18  ;;  %v6170_v52 = vcombine.low %v2508_v39, %v2518_v47  ;;  %v2527_v58 = vrot.slane %v2526_v48, 4  ;;  %v2546_v60 = vrot.slane %v2544_v51, 4  ;;  %v2549_v61 = vrot.slane %v2547_v34, 5  ;;  %v7337_v51 = vld [vmem:[%s7534_s7 + $0x54] sm:$0xff]  }
  0xa3   : > { %7022 = vmatpush3.bf16.msra.mxu1 %v7851_v57  ;;  %6945 = vmatprep.mubr.bf16.mxu1 %v7329_v30  ;;  %v2557_v62 = vshrl.u32 %v6115_v49, 16  ;;  %v2537_v63 = vrot.slane %v2536_v53, 4  ;;  %v2555_v0 = vrot.slane %v2553_v55, 5  ;;  %v2563_v2 = vshll.u32 %v6116_v50, 16 }
  0xa4   : > { %7023 = vmatprep.subr.bf16.mxu1 %v7331_v38  ;;  %6990 = vmatmul.mubr.bf16.vlgmr.msra.gmra.mxu0 %v6170_v52  ;;  %v2532_v57 = vsel %vm7624_vm5, %v2527_v58, %v2531_v40  ;;  %v2550_v4 = vor.u32 %v2549_v61, %v2546_v60  ;;  %v2568_v18 = vshrl.u32 %v6117_v10, 16  ;;  %v2571_v19 = vshll.u32 %v6117_v10, 16  ;;  %v6123_v52 = vld [vmem:[%s7534_s7 + $0x54] sm:$0xf]  ;;  %v6124_v58 = vld [vmem:[%s7534_s7 + $0x58] sm:$0xf] }
  0xa5   : > { %7070 = vmatpush3.bf16.msra.mxu0 %v7866_v7  ;;  %v2559_v5 = vrot.slane %v2557_v62, 4  ;;  %v2542_v8 = vsel %vm7624_vm5, %v2537_v63, %v2541_v54  ;;  %v2565_v9 = vrot.slane %v2563_v2, 5  ;;  %v7339_v7 = vld [vmem:[%s9350_s1 + $0x160] sm:$0xff]   ;;  %v2577_v21 = vshll.u32 %v6118_v12, 16  ;;  %v7344_v61 = vld [vmem:[%s9350_s1 + $0x198] sm:$0xff]  }
  0xa6   : > { %7071 = vmatprep.subr.bf16.mxu0 %v7332_v44  ;;  %v6171_v13 = vcombine.low %v2532_v57, %v2542_v8  ;;  %v2551_v14 = vrot.slane %v2550_v4, 4  ;;  %v2581_v22 = vshrl.u32 %v6118_v12, 16  ;;  %v2587_v23 = vshll.u32 %v6119_v16, 16  ;;  %v7338_v12 = vld [vmem:[%s7534_s7 + $0x60] sm:$0xff]  }
  0xa7   : > { %7024 = vmatpush3.bf16.msra.mxu1 %v7331_v38  ;;  %v2560_v15 = vor.u32 %v2559_v5, %v2555_v0  ;;  %v2570_v26 = vrot.slane %v2568_v18, 4  ;;  %v2573_v1 = vrot.slane %v2571_v19, 5  ;;  %v2579_v11 = vrot.slane %v2577_v21, 5  ;;  %v6128_v18 = vld [vmem:[%s7534_s7 + $0x68] sm:$0x1]  ;;  %v7341_v21 = vld [vmem:[%s7534_s7 + $0x6c] sm:$0xff]  }
  0xa8   : > { %7025 = vmatprep.subr.bf16.mxu1 %v7335_v45  ;;  %6993 = vmatprep.mubr.bf16.mxu0 %v6171_v13  ;;  %v2556_v24 = vsel %vm7624_vm5, %v2551_v14, %v2555_v0  ;;  %v2583_v17 = vrot.slane %v2581_v22, 4  ;;  %v2589_v28 = vrot.slane %v2587_v23, 5  ;;  %v2592_v32 = vshrl.u32 %v6120_v27, 16  ;;  %v6127_v13 = vld [vmem:[%s7534_s7 + $0x64] sm:$0xf]  ;;  %v7348_v22 = vld [vmem:[%s9350_s1 + $0x190] sm:$0xff]  }
  0xa9   : > { %v2561_v25 = vrot.slane %v2560_v15, 4  ;;  %7072 = vmatpush3.bf16.msra.mxu0 %v7332_v44  ;;  %v2595_v33 = vshll.u32 %v6120_v27, 16  ;;  %v2601_v35 = vshll.u32 %v6121_v20, 16  ;;  %v2574_v38 = vor.u32 %v2573_v1, %v2570_v26 }
  0xaa   : > { %6946 = vmatmul.mubr.bf16.gmra.mxu1 %v7330_v59  ;;  %7073 = vmatprep.subr.bf16.mxu0 %v7336_v6  ;;  %v2584_v39 = vor.u32 %v2583_v17, %v2579_v11  ;;  %v2605_v40 = vshrl.u32 %v6121_v20, 16  ;;  %v2594_v42 = vrot.slane %v2592_v32, 4  ;;  %v2611_v47 = vshll.u32 %v6122_v29, 16  ;;  %v6125_v59 = vld [vmem:[%s7534_s7 + $0x5c] sm:$0x1]  ;;  %v7351_v17 = vld [vmem:[%s9350_s1 + $0x148] sm:$0xff]  }
  0xab   : > { %6949 = vmatprep.mubr.bf16.mxu1 %v7333_v3  ;;  %v2566_v30 = vsel %vm7624_vm5, %v2561_v25, %v2565_v9  ;;  %7026 = vmatpush3.bf16.msra.mxu1 %v7335_v45  ;;  %v2597_v43 = vrot.slane %v2595_v33, 5  ;;  %v2603_v44 = vrot.slane %v2601_v35, 5  ;;  %v2575_v48 = vrot.slane %v2574_v38, 4  ;;  %v7347_v3 = vld [vmem:[%s9350_s1 + $0x150] sm:$0xff]  }
  0xac   : > { %v6172_v37 = vcombine.low %v2556_v24, %v2566_v30  ;;  %7027 = vmatprep.subr.bf16.mxu1 %v7339_v7  ;;  %v2585_v49 = vrot.slane %v2584_v39, 4  ;;  %v2607_v50 = vrot.slane %v2605_v40, 4  ;;  %v2613_v45 = vrot.slane %v2611_v47, 5  ;;  %v6129_v39 = vld [vmem:[%s7534_s7 + $0x6c] sm:$0xf] }
  0xad   : > { %v2598_v34 = vor.u32 %v2597_v43, %v2594_v42  ;;  %7074 = vmatpush3.bf16.msra.mxu0 %v7336_v6  ;;  %v2580_v53 = vsel %vm7624_vm5, %v2575_v48, %v2579_v11  ;;  %v2616_v60 = vshrl.u32 %v6123_v52, 16  ;;  %v2619_v0 = vshll.u32 %v6123_v52, 16  ;;  %v6130_v40 = vld [vmem:[%s7534_s7 + $0x70] sm:$0xf]  ;;  %v6131_v43 = vld [vmem:[%s7534_s7 + $0x74] sm:$0x1] }
  0xae   : > { %6994 = vmatmul.mubr.bf16.gmra.mxu0 %v6172_v37  ;;  %v2590_v54 = vsel %vm7624_vm5, %v2585_v49, %v2589_v28  ;;  %v2608_v55 = vor.u32 %v2607_v50, %v2603_v44  ;;  %7075 = vmatprep.subr.bf16.mxu0 %v7340_v36  ;;  %v2625_v2 = vshll.u32 %v6124_v58, 16  ;;  %v2629_v5 = vshrl.u32 %v6124_v58, 16  ;;  %v7345_v58 = vld [vmem:[%s7534_s7 + $0x84] sm:$0xff]  }
  0xaf   : > { %7028 = vmatpush3.bf16.msra.mxu1 %v7339_v7  ;;  %v6173_v62 = vcombine.low %v2580_v53, %v2590_v54  ;;  %v2599_v63 = vrot.slane %v2598_v34, 4  ;;  %v2618_v4 = vrot.slane %v2616_v60, 4  ;;  %v2635_v6 = vshll.u32 %v6125_v59, 16  ;;  %v6126_v7 = vld [vmem:[%s7534_s7 + $0x60] sm:$0xf]  ;;  %v7342_v34 = vld [vmem:[%s7534_s7 + $0x78] sm:$0xff]  }
  0xb0   : > { %7029 = vmatprep.subr.bf16.mxu1 %v7343_v41  ;;  %v2609_v57 = vrot.slane %v2608_v55, 4  ;;  %v2621_v9 = vrot.slane %v2619_v0, 5  ;;  %v2627_v10 = vrot.slane %v2625_v2, 5  ;;  %v2631_v15 = vrot.slane %v2629_v5, 4  ;;  %v6132_v55 = vld [vmem:[%s7534_s7 + $0x78] sm:$0xf] }
  0xb1   : > { %6997 = vmatprep.mubr.bf16.mxu0 %v6173_v62  ;;  %v2604_v8 = vsel %vm7624_vm5, %v2599_v63, %v2603_v44  ;;  %7076 = vmatpush3.bf16.msra.mxu0 %v7340_v36  ;;  %v2637_v16 = vrot.slane %v2635_v6, 5  ;;  %v2640_v19 = vshrl.u32 %v6126_v7, 16  ;;  %v2643_v25 = vshll.u32 %v6126_v7, 16  ;;  %v7355_v36 = vld [vmem:[%s9350_s1 + $0x140] sm:$0xff]   ;;  %v6133_v63 = vld [vmem:[%s7534_s7 + $0x7c] sm:$0xf] }
  0xb2   : > { %6950 = vmatmul.mubr.bf16.gmra.mxu1 %v7334_v31  ;;  %v2614_v14 = vsel %vm7624_vm5, %v2609_v57, %v2613_v45  ;;  %7077 = vmatprep.subr.bf16.mxu0 %v7344_v61  ;;  %v2622_v24 = vor.u32 %v2621_v9, %v2618_v4  ;;  %v2649_v26 = vshll.u32 %v6127_v13, 16  ;;  %v2632_v27 = vor.u32 %v2631_v15, %v2627_v10  ;;  %v7352_v31 = vld [vmem:[%s9350_s1 + $0x188] sm:$0xff]   ;;  %v7356_v59 = vld [vmem:[%s9350_s1 + $0x180] sm:$0xff]   ;;  %v8093_v2 = vld [vmem:[%s9350_s1 + $0x1f8] sm:$0xff]  }
  0xb3   : > { %6953 = vmatprep.mubr.bf16.mxu1 %v7337_v51  ;;  %7030 = vmatpush3.bf16.msra.mxu1 %v7343_v41  ;;  %v6174_v23 = vcombine.low %v2604_v8, %v2614_v14  ;;  %v2642_v20 = vrot.slane %v2640_v19, 4  ;;  %v2653_v1 = vshrl.u32 %v6127_v13, 16  ;;  %v2659_v11 = vshll.u32 %v6128_v18, 16  ;;  %v6134_v0 = vld [vmem:[%s7534_s7 + $0x80] sm:$0x1]  ;;  %v8100_v19 = vld [vmem:[%s9350_s1 + $0x238] sm:$0xff]  }
  0xb4   : > { %7031 = vmatprep.subr.bf16.mxu1 %v7347_v3  ;;  %v2623_v28 = vrot.slane %v2622_v24, 4  ;;  %v2645_v29 = vrot.slane %v2643_v25, 5  ;;  %v2651_v30 = vrot.slane %v2649_v26, 5  ;;  %v2633_v32 = vrot.slane %v2632_v27, 4  ;;  %v6135_v24 = vld [vmem:[%s7534_s7 + $0x84] sm:$0xf] }
  0xb5   : > { %v2655_v33 = vrot.slane %v2653_v1, 4  ;;  %v2661_v35 = vrot.slane %v2659_v11, 5  ;;  %7078 = vmatpush3.bf16.msra.mxu0 %v7344_v61  ;;  %v2664_v44 = vshrl.u32 %v6129_v39, 16  ;;  %v2667_v47 = vshll.u32 %v6129_v39, 16  ;;  %v6136_v25 = vld [vmem:[%s7534_s7 + $0x88] sm:$0xf] }
  0xb6   : > { %6998 = vmatmul.mubr.bf16.gmra.mxu0 %v6174_v23  ;;  %v2628_v37 = vsel %vm7624_vm5, %v2623_v28, %v2627_v10  ;;  %v2646_v38 = vor.u32 %v2645_v29, %v2642_v20  ;;  %7079 = vmatprep.subr.bf16.mxu0 %v7348_v22  ;;  %v2638_v41 = vsel %vm7624_vm5, %v2633_v32, %v2637_v16  ;;  %v2673_v50 = vshll.u32 %v6130_v40, 16  ;;  %v6137_v20 = vld [vmem:[%s7534_s7 + $0x8c] sm:$0x1]  ;;  %v6138_v32 = vld [vmem:[%s7534_s7 + $0x90] sm:$0xf] }
  0xb7   : > { %7032 = vmatpush3.bf16.msra.mxu1 %v7347_v3  ;;  %v2656_v42 = vor.u32 %v2655_v33, %v2651_v30  ;;  %v6175_v48 = vcombine.low %v2628_v37, %v2638_v41  ;;  %v2677_v51 = vshrl.u32 %v6130_v40, 16  ;;  %v2666_v52 = vrot.slane %v2664_v44, 4  ;;  %v7349_v33 = vld [vmem:[%s7534_s7 + $0x9c] sm:$0xff]   ;;  %v6139_v39 = vld [vmem:[%s7534_s7 + $0x94] sm:$0xf] }
  0xb8   : > { %7033 = vmatprep.subr.bf16.mxu1 %v7351_v17  ;;  %v2647_v49 = vrot.slane %v2646_v38, 4  ;;  %v2669_v53 = vrot.slane %v2667_v47, 5  ;;  %v2683_v54 = vshll.u32 %v6131_v43, 16  ;;  %v2675_v61 = vrot.slane %v2673_v50, 5  ;;  %v6140_v43 = vld [vmem:[%s7534_s7 + $0x98] sm:$0x1] }
  0xb9   : > { %v2657_v45 = vrot.slane %v2656_v42, 4  ;;  %7080 = vmatpush3.bf16.msra.mxu0 %v7348_v22  ;;  %7001 = vmatprep.mubr.bf16.mxu0 %v6175_v48  ;;  %v2679_v62 = vrot.slane %v2677_v51, 4  ;;  %v2688_v5 = vshrl.u32 %v6132_v55, 16  ;;  %v2691_v9 = vshll.u32 %v6132_v55, 16 }
  0xba   : > { %6954 = vmatmul.mubr.bf16.gmra.mxu1 %v7338_v12  ;;  %v2652_v60 = vsel %vm7624_vm5, %v2647_v49, %v2651_v30  ;;  %7081 = vmatprep.subr.bf16.mxu0 %v7352_v31  ;;  %v2670_v57 = vor.u32 %v2669_v53, %v2666_v52  ;;  %v2685_v4 = vrot.slane %v2683_v54, 5  ;;  %v2697_v10 = vshll.u32 %v6133_v63, 16 }
  0xbb   : > { %6957 = vmatprep.mubr.bf16.mxu1 %v7341_v21  ;;  %7034 = vmatpush3.bf16.msra.mxu1 %v7351_v17  ;;  %v2662_v3 = vsel %vm7624_vm5, %v2657_v45, %v2661_v35  ;;  %v2680_v8 = vor.u32 %v2679_v62, %v2675_v61  ;;  %v2690_v7 = vrot.slane %v2688_v5, 4  ;;  %v2701_v13 = vshrl.u32 %v6133_v63, 16  ;;  %v7346_v17 = vld [vmem:[%s7534_s7 + $0x90] sm:$0xff]  }
  0xbc   : > { %7035 = vmatprep.subr.bf16.mxu1 %v7355_v36  ;;  %v6176_v6 = vcombine.low %v2652_v60, %v2662_v3  ;;  %v2671_v12 = vrot.slane %v2670_v57, 4  ;;  %v2707_v14 = vshll.u32 %v6134_v0, 16  ;;  %v2693_v16 = vrot.slane %v2691_v9, 5  ;;  %v6141_v3 = vld [vmem:[%s7534_s7 + $0x9c] sm:$0xf] }
  0xbd   : > { %7082 = vmatpush3.bf16.msra.mxu0 %v7352_v31  ;;  %v2681_v15 = vrot.slane %v2680_v8, 4  ;;  %v2699_v18 = vrot.slane %v2697_v10, 5  ;;  %v2703_v22 = vrot.slane %v2701_v13, 4  ;;  %v2712_v1 = vshrl.u32 %v6135_v24, 16  ;;  %v6142_v57 = vld [vmem:[%s7534_s7 + $0xa0] sm:$0xf] }
  0xbe   : > { %7002 = vmatmul.mubr.bf16.gmra.mxu0 %v6176_v6  ;;  %v2676_v21 = vsel %vm7624_vm5, %v2671_v12, %v2675_v61  ;;  %v2709_v23 = vrot.slane %v2707_v14, 5  ;;  %7083 = vmatprep.subr.bf16.mxu0 %v7356_v59  ;;  %v2694_v27 = vor.u32 %v2693_v16, %v2690_v7  ;;  %v2715_v11 = vshll.u32 %v6135_v24, 16  ;;  %v6143_v8 = vld [vmem:[%s7534_s7 + $0xa4] sm:$0x1]  ;;  %v7353_v12 = vld [vmem:[%s7534_s7 + $0xb4] sm:$0xff]  }
  0xbf   : > { %7036 = vmatpush3.bf16.msra.mxu1 %v7355_v36  ;;  %v2686_v26 = vsel %vm7624_vm5, %v2681_v15, %v2685_v4  ;;  %v2704_v29 = vor.u32 %v2703_v22, %v2699_v18  ;;  %v2721_v30 = vshll.u32 %v6136_v25, 16  ;;  %v2725_v31 = vshrl.u32 %v6136_v25, 16  ;;  %v7350_v4 = vld [vmem:[%s7534_s7 + $0xa8] sm:$0xff]  }
  0xc0   : > { %7117 = vmatprep.subr.bf16.mxu1 %v8093_v2  ;;  %v6177_v28 = vcombine.low %v2676_v21, %v2686_v26  ;;  %v2695_v35 = vrot.slane %v2694_v27, 4  ;;  %v2714_v36 = vrot.slane %v2712_v1, 4  ;;  %v2717_v37 = vrot.slane %v2715_v11, 5  ;;  %v6145_v27 = vld [vmem:[%s7534_s7 + $0xac] sm:$0xf] }
  0xc1   : > { %7084 = vmatpush3.bf16.msra.mxu0 %v7356_v59  ;;  %v2731_v38 = vshll.u32 %v6137_v20, 16  ;;  %v2705_v40 = vrot.slane %v2704_v29, 4  ;;  %v2723_v41 = vrot.slane %v2721_v30, 5  ;;  %v2727_v42 = vrot.slane %v2725_v31, 4  ;;  %v6146_v20 = vld [vmem:[%s7534_s7 + $0xb0] sm:$0x1] }
  0xc2   : > { %6958 = vmatmul.mubr.bf16.gmra.mxu1 %v7342_v34  ;;  %7165 = vmatprep.subr.bf16.mxu0 %v8100_v19  ;;  %v2736_v44 = vshrl.u32 %v6138_v32, 16  ;;  %v2700_v47 = vsel %vm7624_vm5, %v2695_v35, %v2699_v18  ;;  %v2718_v48 = vor.u32 %v2717_v37, %v2714_v36  ;;  %v2739_v50 = vshll.u32 %v6138_v32, 16 }
  0xc3   : > { %6961 = vmatprep.mubr.bf16.mxu1 %v7345_v58  ;;  %7005 = vmatprep.mubr.bf16.mxu0 %v6177_v28  ;;  %v2733_v49 = vrot.slane %v2731_v38, 5  ;;  %v2710_v51 = vsel %vm7624_vm5, %v2705_v40, %v2709_v23  ;;  %v2728_v34 = vor.u32 %v2727_v42, %v2723_v41  ;;  %v2745_v52 = vshll.u32 %v6139_v39, 16  ;;  %v6144_v23 = vld [vmem:[%s7534_s7 + $0xa8] sm:$0xf] }
  0xc4   : > { %v2738_v45 = vrot.slane %v2736_v44, 4  ;;  %v6178_v53 = vcombine.low %v2700_v47, %v2710_v51  ;;  %v2719_v54 = vrot.slane %v2718_v48, 4  ;;  %v2741_v55 = vrot.slane %v2739_v50, 5  ;;  %v6147_v44 = vld [vmem:[%s7534_s7 + $0xb4] sm:$0xf]  ;;  %v7354_v47 = vld [vmem:[%s7534_s7 + $0xc0] sm:$0xff]  }
  0xc5   : > { %v2749_v58 = vshrl.u32 %v6139_v39, 16  ;;  %v2729_v59 = vrot.slane %v2728_v34, 4  ;;  %v2747_v60 = vrot.slane %v2745_v52, 5  ;;  %v2755_v61 = vshll.u32 %v6140_v43, 16  ;;  %v6148_v51 = vld [vmem:[%s7534_s7 + $0xb8] sm:$0xf] }
  0xc6   : > { %7006 = vmatmul.mubr.bf16.gmra.mxu0 %v6178_v53  ;;  %v2724_v62 = vsel %vm7624_vm5, %v2719_v54, %v2723_v41  ;;  %v2742_v63 = vor.u32 %v2741_v55, %v2738_v45  ;;  %v2760_v9 = vshrl.u32 %v6141_v3, 16  ;;  %v2763_v10 = vshll.u32 %v6141_v3, 16  ;;  %v6149_v34 = vld [vmem:[%s7534_s7 + $0xbc] sm:$0x1] }
  0xc7   : > { %v2751_v0 = vrot.slane %v2749_v58, 4  ;;  %v2734_v5 = vsel %vm7624_vm5, %v2729_v59, %v2733_v49  ;;  %v2757_v6 = vrot.slane %v2755_v61, 5  ;;  %v2769_v15 = vshll.u32 %v6142_v57, 16 }
  0xc8   : > { %v6179_v7 = vcombine.low %v2724_v62, %v2734_v5  ;;  %v2743_v13 = vrot.slane %v2742_v63, 4  ;;  %v2762_v16 = vrot.slane %v2760_v9, 4  ;;  %v2765_v18 = vrot.slane %v2763_v10, 5 }
  0xc9   : > { %v2752_v14 = vor.u32 %v2751_v0, %v2747_v60  ;;  %v2773_v21 = vshrl.u32 %v6142_v57, 16  ;;  %v2779_v22 = vshll.u32 %v6143_v8, 16  ;;  %v2771_v26 = vrot.slane %v2769_v15, 5  ;;  %v6150_v57 = vld [vmem:[%s7534_s7 + $0xc0] sm:$0xf] }
  0xca   : > { %6962 = vmatmul.mubr.bf16.gmra.mxu1 %v7346_v17  ;;  %7009 = vmatprep.mubr.bf16.mxu0 %v6179_v7  ;;  %v2748_v24 = vsel %vm7624_vm5, %v2743_v13, %v2747_v60  ;;  %v2766_v1 = vor.u32 %v2765_v18, %v2762_v16  ;;  %v2784_v28 = vshrl.u32 %v6144_v23, 16  ;;  %v2787_v30 = vshll.u32 %v6144_v23, 16  ;;  %v6152_v8 = vld [vmem:[%s7534_s7 + $0xc8] sm:$0x1] }
  0xcb   : > { %6965 = vmatprep.mubr.bf16.mxu1 %v7349_v33  ;;  %v2753_v25 = vrot.slane %v2752_v14, 4  ;;  %v2775_v11 = vrot.slane %v2773_v21, 4  ;;  %v2781_v17 = vrot.slane %v2779_v22, 5  ;;  %v2793_v31 = vshll.u32 %v6145_v27, 16 }
  0xcc   : > { %v2797_v32 = vshrl.u32 %v6145_v27, 16  ;;  %v2767_v35 = vrot.slane %v2766_v1, 4  ;;  %v2786_v37 = vrot.slane %v2784_v28, 4  ;;  %v2789_v38 = vrot.slane %v2787_v30, 5  ;;  %v6194_v1 = vld [vmem:[%s7534_s7 + $0x10] sm:$0xf] }
  0xcd   : > { %v2758_v29 = vsel %vm7624_vm5, %v2753_v25, %v2757_v6  ;;  %v2776_v36 = vor.u32 %v2775_v11, %v2771_v26  ;;  %v2795_v39 = vrot.slane %v2793_v31, 5  ;;  %v2803_v41 = vshll.u32 %v6146_v20, 16  ;;  %v6151_v6 = vld [vmem:[%s7534_s7 + $0xc4] sm:$0xf]  ;;  %v6193_v20 = vld [vmem:[%s7534_s7 + $0xc] sm:$0xe] }
  0xce   : > { %v6180_v33 = vcombine.low %v2748_v24, %v2758_v29  ;;  %v2799_v40 = vrot.slane %v2797_v32, 4  ;;  %v2772_v42 = vsel %vm7624_vm5, %v2767_v35, %v2771_v26  ;;  %v2790_v48 = vor.u32 %v2789_v38, %v2786_v37  ;;  %v6195_v29 = vld [vmem:[%s7534_s7 + $0x14] sm:$0x1]  ;;  %v6197_v38 = vld [vmem:[%s7534_s7 + $0x1c] sm:$0xf] }
  0xcf   : > { %v2777_v43 = vrot.slane %v2776_v36, 4  ;;  %v2805_v50 = vrot.slane %v2803_v41, 5  ;;  %v2808_v45 = vshrl.u32 %v6147_v44, 16  ;;  %v2811_v53 = vshll.u32 %v6147_v44, 16  ;;  %v6196_v36 = vld [vmem:[%s7534_s7 + $0x18] sm:$0xe] }
  0xd0   : > { %7010 = vmatmul.mubr.bf16.gmra.mxu0 %v6180_v33  ;;  %v2800_v49 = vor.u32 %v2799_v40, %v2795_v39  ;;  %v2817_v54 = vshll.u32 %v6148_v51, 16  ;;  %v2821_v55 = vshrl.u32 %v6148_v51, 16  ;;  %v2791_v59 = vrot.slane %v2790_v48, 4 }
  0xd1   : > { %v2782_v52 = vsel %vm7624_vm5, %v2777_v43, %v2781_v17  ;;  %v2810_v61 = vrot.slane %v2808_v45, 4  ;;  %v2813_v62 = vrot.slane %v2811_v53, 5  ;;  %v2827_v3 = vshll.u32 %v6149_v34, 16  ;;  %v6199_v34 = vld [vmem:[%s7534_s7 + $0x24] sm:$0xe] }
  0xd2   : > { %6966 = vmatmul.mubr.bf16.gmra.mxu1 %v7350_v4  ;;  %v6181_v58 = vcombine.low %v2772_v42, %v2782_v52  ;;  %v2801_v60 = vrot.slane %v2800_v49, 4  ;;  %v2819_v63 = vrot.slane %v2817_v54, 5  ;;  %v2823_v0 = vrot.slane %v2821_v55, 4  ;;  %v6200_v55 = vld [vmem:[%s7534_s7 + $0x28] sm:$0xf] }
  0xd3   : > { %6969 = vmatprep.mubr.bf16.mxu1 %v7353_v12  ;;  %v2796_v4 = vsel %vm7624_vm5, %v2791_v59, %v2795_v39  ;;  %v2832_v9 = vshrl.u32 %v6150_v57, 16  ;;  %v2835_v10 = vshll.u32 %v6150_v57, 16  ;;  %v2814_v7 = vor.u32 %v2813_v62, %v2810_v61  ;;  %v6198_v39 = vld [vmem:[%s7534_s7 + $0x20] sm:$0x1]  ;;  %v7363_v62 = vld [vmem:[%s9350_s1 + $0x1f0] sm:$0xff]  }
  0xd4   : > { %7013 = vmatprep.mubr.bf16.mxu0 %v6181_v58  ;;  %v2806_v5 = vsel %vm7624_vm5, %v2801_v60, %v2805_v50  ;;  %v2824_v13 = vor.u32 %v2823_v0, %v2819_v63  ;;  %v2829_v14 = vrot.slane %v2827_v3, 5  ;;  %v2841_v18 = vshll.u32 %v6151_v6, 16  ;;  %v6201_v58 = vld [vmem:[%s7534_s7 + $0x2c] sm:$0x1]  ;;  %v6202_v0 = vld [vmem:[%s7534_s7 + $0x30] sm:$0xe] }
  0xd5   : > { %v6182_v12 = vcombine.low %v2796_v4, %v2806_v5  ;;  %v2834_v15 = vrot.slane %v2832_v9, 4  ;;  %v2837_v16 = vrot.slane %v2835_v10, 5  ;;  %v2845_v21 = vshrl.u32 %v6151_v6, 16  ;;  %v6203_v3 = vld [vmem:[%s7534_s7 + $0x34] sm:$0xf]  ;;  %v7358_v9 = vld [vmem:[%s7534_s7 + $0x24] sm:$0xff]  }
  0xd6   : > { %v2815_v22 = vrot.slane %v2814_v7, 4  ;;  %v2825_v23 = vrot.slane %v2824_v13, 4  ;;  %v2851_v24 = vshll.u32 %v6152_v8, 16  ;;  %v2843_v26 = vrot.slane %v2841_v18, 5  ;;  %v6204_v6 = vld [vmem:[%s7534_s7 + $0x38] sm:$0x1] }
  0xd7   : > { %v2838_v25 = vor.u32 %v2837_v16, %v2834_v15  ;;  %v2847_v27 = vrot.slane %v2845_v21, 4  ;;  %v6241_v30 = vrot.slane %v6193_v20, 9  ;;  %v3339_v35 = vrot.slane %v6194_v1, 5  ;;  %v7361_v13 = vld [vmem:[%s7534_s7 + $0x30] sm:$0xff]   ;;  %v6205_v21 = vld [vmem:[%s7534_s7 + $0x3c] sm:$0xe] }
  0xd8   : > { %7014 = vmatmul.mubr.bf16.gmra.mxu0 %v6182_v12  ;;  %v2820_v11 = vsel %vm7624_vm5, %v2815_v22, %v2819_v63  ;;  %v2830_v17 = vsel %vm7624_vm5, %v2825_v23, %v2829_v14  ;;  %v2853_v28 = vrot.slane %v2851_v24, 5  ;;  %v3342_v37 = vrot.slane %v6195_v29, 5  ;;  %v7364_v18 = vld [vmem:[%s9350_s1 + $0x230] sm:$0xff]   ;;  %v6206_v22 = vld [vmem:[%s7534_s7 + $0x40] sm:$0xf]  ;;  %v7367_v20 = vld [vmem:[%s9350_s1 + $0x1e8] sm:$0xff]  }
  0xd9   : > { %v6183_v31 = vcombine.low %v2820_v11, %v2830_v17  ;;  %v2839_v32 = vrot.slane %v2838_v25, 4  ;;  %v2848_v33 = vor.u32 %v2847_v27, %v2843_v26  ;;  %v6242_v40 = vrot.slane %v6196_v36, 9  ;;  %v6207_v23 = vld [vmem:[%s7534_s7 + $0x44] sm:$0x1]  ;;  %v6208_v27 = vld [vmem:[%s7534_s7 + $0x48] sm:$0xe] }
  0xda   : > { %6970 = vmatmul.mubr.bf16.gmra.mxu1 %v7354_v47  ;;  %v3340_v43 = vsel %vm7605_vm4, %v6241_v30, %v3339_v35  ;;  %v3341_v44 = vrot.slane %v3339_v35, 4  ;;  %v7357_v47 = vld [vmem:[%s7534_s7 + $0x18] sm:$0xff]   ;;  %v3346_v48 = vrot.slane %v6197_v38, 5  ;;  %v3349_v49 = vrot.slane %v6198_v39, 5  ;;  %v6210_v29 = vld [vmem:[%s7534_s7 + $0x50] sm:$0x1] }
  0xdb   : > { %7017 = vmatprep.mubr.bf16.mxu0 %v6183_v31  ;;  %v2844_v41 = vsel %vm7624_vm5, %v2839_v32, %v2843_v26  ;;  %v2849_v42 = vrot.slane %v2848_v33, 4  ;;  %v6243_v59 = vrot.slane %v6199_v34, 9  ;;  %v3353_v60 = vrot.slane %v6200_v55, 5  ;;  %v7371_v31 = vld [vmem:[%s9350_s1 + $0x1e0] sm:$0xff]  }
  0xdc   : > { %v3343_v51 = vsel %vm7605_vm4, %v3341_v44, %v3342_v37  ;;  %v3347_v53 = vsel %vm7605_vm4, %v6242_v40, %v3346_v48  ;;  %v3348_v54 = vrot.slane %v3346_v48, 4  ;;  %v3356_v61 = vrot.slane %v6201_v58, 5  ;;  %v7362_v40 = vld [vmem:[%s7534_s7 + $0x3c] sm:$0xff]   ;;  %v6211_v44 = vld [vmem:[%s7534_s7 + $0x54] sm:$0xe] }
  0xdd   : > { %v2854_v50 = vsel %vm7624_vm5, %v2849_v42, %v2853_v28  ;;  %v6273_v52 = vcombine.low %v3340_v43, %v3343_v51  ;;  %v3354_v4 = vsel %vm7605_vm4, %v6243_v59, %v3353_v60  ;;  %v3355_v5 = vrot.slane %v3353_v60, 4  ;;  %v6209_v28 = vld [vmem:[%s7534_s7 + $0x4c] sm:$0xf]  ;;  %v6213_v48 = vld [vmem:[%s7534_s7 + $0x5c] sm:$0x1] }
  0xde   : > { %v6184_v45 = vcombine.low %v2844_v41, %v2854_v50  ;;  %v3350_v63 = vsel %vm7605_vm4, %v3348_v54, %v3349_v49  ;;  %v6244_v8 = vrot.slane %v6202_v0, 9  ;;  %v3360_v10 = vrot.slane %v6203_v3, 5  ;;  %v7368_v43 = vld [vmem:[%s9350_s1 + $0x228] sm:$0xff]   ;;  %v6214_v54 = vld [vmem:[%s7534_s7 + $0x60] sm:$0xe]  ;;  %v7375_v3 = vld [vmem:[%s9350_s1 + $0x1d8] sm:$0xff]  }
  0xdf   : > { %7037 = vmatprep.mubr.bf16.mxu1 %v6273_v52  ;;  %v6274_v57 = vcombine.low %v3347_v53, %v3350_v63  ;;  %v3363_v12 = vrot.slane %v6204_v6, 5  ;;  %v3357_v7 = vsel %vm7605_vm4, %v3355_v5, %v3356_v61  ;;  %v6245_v24 = vrot.slane %v6205_v21, 9  ;;  %v6215_v55 = vld [vmem:[%s7534_s7 + $0x64] sm:$0xf]  ;;  %v6216_v58 = vld [vmem:[%s7534_s7 + $0x68] sm:$0x1] }
  0xe0   : > { %7018 = vmatmul.mubr.bf16.gmra.mxu0 %v6184_v45  ;;  %v6275_v14 = vcombine.low %v3354_v4, %v3357_v7  ;;  %v3361_v15 = vsel %vm7605_vm4, %v6244_v8, %v3360_v10  ;;  %v3362_v16 = vrot.slane %v3360_v10, 4  ;;  %v3367_v25 = vrot.slane %v6206_v22, 5  ;;  %v7372_v0 = vld [vmem:[%s9350_s1 + $0x220] sm:$0xff]   ;;  %v7379_v8 = vld [vmem:[%s9350_s1 + $0x1d0] sm:$0xff]   ;;  %v7376_v7 = vld [vmem:[%s9350_s1 + $0x218] sm:$0xff]  }
  0xe1   : > { %7085 = vmatprep.mubr.bf16.mxu0 %v7357_v47  ;;  %v3370_v26 = vrot.slane %v6207_v23, 5  ;;  %v6246_v30 = vrot.slane %v6208_v27, 9  ;;  %v3374_v35 = vrot.slane %v6209_v28, 5  ;;  %v3377_v36 = vrot.slane %v6210_v29, 5  ;;  %v6212_v47 = vld [vmem:[%s7534_s7 + $0x58] sm:$0xf] }
  0xe2   : > { %7038 = vmatmul.mubr.bf16.vlgmr.msra.gmra.mxu1 %v6274_v57  ;;  %v3368_v11 = vsel %vm7605_vm4, %v6245_v24, %v3367_v25  ;;  %v3369_v17 = vrot.slane %v3367_v25, 4  ;;  %v6247_v49 = vrot.slane %v6211_v44, 9  ;;  %v3381_v52 = vrot.slane %v6212_v47, 5  ;;  %v7366_v21 = vld [vmem:[%s7534_s7 + $0x54] sm:$0xff]   ;;  %v7369_v25 = vld [vmem:[%s7534_s7 + $0x60] sm:$0xff]  }
  0xe3   : > { %7118 = vmatpush3.bf16.msra.mxu1 %v8093_v2  ;;  %7041 = vmatprep.mubr.bf16.mxu1 %v6275_v14  ;;  %v3364_v2 = vsel %vm7605_vm4, %v3362_v16, %v3363_v12  ;;  %v3376_v42 = vrot.slane %v3374_v35, 4  ;;  %v3375_v34 = vsel %vm7605_vm4, %v6246_v30, %v3374_v35  ;;  %v3384_v53 = vrot.slane %v6213_v48, 5  ;;  %v6217_v14 = vld [vmem:[%s7534_s7 + $0x6c] sm:$0xe]  ;;  %v6219_v22 = vld [vmem:[%s7534_s7 + $0x74] sm:$0x1] }
  0xe4   : > { %7119 = vmatprep.subr.bf16.mxu1 %v7363_v62  ;;  %v6276_v1 = vcombine.low %v3361_v15, %v3364_v2  ;;  %v3371_v37 = vsel %vm7605_vm4, %v3369_v17, %v3370_v26  ;;  %v3382_v61 = vsel %vm7605_vm4, %v6247_v49, %v3381_v52  ;;  %v3388_v63 = vrot.slane %v6215_v55, 5  ;;  %v6218_v15 = vld [vmem:[%s7534_s7 + $0x70] sm:$0xf]  ;;  %v6220_v26 = vld [vmem:[%s7534_s7 + $0x78] sm:$0xe]  ;;  %v7387_v49 = vld [vmem:[%s9350_s1 + $0x1c0] sm:$0xff]  }
  0xe5   : > { %v6277_v41 = vcombine.low %v3368_v11, %v3371_v37  ;;  %v3378_v45 = vsel %vm7605_vm4, %v3376_v42, %v3377_v36  ;;  %v6248_v4 = vrot.slane %v6214_v54, 9  ;;  %v3391_v12 = vrot.slane %v6216_v58, 5  ;;  %v6221_v28 = vld [vmem:[%s7534_s7 + $0x7c] sm:$0xf]  ;;  %v6222_v29 = vld [vmem:[%s7534_s7 + $0x80] sm:$0x1] }
  0xe6   : > { %v6278_v57 = vcombine.low %v3375_v34, %v3378_v45  ;;  %v3390_v10 = vrot.slane %v3388_v63, 4  ;;  %v6249_v23 = vrot.slane %v6217_v14, 9  ;;  %v3395_v24 = vrot.slane %v6218_v15, 5  ;;  %v7380_v30 = vld [vmem:[%s9350_s1 + $0x210] sm:$0xff]   ;;  %v7384_v55 = vld [vmem:[%s9350_s1 + $0x208] sm:$0xff]   ;;  %v7388_v15 = vld [vmem:[%s9350_s1 + $0x200] sm:$0xff]  }
  0xe7   : > { %7120 = vmatpush3.bf16.msra.mxu1 %v7363_v62  ;;  %v3383_v62 = vrot.slane %v3381_v52, 4  ;;  %v3398_v2 = vrot.slane %v6219_v22, 5  ;;  %v3402_v35 = vrot.slane %v6221_v28, 5  ;;  %v3405_v44 = vrot.slane %v6222_v29, 5  ;;  %v6224_v52 = vld [vmem:[%s7534_s7 + $0x88] sm:$0xf] }
  0xe8   : > { %7086 = vmatmul.mubr.bf16.vlgmr.msra.gmra.mxu0 %v7358_v9  ;;  %7121 = vmatprep.subr.bf16.mxu1 %v7367_v20  ;;  %v3392_v11 = vsel %vm7605_vm4, %v3390_v10, %v3391_v12  ;;  %v3397_v17 = vrot.slane %v3395_v24, 4  ;;  %v3409_v58 = vrot.slane %v6224_v52, 5  ;;  %v6231_v28 = vld [vmem:[%s7534_s7 + $0xa4] sm:$0x1] }
  0xe9   : > { %7166 = vmatpush3.bf16.msra.mxu0 %v8100_v19  ;;  %7089 = vmatprep.mubr.bf16.mxu0 %v7361_v13  ;;  %v7365_v19 = vld [vmem:[%s7534_s7 + $0x48] sm:$0xff]   ;;  %v3385_v9 = vsel %vm7605_vm4, %v3383_v62, %v3384_v53  ;;  %v3404_v45 = vrot.slane %v3402_v35, 4 }
  0xea   : > { %7167 = vmatprep.subr.bf16.mxu0 %v7364_v18  ;;  %7042 = vmatmul.mubr.bf16.gmra.mxu1 %v6276_v1  ;;  %v6279_v13 = vcombine.low %v3382_v61, %v3385_v9  ;;  %v3389_v1 = vsel %vm7605_vm4, %v6248_v4, %v3388_v63  ;;  %v6225_v53 = vld [vmem:[%s7534_s7 + $0x8c] sm:$0x1]  ;;  %v3411_v9 = vrot.slane %v3409_v58, 4 }
  0xeb   : > { %7045 = vmatprep.mubr.bf16.mxu1 %v6277_v41  ;;  %7122 = vmatpush3.bf16.msra.mxu1 %v7367_v20  ;;  %v3399_v41 = vsel %vm7605_vm4, %v3397_v17, %v3398_v2  ;;  %v6280_v42 = vcombine.low %v3389_v1, %v3392_v11  ;;  %v3412_v61 = vrot.slane %v6225_v53, 5  ;;  %v7370_v4 = vld [vmem:[%s7534_s7 + $0x6c] sm:$0xff]   ;;  %v3406_v14 = vsel %vm7605_vm4, %v3404_v45, %v3405_v44  ;;  %v6230_v1 = vld [vmem:[%s7534_s7 + $0xa0] sm:$0xf] }
  0xec   : > { %7123 = vmatprep.subr.bf16.mxu1 %v7371_v31  ;;  %v3423_v29 = vrot.slane %v6230_v1, 5  ;;  %v6233_v44 = vld [vmem:[%s7534_s7 + $0xac] sm:$0xf] }
  0xed   : > { %7168 = vmatpush3.bf16.msra.mxu0 %v7364_v18  ;;  %v3413_v22 = vsel %vm7605_vm4, %v3411_v9, %v3412_v61  ;;  %v3430_v53 = vrot.slane %v6233_v44, 5  ;;  %v7377_v9 = vld [vmem:[%s7534_s7 + $0x90] sm:$0xff]  }
  0xee   : > { %7169 = vmatprep.subr.bf16.mxu0 %v7368_v43 }
  0xef   : > { %7124 = vmatpush3.bf16.msra.mxu1 %v7371_v31  ;;  %v3396_v31 = vsel %vm7605_vm4, %v6249_v23, %v3395_v24 }
  0xf0   : > { %7090 = vmatmul.mubr.bf16.gmra.mxu0 %v7362_v40  ;;  %7125 = vmatprep.subr.bf16.mxu1 %v7375_v3  ;;  %v7383_v40 = vld [vmem:[%s9350_s1 + $0x1c8] sm:$0xff]   ;;  %v6281_v34 = vcombine.low %v3396_v31, %v3399_v41  ;;  %v3426_v41 = vrot.slane %v6231_v28, 5  ;;  %v6238_v28 = vld [vmem:[%s7534_s7 + $0xc0] sm:$0xe] }
  0xf1   : > { %7093 = vmatprep.mubr.bf16.mxu0 %v7365_v19  ;;  %7170 = vmatpush3.bf16.msra.mxu0 %v7368_v43  ;;  %v6250_v43 = vrot.slane %v6220_v26, 9  ;;  %v6223_v19 = vld [vmem:[%s7534_s7 + $0x84] sm:$0xe]  ;;  %v6229_v26 = vld [vmem:[%s7534_s7 + $0x9c] sm:$0xe] }
  0xf2   : > { %7171 = vmatprep.subr.bf16.mxu0 %v7372_v0  ;;  %7046 = vmatmul.mubr.bf16.gmra.mxu1 %v6278_v57  ;;  %v6251_v54 = vrot.slane %v6223_v19, 9  ;;  %v6228_v57 = vld [vmem:[%s7534_s7 + $0x98] sm:$0x1]  ;;  %v6234_v19 = vld [vmem:[%s7534_s7 + $0xb0] sm:$0x1] }
  0xf3   : > { %7049 = vmatprep.mubr.bf16.mxu1 %v6279_v13  ;;  %7126 = vmatpush3.bf16.msra.mxu1 %v7375_v3  ;;  %v6227_v3 = vld [vmem:[%s7534_s7 + $0x94] sm:$0xf]  ;;  %v3403_v13 = vsel %vm7605_vm4, %v6250_v43, %v3402_v35  ;;  %v3419_v24 = vrot.slane %v6228_v57, 5  ;;  %v3425_v43 = vrot.slane %v3423_v29, 4 }
  0xf4   : > { %v8211_v32 = vpop.f32.mrf.mxu0  ;;  %v8213_v33 = vpop.f32.mrf.mxu1  ;;  %7127 = vmatprep.subr.bf16.mxu1 %v7379_v8  ;;  %v3416_v10 = vrot.slane %v6227_v3, 5  ;;  %v6282_v11 = vcombine.low %v3403_v13, %v3406_v14  ;;  %v6237_v13 = vld [vmem:[%s7534_s7 + $0xbc] sm:$0x1] }
  0xf5   : > { %7172 = vmatpush3.bf16.msra.mxu0 %v7372_v0  ;;  %v6226_v0 = vld [vmem:[%s7534_s7 + $0x90] sm:$0xe]  ;;  %v3427_v57 = vsel %vm7605_vm4, %v3425_v43, %v3426_v41  ;;  %v6256_v43 = vrot.slane %v6238_v28, 9 }
  0xf6   : > { %v8218_v38 = vpop.f32.mrf.mxu0  ;;  %v8220_v39 = vpop.f32.mrf.mxu1  ;;  %7173 = vmatprep.subr.bf16.mxu0 %v7376_v7  ;;  %v6252_v23 = vrot.slane %v6226_v0, 9  ;;  %v3418_v17 = vrot.slane %v3416_v10, 4 }
  0xf7   : > { %7128 = vmatpush3.bf16.msra.mxu1 %v7379_v8  ;;  %v7373_v8 = vld [vmem:[%s7534_s7 + $0x78] sm:$0xff]  }
  0xf8   : > { %v8230_v50 = vpop.f32.mrf.mxu0  ;;  %v8232_v51 = vpop.f32.mrf.mxu1  ;;  %7094 = vmatmul.mubr.bf16.gmra.mxu0 %v7366_v21  ;;  %7129 = vmatprep.subr.bf16.mxu1 %v7383_v40  ;;  %v3410_v21 = vsel %vm7605_vm4, %v6251_v54, %v3409_v58  ;;  %v3433_v54 = vrot.slane %v6234_v19, 5  ;;  %v3420_v0 = vsel %vm7605_vm4, %v3418_v17, %v3419_v24  ;;  %v3440_v24 = vrot.slane %v6237_v13, 5 }
  0xf9   : > { %7097 = vmatprep.mubr.bf16.mxu0 %v7369_v25  ;;  %7174 = vmatpush3.bf16.msra.mxu0 %v7376_v7 }
  0xfa   : > { %v8241_v59 = vpop.f32.mrf.mxu0  ;;  %v8243_v60 = vpop.f32.mrf.mxu1  ;;  %7175 = vmatprep.subr.bf16.mxu0 %v7380_v30  ;;  %7050 = vmatmul.mubr.bf16.gmra.mxu1 %v6280_v42  ;;  %v6232_v42 = vld [vmem:[%s7534_s7 + $0xa8] sm:$0xe] }
  0xfb   : > { %7053 = vmatprep.mubr.bf16.mxu1 %v6281_v34  ;;  %7130 = vmatpush3.bf16.msra.mxu1 %v7383_v40  ;;  %v6253_v40 = vrot.slane %v6229_v26, 9  ;;  %v6254_v34 = vrot.slane %v6232_v42, 9 }
  0xfc   : > { %v8253_v5 = vpop.f32.mrf.mxu0  ;;  %v8255_v6 = vpop.f32.mrf.mxu1  ;;  %7131 = vmatprep.subr.bf16.mxu1 %v7387_v49 }
  0xfd   : > { %7176 = vmatpush3.bf16.msra.mxu0 %v7380_v30  ;;  %v6283_v30 = vcombine.low %v3410_v21, %v3413_v22  ;;  %v3424_v3 = vsel %vm7605_vm4, %v6253_v40, %v3423_v29  ;;  %v6239_v29 = vld [vmem:[%s7534_s7 + $0xc4] sm:$0xf] }
  0xfe   : > { %v8267_v16 = vpop.f32.mrf.mxu0  ;;  %v8269_v18 = vpop.f32.mrf.mxu1  ;;  %7177 = vmatprep.subr.bf16.mxu0 %v7384_v55  ;;  %v6285_v1 = vcombine.low %v3424_v3, %v3427_v57  ;;  %v3444_v44 = vrot.slane %v6239_v29, 5 }
  0xff   : > { %7132 = vmatpush3.bf16.msra.mxu1 %v7387_v49  ;;  %v3417_v49 = vsel %vm7605_vm4, %v6252_v23, %v3416_v10  ;;  %v6236_v10 = vld [vmem:[%s7534_s7 + $0xb8] sm:$0xf] }
 0x100   : > { %v8275_v27 = vpop.f32.mrf.mxu0  ;;  %v8277_v20 = vpop.f32.mrf.mxu1  ;;  %7098 = vmatmul.mubr.bf16.gmra.mxu0 %v7370_v4  ;;  %v3432_v4 = vrot.slane %v3430_v53, 4  ;;  %v3437_v23 = vrot.slane %v6236_v10, 5  ;;  %v6284_v26 = vcombine.low %v3417_v49, %v3420_v0  ;;  %v7378_v49 = vld [vmem:[%s7534_s7 + $0x9c] sm:$0xff]   ;;  %v8398_v0 = vsel %vm7605_vm4, %v6256_v43, %v3444_v44 }
 0x101   : > { %9359 = vst [vmem:[#allocation6_spill] sm:$0xff] %v8277_v20  ;;  %7101 = vmatprep.mubr.bf16.mxu0 %v7373_v8  ;;  %7178 = vmatpush3.bf16.msra.mxu0 %v7384_v55  ;;  %v7374_v55 = vld [vmem:[%s7534_s7 + $0x84] sm:$0xff]   ;;  %v6235_v8 = vld [vmem:[%s7534_s7 + $0xb4] sm:$0xe]  ;;  %v3446_v3 = vrot.slane %v3444_v44, 4 }
 0x102   : > { %v8290_v36 = vpop.f32.mrf.mxu0  ;;  %v8292_v37 = vpop.f32.mrf.mxu1  ;;  %7179 = vmatprep.subr.bf16.mxu0 %v7388_v15  ;;  %7054 = vmatmul.mubr.bf16.gmra.mxu1 %v6282_v11  ;;  %v6255_v14 = vrot.slane %v6235_v8, 9  ;;  %v8377_v11 = vsel %vm7605_vm4, %v6254_v34, %v3430_v53  ;;  %v8381_v17 = vsel %vm7605_vm4, %v3432_v4, %v3433_v54  ;;  %v3439_v42 = vrot.slane %v3437_v23, 4  ;;  %v6369_v8 = vld [vmem:[%s7534_s7 + $0x18] sm:$0xf] }
 0x103   : > { %9360 = vst [vmem:[#allocation7_spill] sm:$0xff] %v8292_v37  ;;  %7057 = vmatprep.mubr.bf16.mxu1 %v6283_v30  ;;  %v6379_v37 = vld [vmem:[%s7534_s7 + $0x40] sm:$0xf] }
 0x104   : > { %v8300_v47 = vpop.f32.mrf.mxu0  ;;  %v8302_v48 = vpop.f32.mrf.mxu1  ;;  %v8388_v41 = vsel %vm7605_vm4, %v6255_v14, %v3437_v23  ;;  %v7381_v23 = vld [vmem:[%s7534_s7 + $0xa8] sm:$0xff]  }
 0x105   : > { %9361 = vst [vmem:[#allocation8_spill] sm:$0xff] %v8302_v48  ;;  %7180 = vmatpush3.bf16.msra.mxu0 %v7388_v15  ;;  %v6240_v15 = vld [vmem:[%s7534_s7 + $0xc8] sm:$0x1] }
 0x106   : > { %v8312_v62 = vpop.f32.mrf.mxu0  ;;  %v8314_v63 = vpop.f32.mrf.mxu1  ;;  %v3447_v19 = vrot.slane %v6240_v15, 5 }
 0x107   : > { %9362 = vst [vmem:[#allocation9_spill] sm:$0xff] %v8314_v63 }
 0x108   : > { %v8321_v12 = vpop.f32.mrf.mxu0  ;;  %v8323_v7 = vpop.f32.mrf.mxu1  ;;  %7102 = vmatmul.mubr.bf16.gmra.mxu0 %v7374_v55  ;;  %v8394_v55 = vsel %vm7605_vm4, %v3439_v42, %v3440_v24  ;;  %v6371_v24 = vld [vmem:[%s7534_s7 + $0x20] sm:$0x1] }
 0x109   : > { %9363 = vst [vmem:[#allocation10_spill] sm:$0xff] %v8323_v7  ;;  %7105 = vmatprep.mubr.bf16.mxu0 %v7377_v9  ;;  %v6287_v4 = vcombine.low %v8388_v41, %v8394_v55  ;;  %v6370_v9 = vld [vmem:[%s7534_s7 + $0x1c] sm:$0xf]  ;;  %v4354_v15 = vshll.u32 %v6371_v24, 16  ;;  %v6372_v24 = vld [vmem:[%s7534_s7 + $0x24] sm:$0xf] }
 0x10a   : > { %v8336_v25 = vpop.f32.mrf.mxu0  ;;  %v8338_v2 = vpop.f32.mrf.mxu1  ;;  %7058 = vmatmul.mubr.bf16.gmra.mxu1 %v6284_v26  ;;  %v4335_v26 = vshrl.u32 %v6369_v8, 16  ;;  %v4348_v29 = vshrl.u32 %v6370_v9, 16 }
 0x10b   : > { %9364 = vst [vmem:[#allocation11_spill] sm:$0xff] %v8338_v2  ;;  %7061 = vmatprep.mubr.bf16.mxu1 %v6285_v1  ;;  %v6375_v2 = vld [vmem:[%s7534_s7 + $0x30] sm:$0xf] }
 0x10c   : > { %v8343_v31 = vpop.f32.mrf.mxu0  ;;  %v8345_v35 = vpop.f32.mrf.mxu1  ;;  %v4337_v43 = vrot.slane %v4335_v26, 4  ;;  %v4350_v55 = vrot.slane %v4348_v29, 4  ;;  %v4359_v26 = vshrl.u32 %v6372_v24, 16 }
 0x10d   : > { %9365 = vst [vmem:[#allocation12_spill] sm:$0xff] %v8345_v35 }
 0x10e   : > { %v8350_v45 = vpop.f32.mrf.mxu0  ;;  %v8352_v52 = vpop.f32.mrf.mxu1 }
 0x10f   : > { %9366 = vst [vmem:[#allocation13_spill] sm:$0xff] %v8352_v52 }
 0x110   : > { %v8356_v58 = vpop.f32.mrf.mxu0  ;;  %v8358_v61 = vpop.f32.mrf.mxu1  ;;  %7106 = vmatmul.mubr.bf16.gmra.mxu0 %v7378_v49 }
 0x111   : > { %9367 = vst [vmem:[#allocation14_spill] sm:$0xff] %v8358_v61  ;;  %7109 = vmatprep.mubr.bf16.mxu0 %v7381_v23 }
 0x112   : > { %v8371_v21 = vpop.f32.mrf.mxu0  ;;  %v8373_v22 = vpop.f32.mrf.mxu1 }
 0x113   : > { %9368 = vst [vmem:[#allocation15_spill] sm:$0xff] %v8373_v22  ;;  %v4361_v22 = vrot.slane %v4359_v26, 4 }
 0x114   : > { %v6847_v30 = vpop.f32.mrf.mxu1  ;;  %v6895_v40 = vpop.f32.mrf.mxu0 }
 0x115   : > { %v1313_v34 = vadd.f32 %v6847_v30, %v8211_v32  ;;  %v6286_v32 = vcombine.low %v8377_v11, %v8381_v17  ;;  %v4338_v11 = vshll.u32 %v6369_v8, 16  ;;  %v4344_v17 = vshll.u32 %v6370_v9, 16  ;;  %v6457_v30 = vld [vmem:[%s7534_s7 + $0x18] sm:$0xe] }
 0x116   : > { %v1152_v53 = vpop.f32.mrf.mxu1  ;;  %v1749_v54 = vpop.f32.mrf.mxu0 }
 0x117   : > { %v1311_v57 = vadd.f32 %v1152_v53, %v8218_v38  ;;  %v8407_v10 = vadd.f32 %v6895_v40, %v1313_v34  ;;  %v8414_v38 = vsel %vm7605_vm4, %v3446_v3, %v3447_v19  ;;  %v6458_v40 = vld [vmem:[%s7534_s7 + $0x1c] sm:$0xf]  ;;  %v4340_v44 = vrot.slane %v4338_v11, 5  ;;  %v6459_v34 = vld [vmem:[%s7534_s7 + $0x20] sm:$0x1]  ;;  %7062 = vmatmul.mubr.bf16.gmra.mxu1 %v6286_v32 }
 0x118   : > { %v6848_v13 = vpop.f32.mrf.mxu1  ;;  %v8409_v14 = vpop.f32.mrf.mxu0  ;;  %v4346_v19 = vrot.slane %v4344_v17, 5  ;;  %v6505_v53 = vrot.slane %v6457_v30, 9  ;;  %v4356_v3 = vrot.slane %v4354_v15, 5  ;;  %v5202_v8 = vrot.slane %v6458_v40, 5  ;;  %7065 = vmatprep.mubr.bf16.mxu1 %v6287_v4 }
 0x119   : > { %9369 = vst [vmem:[#allocation16_spill] sm:$0xff] %v8407_v10  ;;  %v8421_v41 = vadd.f32 %v1749_v54, %v1311_v57  ;;  %v5205_v9 = vrot.slane %v6459_v34, 5  ;;  %v4341_v57 = vor.u32 %v4340_v44, %v4337_v43  ;;  %v6374_v10 = vld [vmem:[%s7534_s7 + $0x2c] sm:$0x1]  ;;  %v4362_v11 = vshll.u32 %v6372_v24, 16 }
 0x11a   : > { %v8423_v1 = vpop.f32.mrf.mxu1  ;;  %v8425_v42 = vpop.f32.mrf.mxu0  ;;  %v1314_v17 = vadd.f32 %v6848_v13, %v8230_v50  ;;  %v4351_v29 = vor.u32 %v4350_v55, %v4346_v19  ;;  %v8438_v15 = vsel %vm7605_vm4, %v6505_v53, %v5202_v8  ;;  %v5204_v30 = vrot.slane %v5202_v8, 4  ;;  %v6460_v34 = vld [vmem:[%s7534_s7 + $0x24] sm:$0xe]  ;;  %v6461_v50 = vld [vmem:[%s7534_s7 + $0x28] sm:$0xf] }
 0x11b   : > { %9370 = vst [vmem:[#allocation17_spill] sm:$0xff] %v8421_v41  ;;  %v6373_v41 = vld [vmem:[%s7534_s7 + $0x28] sm:$0xf]  ;;  %v4342_v44 = vrot.slane %v4341_v57, 4  ;;  %v4364_v24 = vrot.slane %v4362_v11, 5  ;;  %v4378_v55 = vshll.u32 %v6374_v10, 16 }
 0x11c   : > { %v8429_v28 = vpop.f32.mrf.mxu1  ;;  %v8431_v54 = vpop.f32.mrf.mxu0  ;;  %v4368_v40 = vshll.u32 %v6373_v41, 16  ;;  %v4372_v61 = vshrl.u32 %v6373_v41, 16  ;;  %v4352_v13 = vrot.slane %v4351_v29, 4  ;;  %v8448_v23 = vsel %vm7605_vm4, %v5204_v30, %v5205_v9  ;;  %v6462_v8 = vld [vmem:[%s7534_s7 + $0x2c] sm:$0x1]  ;;  %v7382_v57 = vld [vmem:[%s7534_s7 + $0xb4] sm:$0xff]  }
 0x11d   : > { %v4347_v41 = vsel %vm7624_vm5, %v4342_v44, %v4346_v19  ;;  %v4365_v26 = vor.u32 %v4364_v24, %v4361_v22  ;;  %v7385_v11 = vld [vmem:[%s7534_s7 + $0xc0] sm:$0xff]   ;;  %v4380_v29 = vrot.slane %v4378_v55, 5  ;;  %v6506_v30 = vrot.slane %v6460_v34, 9  ;;  %v6376_v22 = vld [vmem:[%s7534_s7 + $0x34] sm:$0xf]  ;;  %7110 = vmatmul.mubr.bf16.gmra.mxu0 %v7382_v57 }
 0x11e   : > { %v8441_v49 = vpop.f32.mrf.mxu1  ;;  %v8443_v43 = vpop.f32.mrf.mxu0  ;;  %v4370_v53 = vrot.slane %v4368_v40, 5  ;;  %v4374_v9 = vrot.slane %v4372_v61, 4  ;;  %v4357_v10 = vsel %vm7624_vm5, %v4352_v13, %v4356_v3  ;;  %v5209_v40 = vrot.slane %v6461_v50, 5  ;;  %v6377_v50 = vld [vmem:[%s7534_s7 + $0x38] sm:$0x1]  ;;  %7113 = vmatprep.mubr.bf16.mxu0 %v7385_v11 }
 0x11f   : > { %v6433_v19 = vcombine.low %v4347_v41, %v4357_v10  ;;  %v4366_v44 = vrot.slane %v4365_v26, 4  ;;  %v5212_v32 = vrot.slane %v6462_v8, 5  ;;  %v8474_v24 = vadd.f32 %v8409_v14, %v1314_v17  ;;  %v6463_v14 = vld [vmem:[%s7534_s7 + $0x30] sm:$0xe]  ;;  %v6465_v57 = vld [vmem:[%s7534_s7 + $0x38] sm:$0x1] }
 0x120   : > { %v8451_v52 = vpop.f32.mrf.mxu1  ;;  %v8453_v35 = vpop.f32.mrf.mxu0  ;;  %v4375_v63 = vor.u32 %v4374_v9, %v4370_v53  ;;  %v8471_v61 = vsel %vm7605_vm4, %v6506_v30, %v5209_v40  ;;  %v5211_v3 = vrot.slane %v5209_v40, 4  ;;  %v1312_v34 = vadd.f32 %v8423_v1, %v8241_v59  ;;  %v6464_v30 = vld [vmem:[%s7534_s7 + $0x34] sm:$0xf] }
 0x121   : > { %9371 = vst [vmem:[#allocation18_spill] sm:$0xff] %v8474_v24  ;;  %v4371_v8 = vsel %vm7624_vm5, %v4366_v44, %v4370_v53  ;;  %v4383_v26 = vshrl.u32 %v6375_v2, 16  ;;  %v4386_v9 = vshll.u32 %v6375_v2, 16  ;;  %v4392_v1 = vshll.u32 %v6376_v22, 16 }
 0x122   : > { %v8464_v7 = vpop.f32.mrf.mxu1  ;;  %v8466_v4 = vpop.f32.mrf.mxu0  ;;  %v4376_v41 = vrot.slane %v4375_v63, 4  ;;  %v8488_v17 = vsel %vm7605_vm4, %v5211_v3, %v5212_v32  ;;  %v8491_v59 = vadd.f32 %v8425_v42, %v1312_v34  ;;  %v4396_v10 = vshrl.u32 %v6376_v22, 16  ;;  %v6378_v42 = vld [vmem:[%s7534_s7 + $0x3c] sm:$0xf] }
 0x123   : > { %v4385_v32 = vrot.slane %v4383_v26, 4  ;;  %v4388_v11 = vrot.slane %v4386_v9, 5  ;;  %v9373_v44 = vcombine.low %v8398_v0, %v8414_v38  ;;  %v4394_v3 = vrot.slane %v4392_v1, 5 }
 0x124   : > { %v8479_v13 = vpop.f32.mrf.mxu1  ;;  %v8481_v55 = vpop.f32.mrf.mxu0  ;;  %9372 = vst [vmem:[#allocation19_spill] sm:$0xff] %v8491_v59  ;;  %v4381_v2 = vsel %vm7624_vm5, %v4376_v41, %v4380_v29  ;;  %v4398_v34 = vrot.slane %v4396_v10, 4  ;;  %v4402_v59 = vshll.u32 %v6377_v50, 16  ;;  %v7386_v29 = vld [vmem:[%s7534_s7 + $0xcc] sm:$0xff]   ;;  %v6507_v26 = vrot.slane %v6463_v14, 9 }
 0x125   : > { %7066 = vmatmul.mubr.bf16.gmra.mxu1 %v9373_v44  ;;  %v6434_v22 = vcombine.low %v4371_v8, %v4381_v2  ;;  %v4389_v41 = vor.u32 %v4388_v11, %v4385_v32  ;;  %v5216_v53 = vrot.slane %v6464_v30, 5  ;;  %v5219_v9 = vrot.slane %v6465_v57, 5  ;;  %v6466_v32 = vld [vmem:[%s7534_s7 + $0x3c] sm:$0xe]  ;;  %7114 = vmatmul.mubr.bf16.gmra.mxu0 %v7386_v29  ;;  %v6467_v44 = vld [vmem:[%s7534_s7 + $0x40] sm:$0xf] }
 0x126   : > { %v8495_v40 = vpop.f32.mrf.mxu1  ;;  %v8497_v63 = vpop.f32.mrf.mxu0  ;;  %7133 = vmatprep.mubr.bf16.mxu1 %v6433_v19  ;;  %v4399_v20 = vor.u32 %v4398_v34, %v4394_v3  ;;  %v4404_v0 = vrot.slane %v4402_v59, 5  ;;  %v1317_v38 = vadd.f32 %v8429_v28, %v8253_v5  ;;  %v4407_v8 = vshrl.u32 %v6378_v42, 16  ;;  %v6380_v19 = vld [vmem:[%s7534_s7 + $0x44] sm:$0x1] }
 0x127   : > { %v4390_v50 = vrot.slane %v4389_v41, 4  ;;  %v8517_v1 = vsel %vm7605_vm4, %v6507_v26, %v5216_v53  ;;  %v5218_v10 = vrot.slane %v5216_v53, 4  ;;  %v4410_v14 = vshll.u32 %v6378_v42, 16 }
 0x128   : > { %v8507_v24 = vpop.f32.mrf.mxu1  ;;  %v8509_v48 = vpop.f32.mrf.mxu0  ;;  %v4400_v30 = vrot.slane %v4399_v20, 4  ;;  %v8521_v57 = vadd.f32 %v8431_v54, %v1317_v38  ;;  %v4409_v2 = vrot.slane %v4407_v8, 4  ;;  %v4416_v59 = vshll.u32 %v6379_v37, 16  ;;  %v6468_v54 = vld [vmem:[%s7534_s7 + $0x44] sm:$0x1] }
 0x129   : > { %v4395_v28 = vsel %vm7624_vm5, %v4390_v50, %v4394_v3  ;;  %v5220_v53 = vsel %vm7605_vm4, %v5218_v10, %v5219_v9  ;;  %v4412_v42 = vrot.slane %v4410_v14, 5  ;;  %v4420_v20 = vshrl.u32 %v6379_v37, 16  ;;  %v6381_v10 = vld [vmem:[%s7534_s7 + $0x48] sm:$0xf] }
 0x12a   : > { %9374 = vst [vmem:[#allocation20_spill] sm:$0xff] %v8521_v57  ;;  %v8524_v11 = vpop.f32.mrf.mxu1  ;;  %v8526_v5 = vpop.f32.mrf.mxu0  ;;  %v9375_v34 = vcombine.low %v8438_v15, %v8448_v23  ;;  %v4405_v41 = vsel %vm7624_vm5, %v4400_v30, %v4404_v0  ;;  %v6539_v29 = vcombine.low %v8517_v1, %v5220_v53  ;;  %v4418_v26 = vrot.slane %v4416_v59, 5 }
 0x12b   : > { %v4426_v38 = vshll.u32 %v6380_v19, 16  ;;  %v6435_v8 = vcombine.low %v4395_v28, %v4405_v41  ;;  %v4413_v3 = vor.u32 %v4412_v42, %v4409_v2  ;;  %v4422_v50 = vrot.slane %v4420_v20, 4  ;;  %v6382_v2 = vld [vmem:[%s7534_s7 + $0x4c] sm:$0xf]  ;;  %v6469_v20 = vld [vmem:[%s7534_s7 + $0x48] sm:$0xe] }
 0x12c   : > { %7181 = vmatprep.mubr.bf16.mxu0 %v9375_v34  ;;  %v6508_v9 = vrot.slane %v6466_v32, 9  ;;  %v5223_v14 = vrot.slane %v6467_v44, 5  ;;  %v5226_v57 = vrot.slane %v6468_v54, 5  ;;  %v1315_v15 = vadd.f32 %v8441_v49, %v8267_v16  ;;  %v8543_v23 = vpop.f32.mrf.mxu1  ;;  %v8545_v0 = vpop.f32.mrf.mxu0  ;;  %v6383_v32 = vld [vmem:[%s7534_s7 + $0x50] sm:$0x1] }
 0x12d   : > { %7134 = vmatmul.mubr.bf16.vlgmr.msra.gmra.mxu1 %v6434_v22  ;;  %v4428_v37 = vrot.slane %v4426_v38, 5  ;;  %v4414_v1 = vrot.slane %v4413_v3, 4  ;;  %v4423_v19 = vor.u32 %v4422_v50, %v4418_v26  ;;  %v1318_v30 = vadd.f32 %v8451_v52, %v8275_v27  ;;  %v6471_v38 = vld [vmem:[%s7534_s7 + $0x50] sm:$0x1] }
 0x12e   : > { %7137 = vmatprep.mubr.bf16.mxu1 %v6435_v8  ;;  %v1316_v22 = vadd.f32 %v8464_v7, %v8290_v36  ;;  %v8554_v59 = vsel %vm7605_vm4, %v6508_v9, %v5223_v14  ;;  %v5225_v16 = vrot.slane %v5223_v14, 4  ;;  %v8557_v49 = vadd.f32 %v8443_v43, %v1315_v15  ;;  %v8560_v53 = vpop.f32.mrf.mxu1  ;;  %v8562_v42 = vpop.f32.mrf.mxu0  ;;  %v6470_v43 = vld [vmem:[%s7534_s7 + $0x4c] sm:$0xf]  ;;  %v6384_v9 = vld [vmem:[%s7534_s7 + $0x54] sm:$0xf] }
 0x12f   : > { %v4431_v28 = vshrl.u32 %v6381_v10, 16  ;;  %v4419_v27 = vsel %vm7624_vm5, %v4414_v1, %v4418_v26  ;;  %v4424_v36 = vrot.slane %v4423_v19, 4  ;;  %v8567_v7 = vadd.f32 %v8453_v35, %v1318_v30  ;;  %v6385_v19 = vld [vmem:[%s7534_s7 + $0x58] sm:$0xf] }
 0x130   : > { %v8570_v52 = vadd.f32 %v8466_v4, %v1316_v22  ;;  %v5227_v44 = vsel %vm7605_vm4, %v5225_v16, %v5226_v57  ;;  %v4434_v34 = vshll.u32 %v6381_v10, 16  ;;  %v4440_v41 = vshll.u32 %v6382_v2, 16  ;;  %v8577_v8 = vpop.f32.mrf.mxu1  ;;  %v8579_v26 = vpop.f32.mrf.mxu0 }
 0x131   : > { %v4433_v54 = vrot.slane %v4431_v28, 4  ;;  %v9376_v35 = vcombine.low %v8471_v61, %v8488_v17  ;;  %v4429_v4 = vsel %vm7624_vm5, %v4424_v36, %v4428_v37  ;;  %v6540_v3 = vcombine.low %v8554_v59, %v5227_v44  ;;  %v6472_v44 = vld [vmem:[%s7534_s7 + $0x54] sm:$0xe] }
 0x132   : > { %v4444_v50 = vshrl.u32 %v6382_v2, 16  ;;  %v4450_v57 = vshll.u32 %v6383_v32, 16  ;;  %v6436_v10 = vcombine.low %v4419_v27, %v4429_v4  ;;  %v4436_v14 = vrot.slane %v4434_v34, 5  ;;  %v8593_v32 = vpop.f32.mrf.mxu0 }
 0x133   : > { %7182 = vmatmul.mubr.bf16.vlgmr.msra.gmra.mxu0 %v9376_v35  ;;  %v4442_v15 = vrot.slane %v4440_v41, 5  ;;  %v6509_v1 = vrot.slane %v6469_v20, 9  ;;  %v5230_v61 = vrot.slane %v6470_v43, 5  ;;  %v5233_v17 = vrot.slane %v6471_v38, 5  ;;  %v6386_v20 = vld [vmem:[%s7534_s7 + $0x5c] sm:$0x1] }
 0x134   : > { %7185 = vmatprep.mubr.bf16.mxu0 %v6539_v29  ;;  %v4446_v30 = vrot.slane %v4444_v50, 4  ;;  %v4452_v22 = vrot.slane %v4450_v57, 5  ;;  %v4437_v16 = vor.u32 %v4436_v14, %v4433_v54  ;;  %v1321_v37 = vadd.f32 %v8479_v13, %v8300_v47  ;;  %v8591_v29 = vpop.f32.mrf.mxu1  ;;  %v6473_v41 = vld [vmem:[%s7534_s7 + $0x58] sm:$0xf]  ;;  %v6474_v57 = vld [vmem:[%s7534_s7 + $0x5c] sm:$0x1] }
 0x135   : > { %7138 = vmatmul.mubr.bf16.gmra.mxu1 %v6436_v10  ;;  %v4455_v2 = vshrl.u32 %v6384_v9, 16  ;;  %v4458_v59 = vshll.u32 %v6384_v9, 16  ;;  %v5231_v27 = vsel %vm7605_vm4, %v6509_v1, %v5230_v61  ;;  %v5232_v36 = vrot.slane %v5230_v61, 4 }
 0x136   : > { %v4447_v28 = vor.u32 %v4446_v30, %v4442_v15  ;;  %v4464_v43 = vshll.u32 %v6385_v19, 16  ;;  %v4438_v54 = vrot.slane %v4437_v16, 4  ;;  %v8600_v34 = vadd.f32 %v8481_v55, %v1321_v37  ;;  %v8610_v55 = vpop.f32.mrf.mxu0 }
 0x137   : > { %v4457_v47 = vrot.slane %v4455_v2, 4  ;;  %v4460_v13 = vrot.slane %v4458_v59, 5  ;;  %v5234_v35 = vsel %vm7605_vm4, %v5232_v36, %v5233_v17  ;;  %v4468_v50 = vshrl.u32 %v6385_v19, 16  ;;  %v6387_v2 = vld [vmem:[%s7534_s7 + $0x60] sm:$0xf] }
 0x138   : > { %v4448_v38 = vrot.slane %v4447_v28, 4  ;;  %v4466_v4 = vrot.slane %v4464_v43, 5  ;;  %v4443_v9 = vsel %vm7624_vm5, %v4438_v54, %v4442_v15  ;;  %v6541_v10 = vcombine.low %v5231_v27, %v5234_v35  ;;  %v8608_v30 = vpop.f32.mrf.mxu1  ;;  %v8617_v36 = vpop.f32.mrf.mxu0 }
 0x139   : > { %v4461_v14 = vor.u32 %v4460_v13, %v4457_v47  ;;  %v4474_v1 = vshll.u32 %v6386_v20, 16  ;;  %v4470_v16 = vrot.slane %v4468_v50, 4  ;;  %v6510_v37 = vrot.slane %v6472_v44, 9  ;;  %v6388_v13 = vld [vmem:[%s7534_s7 + $0x64] sm:$0xf] }
 0x13a   : > { %v4453_v61 = vsel %vm7624_vm5, %v4448_v38, %v4452_v22  ;;  %v5237_v17 = vrot.slane %v6473_v41, 5  ;;  %v5240_v28 = vrot.slane %v6474_v57, 5  ;;  %v8615_v27 = vpop.f32.mrf.mxu1  ;;  %v1319_v43 = vadd.f32 %v8495_v40, %v8312_v62  ;;  %v6389_v41 = vld [vmem:[%s7534_s7 + $0x68] sm:$0x1]  ;;  %v8633_v50 = vpop.f32.mrf.mxu0 }
 0x13b   : > { %7186 = vmatmul.mubr.bf16.gmra.mxu0 %v6540_v3  ;;  %v6437_v19 = vcombine.low %v4443_v9, %v4453_v61  ;;  %v4462_v15 = vrot.slane %v4461_v14, 4  ;;  %v4476_v59 = vrot.slane %v4474_v1, 5  ;;  %v4471_v20 = vor.u32 %v4470_v16, %v4466_v4  ;;  %v6477_v14 = vld [vmem:[%s7534_s7 + $0x68] sm:$0x1] }
 0x13c   : > { %7189 = vmatprep.mubr.bf16.mxu0 %v6541_v10  ;;  %v5238_v3 = vsel %vm7605_vm4, %v6510_v37, %v5237_v17  ;;  %v5239_v22 = vrot.slane %v5237_v17, 4  ;;  %v1322_v54 = vadd.f32 %v8507_v24, %v8321_v12  ;;  %v1320_v47 = vadd.f32 %v8524_v11, %v8336_v25  ;;  %v8631_v35 = vpop.f32.mrf.mxu1  ;;  %v6475_v12 = vld [vmem:[%s7534_s7 + $0x60] sm:$0xe]  ;;  %v6476_v24 = vld [vmem:[%s7534_s7 + $0x64] sm:$0xf] }
 0x13d   : > { %7141 = vmatprep.mubr.bf16.mxu1 %v6437_v19  ;;  %v4467_v44 = vsel %vm7624_vm5, %v4462_v15, %v4466_v4  ;;  %v4479_v38 = vshrl.u32 %v6387_v2, 16  ;;  %v4472_v57 = vrot.slane %v4471_v20, 4  ;;  %v8638_v40 = vadd.f32 %v8497_v63, %v1319_v43  ;;  %v6390_v15 = vld [vmem:[%s7534_s7 + $0x6c] sm:$0xf] }
 0x13e   : > { %v5241_v62 = vsel %vm7605_vm4, %v5239_v22, %v5240_v28  ;;  %v4482_v4 = vshll.u32 %v6387_v2, 16  ;;  %v8643_v11 = vadd.f32 %v8509_v48, %v1322_v54  ;;  %v8646_v9 = vadd.f32 %v8526_v5, %v1320_v47  ;;  %v8652_v48 = vpop.f32.mrf.mxu1  ;;  %v8654_v28 = vpop.f32.mrf.mxu0  ;;  %v6391_v22 = vld [vmem:[%s7534_s7 + $0x70] sm:$0xf] }
 0x13f   : > { %v6542_v25 = vcombine.low %v5238_v3, %v5241_v62  ;;  %v4481_v10 = vrot.slane %v4479_v38, 4  ;;  %v4477_v1 = vsel %vm7624_vm5, %v4472_v57, %v4476_v59  ;;  %v4488_v63 = vshll.u32 %v6388_v13, 16 }
 0x140   : > { %9377 = vst [vmem:[#allocation21_spill] sm:$0xff] %v8646_v9  ;;  %v4484_v61 = vrot.slane %v4482_v4, 5  ;;  %v4492_v16 = vshrl.u32 %v6388_v13, 16  ;;  %v6438_v37 = vcombine.low %v4467_v44, %v4477_v1  ;;  %v4498_v17 = vshll.u32 %v6389_v41, 16  ;;  %v6392_v13 = vld [vmem:[%s7534_s7 + $0x74] sm:$0x1] }
 0x141   : > { %v6511_v2 = vrot.slane %v6475_v12, 9  ;;  %v5244_v19 = vrot.slane %v6476_v24, 5  ;;  %v4490_v20 = vrot.slane %v4488_v63, 5  ;;  %v5247_v59 = vrot.slane %v6477_v14, 5  ;;  %v6478_v4 = vld [vmem:[%s7534_s7 + $0x6c] sm:$0xe] }
 0x142   : > { %v4485_v5 = vor.u32 %v4484_v61, %v4481_v10  ;;  %v4494_v3 = vrot.slane %v4492_v16, 4  ;;  %7142 = vmatmul.mubr.bf16.gmra.mxu1 %v6438_v37  ;;  %v4500_v43 = vrot.slane %v4498_v17, 5  ;;  %v1325_v47 = vadd.f32 %v8543_v23, %v8343_v31  ;;  %v6479_v14 = vld [vmem:[%s7534_s7 + $0x70] sm:$0xf]  ;;  %v6480_v1 = vld [vmem:[%s7534_s7 + $0x74] sm:$0x1]  ;;  %v8670_v61 = vpop.f32.mrf.mxu1  ;;  %v8672_v63 = vpop.f32.mrf.mxu0 }
 0x143   : > { %7190 = vmatmul.mubr.bf16.gmra.mxu0 %v6542_v25  ;;  %v5245_v44 = vsel %vm7605_vm4, %v6511_v2, %v5244_v19  ;;  %v5246_v54 = vrot.slane %v5244_v19, 4  ;;  %v4503_v57 = vshrl.u32 %v6390_v15, 16  ;;  %v4506_v62 = vshll.u32 %v6390_v15, 16 }
 0x144   : > { %v4486_v41 = vrot.slane %v4485_v5, 4  ;;  %v4495_v38 = vor.u32 %v4494_v3, %v4490_v20  ;;  %v8666_v24 = vadd.f32 %v8545_v0, %v1325_v47  ;;  %v4512_v25 = vshll.u32 %v6391_v22, 16  ;;  %v8676_v15 = vpop.f32.mrf.mxu1  ;;  %v8678_v5 = vpop.f32.mrf.mxu0 }
 0x145   : > { %v5248_v12 = vsel %vm7605_vm4, %v5246_v54, %v5247_v59  ;;  %v4516_v10 = vshrl.u32 %v6391_v22, 16  ;;  %v4505_v37 = vrot.slane %v4503_v57, 4  ;;  %v4508_v17 = vrot.slane %v4506_v62, 5 }
 0x146   : > { %9378 = vst [vmem:[#allocation22_spill] sm:$0xff] %v8666_v24  ;;  %v4491_v31 = vsel %vm7624_vm5, %v4486_v41, %v4490_v20  ;;  %v4496_v23 = vrot.slane %v4495_v38, 4  ;;  %v6543_v16 = vcombine.low %v5245_v44, %v5248_v12  ;;  %v4514_v2 = vrot.slane %v4512_v25, 5  ;;  %v6393_v20 = vld [vmem:[%s7534_s7 + $0x78] sm:$0xf]  ;;  %v8683_v57 = vpop.f32.mrf.mxu1 }
 0x147   : > { %v4518_v19 = vrot.slane %v4516_v10, 4  ;;  %v4522_v0 = vshll.u32 %v6392_v13, 16  ;;  %v6512_v59 = vrot.slane %v6478_v4, 9  ;;  %v5251_v22 = vrot.slane %v6479_v14, 5  ;;  %v8685_v13 = vpop.f32.mrf.mxu0  ;;  %v6394_v25 = vld [vmem:[%s7534_s7 + $0x7c] sm:$0xf] }
 0x148   : > { %v4501_v3 = vsel %vm7624_vm5, %v4496_v23, %v4500_v43  ;;  %7193 = vmatprep.mubr.bf16.mxu0 %v6543_v16  ;;  %v5254_v54 = vrot.slane %v6480_v1, 5  ;;  %v4509_v47 = vor.u32 %v4508_v17, %v4505_v37  ;;  %v1323_v4 = vadd.f32 %v8560_v53, %v8350_v45  ;;  %v6481_v53 = vld [vmem:[%s7534_s7 + $0x78] sm:$0xe] }
 0x149   : > { %v6439_v44 = vcombine.low %v4491_v31, %v4501_v3  ;;  %v4519_v41 = vor.u32 %v4518_v19, %v4514_v2  ;;  %v4524_v38 = vrot.slane %v4522_v0, 5  ;;  %v5252_v62 = vsel %vm7605_vm4, %v6512_v59, %v5251_v22  ;;  %v6395_v31 = vld [vmem:[%s7534_s7 + $0x80] sm:$0x1]  ;;  %v8717_v3 = vpop.f32.mrf.mxu0 }
 0x14a   : > { %v5253_v43 = vrot.slane %v5251_v22, 4  ;;  %v1326_v12 = vadd.f32 %v8577_v8, %v8356_v58  ;;  %v4510_v10 = vrot.slane %v4509_v47, 4  ;;  %v1324_v1 = vadd.f32 %v8591_v29, %v8371_v21  ;;  %v6482_v8 = vld [vmem:[%s7534_s7 + $0x7c] sm:$0xf]  ;;  %v6483_v0 = vld [vmem:[%s7534_s7 + $0x80] sm:$0x1] }
 0x14b   : > { %7145 = vmatprep.mubr.bf16.mxu1 %v6439_v44  ;;  %v4520_v14 = vrot.slane %v4519_v41, 4  ;;  %v4527_v23 = vshrl.u32 %v6393_v20, 16  ;;  %v8700_v37 = vadd.f32 %v8562_v42, %v1323_v4  ;;  %v4530_v58 = vshll.u32 %v6393_v20, 16  ;;  %v8715_v42 = vpop.f32.mrf.mxu1  ;;  %v6396_v41 = vld [vmem:[%s7534_s7 + $0x84] sm:$0xf] }
 0x14c   : > { %v5255_v16 = vsel %vm7605_vm4, %v5253_v43, %v5254_v54  ;;  %v8703_v45 = vadd.f32 %v8579_v26, %v1326_v12  ;;  %v4515_v17 = vsel %vm7624_vm5, %v4510_v10, %v4514_v2  ;;  %v8712_v19 = vadd.f32 %v8593_v32, %v1324_v1  ;;  %v6397_v4 = vld [vmem:[%s7534_s7 + $0x88] sm:$0xf]  ;;  %v6398_v1 = vld [vmem:[%s7534_s7 + $0x8c] sm:$0x1] }
 0x14d   : > { %9379 = vst [vmem:[#allocation23_spill] sm:$0xff] %v8700_v37  ;;  %v4525_v21 = vsel %vm7624_vm5, %v4520_v14, %v4524_v38  ;;  %v6544_v29 = vcombine.low %v5252_v62, %v5255_v16  ;;  %v4529_v59 = vrot.slane %v4527_v23, 4  ;;  %v4532_v22 = vrot.slane %v4530_v58, 5 }
 0x14e   : > { %9380 = vst [vmem:[#allocation24_spill] sm:$0xff] %v8703_v45  ;;  %9381 = vst [vmem:[#allocation25_spill] sm:$0xff] %v8712_v19  ;;  %v6440_v26 = vcombine.low %v4515_v17, %v4525_v21  ;;  %v4536_v54 = vshll.u32 %v6394_v25, 16  ;;  %v4540_v2 = vshrl.u32 %v6394_v25, 16  ;;  %v4546_v20 = vshll.u32 %v6395_v31, 16  ;;  %v8726_v31 = vpop.f32.mrf.mxu1  ;;  %v8728_v23 = vpop.f32.mrf.mxu0 }
 0x14f   : > { %7194 = vmatmul.mubr.bf16.gmra.mxu0 %v6544_v29  ;;  %v6513_v44 = vrot.slane %v6481_v53, 9  ;;  %v5258_v47 = vrot.slane %v6482_v8, 5  ;;  %v4533_v32 = vor.u32 %v4532_v22, %v4529_v59  ;;  %v5261_v62 = vrot.slane %v6483_v0, 5  ;;  %v6485_v0 = vld [vmem:[%s7534_s7 + $0x88] sm:$0xf] }
 0x150   : > { %7146 = vmatmul.mubr.bf16.gmra.mxu1 %v6440_v26  ;;  %v4538_v38 = vrot.slane %v4536_v54, 5  ;;  %v1329_v43 = vadd.f32 %v8608_v30, %v8213_v33  ;;  %v4542_v12 = vrot.slane %v4540_v2, 4  ;;  %v4548_v10 = vrot.slane %v4546_v20, 5  ;;  %v6484_v30 = vld [vmem:[%s7534_s7 + $0x84] sm:$0xe]  ;;  %v8738_v59 = vpop.f32.mrf.mxu1  ;;  %v8740_v22 = vpop.f32.mrf.mxu0 }
 0x151   : > { %v5259_v25 = vsel %vm7605_vm4, %v6513_v44, %v5258_v47  ;;  %v5260_v14 = vrot.slane %v5258_v47, 4  ;;  %v4534_v16 = vrot.slane %v4533_v32, 4  ;;  %v4551_v53 = vshrl.u32 %v6396_v41, 16  ;;  %v6486_v26 = vld [vmem:[%s7534_s7 + $0x8c] sm:$0x1] }
 0x152   : > { %v8731_v58 = vadd.f32 %v8610_v55, %v1329_v43  ;;  %v4554_v33 = vshll.u32 %v6396_v41, 16  ;;  %v4543_v8 = vor.u32 %v4542_v12, %v4538_v38  ;;  %v4560_v21 = vshll.u32 %v6397_v4, 16  ;;  %v8746_v43 = vpop.f32.mrf.mxu0 }
 0x153   : > { %v5262_v17 = vsel %vm7605_vm4, %v5260_v14, %v5261_v62  ;;  %v4564_v29 = vshrl.u32 %v6397_v4, 16  ;;  %v4539_v54 = vsel %vm7624_vm5, %v4534_v16, %v4538_v38  ;;  %v4553_v2 = vrot.slane %v4551_v53, 4  ;;  %v8744_v62 = vpop.f32.mrf.mxu1 }
 0x154   : > { %9382 = vst [vmem:[#allocation26_spill] sm:$0xff] %v8731_v58  ;;  %v6545_v55 = vcombine.low %v5259_v25, %v5262_v17  ;;  %v4556_v20 = vrot.slane %v4554_v33, 5  ;;  %v4544_v44 = vrot.slane %v4543_v8, 4  ;;  %v4562_v47 = vrot.slane %v4560_v21, 5 }
 0x155   : > { %v4566_v41 = vrot.slane %v4564_v29, 4  ;;  %v4570_v32 = vshll.u32 %v6398_v1, 16  ;;  %v6514_v12 = vrot.slane %v6484_v30, 9  ;;  %v5265_v14 = vrot.slane %v6485_v0, 5  ;;  %v6399_v1 = vld [vmem:[%s7534_s7 + $0x90] sm:$0xf] }
 0x156   : > { %7197 = vmatprep.mubr.bf16.mxu0 %v6545_v55  ;;  %v4557_v4 = vor.u32 %v4556_v20, %v4553_v2  ;;  %v5268_v58 = vrot.slane %v6486_v26, 5  ;;  %v4549_v38 = vsel %vm7624_vm5, %v4544_v44, %v4548_v10  ;;  %v1327_v53 = vadd.f32 %v8615_v27, %v8220_v39  ;;  %v6400_v39 = vld [vmem:[%s7534_s7 + $0x94] sm:$0xf]  ;;  %v6401_v27 = vld [vmem:[%s7534_s7 + $0x98] sm:$0x1]  ;;  %v8764_v26 = vpop.f32.mrf.mxu1 }
 0x157   : > { %v4567_v25 = vor.u32 %v4566_v41, %v4562_v47  ;;  %v4572_v16 = vrot.slane %v4570_v32, 5  ;;  %v6441_v33 = vcombine.low %v4539_v54, %v4549_v38  ;;  %v5266_v17 = vsel %vm7605_vm4, %v6514_v12, %v5265_v14  ;;  %v8766_v54 = vpop.f32.mrf.mxu0  ;;  %v6489_v32 = vld [vmem:[%s7534_s7 + $0x98] sm:$0x1] }
 0x158   : > { %v4558_v8 = vrot.slane %v4557_v4, 4  ;;  %v5267_v30 = vrot.slane %v5265_v14, 4  ;;  %v8756_v29 = vadd.f32 %v8617_v36, %v1327_v53  ;;  %v1330_v10 = vadd.f32 %v8631_v35, %v8232_v51  ;;  %v6487_v51 = vld [vmem:[%s7534_s7 + $0x90] sm:$0xe]  ;;  %v6488_v35 = vld [vmem:[%s7534_s7 + $0x94] sm:$0xf] }
 0x159   : > { %v4568_v21 = vrot.slane %v4567_v25, 4  ;;  %v1328_v0 = vadd.f32 %v8652_v48, %v8243_v60  ;;  %7149 = vmatprep.mubr.bf16.mxu1 %v6441_v33  ;;  %v4575_v2 = vshrl.u32 %v6399_v1, 16  ;;  %v4578_v20 = vshll.u32 %v6399_v1, 16 }
 0x15a   : > { %9383 = vst [vmem:[#allocation27_spill] sm:$0xff] %v8756_v29  ;;  %v4563_v55 = vsel %vm7624_vm5, %v4558_v8, %v4562_v47  ;;  %v5269_v36 = vsel %vm7605_vm4, %v5267_v30, %v5268_v58  ;;  %v8777_v44 = vadd.f32 %v8633_v50, %v1330_v10  ;;  %v4584_v12 = vshll.u32 %v6400_v39, 16  ;;  %v8784_v1 = vpop.f32.mrf.mxu1  ;;  %v8786_v50 = vpop.f32.mrf.mxu0  ;;  %v6403_v30 = vld [vmem:[%s7534_s7 + $0xa0] sm:$0xf] }
 0x15b   : > { %v4573_v60 = vsel %vm7624_vm5, %v4568_v21, %v4572_v16  ;;  %v6546_v48 = vcombine.low %v5266_v17, %v5269_v36  ;;  %v8780_v41 = vadd.f32 %v8654_v28, %v1328_v0  ;;  %v4577_v4 = vrot.slane %v4575_v2, 4  ;;  %v6402_v16 = vld [vmem:[%s7534_s7 + $0x9c] sm:$0xf] }
 0x15c   : > { %9384 = vst [vmem:[#allocation28_spill] sm:$0xff] %v8777_v44  ;;  %v6442_v47 = vcombine.low %v4563_v55, %v4573_v60  ;;  %v4580_v58 = vrot.slane %v4578_v20, 5  ;;  %v4588_v14 = vshrl.u32 %v6400_v39, 16  ;;  %v4594_v38 = vshll.u32 %v6401_v27, 16  ;;  %v6404_v27 = vld [vmem:[%s7534_s7 + $0xa4] sm:$0x1]  ;;  %v8794_v55 = vpop.f32.mrf.mxu1  ;;  %v8796_v36 = vpop.f32.mrf.mxu0 }
 0x15d   : > { %9385 = vst [vmem:[#allocation29_spill] sm:$0xff] %v8780_v41  ;;  %7198 = vmatmul.mubr.bf16.gmra.mxu0 %v6546_v48  ;;  %v6515_v25 = vrot.slane %v6487_v51, 9  ;;  %v5272_v53 = vrot.slane %v6488_v35, 5  ;;  %v4586_v33 = vrot.slane %v4584_v12, 5  ;;  %v5275_v8 = vrot.slane %v6489_v32, 5 }
 0x15e   : > { %7150 = vmatmul.mubr.bf16.gmra.mxu1 %v6442_v47  ;;  %v4581_v28 = vor.u32 %v4580_v58, %v4577_v4  ;;  %v1333_v17 = vadd.f32 %v8670_v61, %v8255_v6  ;;  %v4590_v21 = vrot.slane %v4588_v14, 4  ;;  %v4596_v10 = vrot.slane %v4594_v38, 5  ;;  %v6490_v61 = vld [vmem:[%s7534_s7 + $0x9c] sm:$0xe]  ;;  %v6491_v47 = vld [vmem:[%s7534_s7 + $0xa0] sm:$0xf]  ;;  %v8806_v58 = vpop.f32.mrf.mxu1  ;;  %v8808_v12 = vpop.f32.mrf.mxu0 }
 0x15f   : > { %v5273_v0 = vsel %vm7605_vm4, %v6515_v25, %v5272_v53  ;;  %v5274_v39 = vrot.slane %v5272_v53, 4  ;;  %v4599_v51 = vshrl.u32 %v6402_v16, 16  ;;  %v4602_v6 = vshll.u32 %v6402_v16, 16  ;;  %v6492_v4 = vld [vmem:[%s7534_s7 + $0xa4] sm:$0x1] }
 0x160   : > { %v4582_v2 = vrot.slane %v4581_v28, 4  ;;  %v8799_v20 = vadd.f32 %v8672_v63, %v1333_v17  ;;  %v4591_v35 = vor.u32 %v4590_v21, %v4586_v33  ;;  %v4608_v48 = vshll.u32 %v6403_v30, 16  ;;  %v8814_v41 = vpop.f32.mrf.mxu0 }
 0x161   : > { %v5276_v60 = vsel %vm7605_vm4, %v5274_v39, %v5275_v8  ;;  %v4612_v32 = vshrl.u32 %v6403_v30, 16  ;;  %v4601_v38 = vrot.slane %v4599_v51, 4  ;;  %v4604_v25 = vrot.slane %v4602_v6, 5  ;;  %v8812_v8 = vpop.f32.mrf.mxu1 }
 0x162   : > { %9386 = vst [vmem:[#allocation30_spill] sm:$0xff] %v8799_v20  ;;  %v4587_v14 = vsel %vm7624_vm5, %v4582_v2, %v4586_v33  ;;  %v6547_v63 = vcombine.low %v5273_v0, %v5276_v60  ;;  %v4592_v53 = vrot.slane %v4591_v35, 4  ;;  %v4610_v16 = vrot.slane %v4608_v48, 5 }
 0x163   : > { %v4614_v28 = vrot.slane %v4612_v32, 4  ;;  %v4618_v17 = vshll.u32 %v6404_v27, 16  ;;  %v4605_v30 = vor.u32 %v4604_v25, %v4601_v38  ;;  %v6516_v21 = vrot.slane %v6490_v61, 9  ;;  %v6405_v27 = vld [vmem:[%s7534_s7 + $0xa8] sm:$0xf]  ;;  %v8821_v6 = vpop.f32.mrf.mxu1 }
 0x164   : > { %7201 = vmatprep.mubr.bf16.mxu0 %v6547_v63  ;;  %v5279_v39 = vrot.slane %v6491_v47, 5  ;;  %v5282_v20 = vrot.slane %v6492_v4, 5  ;;  %v4597_v33 = vsel %vm7624_vm5, %v4592_v53, %v4596_v10  ;;  %v1331_v51 = vadd.f32 %v8676_v15, %v8269_v18  ;;  %v9388_v10 = vld [vmem:[#allocation6_spill] sm:$0xff]  ;;  %v9389_v63 = vld [vmem:[#allocation7_spill] sm:$0xff] }
 0x165   : > { %v4615_v0 = vor.u32 %v4614_v28, %v4610_v16  ;;  %v4620_v2 = vrot.slane %v4618_v17, 5  ;;  %v6443_v35 = vcombine.low %v4587_v14, %v4597_v33  ;;  %v4606_v61 = vrot.slane %v4605_v30, 4  ;;  %v6406_v15 = vld [vmem:[%s7534_s7 + $0xac] sm:$0xf]  ;;  %v6407_v14 = vld [vmem:[%s7534_s7 + $0xb0] sm:$0x1]  ;;  %v8834_v38 = vpop.f32.mrf.mxu1 }
 0x166   : > { %v5280_v60 = vsel %vm7605_vm4, %v6516_v21, %v5279_v39  ;;  %v5281_v48 = vrot.slane %v5279_v39, 4  ;;  %v8826_v47 = vadd.f32 %v8678_v5, %v1331_v51  ;;  %v1334_v4 = vadd.f32 %v8683_v57, %v9388_v10  ;;  %v6493_v17 = vld [vmem:[%s7534_s7 + $0xa8] sm:$0xe]  ;;  %v6494_v30 = vld [vmem:[%s7534_s7 + $0xac] sm:$0xf]  ;;  %v8842_v57 = vpop.f32.mrf.mxu0 }
 0x167   : > { %v4616_v32 = vrot.slane %v4615_v0, 4  ;;  %v1332_v18 = vadd.f32 %v8715_v42, %v9389_v63  ;;  %7153 = vmatprep.mubr.bf16.mxu1 %v6443_v35  ;;  %v4611_v25 = vsel %vm7624_vm5, %v4606_v61, %v4610_v16  ;;  %v4623_v5 = vshrl.u32 %v6405_v27, 16  ;;  %v6495_v16 = vld [vmem:[%s7534_s7 + $0xb0] sm:$0x1]  ;;  %v8853_v0 = vpop.f32.mrf.mxu1 }
 0x168   : > { %9387 = vst [vmem:[#allocation31_spill] sm:$0xff] %v8826_v47  ;;  %v5283_v53 = vsel %vm7605_vm4, %v5281_v48, %v5282_v20  ;;  %v4626_v28 = vshll.u32 %v6405_v27, 16  ;;  %v8847_v39 = vadd.f32 %v8685_v13, %v1334_v4  ;;  %v4632_v35 = vshll.u32 %v6406_v15, 16  ;;  %v8855_v61 = vpop.f32.mrf.mxu0 }
 0x169   : > { %v4621_v42 = vsel %vm7624_vm5, %v4616_v32, %v4620_v2  ;;  %v6548_v21 = vcombine.low %v5280_v60, %v5283_v53  ;;  %v8850_v33 = vadd.f32 %v8717_v3, %v1332_v18  ;;  %v4625_v51 = vrot.slane %v4623_v5, 4  ;;  %v6408_v32 = vld [vmem:[%s7534_s7 + $0xb4] sm:$0xf]  ;;  %v8858_v10 = vpop.f32.mrf.mxu1  ;;  %v6409_v53 = vld [vmem:[%s7534_s7 + $0xb8] sm:$0xf] }
 0x16a   : > { %9390 = vst [vmem:[#allocation6_spill] sm:$0xff] %v8847_v39  ;;  %v6444_v20 = vcombine.low %v4611_v25, %v4621_v42  ;;  %v4628_v27 = vrot.slane %v4626_v28, 5  ;;  %v4636_v2 = vshrl.u32 %v6406_v15, 16  ;;  %v4642_v48 = vshll.u32 %v6407_v14, 16  ;;  %v9392_v18 = vld [vmem:[#allocation8_spill] sm:$0xff]  ;;  %v8863_v5 = vpop.f32.mrf.mxu0 }
 0x16b   : > { %9391 = vst [vmem:[#allocation7_spill] sm:$0xff] %v8850_v33  ;;  %7202 = vmatmul.mubr.bf16.gmra.mxu0 %v6548_v21  ;;  %v6517_v60 = vrot.slane %v6493_v17, 9  ;;  %v5286_v13 = vrot.slane %v6494_v30, 5  ;;  %v4634_v4 = vrot.slane %v4632_v35, 5  ;;  %v5289_v63 = vrot.slane %v6495_v16, 5  ;;  %v8868_v42 = vpop.f32.mrf.mxu1 }
 0x16c   : > { %7154 = vmatmul.mubr.bf16.gmra.mxu1 %v6444_v20  ;;  %v4629_v3 = vor.u32 %v4628_v27, %v4625_v51  ;;  %v1337_v25 = vadd.f32 %v8726_v31, %v9392_v18  ;;  %v4638_v28 = vrot.slane %v4636_v2, 4  ;;  %v4644_v15 = vrot.slane %v4642_v48, 5  ;;  %v6410_v30 = vld [vmem:[%s7534_s7 + $0xbc] sm:$0x1]  ;;  %v6496_v51 = vld [vmem:[%s7534_s7 + $0xb4] sm:$0xe]  ;;  %v8874_v27 = vpop.f32.mrf.mxu0 }
 0x16d   : > { %v5287_v14 = vsel %vm7605_vm4, %v6517_v60, %v5286_v13  ;;  %v5288_v17 = vrot.slane %v5286_v13, 4  ;;  %v4647_v20 = vshrl.u32 %v6408_v32, 16  ;;  %v4650_v31 = vshll.u32 %v6408_v32, 16  ;;  %v6497_v60 = vld [vmem:[%s7534_s7 + $0xb8] sm:$0xf]  ;;  %v8880_v33 = vpop.f32.mrf.mxu1 }
 0x16e   : > { %v4630_v21 = vrot.slane %v4629_v3, 4  ;;  %v8871_v16 = vadd.f32 %v8728_v23, %v1337_v25  ;;  %v4639_v35 = vor.u32 %v4638_v28, %v4634_v4  ;;  %v4656_v48 = vshll.u32 %v6409_v53, 16  ;;  %v6498_v13 = vld [vmem:[%s7534_s7 + $0xbc] sm:$0x1]  ;;  %v8886_v19 = vpop.f32.mrf.mxu0 }
 0x16f   : > { %v5290_v2 = vsel %vm7605_vm4, %v5288_v17, %v5289_v63  ;;  %v4660_v18 = vshrl.u32 %v6409_v53, 16  ;;  %v4649_v25 = vrot.slane %v4647_v20, 4  ;;  %v4666_v28 = vshll.u32 %v6410_v30, 16  ;;  %v8884_v44 = vpop.f32.mrf.mxu1  ;;  %v9394_v20 = vld [vmem:[#allocation9_spill] sm:$0xff] }
 0x170   : > { %9393 = vst [vmem:[#allocation8_spill] sm:$0xff] %v8871_v16  ;;  %v4635_v3 = vsel %vm7624_vm5, %v4630_v21, %v4634_v4  ;;  %v6549_v23 = vcombine.low %v5287_v14, %v5290_v2  ;;  %v4652_v16 = vrot.slane %v4650_v31, 5  ;;  %v4640_v32 = vrot.slane %v4639_v35, 4  ;;  %v6411_v30 = vld [vmem:[%s7534_s7 + $0xc0] sm:$0xf] }
 0x171   : > { %v4658_v39 = vrot.slane %v4656_v48, 5  ;;  %v4662_v47 = vrot.slane %v4660_v18, 4  ;;  %v6518_v53 = vrot.slane %v6496_v51, 9  ;;  %v5293_v17 = vrot.slane %v6497_v60, 5  ;;  %v8893_v35 = vpop.f32.mrf.mxu1  ;;  %v8897_v18 = vpop.f32.mrf.mxu0  ;;  %v9396_v60 = vld [vmem:[#allocation10_spill] sm:$0xff] }
 0x172   : > { %7205 = vmatprep.mubr.bf16.mxu0 %v6549_v23  ;;  %v4653_v63 = vor.u32 %v4652_v16, %v4649_v25  ;;  %v5296_v29 = vrot.slane %v6498_v13, 5  ;;  %v4645_v4 = vsel %vm7624_vm5, %v4640_v32, %v4644_v15  ;;  %v4668_v21 = vrot.slane %v4666_v28, 5  ;;  %v9397_v13 = vld [vmem:[#allocation11_spill] sm:$0xff]  ;;  %v6413_v25 = vld [vmem:[%s7534_s7 + $0xc8] sm:$0x1] }
 0x173   : > { %v4663_v14 = vor.u32 %v4662_v47, %v4658_v39  ;;  %v1335_v31 = vadd.f32 %v8738_v59, %v9394_v20  ;;  %v6445_v2 = vcombine.low %v4635_v3, %v4645_v4  ;;  %v5294_v51 = vsel %vm7605_vm4, %v6518_v53, %v5293_v17  ;;  %v6412_v3 = vld [vmem:[%s7534_s7 + $0xc4] sm:$0xf]  ;;  %v8908_v32 = vpop.f32.mrf.mxu1 }
 0x174   : > { %v4654_v16 = vrot.slane %v4653_v63, 4  ;;  %v5295_v48 = vrot.slane %v5293_v17, 4  ;;  %v1338_v59 = vadd.f32 %v8744_v62, %v9396_v60  ;;  %v1336_v23 = vadd.f32 %v8764_v26, %v9397_v13  ;;  %v6499_v17 = vld [vmem:[%s7534_s7 + $0xc0] sm:$0xe]  ;;  %v6500_v4 = vld [vmem:[%s7534_s7 + $0xc4] sm:$0xf]  ;;  %v8916_v62 = vpop.f32.mrf.mxu0 }
 0x175   : > { %v4664_v15 = vrot.slane %v4663_v14, 4  ;;  %v8900_v47 = vadd.f32 %v8740_v22, %v1335_v31  ;;  %7157 = vmatprep.mubr.bf16.mxu1 %v6445_v2  ;;  %v4671_v22 = vshrl.u32 %v6411_v30, 16  ;;  %v4674_v53 = vshll.u32 %v6411_v30, 16  ;;  %v8927_v2 = vpop.f32.mrf.mxu1 }
 0x176   : > { %v4659_v28 = vsel %vm7624_vm5, %v4654_v16, %v4658_v39  ;;  %v5297_v63 = vsel %vm7605_vm4, %v5295_v48, %v5296_v29  ;;  %v8921_v20 = vadd.f32 %v8746_v43, %v1338_v59  ;;  %v8924_v31 = vadd.f32 %v8766_v54, %v1336_v23  ;;  %v6501_v39 = vld [vmem:[%s7534_s7 + $0xc8] sm:$0x1]  ;;  %v8929_v60 = vpop.f32.mrf.mxu0  ;;  %v6414_v59 = vld [vmem:[%s7534_s7 + $0xcc] sm:$0xf] }
 0x177   : > { %9395 = vst [vmem:[#allocation9_spill] sm:$0xff] %v8900_v47  ;;  %v4669_v26 = vsel %vm7624_vm5, %v4664_v15, %v4668_v21  ;;  %v6550_v14 = vcombine.low %v5294_v51, %v5297_v63  ;;  %v4673_v30 = vrot.slane %v4671_v22, 4  ;;  %v4676_v16 = vrot.slane %v4674_v53, 5  ;;  %v8932_v13 = vpop.f32.mrf.mxu1  ;;  %v9401_v63 = vld [vmem:[#allocation12_spill] sm:$0xff] }
 0x178   : > { %9398 = vst [vmem:[#allocation10_spill] sm:$0xff] %v8921_v20  ;;  %9399 = vst [vmem:[#allocation11_spill] sm:$0xff] %v8924_v31  ;;  %v6446_v29 = vcombine.low %v4659_v28, %v4669_v26  ;;  %v4680_v48 = vshll.u32 %v6412_v3, 16  ;;  %v4684_v21 = vshrl.u32 %v6412_v3, 16  ;;  %v4690_v51 = vshll.u32 %v6413_v25, 16 }
 0x179   : > { %7206 = vmatmul.mubr.bf16.gmra.mxu0 %v6550_v14  ;;  %v6519_v15 = vrot.slane %v6499_v17, 9  ;;  %v5300_v43 = vrot.slane %v6500_v4, 5  ;;  %9400 = vst [vmem:[#allocation32_spill] sm:$0xff] %v8932_v13  ;;  %v4677_v54 = vor.u32 %v4676_v16, %v4673_v30  ;;  %v5303_v28 = vrot.slane %v6501_v39, 5  ;;  %v6415_v53 = vld [vmem:[%s7534_s7 + $0xd0] sm:$0xf]  ;;  %v8940_v4 = vpop.f32.mrf.mxu0 }
 0x17a   : > { %7158 = vmatmul.mubr.bf16.gmra.mxu1 %v6446_v29  ;;  %v4682_v23 = vrot.slane %v4680_v48, 5  ;;  %v1341_v22 = vadd.f32 %v8784_v1, %v9401_v63  ;;  %v4686_v26 = vrot.slane %v4684_v21, 4  ;;  %v4692_v14 = vrot.slane %v4690_v51, 5  ;;  %v6416_v17 = vld [vmem:[%s7534_s7 + $0xd4] sm:$0x1]  ;;  %v8942_v29 = vpop.f32.mrf.mxu1 }
 0x17b   : > { %v5301_v3 = vsel %vm7605_vm4, %v6519_v15, %v5300_v43  ;;  %v5302_v25 = vrot.slane %v5300_v43, 4  ;;  %9402 = vst [vmem:[#allocation12_spill] sm:$0xff] %v8942_v29  ;;  %v4678_v30 = vrot.slane %v4677_v54, 4  ;;  %v4695_v16 = vshrl.u32 %v6414_v59, 16  ;;  %v6502_v48 = vld [vmem:[%s7534_s7 + $0xcc] sm:$0xe]  ;;  %v8952_v20 = vpop.f32.mrf.mxu0 }
 0x17c   : > { %v8945_v39 = vadd.f32 %v8786_v50, %v1341_v22  ;;  %v4698_v1 = vshll.u32 %v6414_v59, 16  ;;  %v4687_v21 = vor.u32 %v4686_v26, %v4682_v23  ;;  %v4704_v63 = vshll.u32 %v6415_v53, 16  ;;  %v6503_v15 = vld [vmem:[%s7534_s7 + $0xd0] sm:$0xf]  ;;  %v6504_v43 = vld [vmem:[%s7534_s7 + $0xd4] sm:$0x1]  ;;  %v8954_v47 = vpop.f32.mrf.mxu1 }
 0x17d   : > { %v5304_v51 = vsel %vm7605_vm4, %v5302_v25, %v5303_v28  ;;  %v4708_v31 = vshrl.u32 %v6415_v53, 16  ;;  %9404 = vst [vmem:[#allocation34_spill] sm:$0xff] %v8954_v47  ;;  %v4683_v54 = vsel %vm7624_vm5, %v4678_v30, %v4682_v23  ;;  %v4697_v22 = vrot.slane %v4695_v16, 4  ;;  %v8958_v24 = vpop.f32.mrf.mxu0 }
 0x17e   : > { %9403 = vst [vmem:[#allocation33_spill] sm:$0xff] %v8945_v39  ;;  %v6551_v50 = vcombine.low %v5301_v3, %v5304_v51  ;;  %v4700_v39 = vrot.slane %v4698_v1, 5  ;;  %v4688_v59 = vrot.slane %v4687_v21, 4  ;;  %v4706_v45 = vrot.slane %v4704_v63, 5  ;;  %v2248_v28 = vpop.f32.mrf.mxu1  ;;  %v9405_v3 = vld [vmem:[#allocation13_spill] sm:$0xff]  ;;  %v9406_v63 = vld [vmem:[#allocation14_spill] sm:$0xff] }
 0x17f   : > { %v4710_v26 = vrot.slane %v4708_v31, 4  ;;  %v4714_v37 = vshll.u32 %v6416_v17, 16  ;;  %v6520_v25 = vrot.slane %v6502_v48, 9  ;;  %v5307_v29 = vrot.slane %v6503_v15, 5  ;;  %v3053_v16 = vpop.f32.mrf.mxu0  ;;  %v9407_v15 = vld [vmem:[#allocation15_spill] sm:$0xff] }
 0x180   : > { %7209 = vmatprep.mubr.bf16.mxu0 %v6551_v50  ;;  %v4701_v53 = vor.u32 %v4700_v39, %v4697_v22  ;;  %v5310_v9 = vrot.slane %v6504_v43, 5  ;;  %v4693_v47 = vsel %vm7624_vm5, %v4688_v59, %v4692_v14  ;;  %v1339_v30 = vadd.f32 %v8794_v55, %v9405_v3  ;;  %v6956_v1 = vpop.f32.mrf.mxu1 }
 0x181   : > { %v4711_v13 = vor.u32 %v4710_v26, %v4706_v45  ;;  %v4716_v23 = vrot.slane %v4714_v37, 5  ;;  %v6447_v31 = vcombine.low %v4683_v54, %v4693_v47  ;;  %v5308_v21 = vsel %vm7605_vm4, %v6520_v25, %v5307_v29  ;;  %v9408_v54 = vld [vmem:[#allocation16_spill] sm:$0xff]  ;;  %v9411_v26 = vld [vmem:[#allocation19_spill] sm:$0xff] }
 0x182   : > { %v4702_v17 = vrot.slane %v4701_v53, 4  ;;  %v5309_v51 = vrot.slane %v5307_v29, 4  ;;  %v8967_v48 = vadd.f32 %v8796_v36, %v1339_v30  ;;  %v1342_v14 = vadd.f32 %v8806_v58, %v9406_v63  ;;  %v2251_v43 = vpop.f32.mrf.mxu1  ;;  %v9409_v29 = vld [vmem:[#allocation17_spill] sm:$0xff]  ;;  %v9412_v53 = vld [vmem:[#allocation20_spill] sm:$0xff]  ;;  %v9416_v30 = vld [vmem:[#allocation22_spill] sm:$0xff] }
 0x183   : > { %v4712_v39 = vrot.slane %v4711_v13, 4  ;;  %v1340_v37 = vadd.f32 %v8812_v8, %v9407_v15  ;;  %7161 = vmatprep.mubr.bf16.mxu1 %v6447_v31  ;;  %v2361_v13 = vadd.f32 %v8821_v6, %v9408_v54  ;;  %v2359_v36 = vadd.f32 %v8834_v38, %v9409_v29  ;;  %v9410_v38 = vld [vmem:[#allocation18_spill] sm:$0xff] }
 0x184   : > { %v4707_v55 = vsel %vm7624_vm5, %v4702_v17, %v4706_v45  ;;  %v5311_v47 = vsel %vm7605_vm4, %v5309_v51, %v5310_v9  ;;  %v8984_v8 = vadd.f32 %v8808_v12, %v1342_v14  ;;  %v7003_v45 = vpop.f32.mrf.mxu0  ;;  %v6959_v59 = vpop.f32.mrf.mxu1  ;;  %v2362_v56 = vadd.f32 %v8853_v0, %v9410_v38  ;;  %v9418_v17 = vld [vmem:[#allocation23_spill] sm:$0xff]  ;;  %v9419_v51 = vld [vmem:[#allocation24_spill] sm:$0xff]  ;;  %v9421_v15 = vld [vmem:[#allocation26_spill] sm:$0xff] }
 0x185   : > { %v4717_v58 = vsel %vm7624_vm5, %v4712_v39, %v4716_v23  ;;  %v6552_v50 = vcombine.low %v5308_v21, %v5311_v47  ;;  %v8987_v22 = vadd.f32 %v8814_v41, %v1340_v37  ;;  %v8990_v9 = vadd.f32 %v8842_v57, %v2361_v13 }
 0x186   : > { %v6448_v46 = vcombine.low %v4707_v55, %v4717_v58  ;;  %v8993_v6 = vadd.f32 %v8855_v61, %v2359_v36  ;;  %v2360_v12 = vadd.f32 %v8858_v10, %v9411_v26  ;;  %v2365_v41 = vadd.f32 %v8868_v42, %v9412_v53  ;;  %v3066_v23 = vpop.f32.mrf.mxu0  ;;  %v2264_v3 = vpop.f32.mrf.mxu1  ;;  %v9423_v36 = vld [vmem:[#allocation28_spill] sm:$0xff]  ;;  %v9424_v58 = vld [vmem:[#allocation29_spill] sm:$0xff] }
 0x187   : > { %7210 = vmatmul.mubr.bf16.gmra.mxu0 %v6552_v50  ;;  %v2363_v25 = vadd.f32 %v8880_v33, %v8557_v49  ;;  %v2366_v57 = vadd.f32 %v8884_v44, %v8567_v7  ;;  %v9006_v61 = vadd.f32 %v8863_v5, %v2362_v56  ;;  %v2364_v0 = vadd.f32 %v8893_v35, %v8570_v52 }
 0x188   : > { %7162 = vmatmul.mubr.bf16.gmra.mxu1 %v6448_v46  ;;  %v2369_v10 = vadd.f32 %v8908_v32, %v8600_v34  ;;  %v2367_v42 = vadd.f32 %v8927_v2, %v8638_v40  ;;  %v9015_v49 = vadd.f32 %v8874_v27, %v2360_v12  ;;  %v9018_v7 = vadd.f32 %v8886_v19, %v2365_v41  ;;  %v7004_v5 = vpop.f32.mrf.mxu0  ;;  %v6960_v52 = vpop.f32.mrf.mxu1  ;;  %v9413_v19 = vld [vmem:[#allocation32_spill] sm:$0xff]  ;;  %v9414_v32 = vld [vmem:[#allocation21_spill] sm:$0xff]  ;;  %v9427_v41 = vld [vmem:[#allocation6_spill] sm:$0xff] }
 0x189   : > { %v9021_v44 = vadd.f32 %v8897_v18, %v2363_v25  ;;  %v9024_v33 = vadd.f32 %v8916_v62, %v2366_v57  ;;  %v9027_v35 = vadd.f32 %v8929_v60, %v2364_v0  ;;  %v2370_v27 = vadd.f32 %v9413_v19, %v8643_v11  ;;  %v9415_v18 = vld [vmem:[#allocation12_spill] sm:$0xff]  ;;  %v9417_v62 = vld [vmem:[#allocation34_spill] sm:$0xff]  ;;  %v9422_v11 = vld [vmem:[#allocation27_spill] sm:$0xff] }
 0x18a   : > { %v9030_v34 = vadd.f32 %v8940_v4, %v2369_v10  ;;  %v9033_v40 = vadd.f32 %v8952_v20, %v2367_v42  ;;  %v2368_v2 = vadd.f32 %v9415_v18, %v9414_v32  ;;  %v2373_v31 = vadd.f32 %v9417_v62, %v9416_v30  ;;  %v3069_v39 = vpop.f32.mrf.mxu0  ;;  %v2267_v63 = vpop.f32.mrf.mxu1  ;;  %v9420_v20 = vld [vmem:[#allocation25_spill] sm:$0xff]  ;;  %v9428_v0 = vld [vmem:[#allocation7_spill] sm:$0xff]  ;;  %v9429_v19 = vld [vmem:[#allocation8_spill] sm:$0xff] }
 0x18b   : > { %v2371_v21 = vadd.f32 %v2248_v28, %v9418_v17  ;;  %v2374_v60 = vadd.f32 %v6956_v1, %v9419_v51  ;;  %v9044_v4 = vadd.f32 %v8958_v24, %v2370_v27  ;;  %v2372_v14 = vadd.f32 %v2251_v43, %v9420_v20  ;;  %v9425_v43 = vld [vmem:[#allocation30_spill] sm:$0xff]  ;;  %v9432_v20 = vld [vmem:[#allocation11_spill] sm:$0xff] }
 0x18c   : > { %v2377_v37 = vadd.f32 %v6959_v59, %v9421_v15  ;;  %v2375_v55 = vadd.f32 %v2264_v3, %v9422_v11  ;;  %v9049_v47 = vadd.f32 %v3053_v16, %v2368_v2  ;;  %v9051_v54 = vadd.f32 %v7003_v45, %v2373_v31  ;;  %v6963_v1 = vpop.f32.mrf.mxu1  ;;  %v7007_v59 = vpop.f32.mrf.mxu0  ;;  %v9426_v16 = vld [vmem:[#allocation31_spill] sm:$0xff]  ;;  %v9430_v2 = vld [vmem:[#allocation9_spill] sm:$0xff] }
 0x18d   : > { %v9053_v13 = vadd.f32 %v3066_v23, %v2371_v21  ;;  %v9055_v28 = vadd.f32 %v7004_v5, %v2374_v60  ;;  %v9057_v29 = vadd.f32 %v3069_v39, %v2372_v14  ;;  %v2378_v24 = vadd.f32 %v6960_v52, %v9423_v36  ;;  %v9431_v21 = vld [vmem:[#allocation10_spill] sm:$0xff] }
 0x18e   : > { %v2376_v50 = vadd.f32 %v2267_v63, %v9424_v58  ;;  %v2381_v46 = vadd.f32 %v6963_v1, %v9425_v43  ;;  %v2280_v38 = vpop.f32.mrf.mxu1  ;;  %v9062_v56 = vadd.f32 %v7007_v59, %v2377_v37  ;;  %v3082_v26 = vpop.f32.mrf.mxu0 }
 0x18f   : > { %v2379_v45 = vadd.f32 %v2280_v38, %v9426_v16  ;;  %v9065_v53 = vadd.f32 %v3082_v26, %v2375_v55  ;;  %v9433_v55 = vld [vmem:[#allocation33_spill] sm:$0xff] }
 0x190   : > { %v6964_v12 = vpop.f32.mrf.mxu1  ;;  %v7008_v57 = vpop.f32.mrf.mxu0 }
 0x191   : > { %v2382_v25 = vadd.f32 %v6964_v12, %v9427_v41  ;;  %v9068_v3 = vadd.f32 %v7008_v57, %v2378_v24 }
 0x192   : > { %v2283_v23 = vpop.f32.mrf.mxu1  ;;  %v3085_v42 = vpop.f32.mrf.mxu0 }
 0x193   : > { %v2380_v10 = vadd.f32 %v2283_v23, %v9428_v0  ;;  %v9071_v52 = vadd.f32 %v3085_v42, %v2376_v50 }
 0x194   : > { %v6967_v5 = vpop.f32.mrf.mxu1  ;;  %v7011_v18 = vpop.f32.mrf.mxu0 }
 0x195   : > { %v2385_v27 = vadd.f32 %v6967_v5, %v9429_v19  ;;  %v9075_v62 = vadd.f32 %v7011_v18, %v2381_v46 }
 0x196   : > { %v2296_v32 = vpop.f32.mrf.mxu1  ;;  %v3098_v17 = vpop.f32.mrf.mxu0 }
 0x197   : > { %v2383_v30 = vadd.f32 %v2296_v32, %v9430_v2  ;;  %v9078_v60 = vadd.f32 %v3098_v17, %v2379_v45 }
 0x198   : > { %v6968_v31 = vpop.f32.mrf.mxu1  ;;  %v7012_v63 = vpop.f32.mrf.mxu0 }
 0x199   : > { %v2386_v51 = vadd.f32 %v6968_v31, %v9431_v21  ;;  %v9081_v15 = vadd.f32 %v7012_v63, %v2382_v25 }
 0x19a   : > { %v2299_v39 = vpop.f32.mrf.mxu1  ;;  %v3101_v11 = vpop.f32.mrf.mxu0 }
 0x19b   : > { %v2384_v14 = vadd.f32 %v2299_v39, %v9432_v20  ;;  %v9084_v36 = vadd.f32 %v3101_v11, %v2380_v10 }
 0x19c   : > { %v6971_v37 = vpop.f32.mrf.mxu1  ;;  %v7015_v58 = vpop.f32.mrf.mxu0 }
 0x19d   : > { %v2389_v1 = vadd.f32 %v6971_v37, %v9433_v55  ;;  %v9087_v43 = vadd.f32 %v7015_v58, %v2385_v27 }
 0x19e   : > { %v2312_v24 = vpop.f32.mrf.mxu1  ;;  %v3114_v59 = vpop.f32.mrf.mxu0 }
 0x19f   : > { %v2387_v50 = vadd.f32 %v2312_v24, %v8967_v48  ;;  %v9090_v16 = vadd.f32 %v3114_v59, %v2383_v30 }
 0x1a0   : > { %v6972_v46 = vpop.f32.mrf.mxu1  ;;  %v7016_v26 = vpop.f32.mrf.mxu0 }
 0x1a1   : > { %v2390_v38 = vadd.f32 %v6972_v46, %v8984_v8  ;;  %9434 = vst [vmem:[#allocation13_spill] sm:$0xff] %v9090_v16  ;;  %v9093_v41 = vadd.f32 %v7016_v26, %v2386_v51 }
 0x1a2   : > { %v2315_v45 = vpop.f32.mrf.mxu1  ;;  %v3117_v25 = vpop.f32.mrf.mxu0 }
 0x1a3   : > { %v2388_v12 = vadd.f32 %v2315_v45, %v8987_v22  ;;  %v9095_v57 = vadd.f32 %v3117_v25, %v2384_v14 }
 0x1a4   : > { %v7019_v23 = vpop.f32.mrf.mxu0  ;;  %v7039_v42 = vpop.f32.mrf.mxu1 }
 0x1a5   : > { %9435 = vst [vmem:[#allocation14_spill] sm:$0xff] %v9095_v57  ;;  %v9097_v0 = vadd.f32 %v7019_v23, %v2389_v1  ;;  %v3773_v8 = vadd.f32 %v7039_v42, %v8990_v9 }
 0x1a6   : > { %v3130_v48 = vpop.f32.mrf.mxu0  ;;  %v3612_v27 = vpop.f32.mrf.mxu1 }
 0x1a7   : > { %v9099_v10 = vadd.f32 %v3130_v48, %v2387_v50  ;;  %v3771_v22 = vadd.f32 %v3612_v27, %v8993_v6 }
 0x1a8   : > { %v7020_v5 = vpop.f32.mrf.mxu0  ;;  %v7040_v2 = vpop.f32.mrf.mxu1 }
 0x1a9   : > { %9436 = vst [vmem:[#allocation15_spill] sm:$0xff] %v9099_v10  ;;  %v9102_v19 = vadd.f32 %v7020_v5, %v2390_v38  ;;  %v3774_v31 = vadd.f32 %v7040_v2, %v9006_v61 }
 0x1aa   : > { %v3133_v32 = vpop.f32.mrf.mxu0  ;;  %v9110_v21 = vpop.f32.mrf.mxu1 }
 0x1ab   : > { %v9105_v18 = vadd.f32 %v3133_v32, %v2388_v12 }
 0x1ac   : > { %v7087_v30 = vpop.f32.mrf.mxu0  ;;  %v7043_v9 = vpop.f32.mrf.mxu1 }
 0x1ad   : > { %9437 = vst [vmem:[#allocation16_spill] sm:$0xff] %v9105_v18  ;;  %v9108_v17 = vadd.f32 %v7087_v30, %v3773_v8  ;;  %v3777_v20 = vadd.f32 %v7043_v9, %v9018_v7 }
 0x1ae   : > { %v4063_v51 = vpop.f32.mrf.mxu0  ;;  %v9117_v6 = vpop.f32.mrf.mxu1 }
 0x1af   : > { %v9112_v39 = vadd.f32 %v4063_v51, %v3771_v22 }
 0x1b0   : > { %v7088_v63 = vpop.f32.mrf.mxu0  ;;  %v7044_v11 = vpop.f32.mrf.mxu1 }
 0x1b1   : > { %v9115_v14 = vadd.f32 %v7088_v63, %v3774_v31  ;;  %v3778_v61 = vadd.f32 %v7044_v11, %v9024_v33 }
 0x1b2   : > { %v9119_v37 = vpop.f32.mrf.mxu0  ;;  %v9124_v24 = vpop.f32.mrf.mxu1 }
 0x1b4   : > { %v7091_v55 = vpop.f32.mrf.mxu0  ;;  %v7047_v50 = vpop.f32.mrf.mxu1 }
 0x1b5   : > { %v9122_v1 = vadd.f32 %v7091_v55, %v3777_v20  ;;  %v3781_v7 = vadd.f32 %v7047_v50, %v9030_v34 }
 0x1b6   : > { %v9126_v58 = vpop.f32.mrf.mxu0  ;;  %v9131_v38 = vpop.f32.mrf.mxu1 }
 0x1b8   : > { %v7092_v46 = vpop.f32.mrf.mxu0  ;;  %v7048_v26 = vpop.f32.mrf.mxu1 }
 0x1b9   : > { %v9129_v59 = vadd.f32 %v7092_v46, %v3778_v61  ;;  %v3782_v33 = vadd.f32 %v7048_v26, %v9044_v4 }
 0x1ba   : > { %v9133_v45 = vpop.f32.mrf.mxu0  ;;  %v9138_v23 = vpop.f32.mrf.mxu1 }
 0x1bc   : > { %v7095_v12 = vpop.f32.mrf.mxu0  ;;  %v7051_v42 = vpop.f32.mrf.mxu1 }
 0x1bd   : > { %v9136_v25 = vadd.f32 %v7095_v12, %v3781_v7  ;;  %v3785_v34 = vadd.f32 %v7051_v42, %v9051_v54 }
 0x1be   : > { %v9140_v48 = vpop.f32.mrf.mxu0  ;;  %v9145_v27 = vpop.f32.mrf.mxu1 }
 0x1c0   : > { %v7096_v5 = vpop.f32.mrf.mxu0  ;;  %v7052_v22 = vpop.f32.mrf.mxu1 }
 0x1c1   : > { %v9143_v8 = vadd.f32 %v7096_v5, %v3782_v33  ;;  %v3786_v4 = vadd.f32 %v7052_v22, %v9055_v28 }
 0x1c2   : > { %v9147_v32 = vpop.f32.mrf.mxu0  ;;  %v9152_v31 = vpop.f32.mrf.mxu1 }
 0x1c4   : > { %v7099_v2 = vpop.f32.mrf.mxu0  ;;  %v7055_v9 = vpop.f32.mrf.mxu1 }
 0x1c5   : > { %v9150_v30 = vadd.f32 %v7099_v2, %v3785_v34  ;;  %v3789_v54 = vadd.f32 %v7055_v9, %v9062_v56 }
 0x1c6   : > { %v9154_v51 = vpop.f32.mrf.mxu0  ;;  %v9159_v11 = vpop.f32.mrf.mxu1 }
 0x1c8   : > { %v7100_v63 = vpop.f32.mrf.mxu0  ;;  %v7056_v61 = vpop.f32.mrf.mxu1 }
 0x1c9   : > { %v9157_v20 = vadd.f32 %v7100_v63, %v3786_v4  ;;  %v3790_v28 = vadd.f32 %v7056_v61, %v9068_v3 }
 0x1ca   : > { %v9161_v55 = vpop.f32.mrf.mxu0  ;;  %v9166_v7 = vpop.f32.mrf.mxu1 }
 0x1cc   : > { %v7103_v50 = vpop.f32.mrf.mxu0  ;;  %v7059_v12 = vpop.f32.mrf.mxu1 }
 0x1cd   : > { %v9164_v46 = vadd.f32 %v7103_v50, %v3789_v54  ;;  %v3793_v56 = vadd.f32 %v7059_v12, %v9075_v62 }
 0x1ce   : > { %v9168_v26 = vpop.f32.mrf.mxu0  ;;  %v9173_v5 = vpop.f32.mrf.mxu1 }
 0x1d0   : > { %v7104_v33 = vpop.f32.mrf.mxu0  ;;  %v7060_v22 = vpop.f32.mrf.mxu1 }
 0x1d1   : > { %v9171_v42 = vadd.f32 %v7104_v33, %v3790_v28  ;;  %v3794_v3 = vadd.f32 %v7060_v22, %v9081_v15 }
 0x1d2   : > { %v9175_v34 = vpop.f32.mrf.mxu0  ;;  %v9180_v9 = vpop.f32.mrf.mxu1 }
 0x1d4   : > { %v7107_v2 = vpop.f32.mrf.mxu0 }
 0x1d5   : > { %v9178_v4 = vadd.f32 %v7107_v2, %v3793_v56 }
 0x1d6   : > { %v9182_v63 = vpop.f32.mrf.mxu0 }
 0x1d7   : > { %v7063_v54 = vpop.f32.mrf.mxu1 }
 0x1d8   : > { %v7108_v61 = vpop.f32.mrf.mxu0  ;;  %v3797_v62 = vadd.f32 %v7063_v54, %v9087_v43 }
 0x1d9   : > { %v9185_v50 = vadd.f32 %v7108_v61, %v3794_v3  ;;  %v9187_v28 = vpop.f32.mrf.mxu1 }
 0x1da   : > { %9438 = vst [vmem:[#allocation17_spill] sm:$0xff] %v9187_v28  ;;  %v9189_v12 = vpop.f32.mrf.mxu0 }
 0x1db   : > { %v7064_v33 = vpop.f32.mrf.mxu1 }
 0x1dc   : > { %v3798_v15 = vadd.f32 %v7064_v33, %v9093_v41 }
 0x1dd   : > { %v7111_v18 = vpop.f32.mrf.mxu0  ;;  %v9194_v22 = vpop.f32.mrf.mxu1 }
 0x1de   : > { %v9192_v56 = vadd.f32 %v7111_v18, %v3797_v62  ;;  %9440 = vst [vmem:[#allocation19_spill] sm:$0xff] %v9194_v22 }
 0x1df   : > { %v9196_v2 = vpop.f32.mrf.mxu0 }
 0x1e0   : > { %9439 = vst [vmem:[#allocation18_spill] sm:$0xff] %v9192_v56 }
 0x1e1   : > { %v7112_v57 = vpop.f32.mrf.mxu0 }
 0x1e2   : > { %v9199_v3 = vadd.f32 %v7112_v57, %v3798_v15  ;;  %v3772_v57 = vadd.f32 %v9110_v21, %v9015_v49 }
 0x1e3   : > { %v9203_v61 = vpop.f32.mrf.mxu0 }
 0x1e4   : > { %9441 = vst [vmem:[#allocation20_spill] sm:$0xff] %v9199_v3 }
 0x1e5   : > { %v7067_v10 = vpop.f32.mrf.mxu1  ;;  %v7115_v16 = vpop.f32.mrf.mxu0 }
 0x1e6   : > { %v3801_v43 = vadd.f32 %v7067_v10, %v9097_v0 }
 0x1e7   : > { %v9201_v54 = vpop.f32.mrf.mxu1  ;;  %v9210_v33 = vpop.f32.mrf.mxu0 }
 0x1e8   : > { %9442 = vst [vmem:[#allocation32_spill] sm:$0xff] %v9201_v54  ;;  %v9206_v18 = vadd.f32 %v7115_v16, %v3801_v43  ;;  %v4223_v16 = vadd.f32 %v9119_v37, %v3772_v57 }
 0x1e9   : > { %v7068_v28 = vpop.f32.mrf.mxu1  ;;  %v7116_v22 = vpop.f32.mrf.mxu0 }
 0x1ea   : > { %v3802_v41 = vadd.f32 %v7068_v28, %v9102_v19  ;;  %9443 = vst [vmem:[#allocation21_spill] sm:$0xff] %v9206_v18  ;;  %v3775_v28 = vadd.f32 %v9117_v6, %v9021_v44  ;;  %v9230_v44 = vld [vmem:[%s9351_s2] ss:$0 sm:$0xff] }
 0x1eb   : > { %v9208_v62 = vpop.f32.mrf.mxu1  ;;  %v9216_v15 = vpop.f32.mrf.mxu0 }
 0x1ec   : > { %9444 = vst [vmem:[#allocation12_spill] sm:$0xff] %v9208_v62  ;;  %v9214_v0 = vadd.f32 %v7116_v22, %v3802_v41  ;;  %9446 = vst [vmem:[#allocation34_spill] sm:$0xff] %v9216_v15  ;;  %v4226_v15 = vadd.f32 %v9126_v58, %v3775_v28 }
 0x1ed   : > { %v7135_v56 = vpop.f32.mrf.mxu1 }
 0x1ee   : > { %9445 = vst [vmem:[#allocation22_spill] sm:$0xff] %v9214_v0  ;;  %v5042_v43 = vadd.f32 %v7135_v56, %v9108_v17 }
 0x1ef   : > { %v4881_v10 = vpop.f32.mrf.mxu1 }
 0x1f0   : > { %v5040_v54 = vadd.f32 %v4881_v10, %v9112_v39  ;;  %v3776_v39 = vadd.f32 %v9124_v24, %v9027_v35 }
 0x1f1   : > { %v7136_v3 = vpop.f32.mrf.mxu1 }
 0x1f2   : > { %v5043_v49 = vadd.f32 %v7136_v3, %v9115_v14  ;;  %v4227_v58 = vadd.f32 %v9133_v45, %v3776_v39 }
 0x1f3   : > { %v7183_v19 = vpop.f32.mrf.mxu0  ;;  %v4884_v18 = vpop.f32.mrf.mxu1 }
 0x1f4   : > { %v5041_v22 = vadd.f32 %v4884_v18, %v4223_v16  ;;  %v5636_v10 = vadd.f32 %v7183_v19, %v5042_v43 }
 0x1f5   : > { %v5475_v62 = vpop.f32.mrf.mxu0  ;;  %v7139_v41 = vpop.f32.mrf.mxu1 }
 0x1f6   : > { %v5634_v21 = vadd.f32 %v5475_v62, %v5040_v54  ;;  %v5739_v62 = vadd.f32 %v9230_v44, %v5636_v10  ;;  %v5046_v24 = vadd.f32 %v7139_v41, %v9122_v1  ;;  %v3779_v10 = vadd.f32 %v9131_v38, %v9033_v40 }
 0x1f7   : > { %v7184_v0 = vpop.f32.mrf.mxu0  ;;  %v4897_v17 = vpop.f32.mrf.mxu1 }
 0x1f8   : > { %v5737_v6 = vadd.f32 %v9230_v44, %v5634_v21  ;;  %v5637_v37 = vadd.f32 %v7184_v0, %v5043_v49  ;;  %v5044_v3 = vadd.f32 %v4897_v17, %v4226_v15 }
 0x1f9   : > { %v5478_v14 = vpop.f32.mrf.mxu0  ;;  %v7140_v54 = vpop.f32.mrf.mxu1 }
 0x1fa   : > { %v5635_v56 = vadd.f32 %v5478_v14, %v5041_v22  ;;  %v5769_v19 = vmax.f32 %v5737_v6, 0.0  ;;  %v5740_v16 = vadd.f32 %v9230_v44, %v5637_v37  ;;  %v5047_v49 = vadd.f32 %v7140_v54, %v9129_v59 }
 0x1fb   : > { %v7187_v18 = vpop.f32.mrf.mxu0  ;;  %v4900_v57 = vpop.f32.mrf.mxu1  ;;  %v5771_v22 = vmax.f32 %v5739_v62, 0.0  ;;  %v3780_v62 = vadd.f32 %v9138_v23, %v9049_v47 }
 0x1fc   : > { %v5738_v35 = vadd.f32 %v9230_v44, %v5635_v56  ;;  %v5045_v15 = vadd.f32 %v4900_v57, %v4227_v58  ;;  %v5640_v45 = vadd.f32 %v7187_v18, %v5046_v24  ;;  %v5772_v41 = vmax.f32 %v5740_v16, 0.0 }
 0x1fd   : > { %v5491_v28 = vpop.f32.mrf.mxu0  ;;  %v4230_v18 = vadd.f32 %v9140_v48, %v3779_v10 }
 0x1fe   : > { %v5770_v43 = vmax.f32 %v5738_v35, 0.0  ;;  %v5638_v0 = vadd.f32 %v5491_v28, %v5044_v3  ;;  %v5743_v3 = vadd.f32 %v9230_v44, %v5640_v45 }
 0x1ff   : > { %v7188_v21 = vpop.f32.mrf.mxu0 }
 0x200   : > { %v5801_v17 = vadd.f32 %v5770_v43, %v5769_v19  ;;  %v5741_v39 = vadd.f32 %v9230_v44, %v5638_v0  ;;  %v5641_v14 = vadd.f32 %v7188_v21, %v5047_v49  ;;  %v5775_v43 = vmax.f32 %v5743_v3, 0.0 }
 0x201   : > { %v5494_v1 = vpop.f32.mrf.mxu0  ;;  %v4231_v21 = vadd.f32 %v9147_v32, %v3780_v62 }
 0x202   : > { %v5802_v6 = vadd.f32 %v5801_v17, %v5771_v22  ;;  %v5639_v37 = vadd.f32 %v5494_v1, %v5045_v15  ;;  %v5773_v35 = vmax.f32 %v5741_v39, 0.0  ;;  %v7143_v58 = vpop.f32.mrf.mxu1  ;;  %v5744_v38 = vadd.f32 %v9230_v44, %v5641_v14 }
 0x203   : > { %v7191_v56 = vpop.f32.mrf.mxu0  ;;  %v5050_v16 = vadd.f32 %v7143_v58, %v9136_v25 }
 0x204   : > { %v5803_v59 = vadd.f32 %v5802_v6, %v5772_v41  ;;  %v5742_v54 = vadd.f32 %v9230_v44, %v5639_v37  ;;  %v4913_v19 = vpop.f32.mrf.mxu1  ;;  %v5776_v17 = vmax.f32 %v5744_v38, 0.0  ;;  %v3783_v37 = vadd.f32 %v9145_v27, %v9053_v13 }
 0x205   : > { %v5507_v24 = vpop.f32.mrf.mxu0  ;;  %v5048_v28 = vadd.f32 %v4913_v19, %v4230_v18  ;;  %v5644_v45 = vadd.f32 %v7191_v56, %v5050_v16  ;;  %v3784_v18 = vadd.f32 %v9152_v31, %v9057_v29 }
 0x206   : > { %v5804_v40 = vadd.f32 %v5803_v59, %v5773_v35  ;;  %v5774_v57 = vmax.f32 %v5742_v54, 0.0  ;;  %v7144_v49 = vpop.f32.mrf.mxu1  ;;  %v4234_v58 = vadd.f32 %v9154_v51, %v3783_v37 }
 0x207   : > { %v7192_v15 = vpop.f32.mrf.mxu0  ;;  %v5642_v22 = vadd.f32 %v5507_v24, %v5048_v28  ;;  %v5051_v48 = vadd.f32 %v7144_v49, %v9143_v8  ;;  %v5747_v32 = vadd.f32 %v9230_v44, %v5644_v45 }
 0x208   : > { %v5805_v0 = vadd.f32 %v5804_v40, %v5774_v57  ;;  %v4916_v23 = vpop.f32.mrf.mxu1 }
 0x209   : > { %v5745_v39 = vadd.f32 %v9230_v44, %v5642_v22  ;;  %v5049_v10 = vadd.f32 %v4916_v23, %v4231_v21  ;;  %v5510_v41 = vpop.f32.mrf.mxu0  ;;  %v5645_v6 = vadd.f32 %v7192_v15, %v5051_v48  ;;  %v5779_v24 = vmax.f32 %v5747_v32, 0.0 }
 0x20a   : > { %v5806_v47 = vadd.f32 %v5805_v0, %v5775_v43  ;;  %v4235_v43 = vadd.f32 %v9161_v55, %v3784_v18 }
 0x20b   : > { %v5777_v25 = vmax.f32 %v5745_v39, 0.0  ;;  %v5643_v14 = vadd.f32 %v5510_v41, %v5049_v10  ;;  %v5748_v59 = vadd.f32 %v9230_v44, %v5645_v6 }
 0x20c   : > { %v5807_v1 = vadd.f32 %v5806_v47, %v5776_v17  ;;  %v3787_v47 = vadd.f32 %v9159_v11, %v9065_v53 }
 0x20d   : > { %v5746_v8 = vadd.f32 %v9230_v44, %v5643_v14  ;;  %v5780_v57 = vmax.f32 %v5748_v59, 0.0 }
 0x20e   : > { %v5808_v3 = vadd.f32 %v5807_v1, %v5777_v25  ;;  %v4238_v41 = vadd.f32 %v9168_v26, %v3787_v47  ;;  %v3788_v25 = vadd.f32 %v9166_v7, %v9071_v52 }
 0x20f   : > { %v7195_v35 = vpop.f32.mrf.mxu0  ;;  %v5778_v56 = vmax.f32 %v5746_v8, 0.0 }
 0x210   : > { %v7147_v54 = vpop.f32.mrf.mxu1 }
 0x211   : > { %v5523_v62 = vpop.f32.mrf.mxu0  ;;  %v5809_v40 = vadd.f32 %v5808_v3, %v5778_v56  ;;  %v5054_v13 = vadd.f32 %v7147_v54, %v9150_v30  ;;  %v4239_v56 = vadd.f32 %v9175_v34, %v3788_v25 }
 0x212   : > { %v4929_v38 = vpop.f32.mrf.mxu1 }
 0x213   : > { %v5052_v27 = vadd.f32 %v4929_v38, %v4234_v58  ;;  %v5810_v19 = vadd.f32 %v5809_v40, %v5779_v24  ;;  %v7196_v28 = vpop.f32.mrf.mxu0  ;;  %v5648_v21 = vadd.f32 %v7195_v35, %v5054_v13 }
 0x214   : > { %v7148_v16 = vpop.f32.mrf.mxu1 }
 0x215   : > { %v5646_v0 = vadd.f32 %v5523_v62, %v5052_v27  ;;  %v5055_v49 = vadd.f32 %v7148_v16, %v9157_v20  ;;  %v5811_v51 = vadd.f32 %v5810_v19, %v5780_v57  ;;  %v5526_v22 = vpop.f32.mrf.mxu0  ;;  %v5751_v23 = vadd.f32 %v9230_v44, %v5648_v21 }
 0x216   : > { %v4932_v15 = vpop.f32.mrf.mxu1 }
 0x217   : > { %v5749_v29 = vadd.f32 %v9230_v44, %v5646_v0  ;;  %v5053_v31 = vadd.f32 %v4932_v15, %v4235_v43  ;;  %v5649_v17 = vadd.f32 %v7196_v28, %v5055_v49  ;;  %v5783_v6 = vmax.f32 %v5751_v23, 0.0 }
 0x218   : > { %v3792_v0 = vadd.f32 %v9180_v9, %v9084_v36 }
 0x219   : > { %v5781_v48 = vmax.f32 %v5749_v29, 0.0  ;;  %v5647_v30 = vadd.f32 %v5526_v22, %v5053_v31  ;;  %v5752_v20 = vadd.f32 %v9230_v44, %v5649_v17 }
 0x21a   : > { %v4243_v17 = vadd.f32 %v9189_v12, %v3792_v0  ;;  %v9453_v0 = vld [vmem:[#allocation15_spill] sm:$0xff] }
 0x21b   : > { %v5812_v45 = vadd.f32 %v5811_v51, %v5781_v48  ;;  %v5750_v55 = vadd.f32 %v9230_v44, %v5647_v30  ;;  %v5784_v53 = vmax.f32 %v5752_v20, 0.0 }
 0x21d   : > { %v5782_v39 = vmax.f32 %v5750_v55, 0.0  ;;  %v7199_v10 = vpop.f32.mrf.mxu0 }
 0x21e   : > { %v7151_v1 = vpop.f32.mrf.mxu1 }
 0x21f   : > { %v5813_v14 = vadd.f32 %v5812_v45, %v5782_v39  ;;  %v5539_v37 = vpop.f32.mrf.mxu0  ;;  %v5058_v3 = vadd.f32 %v7151_v1, %v9164_v46  ;;  %v3791_v46 = vadd.f32 %v9173_v5, %v9078_v60  ;;  %v9447_v1 = vld [vmem:[#allocation13_spill] sm:$0xff] }
 0x220   : > { %v4945_v32 = vpop.f32.mrf.mxu1 }
 0x221   : > { %v5814_v11 = vadd.f32 %v5813_v14, %v5783_v6  ;;  %v5056_v8 = vadd.f32 %v4945_v32, %v4238_v41  ;;  %v7200_v59 = vpop.f32.mrf.mxu0  ;;  %v5652_v62 = vadd.f32 %v7199_v10, %v5058_v3  ;;  %v4242_v43 = vadd.f32 %v9182_v63, %v3791_v46  ;;  %v9450_v3 = vld [vmem:[#allocation19_spill] sm:$0xff]  ;;  %v9452_v46 = vld [vmem:[#allocation20_spill] sm:$0xff] }
 0x222   : > { %v7152_v35 = vpop.f32.mrf.mxu1 }
 0x223   : > { %v5650_v54 = vadd.f32 %v5539_v37, %v5056_v8  ;;  %v5815_v58 = vadd.f32 %v5814_v11, %v5784_v53  ;;  %v5059_v26 = vadd.f32 %v7152_v35, %v9171_v42  ;;  %v5542_v24 = vpop.f32.mrf.mxu0  ;;  %v5755_v27 = vadd.f32 %v9230_v44, %v5652_v62  ;;  %v9449_v11 = vld [vmem:[#allocation14_spill] sm:$0xff] }
 0x224   : > { %v4948_v18 = vpop.f32.mrf.mxu1  ;;  %v3796_v8 = vadd.f32 %v9450_v3, %v9449_v11 }
 0x225   : > { %v5753_v52 = vadd.f32 %v9230_v44, %v5650_v54  ;;  %v5057_v7 = vadd.f32 %v4948_v18, %v4239_v56  ;;  %v5653_v38 = vadd.f32 %v7200_v59, %v5059_v26  ;;  %v5787_v49 = vmax.f32 %v5755_v27, 0.0  ;;  %v9451_v18 = vld [vmem:[#allocation18_spill] sm:$0xff] }
 0x227   : > { %v5785_v40 = vmax.f32 %v5753_v52, 0.0  ;;  %v5651_v13 = vadd.f32 %v5542_v24, %v5057_v7  ;;  %v5756_v19 = vadd.f32 %v9230_v44, %v5653_v38 }
 0x229   : > { %v5816_v57 = vadd.f32 %v5815_v58, %v5785_v40  ;;  %v5754_v34 = vadd.f32 %v9230_v44, %v5651_v13  ;;  %v5788_v60 = vmax.f32 %v5756_v19, 0.0  ;;  %v4247_v40 = vadd.f32 %v9203_v61, %v3796_v8 }
 0x22b   : > { %v5786_v42 = vmax.f32 %v5754_v34, 0.0  ;;  %v7203_v16 = vpop.f32.mrf.mxu0 }
 0x22c   : > { %v7155_v28 = vpop.f32.mrf.mxu1 }
 0x22d   : > { %v5817_v51 = vadd.f32 %v5816_v57, %v5786_v42  ;;  %v5555_v15 = vpop.f32.mrf.mxu0  ;;  %v5062_v29 = vadd.f32 %v7155_v28, %v9178_v4  ;;  %v9448_v4 = vld [vmem:[#allocation17_spill] sm:$0xff] }
 0x22e   : > { %v4961_v21 = vpop.f32.mrf.mxu1  ;;  %v3795_v41 = vadd.f32 %v9448_v4, %v9447_v1  ;;  %v9458_v4 = vld [vmem:[#allocation34_spill] sm:$0xff] }
 0x22f   : > { %v5818_v5 = vadd.f32 %v5817_v51, %v5787_v49  ;;  %v5060_v31 = vadd.f32 %v4961_v21, %v4242_v43  ;;  %v7204_v48 = vpop.f32.mrf.mxu0  ;;  %v5656_v45 = vadd.f32 %v7203_v16, %v5062_v29  ;;  %v9454_v49 = vld [vmem:[#allocation32_spill] sm:$0xff] }
 0x230   : > { %v7156_v22 = vpop.f32.mrf.mxu1  ;;  %v4246_v53 = vadd.f32 %v9196_v2, %v3795_v41  ;;  %v3799_v51 = vadd.f32 %v9454_v49, %v9453_v0 }
 0x231   : > { %v5654_v30 = vadd.f32 %v5555_v15, %v5060_v31  ;;  %v5819_v47 = vadd.f32 %v5818_v5, %v5788_v60  ;;  %v5063_v63 = vadd.f32 %v7156_v22, %v9185_v50  ;;  %v5558_v55 = vpop.f32.mrf.mxu0  ;;  %v5759_v25 = vadd.f32 %v9230_v44, %v5656_v45 }
 0x232   : > { %v4964_v23 = vpop.f32.mrf.mxu1  ;;  %v4250_v22 = vadd.f32 %v9210_v33, %v3799_v51 }
 0x233   : > { %v5757_v36 = vadd.f32 %v9230_v44, %v5654_v30  ;;  %v5061_v9 = vadd.f32 %v4964_v23, %v4243_v17  ;;  %v5657_v39 = vadd.f32 %v7204_v48, %v5063_v63  ;;  %v5791_v35 = vmax.f32 %v5759_v25, 0.0  ;;  %v9455_v48 = vld [vmem:[#allocation16_spill] sm:$0xff] }
 0x234   : > { %v9456_v17 = vld [vmem:[#allocation12_spill] sm:$0xff] }
 0x235   : > { %v5789_v20 = vmax.f32 %v5757_v36, 0.0  ;;  %v5655_v10 = vadd.f32 %v5558_v55, %v5061_v9  ;;  %v5760_v14 = vadd.f32 %v9230_v44, %v5657_v39  ;;  %v3800_v30 = vadd.f32 %v9456_v17, %v9455_v48  ;;  %v9457_v55 = vld [vmem:[#allocation21_spill] sm:$0xff] }
 0x237   : > { %v5820_v6 = vadd.f32 %v5819_v47, %v5789_v20  ;;  %v5758_v12 = vadd.f32 %v9230_v44, %v5655_v10  ;;  %v5792_v58 = vmax.f32 %v5760_v14, 0.0  ;;  %v4251_v41 = vadd.f32 %v9458_v4, %v3800_v30 }
 0x239   : > { %v5790_v50 = vmax.f32 %v5758_v12, 0.0  ;;  %v7207_v37 = vpop.f32.mrf.mxu0  ;;  %v9459_v12 = vld [vmem:[#allocation22_spill] sm:$0xff] }
 0x23a   : > { %v7159_v32 = vpop.f32.mrf.mxu1 }
 0x23b   : > { %v5821_v59 = vadd.f32 %v5820_v6, %v5790_v50  ;;  %v5571_v56 = vpop.f32.mrf.mxu0  ;;  %v5066_v62 = vadd.f32 %v7159_v32, %v9451_v18 }
 0x23c   : > { %v4977_v54 = vpop.f32.mrf.mxu1 }
 0x23d   : > { %v5822_v26 = vadd.f32 %v5821_v59, %v5791_v35  ;;  %v5064_v52 = vadd.f32 %v4977_v54, %v4246_v53  ;;  %v7208_v24 = vpop.f32.mrf.mxu0  ;;  %v5660_v57 = vadd.f32 %v7207_v37, %v5066_v62 }
 0x23e   : > { %v7160_v7 = vpop.f32.mrf.mxu1 }
 0x23f   : > { %v5658_v38 = vadd.f32 %v5571_v56, %v5064_v52  ;;  %v5823_v13 = vadd.f32 %v5822_v26, %v5792_v58  ;;  %v5067_v2 = vadd.f32 %v7160_v7, %v9452_v46  ;;  %v5574_v42 = vpop.f32.mrf.mxu0  ;;  %v5763_v15 = vadd.f32 %v9230_v44, %v5660_v57 }
 0x240   : > { %v4980_v27 = vpop.f32.mrf.mxu1 }
 0x241   : > { %v5761_v34 = vadd.f32 %v9230_v44, %v5658_v38  ;;  %v5065_v19 = vadd.f32 %v4980_v27, %v4247_v40  ;;  %v5661_v28 = vadd.f32 %v7208_v24, %v5067_v2  ;;  %v5795_v47 = vmax.f32 %v5763_v15, 0.0 }
 0x243   : > { %v5793_v16 = vmax.f32 %v5761_v34, 0.0  ;;  %v5659_v43 = vadd.f32 %v5574_v42, %v5065_v19  ;;  %v5764_v60 = vadd.f32 %v9230_v44, %v5661_v28 }
 0x245   : > { %v5824_v21 = vadd.f32 %v5823_v13, %v5793_v16  ;;  %v5762_v61 = vadd.f32 %v9230_v44, %v5659_v43  ;;  %v5796_v36 = vmax.f32 %v5764_v60, 0.0 }
 0x247   : > { %v5794_v5 = vmax.f32 %v5762_v61, 0.0  ;;  %v7211_v29 = vpop.f32.mrf.mxu0 }
 0x248   : > { %v7163_v31 = vpop.f32.mrf.mxu1 }
 0x249   : > { %v5825_v63 = vadd.f32 %v5824_v21, %v5794_v5  ;;  %v5587_v23 = vpop.f32.mrf.mxu0  ;;  %v5070_v20 = vadd.f32 %v7163_v31, %v9457_v55 }
 0x24a   : > { %v4993_v45 = vpop.f32.mrf.mxu1 }
 0x24b   : > { %v5826_v9 = vadd.f32 %v5825_v63, %v5795_v47  ;;  %v5068_v39 = vadd.f32 %v4993_v45, %v4250_v22  ;;  %v7212_v1 = vpop.f32.mrf.mxu0  ;;  %v5664_v50 = vadd.f32 %v7211_v29, %v5070_v20 }
 0x24c   : > { %v7164_v10 = vpop.f32.mrf.mxu1 }
 0x24d   : > { %v5662_v25 = vadd.f32 %v5587_v23, %v5068_v39  ;;  %v5827_v6 = vadd.f32 %v5826_v9, %v5796_v36  ;;  %v5071_v33 = vadd.f32 %v7164_v10, %v9459_v12  ;;  %v5590_v53 = vpop.f32.mrf.mxu0  ;;  %v5767_v35 = vadd.f32 %v9230_v44, %v5664_v50 }
 0x24e   : > { %v4996_v14 = vpop.f32.mrf.mxu1 }
 0x24f   : > { %v5765_v37 = vadd.f32 %v9230_v44, %v5662_v25  ;;  %v5069_v32 = vadd.f32 %v4996_v14, %v4251_v41  ;;  %v5665_v3 = vadd.f32 %v7212_v1, %v5071_v33  ;;  %v5799_v26 = vmax.f32 %v5767_v35, 0.0 }
 0x251   : > { %v5797_v11 = vmax.f32 %v5765_v37, 0.0  ;;  %v5663_v8 = vadd.f32 %v5590_v53, %v5069_v32  ;;  %v5768_v54 = vadd.f32 %v9230_v44, %v5665_v3 }
 0x253   : > { %v5828_v59 = vadd.f32 %v5827_v6, %v5797_v11  ;;  %v5766_v56 = vadd.f32 %v9230_v44, %v5663_v8  ;;  %v5800_v62 = vmax.f32 %v5768_v54, 0.0 }
 0x255   : > { %v5798_v58 = vmax.f32 %v5766_v56, 0.0 }
 0x257   : > { %v5829_v18 = vadd.f32 %v5828_v59, %v5798_v58 }
 0x259   : > { %v5830_v52 = vadd.f32 %v5829_v18, %v5799_v26 }
 0x25b   : > { %v5831_v7 = vadd.f32 %v5830_v52, %v5800_v62 }
 0x25d   : > { %v5832_v24 = vrot.slane %v5831_v7, 4 }
 0x25f   : > { %v5833_v40 = vadd.f32 %v5832_v24, %v5831_v7 }
 0x261   : > { %v5834_v38 = vrot.slane %v5833_v40, 2 }
 0x263   : > { %v5835_v13 = vadd.f32 %v5834_v38, %v5833_v40 }
 0x265   : > { %v5836_v46 = vrot.slane %v5835_v13, 1 }
 0x267   : > { %v5837_v2 = vadd.f32 %v5836_v46, %v5835_v13 }
 0x269   : > { %v5838_v27 = vmul.f32 0.00390625, %v5837_v2 }
 0x26b   : > { %5839 = vst [vmem:[%s162_s19] sm:$0x1] %v5838_v27 }
 0x26c   : > { %7402 = shalt.err (!%p7399_p3)
}
 0x26d   : > { %s7403_s4 = scalar_lea.hbm %s5851_s26, 16  ;;  %s7407_s8 = scalar_lea.hbm %s9352_s3, 32 }
 0x26e   : > { %p7404_p4 = scmp.ne.s32.totalorder %s5851_s26, %s7403_s4  ;;  %p7408_p9 = scmp.lt.s32.totalorder %s5851_s26, %s9352_s3 }
 0x26f   : > { %p7409_p10 = scmp.lt.s32.totalorder %s7407_s8, %s7403_s4 }
 0x270   : > { %p7405_p7 = pnand %p7404_p4, %p7510_p5 }
 0x271   : > { %p7410_p11 = por %p7409_p10, %p7408_p9 }
 0x272   : > { %p7406_p8 = pneg %p7405_p7 }
 0x274   : > { %p7411_p12 = pnand %p7410_p11, %p7406_p8 }
 0x276   : > { %7414 = shalt.err (!%p7411_p12)
}
 0x277   : > { %7230 = dma.vmem_to_hbm [thread:$0]  (%p7510_p5), %s5854_s20, 16, %s5851_s26, %s5841_s27  }
 0x278 PF: > { %p7236_p13 = scmp.ge.s32.totalorder %s7449_s15, 2  ;;  %s5865_s10 = sand.u32 1, %s7437_s12  }
 0x279   : > { %s5866_s11 = scalar_lea.sflag [#allocation4], %s5865_s10 }
 0x27a   : > { %p7233_p0 = pnand %p7236_p13, %p7514_p6 }
 0x27c   : > { %p7234_p1 = pneg %p7233_p0 }
 0x27e   : > { %7432 = dma.done.wait (%p7234_p1), %s5866_s11, 16  }
 0x27f   : > { %7434 = vsyncadd (%p7234_p1), %s5866_s11, 4294967280  ;;  %p13_p2 = scmp.ge.s32.totalorder %s7497_s18, 4   ;;  %s9460_s12 = smov %s7441_s13 }
 0x280   : > { %s9461_s13 = smov %s7445_s14  ;;  %s9462_s14 = smov %s7508_s21 }
 0x281   : > { %s9463_s15 = smov %s7497_s18  ;;  %15 = sbr.rel (!%p13_p2) target bundleno = 3 (0x3), region = 77 }
 0x286   :  { %5870 = vsyncpa [#allocation4], 1 }
 0x287   :  { %5872 = vsyncpa [#allocation4 + $0x1], 1 }

// kernel: backbone_without_classifier.2
= control target key start
LH: loop header
LB: loop body
LE: loop exit
PB: predicated region body
PF: predicated region fallthrough
CT: control target
= control target key end

     0   :  { %s7659_s12 = smov 0   ;;  %s9461_s0 = inlined_call_operand.vmem [shape: bf16[2,18,18,128], index: 0, kind: input, shape index: {}]   ;;  %s9462_s1 = inlined_call_operand.vmem [shape: bf16[9,128,128], index: 1, kind: input, shape index: {}]   ;;  %s9463_s2 = inlined_call_operand.vmem [shape: f32[1,128], index: 2, kind: input, shape index: {}]   ;;  %s9464_s3 = inlined_call_operand.vmem [shape: bf16[2,16,16,128], index: 3, kind: output, shape index: {}]  }
   0x1 LB: > { %s6019_s13 = sadd.s32 4294967295, %s7637_s12   ;;  %p6023_p0 = scmp.ge.s32.totalorder %s7637_s12, 1  ;;  %s7637_s12 = sphi %s7659_s12, %s13_s12  }
   0x2   : > { %p137_p1 = scmp.lt.s32.totalorder %s7637_s12, 3 }
   0x4   : > { %p138_p2 = pnand %p6023_p0, %p137_p1 }
   0x6   : > { %141 = sbr.rel (%p138_p2) target bundleno = 594 (0x252), region = 32 }
   0xb   : > { %v7511_v0 = vld [vmem:[%s9462_s1 + $0x38] sm:$0xff]   ;;  %p161_p3 = scmp.lt.s32.totalorder %s6019_s13, 1  ;;  %v7512_v1 = vld [vmem:[%s9462_s1 + $0x30] sm:$0xff]   ;;  %v7513_v2 = vld [vmem:[%s9462_s1 + $0x28] sm:$0xff]   ;;  %vm1474_vm0 = vcmask 1042432   ;;  %vm1475_vm1 = vcmask 1046532  }
   0xc   : > { %7054 = vmatprep.subr.bf16.mxu0 %v7511_v0  ;;  %7486 = vmatprep.subr.bf16.mxu1 %v7511_v0  ;;  %v7514_v3 = vld [vmem:[%s9462_s1 + $0x20] sm:$0xff]   ;;  %v7515_v6 = vld [vmem:[%s9462_s1 + $0x18] sm:$0xff]   ;;  %v7516_v7 = vld [vmem:[%s9462_s1 + $0x10] sm:$0xff]   ;;  %vm605_vm2 = vsmask.f32 3328 }
   0xd   : > { %s9545_s13 = smov (!%p161_p3, %s6019_s13), 1  ;;  %7055 = vmatpush3.bf16.msra.mxu0 %v7511_v0  ;;  %7494 = vmatpush3.bf16.msra.mxu1 %v7511_v0  ;;  %v7517_v8 = vld [vmem:[%s9462_s1 + $0x8] sm:$0xff]   ;;  %v7518_v9 = vld [vmem:[%s9462_s1] sm:$0xff]   ;;  %v7523_v10 = vld [vmem:[%s9462_s1 + $0x78] sm:$0xff]   ;;  %vm606_vm3 = vsmask.f32 7440 }
   0xe   : > { %7056 = vmatprep.subr.bf16.mxu0 %v7512_v1  ;;  %7487 = vmatprep.subr.bf16.mxu1 %v7512_v1  ;;  %s7502_s20 = smul.u32 216, %s9545_s13  ;;  %v7524_v12 = vld [vmem:[%s9462_s1 + $0xb8] sm:$0xff]   ;;  %v7525_v14 = vld [vmem:[%s9462_s1 + $0x70] sm:$0xff]   ;;  %v7531_v18 = vld [vmem:[%s9462_s1 + $0x68] sm:$0xff]   ;;  %s6710_s18 = sshll.u32 %s9545_s13, 7 }
   0xf   : > { %v7526_v15 = vld [vmem:[%s9462_s1 + $0xb0] sm:$0xff]   ;;  %v7532_v20 = vld [vmem:[%s9462_s1 + $0xa8] sm:$0xff]   ;;  %v7533_v22 = vld [vmem:[%s9462_s1 + $0x60] sm:$0xff]   ;;  %s9384_s13 = scalar_lea.vmem %s9464_s3, %s6710_s18 }
  0x10   : > { %s7682_s23 = scalar_lea.vmem %s9461_s0, %s7502_s20  ;;  %v7534_v23 = vld [vmem:[%s9462_s1 + $0xa0] sm:$0xff]   ;;  %v7739_v31 = vld [vmem:[%s9462_s1 + $0x58] sm:$0xff]   ;;  %vm7753_vm4 = vmor %vm1474_vm0, %vm1475_vm1 }
  0x11   : > { %7057 = vmatpush3.bf16.msra.mxu0 %v7512_v1  ;;  %7495 = vmatpush3.bf16.msra.mxu1 %v7512_v1  ;;  %v7519_v4 = vld [vmem:[%s7682_s23] sm:$0xff]   ;;  %v7521_v11 = vld [vmem:[%s7682_s23 + $0xc] sm:$0xff]   ;;  %v7527_v16 = vld [vmem:[%s7682_s23 + $0x18] sm:$0xff]  }
  0x12   : > { %7058 = vmatprep.subr.bf16.mxu0 %v7513_v2  ;;  %7488 = vmatprep.subr.bf16.mxu1 %v7513_v2  ;;  %v7520_v5 = vld [vmem:[%s7682_s23 + $0x60] sm:$0xff]   ;;  %v7522_v13 = vld [vmem:[%s7682_s23 + $0x6c] sm:$0xff]   ;;  %v7528_v17 = vld [vmem:[%s7682_s23 + $0x78] sm:$0xff]  }
  0x13   : > { %7070 = vmatprep.mubr.bf16.mxu0 %v7519_v4  ;;  %7086 = vmatprep.mubr.bf16.mxu1 %v7520_v5  ;;  %v7529_v19 = vld [vmem:[%s7682_s23 + $0x24] sm:$0xff]   ;;  %v7535_v24 = vld [vmem:[%s7682_s23 + $0x30] sm:$0xff]   ;;  %v557_v26 = vld [vmem:[%s7682_s23] sm:$0xf] }
  0x14   : > { %v7530_v21 = vld [vmem:[%s7682_s23 + $0x84] sm:$0xff]   ;;  %v7536_v25 = vld [vmem:[%s7682_s23 + $0x90] sm:$0xff]   ;;  %v609_v29 = vshrl.u32 %v557_v26, 16  ;;  %v612_v30 = vshll.u32 %v557_v26, 16  ;;  %v7744_v32 = vld [vmem:[%s9462_s1 + $0x98] sm:$0xff]  }
  0x15   : > { %7059 = vmatpush3.bf16.msra.mxu0 %v7513_v2  ;;  %7496 = vmatpush3.bf16.msra.mxu1 %v7513_v2  ;;  %v558_v27 = vld [vmem:[%s7682_s23 + $0x4] sm:$0xf]  ;;  %v559_v28 = vld [vmem:[%s7682_s23 + $0x8] sm:$0x1]  ;;  %v1378_v36 = vld [vmem:[%s7682_s23] sm:$0xe] }
  0x16   : > { %7060 = vmatprep.subr.bf16.mxu0 %v7514_v3  ;;  %7489 = vmatprep.subr.bf16.mxu1 %v7514_v3  ;;  %v618_v33 = vshll.u32 %v558_v27, 16  ;;  %v622_v34 = vshrl.u32 %v558_v27, 16  ;;  %v628_v35 = vshll.u32 %v559_v28, 16  ;;  %v611_v37 = vrot.slane %v609_v29, 4  ;;  %v1379_v39 = vld [vmem:[%s7682_s23 + $0x4] sm:$0xf]  ;;  %vm7772_vm5 = vmor %vm605_vm2, %vm606_vm3 }
  0x17   : > { %v614_v38 = vrot.slane %v612_v30, 5  ;;  %v1380_v40 = vld [vmem:[%s7682_s23 + $0x8] sm:$0x1]  ;;  %v7537_v41 = vld [vmem:[%s7682_s23 + $0x3c] sm:$0xff]   ;;  %v6091_v47 = vrot.slane %v1378_v36, 9  ;;  %v1479_v50 = vrot.slane %v1379_v39, 5 }
  0x18   : > { %v7538_v42 = vld [vmem:[%s7682_s23 + $0x9c] sm:$0xff]   ;;  %v620_v43 = vrot.slane %v618_v33, 5  ;;  %v624_v44 = vrot.slane %v622_v34, 4  ;;  %v630_v45 = vrot.slane %v628_v35, 5  ;;  %v560_v48 = vld [vmem:[%s7682_s23 + $0xc] sm:$0xf] }
  0x19   : > { %7061 = vmatpush3.bf16.msra.mxu0 %v7514_v3  ;;  %7497 = vmatpush3.bf16.msra.mxu1 %v7514_v3  ;;  %v615_v49 = vor.u32 %v614_v38, %v611_v37  ;;  %v1482_v51 = vrot.slane %v1380_v40, 5  ;;  %v561_v52 = vld [vmem:[%s7682_s23 + $0x10] sm:$0xf]  ;;  %v562_v53 = vld [vmem:[%s7682_s23 + $0x14] sm:$0x1]  ;;  %v633_v58 = vshrl.u32 %v560_v48, 16  ;;  %v7781_v1 = vsel %vm7753_vm4, %v6091_v47, %v1479_v50 }
  0x1a   : > { %7062 = vmatprep.subr.bf16.mxu0 %v7515_v6  ;;  %7490 = vmatprep.subr.bf16.mxu1 %v7515_v6  ;;  %v7763_v54 = vld [vmem:[%s9462_s1 + $0x50] sm:$0xff]   ;;  %v625_v57 = vor.u32 %v624_v44, %v620_v43  ;;  %v636_v59 = vshll.u32 %v560_v48, 16  ;;  %v642_v60 = vshll.u32 %v561_v52, 16  ;;  %v1381_v61 = vld [vmem:[%s7682_s23 + $0xc] sm:$0xe]  ;;  %v1481_v2 = vrot.slane %v1479_v50, 4 }
  0x1b   : > { %v7768_v55 = vld [vmem:[%s9462_s1 + $0x90] sm:$0xff]   ;;  %v7543_v62 = vld [vmem:[%s7682_s23 + $0x48] sm:$0xff]   ;;  %v616_v0 = vrot.slane %v615_v49, 4  ;;  %v646_v3 = vshrl.u32 %v561_v52, 16  ;;  %v565_v29 = vld [vmem:[%s7682_s23 + $0x20] sm:$0x1] }
  0x1c   : > { %v7544_v63 = vld [vmem:[%s7682_s23 + $0xa8] sm:$0xff]   ;;  %v1382_v4 = vld [vmem:[%s7682_s23 + $0x10] sm:$0xf]  ;;  %v626_v5 = vrot.slane %v625_v57, 4  ;;  %v7545_v26 = vld [vmem:[%s7682_s23 + $0x54] sm:$0xff]   ;;  %v676_v48 = vshll.u32 %v565_v29, 16 }
  0x1d   : > { %7063 = vmatpush3.bf16.msra.mxu0 %v7515_v6  ;;  %7498 = vmatpush3.bf16.msra.mxu1 %v7515_v6  ;;  %v635_v6 = vrot.slane %v633_v58, 4  ;;  %v1384_v37 = vld [vmem:[%s7682_s23 + $0x18] sm:$0xe]  ;;  %v7549_v38 = vld [vmem:[%s9462_s1 + $0x40] sm:$0xff]   ;;  %v567_v57 = vld [vmem:[%s7682_s23 + $0x28] sm:$0xf] }
  0x1e   : > { %7064 = vmatprep.subr.bf16.mxu0 %v7516_v7  ;;  %7491 = vmatprep.subr.bf16.mxu1 %v7516_v7  ;;  %v1386_v49 = vld [vmem:[%s7682_s23 + $0x20] sm:$0x1]  ;;  %v566_v50 = vld [vmem:[%s7682_s23 + $0x24] sm:$0xf]  ;;  %v568_v58 = vld [vmem:[%s7682_s23 + $0x2c] sm:$0x1] }
  0x1f   : > { %v569_v29 = vld [vmem:[%s7682_s23 + $0x30] sm:$0xf] }
  0x21   : > { %7065 = vmatpush3.bf16.msra.mxu0 %v7516_v7  ;;  %7499 = vmatpush3.bf16.msra.mxu1 %v7516_v7  ;;  %v638_v7 = vrot.slane %v636_v59, 5  ;;  %v678_v59 = vrot.slane %v676_v48, 5 }
  0x22   : > { %7066 = vmatprep.subr.bf16.mxu0 %v7517_v8  ;;  %7492 = vmatprep.subr.bf16.mxu1 %v7517_v8 }
  0x25   : > { %7067 = vmatpush3.bf16.msra.mxu0 %v7517_v8  ;;  %7500 = vmatpush3.bf16.msra.mxu1 %v7517_v8  ;;  %v644_v8 = vrot.slane %v642_v60, 5  ;;  %v6093_v60 = vrot.slane %v1384_v37, 9 }
  0x26   : > { %7068 = vmatprep.subr.bf16.mxu0 %v7518_v9  ;;  %7493 = vmatprep.subr.bf16.mxu1 %v7518_v9 }
  0x29   : > { %7069 = vmatpush3.bf16.msra.mxu0 %v7518_v9  ;;  %7501 = vmatpush3.bf16.msra.mxu1 %v7518_v9  ;;  %v1383_v9 = vld [vmem:[%s7682_s23 + $0x14] sm:$0x1] }
  0x2a   : > { %7102 = vmatprep.subr.bf16.mxu1 %v7523_v10  ;;  %7150 = vmatprep.subr.bf16.mxu0 %v7524_v12  ;;  %v1489_v28 = vrot.slane %v1383_v9, 5  ;;  %v690_v9 = vshll.u32 %v567_v57, 16 }
  0x2c   : > { %7071 = vmatmul.mubr.bf16.vlgmr.msra.gmra.mxu0 %v7521_v11  ;;  %7087 = vmatmul.mubr.bf16.vlgmr.msra.gmra.mxu1 %v7522_v13  ;;  %v7791_v11 = vsel %vm7753_vm4, %v1481_v2, %v1482_v51  ;;  %v652_v13 = vshll.u32 %v562_v53, 16  ;;  %v7550_v51 = vld [vmem:[%s9462_s1 + $0x80] sm:$0xff]  }
  0x2d   : > { %7103 = vmatpush3.bf16.msra.mxu1 %v7523_v10  ;;  %7151 = vmatpush3.bf16.msra.mxu0 %v7524_v12  ;;  %v621_v10 = vsel %vm7772_vm5, %v616_v0, %v620_v43  ;;  %v648_v12 = vrot.slane %v646_v3, 4  ;;  %v1385_v43 = vld [vmem:[%s7682_s23 + $0x1c] sm:$0xf]  ;;  %v681_v3 = vshrl.u32 %v566_v50, 16 }
  0x2e   : > { %7104 = vmatprep.subr.bf16.mxu1 %v7525_v14  ;;  %7152 = vmatprep.subr.bf16.mxu0 %v7526_v15 }
  0x2f   : > { %7074 = vmatprep.mubr.bf16.mxu0 %v7527_v16  ;;  %7090 = vmatprep.mubr.bf16.mxu1 %v7528_v17  ;;  %v631_v16 = vsel %vm7772_vm5, %v626_v5, %v630_v45  ;;  %v6123_v17 = vcombine.low %v7781_v1, %v7791_v11  ;;  %v1388_v5 = vld [vmem:[%s7682_s23 + $0x28] sm:$0xf] }
  0x31   : > { %7105 = vmatpush3.bf16.msra.mxu1 %v7525_v14  ;;  %7153 = vmatpush3.bf16.msra.mxu0 %v7526_v15  ;;  %v7796_v14 = vld [vmem:[%s9462_s1 + $0x48] sm:$0xff]  }
  0x32   : > { %7106 = vmatprep.subr.bf16.mxu1 %v7531_v18  ;;  %7154 = vmatprep.subr.bf16.mxu0 %v7532_v20  ;;  %v7801_v15 = vld [vmem:[%s9462_s1 + $0x88] sm:$0xff]  }
  0x34   : > { %7075 = vmatmul.mubr.bf16.gmra.mxu0 %v7529_v19  ;;  %7091 = vmatmul.mubr.bf16.gmra.mxu1 %v7530_v21  ;;  %v6092_v19 = vrot.slane %v1381_v61, 9  ;;  %v649_v21 = vor.u32 %v648_v12, %v644_v8  ;;  %v1493_v61 = vrot.slane %v1385_v43, 5  ;;  %v1389_v12 = vld [vmem:[%s7682_s23 + $0x2c] sm:$0x1] }
  0x35   : > { %7107 = vmatpush3.bf16.msra.mxu1 %v7531_v18  ;;  %7155 = vmatpush3.bf16.msra.mxu0 %v7532_v20  ;;  %v639_v18 = vor.u32 %v638_v7, %v635_v6  ;;  %v7809_v20 = vcombine.low %v621_v10, %v631_v16  ;;  %v7551_v6 = vld [vmem:[%s9462_s1 + $0xf8] sm:$0xff]   ;;  %v694_v10 = vshrl.u32 %v567_v57, 16  ;;  %v683_v16 = vrot.slane %v681_v3, 4 }
  0x36   : > { %7108 = vmatprep.subr.bf16.mxu1 %v7533_v22  ;;  %7156 = vmatprep.subr.bf16.mxu0 %v7534_v23  ;;  %v650_v33 = vrot.slane %v649_v21, 4  ;;  %v1494_v7 = vsel %vm7753_vm4, %v6093_v60, %v1493_v61  ;;  %v692_v21 = vrot.slane %v690_v9, 5  ;;  %v573_v60 = vld [vmem:[%s7682_s23 + $0x40] sm:$0xf] }
  0x37   : > { %7078 = vmatprep.mubr.bf16.mxu0 %v7535_v24  ;;  %7094 = vmatprep.mubr.bf16.mxu1 %v7536_v25  ;;  %v563_v24 = vld [vmem:[%s7682_s23 + $0x18] sm:$0xf]  ;;  %v564_v25 = vld [vmem:[%s7682_s23 + $0x1c] sm:$0xf]  ;;  %v640_v27 = vrot.slane %v639_v18, 4 }
  0x38   : > { %v657_v30 = vshrl.u32 %v563_v24, 16  ;;  %v666_v36 = vshll.u32 %v564_v25, 16  ;;  %v1394_v9 = vld [vmem:[%s7682_s23 + $0x40] sm:$0xf] }
  0x39   : > { %7109 = vmatpush3.bf16.msra.mxu1 %v7533_v22  ;;  %7157 = vmatpush3.bf16.msra.mxu0 %v7534_v23  ;;  %v654_v22 = vrot.slane %v652_v13, 5  ;;  %v1486_v23 = vrot.slane %v1382_v4, 5  ;;  %v645_v39 = vsel %vm7772_vm5, %v640_v27, %v644_v8  ;;  %v684_v4 = vshll.u32 %v566_v50, 16  ;;  %v7552_v13 = vld [vmem:[%s9462_s1 + $0x138] sm:$0xff]   ;;  %v7555_v50 = vld [vmem:[%s9462_s1 + $0xe8] sm:$0xff]  }
  0x3a   : > { %7110 = vmatprep.subr.bf16.mxu1 %v7739_v31  ;;  %7158 = vmatprep.subr.bf16.mxu0 %v7744_v32  ;;  %v659_v40 = vrot.slane %v657_v30, 4  ;;  %v668_v47 = vrot.slane %v666_v36, 5  ;;  %v1495_v8 = vrot.slane %v1493_v61, 4  ;;  %v570_v30 = vld [vmem:[%s7682_s23 + $0x34] sm:$0xf]  ;;  %v708_v36 = vshll.u32 %v569_v29, 16 }
  0x3b   : > { %v7820_v34 = vsel %vm7753_vm4, %v6092_v19, %v1486_v23  ;;  %v1488_v35 = vrot.slane %v1486_v23, 4  ;;  %v655_v44 = vsel %vm7772_vm5, %v650_v33, %v654_v22  ;;  %v686_v18 = vrot.slane %v684_v4, 5  ;;  %v571_v33 = vld [vmem:[%s7682_s23 + $0x38] sm:$0x1]  ;;  %v574_v61 = vld [vmem:[%s7682_s23 + $0x44] sm:$0x1] }
  0x3c   : > { %7079 = vmatmul.mubr.bf16.gmra.mxu0 %v7537_v41  ;;  %7095 = vmatmul.mubr.bf16.gmra.mxu1 %v7538_v42  ;;  %v670_v42 = vshrl.u32 %v564_v25, 16  ;;  %v7844_v52 = vcombine.low %v645_v39, %v655_v44  ;;  %v696_v22 = vrot.slane %v694_v10, 4  ;;  %v700_v23 = vshll.u32 %v568_v58, 16  ;;  %v1393_v4 = vld [vmem:[%s7682_s23 + $0x3c] sm:$0xe] }
  0x3d   : > { %7111 = vmatpush3.bf16.msra.mxu1 %v7739_v31  ;;  %7159 = vmatpush3.bf16.msra.mxu0 %v7744_v32  ;;  %v660_v31 = vshll.u32 %v563_v24, 16  ;;  %v7546_v32 = vld [vmem:[%s7682_s23 + $0xb4] sm:$0xff]   ;;  %v7835_v45 = vsel %vm7753_vm4, %v1488_v35, %v1489_v28  ;;  %v705_v35 = vshrl.u32 %v569_v29, 16  ;;  %v718_v48 = vshrl.u32 %v570_v30, 16 }
  0x3e   : > { %7112 = vmatprep.subr.bf16.mxu1 %v7763_v54  ;;  %7160 = vmatprep.subr.bf16.mxu0 %v7768_v55  ;;  %v6124_v53 = vcombine.low %v7820_v34, %v7835_v45  ;;  %v697_v1 = vor.u32 %v696_v22, %v692_v21  ;;  %v702_v11 = vrot.slane %v700_v23, 5  ;;  %v7553_v28 = vld [vmem:[%s9462_s1 + $0xf0] sm:$0xff]   ;;  %v7557_v22 = vld [vmem:[%s9462_s1 + $0xe0] sm:$0xff]   ;;  %v7931_v29 = vld [vmem:[%s9462_s1 + $0x118] sm:$0xff]  }
  0x3f   : > { %7082 = vmatprep.mubr.bf16.mxu0 %v7543_v62  ;;  %7098 = vmatprep.mubr.bf16.mxu1 %v7544_v63  ;;  %v662_v41 = vrot.slane %v660_v31, 5  ;;  %v1496_v62 = vrot.slane %v1386_v49, 5  ;;  %v1387_v63 = vld [vmem:[%s7682_s23 + $0x24] sm:$0xe]  ;;  %v707_v44 = vrot.slane %v705_v35, 4 }
  0x40   : > { %v6094_v27 = vrot.slane %v1387_v63, 9  ;;  %v698_v37 = vrot.slane %v697_v1, 4  ;;  %v1391_v49 = vld [vmem:[%s7682_s23 + $0x34] sm:$0xf]  ;;  %v575_v35 = vld [vmem:[%s7682_s23 + $0x48] sm:$0xf] }
  0x41   : > { %7113 = vmatpush3.bf16.msra.mxu1 %v7763_v54  ;;  %7161 = vmatpush3.bf16.msra.mxu0 %v7768_v55  ;;  %v663_v54 = vor.u32 %v662_v41, %v659_v40  ;;  %v672_v55 = vrot.slane %v670_v42, 4  ;;  %v1497_v19 = vsel %vm7753_vm4, %v1495_v8, %v1496_v62  ;;  %v7554_v40 = vld [vmem:[%s9462_s1 + $0x130] sm:$0xff]   ;;  %v714_v41 = vshll.u32 %v570_v30, 16  ;;  %v7556_v62 = vld [vmem:[%s9462_s1 + $0x128] sm:$0xff]  }
  0x42   : > { %7114 = vmatprep.subr.bf16.mxu1 %v7796_v14  ;;  %7162 = vmatprep.subr.bf16.mxu0 %v7801_v15  ;;  %v6125_v25 = vcombine.low %v1494_v7, %v1497_v19  ;;  %v1390_v42 = vld [vmem:[%s7682_s23 + $0x30] sm:$0xe] }
  0x43   : > { %v664_v0 = vrot.slane %v663_v54, 4  ;;  %v673_v2 = vor.u32 %v672_v55, %v668_v47  ;;  %v716_v45 = vrot.slane %v714_v41, 5  ;;  %v572_v54 = vld [vmem:[%s7682_s23 + $0x3c] sm:$0xf]  ;;  %v756_v41 = vshll.u32 %v575_v35, 16 }
  0x44   : > { %7083 = vmatmul.mubr.bf16.gmra.mxu0 %v7545_v26  ;;  %7099 = vmatmul.mubr.bf16.gmra.mxu1 %v7546_v32  ;;  %v687_v26 = vor.u32 %v686_v18, %v683_v16  ;;  %v1503_v32 = vrot.slane %v1389_v12, 5  ;;  %v729_v7 = vshrl.u32 %v572_v54, 16  ;;  %v732_v8 = vshll.u32 %v572_v54, 16 }
  0x45   : > { %7115 = vmatpush3.bf16.msra.mxu1 %v7796_v14  ;;  %7163 = vmatpush3.bf16.msra.mxu0 %v7801_v15  ;;  %v669_v14 = vsel %vm7772_vm5, %v664_v0, %v668_v47  ;;  %v674_v15 = vrot.slane %v673_v2, 4  ;;  %v710_v47 = vrot.slane %v708_v36, 5  ;;  %v6095_v0 = vrot.slane %v1390_v42, 9  ;;  %v576_v36 = vld [vmem:[%s7682_s23 + $0x4c] sm:$0xf] }
  0x46   : > { %7116 = vmatprep.subr.bf16.mxu1 %v7549_v38  ;;  %7164 = vmatprep.subr.bf16.mxu0 %v7550_v51  ;;  %v688_v31 = vrot.slane %v687_v26, 4  ;;  %v1507_v2 = vrot.slane %v1391_v49, 5  ;;  %v731_v19 = vrot.slane %v729_v7, 4  ;;  %v748_v26 = vshll.u32 %v574_v61, 16 }
  0x47   : > { %7118 = vmatprep.mubr.bf16.mxu1 %v7809_v20  ;;  %7166 = vmatprep.mubr.bf16.mxu0 %v6123_v17  ;;  %v679_v24 = vsel %vm7772_vm5, %v674_v15, %v678_v59  ;;  %v1500_v17 = vrot.slane %v1388_v5, 5  ;;  %v711_v58 = vor.u32 %v710_v47, %v707_v44  ;;  %v720_v59 = vrot.slane %v718_v48, 4  ;;  %v1395_v15 = vld [vmem:[%s7682_s23 + $0x44] sm:$0x1]  ;;  %v1396_v48 = vld [vmem:[%s7682_s23 + $0x48] sm:$0xe] }
  0x48   : > { %v6069_v20 = vcombine.low %v669_v14, %v679_v24  ;;  %v693_v43 = vsel %vm7772_vm5, %v688_v31, %v692_v21  ;;  %v1508_v10 = vsel %vm7753_vm4, %v6095_v0, %v1507_v2  ;;  %v1509_v12 = vrot.slane %v1507_v2, 4  ;;  %v579_v0 = vld [vmem:[%s7682_s23 + $0x58] sm:$0xf]  ;;  %v580_v2 = vld [vmem:[%s7682_s23 + $0x5c] sm:$0x1] }
  0x49   : > { %7117 = vmatpush3.bf16.msra.mxu1 %v7549_v38  ;;  %7165 = vmatpush3.bf16.msra.mxu0 %v7550_v51  ;;  %v1501_v38 = vsel %vm7753_vm4, %v6094_v27, %v1500_v17  ;;  %v1502_v39 = vrot.slane %v1500_v17, 4  ;;  %v703_v51 = vsel %vm7772_vm5, %v698_v37, %v702_v11  ;;  %v712_v5 = vrot.slane %v711_v58, 4  ;;  %v7558_v27 = vld [vmem:[%s9462_s1 + $0x120] sm:$0xff]   ;;  %v1398_v58 = vld [vmem:[%s7682_s23 + $0x50] sm:$0x1] }
  0x4a   : > { %7198 = vmatprep.subr.bf16.mxu1 %v7551_v6  ;;  %7246 = vmatprep.subr.bf16.mxu0 %v7552_v13  ;;  %v6070_v55 = vcombine.low %v693_v43, %v703_v51  ;;  %v742_v14 = vshrl.u32 %v573_v60, 16  ;;  %v734_v21 = vrot.slane %v732_v8, 5  ;;  %v6096_v17 = vrot.slane %v1393_v4, 9  ;;  %v1399_v8 = vld [vmem:[%s7682_s23 + $0x54] sm:$0xe] }
  0x4b   : > { %v1504_v34 = vsel %vm7753_vm4, %v1502_v39, %v1503_v32  ;;  %v717_v16 = vsel %vm7772_vm5, %v712_v5, %v716_v45  ;;  %v750_v32 = vrot.slane %v748_v26, 5  ;;  %v577_v39 = vld [vmem:[%s7682_s23 + $0x50] sm:$0x1]  ;;  %v762_v47 = vshll.u32 %v576_v36, 16  ;;  %v7563_v26 = vld [vmem:[%s9462_s1 + $0xc8] sm:$0xff]  }
  0x4c   : > { %7119 = vmatmul.mubr.bf16.vlgmr.msra.gmra.mxu1 %v7844_v52  ;;  %7167 = vmatmul.mubr.bf16.vlgmr.msra.gmra.mxu0 %v6124_v53  ;;  %v724_v52 = vshll.u32 %v571_v33, 16  ;;  %v1392_v53 = vld [vmem:[%s7682_s23 + $0x38] sm:$0x1]  ;;  %v6126_v57 = vcombine.low %v1501_v38, %v1504_v34  ;;  %v735_v11 = vor.u32 %v734_v21, %v731_v19  ;;  %v1514_v33 = vrot.slane %v1394_v9, 5  ;;  %v1401_v21 = vld [vmem:[%s7682_s23 + $0x5c] sm:$0x1] }
  0x4d   : > { %7199 = vmatpush3.bf16.msra.mxu1 %v7551_v6  ;;  %7247 = vmatpush3.bf16.msra.mxu0 %v7552_v13  ;;  %v1510_v3 = vrot.slane %v1392_v53, 5  ;;  %v721_v6 = vor.u32 %v720_v59, %v716_v45  ;;  %v738_v13 = vshll.u32 %v573_v60, 16  ;;  %v1517_v38 = vrot.slane %v1395_v15, 5  ;;  %v1397_v45 = vld [vmem:[%s7682_s23 + $0x4c] sm:$0xf] }
  0x4e   : > { %7122 = vmatprep.mubr.bf16.mxu1 %v6069_v20  ;;  %7170 = vmatprep.mubr.bf16.mxu0 %v6125_v25  ;;  %v726_v63 = vrot.slane %v724_v52, 5  ;;  %v744_v25 = vrot.slane %v742_v14, 4  ;;  %v736_v37 = vrot.slane %v735_v11, 4  ;;  %v1515_v43 = vsel %vm7753_vm4, %v6096_v17, %v1514_v33  ;;  %v7561_v52 = vld [vmem:[%s9462_s1 + $0xd0] sm:$0xff]   ;;  %v1400_v14 = vld [vmem:[%s7682_s23 + $0x58] sm:$0xf] }
  0x4f   : > { %7200 = vmatprep.subr.bf16.mxu1 %v7553_v28  ;;  %7248 = vmatprep.subr.bf16.mxu0 %v7554_v40  ;;  %v722_v18 = vrot.slane %v721_v6, 4  ;;  %v1511_v23 = vsel %vm7753_vm4, %v1509_v12, %v1510_v3  ;;  %v740_v24 = vrot.slane %v738_v13, 5  ;;  %v1516_v44 = vrot.slane %v1514_v33, 4  ;;  %v578_v59 = vld [vmem:[%s7682_s23 + $0x54] sm:$0xf]  ;;  %v7564_v17 = vld [vmem:[%s9462_s1 + $0x108] sm:$0xff]  }
  0x50   : > { %v6127_v1 = vcombine.low %v1508_v10, %v1511_v23  ;;  %v758_v51 = vrot.slane %v756_v41, 5  ;;  %v766_v34 = vshrl.u32 %v576_v36, 16  ;;  %v7562_v3 = vld [vmem:[%s9462_s1 + $0x110] sm:$0xff]   ;;  %v6097_v5 = vrot.slane %v1396_v48, 9  ;;  %v7985_v33 = vld [vmem:[%s9462_s1 + $0x100] sm:$0xff]  }
  0x51   : > { %7201 = vmatpush3.bf16.msra.mxu1 %v7553_v28  ;;  %7249 = vmatpush3.bf16.msra.mxu0 %v7554_v40  ;;  %v727_v20 = vsel %vm7772_vm5, %v722_v18, %v726_v63  ;;  %v7926_v28 = vld [vmem:[%s9462_s1 + $0xd8] sm:$0xff]   ;;  %v745_v31 = vor.u32 %v744_v25, %v740_v24  ;;  %v753_v40 = vshrl.u32 %v575_v35, 16  ;;  %v741_v49 = vsel %vm7772_vm5, %v736_v37, %v740_v24 }
  0x52   : > { %7202 = vmatprep.subr.bf16.mxu1 %v7555_v50  ;;  %7250 = vmatprep.subr.bf16.mxu0 %v7556_v62  ;;  %v6071_v30 = vcombine.low %v717_v16, %v727_v20  ;;  %v1518_v54 = vsel %vm7753_vm4, %v1516_v44, %v1517_v38  ;;  %v768_v63 = vrot.slane %v766_v34, 4  ;;  %v1521_v6 = vrot.slane %v1397_v45, 5  ;;  %v1402_v34 = vld [vmem:[%s7682_s23 + $0x60] sm:$0xe] }
  0x53   : > { %v746_v42 = vrot.slane %v745_v31, 4  ;;  %v6128_v61 = vcombine.low %v1515_v43, %v1518_v54  ;;  %v1524_v7 = vrot.slane %v1398_v58, 5  ;;  %v777_v12 = vshrl.u32 %v578_v59, 16  ;;  %v583_v43 = vld [vmem:[%s7682_s23 + $0x68] sm:$0x1] }
  0x54   : > { %7123 = vmatmul.mubr.bf16.gmra.mxu1 %v6070_v55  ;;  %7171 = vmatmul.mubr.bf16.gmra.mxu0 %v6126_v57  ;;  %v764_v55 = vrot.slane %v762_v47, 5  ;;  %v772_v57 = vshll.u32 %v577_v39, 16  ;;  %v780_v13 = vshll.u32 %v578_v59, 16  ;;  %v1522_v15 = vsel %vm7753_vm4, %v6097_v5, %v1521_v6  ;;  %v581_v39 = vld [vmem:[%s7682_s23 + $0x60] sm:$0xf] }
  0x55   : > { %7203 = vmatpush3.bf16.msra.mxu1 %v7555_v50  ;;  %7251 = vmatpush3.bf16.msra.mxu0 %v7556_v62  ;;  %v755_v50 = vrot.slane %v753_v40, 4  ;;  %v751_v53 = vsel %vm7772_vm5, %v746_v42, %v750_v32  ;;  %v1523_v16 = vrot.slane %v1521_v6, 4  ;;  %v786_v18 = vshll.u32 %v579_v0, 16  ;;  %v7980_v32 = vld [vmem:[%s9462_s1 + $0xc0] sm:$0xff]   ;;  %v585_v5 = vld [vmem:[%s7682_s23 + $0x70] sm:$0xf] }
  0x56   : > { %7174 = vmatprep.mubr.bf16.mxu0 %v6127_v1  ;;  %7204 = vmatprep.subr.bf16.mxu1 %v7557_v22  ;;  %v6072_v60 = vcombine.low %v741_v49, %v751_v53  ;;  %v774_v4 = vrot.slane %v772_v57, 5  ;;  %v769_v10 = vor.u32 %v768_v63, %v764_v55  ;;  %v790_v19 = vshrl.u32 %v579_v0, 16  ;;  %v582_v40 = vld [vmem:[%s7682_s23 + $0x64] sm:$0xf]  ;;  %v7999_v57 = vld [vmem:[%s9462_s1 + $0x178] sm:$0xff]  }
  0x57   : > { %7126 = vmatprep.mubr.bf16.mxu1 %v6071_v30  ;;  %7252 = vmatprep.subr.bf16.mxu0 %v7558_v27  ;;  %v759_v62 = vor.u32 %v758_v51, %v755_v50  ;;  %v779_v24 = vrot.slane %v777_v12, 4  ;;  %v782_v25 = vrot.slane %v780_v13, 5  ;;  %v788_v20 = vrot.slane %v786_v18, 5  ;;  %v584_v63 = vld [vmem:[%s7682_s23 + $0x6c] sm:$0xf] }
  0x58   : > { %v770_v23 = vrot.slane %v769_v10, 4  ;;  %v792_v1 = vrot.slane %v790_v19, 4  ;;  %v796_v11 = vshll.u32 %v580_v2, 16  ;;  %v6098_v31 = vrot.slane %v1399_v8, 9  ;;  %v586_v6 = vld [vmem:[%s7682_s23 + $0x74] sm:$0x1] }
  0x59   : > { %7205 = vmatpush3.bf16.msra.mxu1 %v7557_v22  ;;  %7253 = vmatpush3.bf16.msra.mxu0 %v7558_v27  ;;  %v760_v9 = vrot.slane %v759_v62, 4  ;;  %v1525_v27 = vsel %vm7753_vm4, %v1523_v16, %v1524_v7  ;;  %v783_v30 = vor.u32 %v782_v25, %v779_v24  ;;  %v1528_v38 = vrot.slane %v1400_v14, 5  ;;  %v1404_v62 = vld [vmem:[%s7682_s23 + $0x68] sm:$0x1]  ;;  %v8014_v7 = vld [vmem:[%s9462_s1 + $0x1b8] sm:$0xff]  }
  0x5a   : > { %7206 = vmatprep.subr.bf16.mxu1 %v7926_v28  ;;  %7254 = vmatprep.subr.bf16.mxu0 %v7931_v29  ;;  %v793_v36 = vor.u32 %v792_v1, %v788_v20  ;;  %v798_v37 = vrot.slane %v796_v11, 5  ;;  %v1531_v42 = vrot.slane %v1401_v21, 5  ;;  %v801_v44 = vshrl.u32 %v581_v39, 16  ;;  %v1405_v13 = vld [vmem:[%s7682_s23 + $0x6c] sm:$0xe] }
  0x5b   : > { %v765_v22 = vsel %vm7772_vm5, %v760_v9, %v764_v55  ;;  %v784_v41 = vrot.slane %v783_v30, 4  ;;  %v804_v47 = vshll.u32 %v581_v39, 16  ;;  %v1529_v49 = vsel %vm7753_vm4, %v6098_v31, %v1528_v38  ;;  %v1403_v55 = vld [vmem:[%s7682_s23 + $0x64] sm:$0xf]  ;;  %v1406_v19 = vld [vmem:[%s7682_s23 + $0x70] sm:$0xf] }
  0x5c   : > { %7127 = vmatmul.mubr.bf16.gmra.mxu1 %v6072_v60  ;;  %7175 = vmatmul.mubr.bf16.gmra.mxu0 %v6128_v61  ;;  %v794_v48 = vrot.slane %v793_v36, 4  ;;  %v1530_v50 = vrot.slane %v1528_v38, 4  ;;  %v810_v51 = vshll.u32 %v582_v40, 16  ;;  %v814_v54 = vshrl.u32 %v582_v40, 16  ;;  %v1407_v25 = vld [vmem:[%s7682_s23 + $0x74] sm:$0x1] }
  0x5d   : > { %7207 = vmatpush3.bf16.msra.mxu1 %v7926_v28  ;;  %7255 = vmatpush3.bf16.msra.mxu0 %v7931_v29  ;;  %v775_v28 = vsel %vm7772_vm5, %v770_v23, %v774_v4  ;;  %v6129_v29 = vcombine.low %v1522_v15, %v1525_v27  ;;  %v789_v45 = vsel %vm7772_vm5, %v784_v41, %v788_v20  ;;  %v806_v53 = vrot.slane %v804_v47, 5  ;;  %v587_v39 = vld [vmem:[%s7682_s23 + $0x78] sm:$0xf]  ;;  %v588_v40 = vld [vmem:[%s7682_s23 + $0x7c] sm:$0xf] }
  0x5e   : > { %7208 = vmatprep.subr.bf16.mxu1 %v7561_v52  ;;  %7256 = vmatprep.subr.bf16.mxu0 %v7562_v3  ;;  %v6073_v35 = vcombine.low %v765_v22, %v775_v28  ;;  %v799_v58 = vsel %vm7772_vm5, %v794_v48, %v798_v37  ;;  %v1532_v59 = vsel %vm7753_vm4, %v1530_v50, %v1531_v42  ;;  %v812_v60 = vrot.slane %v810_v51, 5 }
  0x5f   : > { %7178 = vmatprep.mubr.bf16.mxu0 %v6129_v29  ;;  %v820_v61 = vshll.u32 %v583_v43, 16  ;;  %v6074_v0 = vcombine.low %v789_v45, %v799_v58  ;;  %v6130_v2 = vcombine.low %v1529_v49, %v1532_v59  ;;  %v816_v4 = vrot.slane %v814_v54, 4  ;;  %v589_v43 = vld [vmem:[%s7682_s23 + $0x80] sm:$0x1] }
  0x60   : > { %7130 = vmatprep.mubr.bf16.mxu1 %v6073_v35  ;;  %v6099_v9 = vrot.slane %v1402_v34, 9  ;;  %v1535_v10 = vrot.slane %v1403_v55, 5  ;;  %v1538_v12 = vrot.slane %v1404_v62, 5  ;;  %v825_v16 = vshrl.u32 %v584_v63, 16  ;;  %v1408_v34 = vld [vmem:[%s7682_s23 + $0x78] sm:$0xe] }
  0x61   : > { %7209 = vmatpush3.bf16.msra.mxu1 %v7561_v52  ;;  %7257 = vmatpush3.bf16.msra.mxu0 %v7562_v3  ;;  %v803_v52 = vrot.slane %v801_v44, 4  ;;  %v822_v8 = vrot.slane %v820_v61, 5  ;;  %v817_v15 = vor.u32 %v816_v4, %v812_v60  ;;  %v828_v18 = vshll.u32 %v584_v63, 16  ;;  %v1409_v55 = vld [vmem:[%s7682_s23 + $0x7c] sm:$0xf] }
  0x62   : > { %7210 = vmatprep.subr.bf16.mxu1 %v7563_v26  ;;  %7258 = vmatprep.subr.bf16.mxu0 %v7564_v17  ;;  %v1536_v21 = vsel %vm7753_vm4, %v6099_v9, %v1535_v10  ;;  %v1537_v22 = vrot.slane %v1535_v10, 4  ;;  %v834_v23 = vshll.u32 %v585_v5, 16  ;;  %v838_v24 = vshrl.u32 %v585_v5, 16  ;;  %v1410_v62 = vld [vmem:[%s7682_s23 + $0x80] sm:$0x1] }
  0x63   : > { %v807_v3 = vor.u32 %v806_v53, %v803_v52  ;;  %v818_v27 = vrot.slane %v817_v15, 4  ;;  %v827_v20 = vrot.slane %v825_v16, 4  ;;  %v830_v1 = vrot.slane %v828_v18, 5  ;;  %v590_v63 = vld [vmem:[%s7682_s23 + $0x84] sm:$0xf] }
  0x64   : > { %7131 = vmatmul.mubr.bf16.gmra.mxu1 %v6074_v0  ;;  %7179 = vmatmul.mubr.bf16.gmra.mxu0 %v6130_v2  ;;  %v1539_v11 = vsel %vm7753_vm4, %v1537_v22, %v1538_v12  ;;  %v840_v28 = vrot.slane %v838_v24, 4  ;;  %v844_v29 = vshll.u32 %v586_v6, 16  ;;  %v1542_v38 = vrot.slane %v1406_v19, 5  ;;  %v591_v5 = vld [vmem:[%s7682_s23 + $0x88] sm:$0xf] }
  0x65   : > { %7211 = vmatpush3.bf16.msra.mxu1 %v7563_v26  ;;  %7259 = vmatpush3.bf16.msra.mxu0 %v7564_v17  ;;  %v808_v14 = vrot.slane %v807_v3, 4  ;;  %v836_v17 = vrot.slane %v834_v23, 5  ;;  %v823_v30 = vsel %vm7772_vm5, %v818_v27, %v822_v8  ;;  %v6131_v31 = vcombine.low %v1536_v21, %v1539_v11  ;;  %v592_v6 = vld [vmem:[%s7682_s23 + $0x8c] sm:$0x1]  ;;  %v1412_v19 = vld [vmem:[%s7682_s23 + $0x88] sm:$0xf] }
  0x66   : > { %7212 = vmatprep.subr.bf16.mxu1 %v7980_v32  ;;  %7260 = vmatprep.subr.bf16.mxu0 %v7985_v33  ;;  %v846_v37 = vrot.slane %v844_v29, 5  ;;  %v1545_v42 = vrot.slane %v1407_v25, 5  ;;  %v849_v44 = vshrl.u32 %v587_v39, 16  ;;  %v852_v47 = vshll.u32 %v587_v39, 16  ;;  %v1413_v25 = vld [vmem:[%s7682_s23 + $0x8c] sm:$0x1] }
  0x67   : > { %v813_v26 = vsel %vm7772_vm5, %v808_v14, %v812_v60  ;;  %v841_v36 = vor.u32 %v840_v28, %v836_v17  ;;  %7182 = vmatprep.mubr.bf16.mxu0 %v6131_v31  ;;  %v1544_v50 = vrot.slane %v1542_v38, 4  ;;  %v858_v51 = vshll.u32 %v588_v40, 16  ;;  %v593_v39 = vld [vmem:[%s7682_s23 + $0x90] sm:$0xf] }
  0x68   : > { %v6075_v35 = vcombine.low %v813_v26, %v823_v30  ;;  %v851_v52 = vrot.slane %v849_v44, 4  ;;  %v854_v53 = vrot.slane %v852_v47, 5  ;;  %v862_v54 = vshrl.u32 %v588_v40, 16  ;;  %v594_v40 = vld [vmem:[%s7682_s23 + $0x94] sm:$0xf] }
  0x69   : > { %7213 = vmatpush3.bf16.msra.mxu1 %v7980_v32  ;;  %7261 = vmatpush3.bf16.msra.mxu0 %v7985_v33  ;;  %v831_v32 = vor.u32 %v830_v1, %v827_v20  ;;  %v6100_v33 = vrot.slane %v1405_v13, 9  ;;  %v842_v48 = vrot.slane %v841_v36, 4  ;;  %v1546_v59 = vsel %vm7753_vm4, %v1544_v50, %v1545_v42  ;;  %v1411_v13 = vld [vmem:[%s7682_s23 + $0x84] sm:$0xe] }
  0x6a   : > { %7294 = vmatprep.subr.bf16.mxu1 %v7999_v57  ;;  %7342 = vmatprep.subr.bf16.mxu0 %v8014_v7  ;;  %v860_v60 = vrot.slane %v858_v51, 5  ;;  %v868_v61 = vshll.u32 %v589_v43, 16  ;;  %v855_v3 = vor.u32 %v854_v53, %v851_v52  ;;  %v864_v4 = vrot.slane %v862_v54, 4  ;;  %v595_v43 = vld [vmem:[%s7682_s23 + $0x98] sm:$0x1] }
  0x6b   : > { %v832_v41 = vrot.slane %v831_v32, 4  ;;  %7134 = vmatprep.mubr.bf16.mxu1 %v6075_v35  ;;  %v1543_v49 = vsel %vm7753_vm4, %v6100_v33, %v1542_v38  ;;  %v847_v58 = vsel %vm7772_vm5, %v842_v48, %v846_v37  ;;  %v6101_v9 = vrot.slane %v1408_v34, 9  ;;  %v1414_v34 = vld [vmem:[%s7682_s23 + $0x90] sm:$0xe] }
  0x6c   : > { %v6132_v2 = vcombine.low %v1543_v49, %v1546_v59  ;;  %v870_v8 = vrot.slane %v868_v61, 5  ;;  %v1549_v10 = vrot.slane %v1409_v55, 5  ;;  %v1552_v12 = vrot.slane %v1410_v62, 5  ;;  %v1415_v55 = vld [vmem:[%s7682_s23 + $0x94] sm:$0xf] }
  0x6d   : > { %v837_v45 = vsel %vm7772_vm5, %v832_v41, %v836_v17  ;;  %v856_v14 = vrot.slane %v855_v3, 4  ;;  %v865_v15 = vor.u32 %v864_v4, %v860_v60  ;;  %v873_v16 = vshrl.u32 %v590_v63, 16  ;;  %v1416_v62 = vld [vmem:[%s7682_s23 + $0x98] sm:$0x1] }
  0x6e   : > { %v6076_v0 = vcombine.low %v837_v45, %v847_v58  ;;  %7183 = vmatmul.mubr.bf16.gmra.mxu0 %v6132_v2  ;;  %v876_v18 = vshll.u32 %v590_v63, 16  ;;  %v1550_v21 = vsel %vm7753_vm4, %v6101_v9, %v1549_v10  ;;  %v1551_v22 = vrot.slane %v1549_v10, 4  ;;  %v596_v63 = vld [vmem:[%s7682_s23 + $0x9c] sm:$0xf] }
  0x6f   : > { %v882_v23 = vshll.u32 %v591_v5, 16  ;;  %v886_v24 = vshrl.u32 %v591_v5, 16  ;;  %v861_v26 = vsel %vm7772_vm5, %v856_v14, %v860_v60  ;;  %v866_v27 = vrot.slane %v865_v15, 4  ;;  %v597_v5 = vld [vmem:[%s7682_s23 + $0xa0] sm:$0xf] }
  0x70   : > { %7135 = vmatmul.mubr.bf16.gmra.mxu1 %v6076_v0  ;;  %v875_v20 = vrot.slane %v873_v16, 4  ;;  %v878_v1 = vrot.slane %v876_v18, 5  ;;  %v1553_v11 = vsel %vm7753_vm4, %v1551_v22, %v1552_v12  ;;  %v892_v29 = vshll.u32 %v592_v6, 16  ;;  %v598_v6 = vld [vmem:[%s7682_s23 + $0xa4] sm:$0x1] }
  0x71   : > { %v884_v17 = vrot.slane %v882_v23, 5  ;;  %v888_v28 = vrot.slane %v886_v24, 4  ;;  %v871_v30 = vsel %vm7772_vm5, %v866_v27, %v870_v8  ;;  %v6133_v31 = vcombine.low %v1550_v21, %v1553_v11 }
  0x72   : > { %v879_v32 = vor.u32 %v878_v1, %v875_v20  ;;  %v6102_v33 = vrot.slane %v1411_v13, 9  ;;  %v6077_v35 = vcombine.low %v861_v26, %v871_v30  ;;  %v894_v37 = vrot.slane %v892_v29, 5  ;;  %v1417_v13 = vld [vmem:[%s7682_s23 + $0x9c] sm:$0xe] }
  0x73   : > { %v889_v36 = vor.u32 %v888_v28, %v884_v17  ;;  %v1556_v38 = vrot.slane %v1412_v19, 5  ;;  %7186 = vmatprep.mubr.bf16.mxu0 %v6133_v31  ;;  %v1559_v42 = vrot.slane %v1413_v25, 5  ;;  %v897_v44 = vshrl.u32 %v593_v39, 16  ;;  %v1418_v19 = vld [vmem:[%s7682_s23 + $0xa0] sm:$0xf] }
  0x74   : > { %v880_v41 = vrot.slane %v879_v32, 4  ;;  %v900_v47 = vshll.u32 %v593_v39, 16  ;;  %7138 = vmatprep.mubr.bf16.mxu1 %v6077_v35  ;;  %v906_v51 = vshll.u32 %v594_v40, 16  ;;  %v910_v54 = vshrl.u32 %v594_v40, 16  ;;  %v1419_v25 = vld [vmem:[%s7682_s23 + $0xa4] sm:$0x1] }
  0x75   : > { %v890_v48 = vrot.slane %v889_v36, 4  ;;  %v1557_v49 = vsel %vm7753_vm4, %v6102_v33, %v1556_v38  ;;  %v1558_v50 = vrot.slane %v1556_v38, 4  ;;  %v899_v52 = vrot.slane %v897_v44, 4  ;;  %v599_v39 = vld [vmem:[%s7682_s23 + $0xa8] sm:$0xf] }
  0x76   : > { %v885_v45 = vsel %vm7772_vm5, %v880_v41, %v884_v17  ;;  %v902_v53 = vrot.slane %v900_v47, 5  ;;  %v908_v60 = vrot.slane %v906_v51, 5  ;;  %v916_v61 = vshll.u32 %v595_v43, 16  ;;  %v600_v40 = vld [vmem:[%s7682_s23 + $0xac] sm:$0xf] }
  0x77   : > { %v895_v58 = vsel %vm7772_vm5, %v890_v48, %v894_v37  ;;  %v1560_v59 = vsel %vm7753_vm4, %v1558_v50, %v1559_v42  ;;  %v912_v4 = vrot.slane %v910_v54, 4  ;;  %v6103_v9 = vrot.slane %v1414_v34, 9  ;;  %v601_v43 = vld [vmem:[%s7682_s23 + $0xb0] sm:$0x1]  ;;  %v1420_v34 = vld [vmem:[%s7682_s23 + $0xa8] sm:$0xe] }
  0x78   : > { %v6078_v0 = vcombine.low %v885_v45, %v895_v58  ;;  %v6134_v2 = vcombine.low %v1557_v49, %v1560_v59  ;;  %v903_v3 = vor.u32 %v902_v53, %v899_v52  ;;  %v918_v8 = vrot.slane %v916_v61, 5 }
  0x79   : > { %v1563_v10 = vrot.slane %v1415_v55, 5  ;;  %v1566_v12 = vrot.slane %v1416_v62, 5  ;;  %v913_v15 = vor.u32 %v912_v4, %v908_v60  ;;  %v921_v16 = vshrl.u32 %v596_v63, 16  ;;  %v1421_v55 = vld [vmem:[%s7682_s23 + $0xac] sm:$0xf] }
  0x7a   : > { %7139 = vmatmul.mubr.bf16.gmra.mxu1 %v6078_v0  ;;  %7187 = vmatmul.mubr.bf16.gmra.mxu0 %v6134_v2  ;;  %v904_v14 = vrot.slane %v903_v3, 4  ;;  %v924_v18 = vshll.u32 %v596_v63, 16  ;;  %v930_v23 = vshll.u32 %v597_v5, 16  ;;  %v934_v24 = vshrl.u32 %v597_v5, 16  ;;  %v1422_v62 = vld [vmem:[%s7682_s23 + $0xb0] sm:$0x1] }
  0x7b   : > { %v1564_v21 = vsel %vm7753_vm4, %v6103_v9, %v1563_v10  ;;  %v1565_v22 = vrot.slane %v1563_v10, 4  ;;  %v914_v27 = vrot.slane %v913_v15, 4  ;;  %v923_v20 = vrot.slane %v921_v16, 4  ;;  %v602_v63 = vld [vmem:[%s7682_s23 + $0xb4] sm:$0xf] }
  0x7c   : > { %v909_v26 = vsel %vm7772_vm5, %v904_v14, %v908_v60  ;;  %v926_v1 = vrot.slane %v924_v18, 5  ;;  %v932_v17 = vrot.slane %v930_v23, 5  ;;  %v936_v28 = vrot.slane %v934_v24, 4  ;;  %v603_v5 = vld [vmem:[%s7682_s23 + $0xb8] sm:$0xf] }
  0x7d   : > { %v1567_v11 = vsel %vm7753_vm4, %v1565_v22, %v1566_v12  ;;  %v940_v29 = vshll.u32 %v598_v6, 16  ;;  %v919_v30 = vsel %vm7772_vm5, %v914_v27, %v918_v8  ;;  %v6104_v33 = vrot.slane %v1417_v13, 9  ;;  %v604_v6 = vld [vmem:[%s7682_s23 + $0xbc] sm:$0x1]  ;;  %v1423_v13 = vld [vmem:[%s7682_s23 + $0xb4] sm:$0xe] }
  0x7e   : > { %v6135_v31 = vcombine.low %v1564_v21, %v1567_v11  ;;  %v927_v32 = vor.u32 %v926_v1, %v923_v20  ;;  %v6079_v35 = vcombine.low %v909_v26, %v919_v30  ;;  %v937_v36 = vor.u32 %v936_v28, %v932_v17 }
  0x7f   : > { %v942_v37 = vrot.slane %v940_v29, 5  ;;  %v1570_v38 = vrot.slane %v1418_v19, 5  ;;  %v1573_v42 = vrot.slane %v1419_v25, 5  ;;  %v945_v44 = vshrl.u32 %v599_v39, 16  ;;  %v1424_v19 = vld [vmem:[%s7682_s23 + $0xb8] sm:$0xf] }
  0x80   : > { %7190 = vmatprep.mubr.bf16.mxu0 %v6135_v31  ;;  %v928_v41 = vrot.slane %v927_v32, 4  ;;  %v948_v47 = vshll.u32 %v599_v39, 16  ;;  %7142 = vmatprep.mubr.bf16.mxu1 %v6079_v35  ;;  %v938_v48 = vrot.slane %v937_v36, 4  ;;  %v954_v51 = vshll.u32 %v600_v40, 16  ;;  %v1425_v25 = vld [vmem:[%s7682_s23 + $0xbc] sm:$0x1] }
  0x81   : > { %v1571_v49 = vsel %vm7753_vm4, %v6104_v33, %v1570_v38  ;;  %v1572_v50 = vrot.slane %v1570_v38, 4  ;;  %v947_v52 = vrot.slane %v945_v44, 4  ;;  %v958_v54 = vshrl.u32 %v600_v40, 16 }
  0x82   : > { %v933_v45 = vsel %vm7772_vm5, %v928_v41, %v932_v17  ;;  %v950_v53 = vrot.slane %v948_v47, 5  ;;  %v943_v58 = vsel %vm7772_vm5, %v938_v48, %v942_v37  ;;  %v956_v60 = vrot.slane %v954_v51, 5  ;;  %v6219_v41 = vld [vmem:[%s7682_s23 + $0xc] sm:$0xf]  ;;  %v6221_v48 = vld [vmem:[%s7682_s23 + $0x14] sm:$0x1] }
  0x83   : > { %v1574_v59 = vsel %vm7753_vm4, %v1572_v50, %v1573_v42  ;;  %v964_v61 = vshll.u32 %v601_v43, 16  ;;  %v6080_v0 = vcombine.low %v933_v45, %v943_v58  ;;  %v960_v4 = vrot.slane %v958_v54, 4  ;;  %v6220_v42 = vld [vmem:[%s7682_s23 + $0x10] sm:$0xf] }
  0x84   : > { %v6136_v2 = vcombine.low %v1571_v49, %v1574_v59  ;;  %v951_v3 = vor.u32 %v950_v53, %v947_v52  ;;  %v6105_v9 = vrot.slane %v1420_v34, 9  ;;  %v1577_v10 = vrot.slane %v1421_v55, 5  ;;  %v7567_v51 = vld [vmem:[%s7682_s23 + $0xc] sm:$0xff]   ;;  %v6222_v59 = vld [vmem:[%s7682_s23 + $0x18] sm:$0xf] }
  0x85   : > { %v966_v8 = vrot.slane %v964_v61, 5  ;;  %v1580_v12 = vrot.slane %v1422_v62, 5  ;;  %7143 = vmatmul.mubr.bf16.gmra.mxu1 %v6080_v0  ;;  %v961_v15 = vor.u32 %v960_v4, %v956_v60  ;;  %v969_v16 = vshrl.u32 %v602_v63, 16  ;;  %v6223_v0 = vld [vmem:[%s7682_s23 + $0x1c] sm:$0xf] }
  0x86   : > { %7191 = vmatmul.mubr.bf16.gmra.mxu0 %v6136_v2  ;;  %v952_v14 = vrot.slane %v951_v3, 4  ;;  %v972_v18 = vshll.u32 %v602_v63, 16  ;;  %v1578_v21 = vsel %vm7753_vm4, %v6105_v9, %v1577_v10  ;;  %v1579_v22 = vrot.slane %v1577_v10, 4  ;;  %v6224_v2 = vld [vmem:[%s7682_s23 + $0x20] sm:$0x1] }
  0x87   : > { %v978_v23 = vshll.u32 %v603_v5, 16  ;;  %v982_v24 = vshrl.u32 %v603_v5, 16  ;;  %v962_v27 = vrot.slane %v961_v15, 4  ;;  %v971_v20 = vrot.slane %v969_v16, 4 }
  0x88   : > { %v957_v26 = vsel %vm7772_vm5, %v952_v14, %v956_v60  ;;  %v974_v1 = vrot.slane %v972_v18, 5  ;;  %v1581_v11 = vsel %vm7753_vm4, %v1579_v22, %v1580_v12  ;;  %v988_v29 = vshll.u32 %v604_v6, 16  ;;  %v7568_v18 = vld [vmem:[%s7682_s23 + $0x18] sm:$0xff]  }
  0x89   : > { %v980_v17 = vrot.slane %v978_v23, 5  ;;  %v984_v28 = vrot.slane %v982_v24, 4  ;;  %v967_v30 = vsel %vm7772_vm5, %v962_v27, %v966_v8  ;;  %v6137_v31 = vcombine.low %v1578_v21, %v1581_v11 }
  0x8a   : > { %v975_v32 = vor.u32 %v974_v1, %v971_v20  ;;  %v6106_v33 = vrot.slane %v1423_v13, 9  ;;  %v6081_v35 = vcombine.low %v957_v26, %v967_v30  ;;  %v990_v37 = vrot.slane %v988_v29, 5  ;;  %v6226_v20 = vld [vmem:[%s7682_s23 + $0x28] sm:$0xf]  ;;  %v6227_v1 = vld [vmem:[%s7682_s23 + $0x2c] sm:$0x1] }
  0x8b   : > { %v985_v36 = vor.u32 %v984_v28, %v980_v17  ;;  %v1584_v38 = vrot.slane %v1424_v19, 5  ;;  %7194 = vmatprep.mubr.bf16.mxu0 %v6137_v31  ;;  %v1587_v40 = vrot.slane %v1425_v25, 5  ;;  %v2475_v49 = vshrl.u32 %v6219_v41, 16  ;;  %v6225_v25 = vld [vmem:[%s7682_s23 + $0x24] sm:$0xf] }
  0x8c   : > { %v976_v39 = vrot.slane %v975_v32, 4  ;;  %7146 = vmatprep.mubr.bf16.mxu1 %v6081_v35  ;;  %v2478_v34 = vshll.u32 %v6219_v41, 16  ;;  %v2484_v45 = vshll.u32 %v6220_v42, 16  ;;  %v2488_v52 = vshrl.u32 %v6220_v42, 16  ;;  %v7571_v30 = vld [vmem:[%s7682_s23 + $0x24] sm:$0xff]  }
  0x8d   : > { %v986_v43 = vrot.slane %v985_v36, 4  ;;  %v1585_v44 = vsel %vm7753_vm4, %v6106_v33, %v1584_v38  ;;  %v1586_v47 = vrot.slane %v1584_v38, 4  ;;  %v2477_v55 = vrot.slane %v2475_v49, 4  ;;  %v7573_v38 = vld [vmem:[%s9462_s1 + $0x170] sm:$0xff]  }
  0x8e   : > { %v981_v50 = vsel %vm7772_vm5, %v976_v39, %v980_v17  ;;  %v2494_v58 = vshll.u32 %v6221_v48, 16  ;;  %v2480_v62 = vrot.slane %v2478_v34, 5  ;;  %v2486_v63 = vrot.slane %v2484_v45, 5  ;;  %v6229_v49 = vld [vmem:[%s7682_s23 + $0x34] sm:$0xf]  ;;  %v7577_v45 = vld [vmem:[%s9462_s1 + $0x168] sm:$0xff]  }
  0x8f   : > { %v991_v53 = vsel %vm7772_vm5, %v986_v43, %v990_v37  ;;  %v1588_v54 = vsel %vm7753_vm4, %v1586_v47, %v1587_v40  ;;  %v2490_v3 = vrot.slane %v2488_v52, 4  ;;  %v2499_v5 = vshrl.u32 %v6222_v59, 16  ;;  %v6228_v43 = vld [vmem:[%s7682_s23 + $0x30] sm:$0xf] }
  0x90   : > { %v6082_v60 = vcombine.low %v981_v50, %v991_v53  ;;  %v6138_v61 = vcombine.low %v1585_v44, %v1588_v54  ;;  %v2496_v4 = vrot.slane %v2494_v58, 5  ;;  %v2502_v6 = vshll.u32 %v6222_v59, 16  ;;  %v7574_v44 = vld [vmem:[%s9462_s1 + $0x1b0] sm:$0xff]   ;;  %v6230_v50 = vld [vmem:[%s7682_s23 + $0x38] sm:$0x1] }
  0x91   : > { %v2481_v8 = vor.u32 %v2480_v62, %v2477_v55  ;;  %v2508_v9 = vshll.u32 %v6223_v0, 16  ;;  %v2512_v10 = vshrl.u32 %v6223_v0, 16  ;;  %v2518_v12 = vshll.u32 %v6224_v2, 16  ;;  %v7572_v59 = vld [vmem:[%s7682_s23 + $0x30] sm:$0xff]  }
  0x92   : > { %7147 = vmatmul.mubr.bf16.gmra.mxu1 %v6082_v60  ;;  %7195 = vmatmul.mubr.bf16.gmra.mxu0 %v6138_v61  ;;  %v2491_v13 = vor.u32 %v2490_v3, %v2486_v63  ;;  %v2501_v14 = vrot.slane %v2499_v5, 4  ;;  %v2504_v15 = vrot.slane %v2502_v6, 5  ;;  %v2523_v11 = vshrl.u32 %v6225_v25, 16  ;;  %v7575_v3 = vld [vmem:[%s7682_s23 + $0x3c] sm:$0xff]   ;;  %v7578_v6 = vld [vmem:[%s9462_s1 + $0x1a8] sm:$0xff]  }
  0x93   : > { %7214 = vmatprep.mubr.bf16.mxu1 %v7567_v51  ;;  %v2482_v16 = vrot.slane %v2481_v8, 4  ;;  %v2510_v19 = vrot.slane %v2508_v9, 5  ;;  %v2514_v21 = vrot.slane %v2512_v10, 4  ;;  %v2520_v24 = vrot.slane %v2518_v12, 5  ;;  %v6231_v10 = vld [vmem:[%s7682_s23 + $0x3c] sm:$0xf] }
  0x94   : > { %v2492_v22 = vrot.slane %v2491_v13, 4  ;;  %v2505_v23 = vor.u32 %v2504_v15, %v2501_v14  ;;  %v2526_v17 = vshll.u32 %v6225_v25, 16  ;;  %v2532_v31 = vshll.u32 %v6226_v20, 16  ;;  %v6232_v12 = vld [vmem:[%s7682_s23 + $0x40] sm:$0xf] }
  0x95   : > { %v2487_v26 = vsel %vm7772_vm5, %v2482_v16, %v2486_v63  ;;  %v2515_v27 = vor.u32 %v2514_v21, %v2510_v19  ;;  %v2536_v32 = vshrl.u32 %v6226_v20, 16  ;;  %v2525_v36 = vrot.slane %v2523_v11, 4  ;;  %v6233_v16 = vld [vmem:[%s7682_s23 + $0x44] sm:$0x1]  ;;  %v6235_v20 = vld [vmem:[%s7682_s23 + $0x4c] sm:$0xf] }
  0x96   : > { %v2497_v28 = vsel %vm7772_vm5, %v2492_v22, %v2496_v4  ;;  %v2506_v29 = vrot.slane %v2505_v23, 4  ;;  %v2528_v37 = vrot.slane %v2526_v17, 5  ;;  %v2534_v40 = vrot.slane %v2532_v31, 5  ;;  %v7576_v31 = vld [vmem:[%s7682_s23 + $0x48] sm:$0xff]  }
  0x97   : > { %v6283_v33 = vcombine.low %v2487_v26, %v2497_v28  ;;  %v2516_v35 = vrot.slane %v2515_v27, 4  ;;  %v2538_v41 = vrot.slane %v2536_v32, 4  ;;  %v2542_v42 = vshll.u32 %v6227_v1, 16  ;;  %v6234_v27 = vld [vmem:[%s7682_s23 + $0x48] sm:$0xf] }
  0x98   : > { %v2511_v39 = vsel %vm7772_vm5, %v2506_v29, %v2510_v19  ;;  %v2529_v48 = vor.u32 %v2528_v37, %v2525_v36  ;;  %v2547_v51 = vshrl.u32 %v6228_v43, 16  ;;  %v2550_v34 = vshll.u32 %v6228_v43, 16  ;;  %v6236_v29 = vld [vmem:[%s7682_s23 + $0x50] sm:$0x1]  ;;  %v7582_v36 = vld [vmem:[%s9462_s1 + $0x1a0] sm:$0xff]  }
  0x99   : > { %7262 = vmatprep.mubr.bf16.mxu0 %v6283_v33  ;;  %v2521_v47 = vsel %vm7772_vm5, %v2516_v35, %v2520_v24  ;;  %v2539_v53 = vor.u32 %v2538_v41, %v2534_v40  ;;  %v2544_v54 = vrot.slane %v2542_v42, 5  ;;  %v2556_v55 = vshll.u32 %v6229_v49, 16  ;;  %v7585_v41 = vld [vmem:[%s9462_s1 + $0x158] sm:$0xff]  }
  0x9a   : > { %7215 = vmatmul.mubr.bf16.vlgmr.msra.gmra.mxu1 %v7568_v18  ;;  %v6284_v52 = vcombine.low %v2511_v39, %v2521_v47  ;;  %v2530_v58 = vrot.slane %v2529_v48, 4  ;;  %v2549_v60 = vrot.slane %v2547_v51, 4  ;;  %v2552_v61 = vrot.slane %v2550_v34, 5  ;;  %v7579_v51 = vld [vmem:[%s7682_s23 + $0x54] sm:$0xff]  }
  0x9b   : > { %7295 = vmatpush3.bf16.msra.mxu1 %v7999_v57  ;;  %7218 = vmatprep.mubr.bf16.mxu1 %v7571_v30  ;;  %v2560_v62 = vshrl.u32 %v6229_v49, 16  ;;  %v2540_v63 = vrot.slane %v2539_v53, 4  ;;  %v2558_v0 = vrot.slane %v2556_v55, 5  ;;  %v2566_v2 = vshll.u32 %v6230_v50, 16 }
  0x9c   : > { %7296 = vmatprep.subr.bf16.mxu1 %v7573_v38  ;;  %7263 = vmatmul.mubr.bf16.vlgmr.msra.gmra.mxu0 %v6284_v52  ;;  %v2535_v57 = vsel %vm7772_vm5, %v2530_v58, %v2534_v40  ;;  %v2553_v4 = vor.u32 %v2552_v61, %v2549_v60  ;;  %v2571_v18 = vshrl.u32 %v6231_v10, 16  ;;  %v2574_v19 = vshll.u32 %v6231_v10, 16  ;;  %v6237_v52 = vld [vmem:[%s7682_s23 + $0x54] sm:$0xf]  ;;  %v6238_v58 = vld [vmem:[%s7682_s23 + $0x58] sm:$0xf] }
  0x9d   : > { %7343 = vmatpush3.bf16.msra.mxu0 %v8014_v7  ;;  %v2562_v5 = vrot.slane %v2560_v62, 4  ;;  %v2545_v8 = vsel %vm7772_vm5, %v2540_v63, %v2544_v54  ;;  %v2568_v9 = vrot.slane %v2566_v2, 5  ;;  %v7581_v7 = vld [vmem:[%s9462_s1 + $0x160] sm:$0xff]   ;;  %v2580_v21 = vshll.u32 %v6232_v12, 16  ;;  %v7586_v61 = vld [vmem:[%s9462_s1 + $0x198] sm:$0xff]  }
  0x9e   : > { %7344 = vmatprep.subr.bf16.mxu0 %v7574_v44  ;;  %v6285_v13 = vcombine.low %v2535_v57, %v2545_v8  ;;  %v2554_v14 = vrot.slane %v2553_v4, 4  ;;  %v2584_v22 = vshrl.u32 %v6232_v12, 16  ;;  %v2590_v23 = vshll.u32 %v6233_v16, 16  ;;  %v7580_v12 = vld [vmem:[%s7682_s23 + $0x60] sm:$0xff]  }
  0x9f   : > { %7297 = vmatpush3.bf16.msra.mxu1 %v7573_v38  ;;  %v2563_v15 = vor.u32 %v2562_v5, %v2558_v0  ;;  %v2573_v26 = vrot.slane %v2571_v18, 4  ;;  %v2576_v1 = vrot.slane %v2574_v19, 5  ;;  %v2582_v11 = vrot.slane %v2580_v21, 5  ;;  %v6242_v18 = vld [vmem:[%s7682_s23 + $0x68] sm:$0x1]  ;;  %v7583_v21 = vld [vmem:[%s7682_s23 + $0x6c] sm:$0xff]  }
  0xa0   : > { %7298 = vmatprep.subr.bf16.mxu1 %v7577_v45  ;;  %7266 = vmatprep.mubr.bf16.mxu0 %v6285_v13  ;;  %v2559_v24 = vsel %vm7772_vm5, %v2554_v14, %v2558_v0  ;;  %v2586_v17 = vrot.slane %v2584_v22, 4  ;;  %v2592_v28 = vrot.slane %v2590_v23, 5  ;;  %v2595_v32 = vshrl.u32 %v6234_v27, 16  ;;  %v6241_v13 = vld [vmem:[%s7682_s23 + $0x64] sm:$0xf]  ;;  %v7590_v22 = vld [vmem:[%s9462_s1 + $0x190] sm:$0xff]  }
  0xa1   : > { %v2564_v25 = vrot.slane %v2563_v15, 4  ;;  %7345 = vmatpush3.bf16.msra.mxu0 %v7574_v44  ;;  %v2598_v33 = vshll.u32 %v6234_v27, 16  ;;  %v2604_v35 = vshll.u32 %v6235_v20, 16  ;;  %v2577_v38 = vor.u32 %v2576_v1, %v2573_v26 }
  0xa2   : > { %7219 = vmatmul.mubr.bf16.gmra.mxu1 %v7572_v59  ;;  %7346 = vmatprep.subr.bf16.mxu0 %v7578_v6  ;;  %v2587_v39 = vor.u32 %v2586_v17, %v2582_v11  ;;  %v2608_v40 = vshrl.u32 %v6235_v20, 16  ;;  %v2597_v42 = vrot.slane %v2595_v32, 4  ;;  %v2614_v47 = vshll.u32 %v6236_v29, 16  ;;  %v6239_v59 = vld [vmem:[%s7682_s23 + $0x5c] sm:$0x1]  ;;  %v7593_v17 = vld [vmem:[%s9462_s1 + $0x148] sm:$0xff]  }
  0xa3   : > { %7222 = vmatprep.mubr.bf16.mxu1 %v7575_v3  ;;  %v2569_v30 = vsel %vm7772_vm5, %v2564_v25, %v2568_v9  ;;  %7299 = vmatpush3.bf16.msra.mxu1 %v7577_v45  ;;  %v2600_v43 = vrot.slane %v2598_v33, 5  ;;  %v2606_v44 = vrot.slane %v2604_v35, 5  ;;  %v2578_v48 = vrot.slane %v2577_v38, 4  ;;  %v7589_v3 = vld [vmem:[%s9462_s1 + $0x150] sm:$0xff]  }
  0xa4   : > { %v6286_v37 = vcombine.low %v2559_v24, %v2569_v30  ;;  %7300 = vmatprep.subr.bf16.mxu1 %v7581_v7  ;;  %v2588_v49 = vrot.slane %v2587_v39, 4  ;;  %v2610_v50 = vrot.slane %v2608_v40, 4  ;;  %v2616_v45 = vrot.slane %v2614_v47, 5  ;;  %v6243_v39 = vld [vmem:[%s7682_s23 + $0x6c] sm:$0xf] }
  0xa5   : > { %v2601_v34 = vor.u32 %v2600_v43, %v2597_v42  ;;  %7347 = vmatpush3.bf16.msra.mxu0 %v7578_v6  ;;  %v2583_v53 = vsel %vm7772_vm5, %v2578_v48, %v2582_v11  ;;  %v2619_v60 = vshrl.u32 %v6237_v52, 16  ;;  %v2622_v0 = vshll.u32 %v6237_v52, 16  ;;  %v6244_v40 = vld [vmem:[%s7682_s23 + $0x70] sm:$0xf]  ;;  %v6245_v43 = vld [vmem:[%s7682_s23 + $0x74] sm:$0x1] }
  0xa6   : > { %7267 = vmatmul.mubr.bf16.gmra.mxu0 %v6286_v37  ;;  %v2593_v54 = vsel %vm7772_vm5, %v2588_v49, %v2592_v28  ;;  %v2611_v55 = vor.u32 %v2610_v50, %v2606_v44  ;;  %7348 = vmatprep.subr.bf16.mxu0 %v7582_v36  ;;  %v2628_v2 = vshll.u32 %v6238_v58, 16  ;;  %v2632_v5 = vshrl.u32 %v6238_v58, 16  ;;  %v7587_v58 = vld [vmem:[%s7682_s23 + $0x84] sm:$0xff]  }
  0xa7   : > { %7301 = vmatpush3.bf16.msra.mxu1 %v7581_v7  ;;  %v6287_v62 = vcombine.low %v2583_v53, %v2593_v54  ;;  %v2602_v63 = vrot.slane %v2601_v34, 4  ;;  %v2621_v4 = vrot.slane %v2619_v60, 4  ;;  %v2638_v6 = vshll.u32 %v6239_v59, 16  ;;  %v6240_v7 = vld [vmem:[%s7682_s23 + $0x60] sm:$0xf]  ;;  %v7584_v34 = vld [vmem:[%s7682_s23 + $0x78] sm:$0xff]  }
  0xa8   : > { %7302 = vmatprep.subr.bf16.mxu1 %v7585_v41  ;;  %v2612_v57 = vrot.slane %v2611_v55, 4  ;;  %v2624_v9 = vrot.slane %v2622_v0, 5  ;;  %v2630_v10 = vrot.slane %v2628_v2, 5  ;;  %v2634_v15 = vrot.slane %v2632_v5, 4  ;;  %v6246_v55 = vld [vmem:[%s7682_s23 + $0x78] sm:$0xf] }
  0xa9   : > { %7270 = vmatprep.mubr.bf16.mxu0 %v6287_v62  ;;  %v2607_v8 = vsel %vm7772_vm5, %v2602_v63, %v2606_v44  ;;  %7349 = vmatpush3.bf16.msra.mxu0 %v7582_v36  ;;  %v2640_v16 = vrot.slane %v2638_v6, 5  ;;  %v2643_v19 = vshrl.u32 %v6240_v7, 16  ;;  %v2646_v25 = vshll.u32 %v6240_v7, 16  ;;  %v7597_v36 = vld [vmem:[%s9462_s1 + $0x140] sm:$0xff]   ;;  %v6247_v63 = vld [vmem:[%s7682_s23 + $0x7c] sm:$0xf] }
  0xaa   : > { %7223 = vmatmul.mubr.bf16.gmra.mxu1 %v7576_v31  ;;  %v2617_v14 = vsel %vm7772_vm5, %v2612_v57, %v2616_v45  ;;  %7350 = vmatprep.subr.bf16.mxu0 %v7586_v61  ;;  %v2625_v24 = vor.u32 %v2624_v9, %v2621_v4  ;;  %v2652_v26 = vshll.u32 %v6241_v13, 16  ;;  %v2635_v27 = vor.u32 %v2634_v15, %v2630_v10  ;;  %v7594_v31 = vld [vmem:[%s9462_s1 + $0x188] sm:$0xff]   ;;  %v7598_v59 = vld [vmem:[%s9462_s1 + $0x180] sm:$0xff]   ;;  %v8241_v2 = vld [vmem:[%s9462_s1 + $0x1f8] sm:$0xff]  }
  0xab   : > { %7226 = vmatprep.mubr.bf16.mxu1 %v7579_v51  ;;  %7303 = vmatpush3.bf16.msra.mxu1 %v7585_v41  ;;  %v6288_v23 = vcombine.low %v2607_v8, %v2617_v14  ;;  %v2645_v20 = vrot.slane %v2643_v19, 4  ;;  %v2656_v1 = vshrl.u32 %v6241_v13, 16  ;;  %v2662_v11 = vshll.u32 %v6242_v18, 16  ;;  %v6248_v0 = vld [vmem:[%s7682_s23 + $0x80] sm:$0x1]  ;;  %v8248_v19 = vld [vmem:[%s9462_s1 + $0x238] sm:$0xff]  }
  0xac   : > { %7304 = vmatprep.subr.bf16.mxu1 %v7589_v3  ;;  %v2626_v28 = vrot.slane %v2625_v24, 4  ;;  %v2648_v29 = vrot.slane %v2646_v25, 5  ;;  %v2654_v30 = vrot.slane %v2652_v26, 5  ;;  %v2636_v32 = vrot.slane %v2635_v27, 4  ;;  %v6249_v24 = vld [vmem:[%s7682_s23 + $0x84] sm:$0xf] }
  0xad   : > { %v2658_v33 = vrot.slane %v2656_v1, 4  ;;  %v2664_v35 = vrot.slane %v2662_v11, 5  ;;  %7351 = vmatpush3.bf16.msra.mxu0 %v7586_v61  ;;  %v2667_v44 = vshrl.u32 %v6243_v39, 16  ;;  %v2670_v47 = vshll.u32 %v6243_v39, 16  ;;  %v6250_v25 = vld [vmem:[%s7682_s23 + $0x88] sm:$0xf] }
  0xae   : > { %7271 = vmatmul.mubr.bf16.gmra.mxu0 %v6288_v23  ;;  %v2631_v37 = vsel %vm7772_vm5, %v2626_v28, %v2630_v10  ;;  %v2649_v38 = vor.u32 %v2648_v29, %v2645_v20  ;;  %7352 = vmatprep.subr.bf16.mxu0 %v7590_v22  ;;  %v2641_v41 = vsel %vm7772_vm5, %v2636_v32, %v2640_v16  ;;  %v2676_v50 = vshll.u32 %v6244_v40, 16  ;;  %v6251_v20 = vld [vmem:[%s7682_s23 + $0x8c] sm:$0x1]  ;;  %v6252_v32 = vld [vmem:[%s7682_s23 + $0x90] sm:$0xf] }
  0xaf   : > { %7305 = vmatpush3.bf16.msra.mxu1 %v7589_v3  ;;  %v2659_v42 = vor.u32 %v2658_v33, %v2654_v30  ;;  %v6289_v48 = vcombine.low %v2631_v37, %v2641_v41  ;;  %v2680_v51 = vshrl.u32 %v6244_v40, 16  ;;  %v2669_v52 = vrot.slane %v2667_v44, 4  ;;  %v7591_v33 = vld [vmem:[%s7682_s23 + $0x9c] sm:$0xff]   ;;  %v6253_v39 = vld [vmem:[%s7682_s23 + $0x94] sm:$0xf] }
  0xb0   : > { %7306 = vmatprep.subr.bf16.mxu1 %v7593_v17  ;;  %v2650_v49 = vrot.slane %v2649_v38, 4  ;;  %v2672_v53 = vrot.slane %v2670_v47, 5  ;;  %v2686_v54 = vshll.u32 %v6245_v43, 16  ;;  %v2678_v61 = vrot.slane %v2676_v50, 5  ;;  %v6254_v43 = vld [vmem:[%s7682_s23 + $0x98] sm:$0x1] }
  0xb1   : > { %v2660_v45 = vrot.slane %v2659_v42, 4  ;;  %7353 = vmatpush3.bf16.msra.mxu0 %v7590_v22  ;;  %7274 = vmatprep.mubr.bf16.mxu0 %v6289_v48  ;;  %v2682_v62 = vrot.slane %v2680_v51, 4  ;;  %v2691_v5 = vshrl.u32 %v6246_v55, 16  ;;  %v2694_v9 = vshll.u32 %v6246_v55, 16 }
  0xb2   : > { %7227 = vmatmul.mubr.bf16.gmra.mxu1 %v7580_v12  ;;  %v2655_v60 = vsel %vm7772_vm5, %v2650_v49, %v2654_v30  ;;  %7354 = vmatprep.subr.bf16.mxu0 %v7594_v31  ;;  %v2673_v57 = vor.u32 %v2672_v53, %v2669_v52  ;;  %v2688_v4 = vrot.slane %v2686_v54, 5  ;;  %v2700_v10 = vshll.u32 %v6247_v63, 16 }
  0xb3   : > { %7230 = vmatprep.mubr.bf16.mxu1 %v7583_v21  ;;  %7307 = vmatpush3.bf16.msra.mxu1 %v7593_v17  ;;  %v2665_v3 = vsel %vm7772_vm5, %v2660_v45, %v2664_v35  ;;  %v2683_v8 = vor.u32 %v2682_v62, %v2678_v61  ;;  %v2693_v7 = vrot.slane %v2691_v5, 4  ;;  %v2704_v13 = vshrl.u32 %v6247_v63, 16  ;;  %v7588_v17 = vld [vmem:[%s7682_s23 + $0x90] sm:$0xff]  }
  0xb4   : > { %7308 = vmatprep.subr.bf16.mxu1 %v7597_v36  ;;  %v6290_v6 = vcombine.low %v2655_v60, %v2665_v3  ;;  %v2674_v12 = vrot.slane %v2673_v57, 4  ;;  %v2710_v14 = vshll.u32 %v6248_v0, 16  ;;  %v2696_v16 = vrot.slane %v2694_v9, 5  ;;  %v6255_v3 = vld [vmem:[%s7682_s23 + $0x9c] sm:$0xf] }
  0xb5   : > { %7355 = vmatpush3.bf16.msra.mxu0 %v7594_v31  ;;  %v2684_v15 = vrot.slane %v2683_v8, 4  ;;  %v2702_v18 = vrot.slane %v2700_v10, 5  ;;  %v2706_v22 = vrot.slane %v2704_v13, 4  ;;  %v2715_v1 = vshrl.u32 %v6249_v24, 16  ;;  %v6256_v57 = vld [vmem:[%s7682_s23 + $0xa0] sm:$0xf] }
  0xb6   : > { %7275 = vmatmul.mubr.bf16.gmra.mxu0 %v6290_v6  ;;  %v2679_v21 = vsel %vm7772_vm5, %v2674_v12, %v2678_v61  ;;  %v2712_v23 = vrot.slane %v2710_v14, 5  ;;  %7356 = vmatprep.subr.bf16.mxu0 %v7598_v59  ;;  %v2697_v27 = vor.u32 %v2696_v16, %v2693_v7  ;;  %v2718_v11 = vshll.u32 %v6249_v24, 16  ;;  %v6257_v8 = vld [vmem:[%s7682_s23 + $0xa4] sm:$0x1]  ;;  %v7595_v12 = vld [vmem:[%s7682_s23 + $0xb4] sm:$0xff]  }
  0xb7   : > { %7309 = vmatpush3.bf16.msra.mxu1 %v7597_v36  ;;  %v2689_v26 = vsel %vm7772_vm5, %v2684_v15, %v2688_v4  ;;  %v2707_v29 = vor.u32 %v2706_v22, %v2702_v18  ;;  %v2724_v30 = vshll.u32 %v6250_v25, 16  ;;  %v2728_v31 = vshrl.u32 %v6250_v25, 16  ;;  %v7592_v4 = vld [vmem:[%s7682_s23 + $0xa8] sm:$0xff]  }
  0xb8   : > { %7390 = vmatprep.subr.bf16.mxu1 %v8241_v2  ;;  %v6291_v28 = vcombine.low %v2679_v21, %v2689_v26  ;;  %v2698_v35 = vrot.slane %v2697_v27, 4  ;;  %v2717_v36 = vrot.slane %v2715_v1, 4  ;;  %v2720_v37 = vrot.slane %v2718_v11, 5  ;;  %v6259_v27 = vld [vmem:[%s7682_s23 + $0xac] sm:$0xf] }
  0xb9   : > { %7357 = vmatpush3.bf16.msra.mxu0 %v7598_v59  ;;  %v2734_v38 = vshll.u32 %v6251_v20, 16  ;;  %v2708_v40 = vrot.slane %v2707_v29, 4  ;;  %v2726_v41 = vrot.slane %v2724_v30, 5  ;;  %v2730_v42 = vrot.slane %v2728_v31, 4  ;;  %v6260_v20 = vld [vmem:[%s7682_s23 + $0xb0] sm:$0x1] }
  0xba   : > { %7231 = vmatmul.mubr.bf16.gmra.mxu1 %v7584_v34  ;;  %7438 = vmatprep.subr.bf16.mxu0 %v8248_v19  ;;  %v2739_v44 = vshrl.u32 %v6252_v32, 16  ;;  %v2703_v47 = vsel %vm7772_vm5, %v2698_v35, %v2702_v18  ;;  %v2721_v48 = vor.u32 %v2720_v37, %v2717_v36  ;;  %v2742_v50 = vshll.u32 %v6252_v32, 16 }
  0xbb   : > { %7234 = vmatprep.mubr.bf16.mxu1 %v7587_v58  ;;  %7278 = vmatprep.mubr.bf16.mxu0 %v6291_v28  ;;  %v2736_v49 = vrot.slane %v2734_v38, 5  ;;  %v2713_v51 = vsel %vm7772_vm5, %v2708_v40, %v2712_v23  ;;  %v2731_v34 = vor.u32 %v2730_v42, %v2726_v41  ;;  %v2748_v52 = vshll.u32 %v6253_v39, 16  ;;  %v6258_v23 = vld [vmem:[%s7682_s23 + $0xa8] sm:$0xf] }
  0xbc   : > { %v2741_v45 = vrot.slane %v2739_v44, 4  ;;  %v6292_v53 = vcombine.low %v2703_v47, %v2713_v51  ;;  %v2722_v54 = vrot.slane %v2721_v48, 4  ;;  %v2744_v55 = vrot.slane %v2742_v50, 5  ;;  %v6261_v44 = vld [vmem:[%s7682_s23 + $0xb4] sm:$0xf]  ;;  %v7596_v47 = vld [vmem:[%s7682_s23 + $0xc0] sm:$0xff]  }
  0xbd   : > { %v2752_v58 = vshrl.u32 %v6253_v39, 16  ;;  %v2732_v59 = vrot.slane %v2731_v34, 4  ;;  %v2750_v60 = vrot.slane %v2748_v52, 5  ;;  %v2758_v61 = vshll.u32 %v6254_v43, 16  ;;  %v6262_v51 = vld [vmem:[%s7682_s23 + $0xb8] sm:$0xf] }
  0xbe   : > { %7279 = vmatmul.mubr.bf16.gmra.mxu0 %v6292_v53  ;;  %v2727_v62 = vsel %vm7772_vm5, %v2722_v54, %v2726_v41  ;;  %v2745_v63 = vor.u32 %v2744_v55, %v2741_v45  ;;  %v2763_v9 = vshrl.u32 %v6255_v3, 16  ;;  %v2766_v10 = vshll.u32 %v6255_v3, 16  ;;  %v6263_v34 = vld [vmem:[%s7682_s23 + $0xbc] sm:$0x1] }
  0xbf   : > { %v2754_v0 = vrot.slane %v2752_v58, 4  ;;  %v2737_v5 = vsel %vm7772_vm5, %v2732_v59, %v2736_v49  ;;  %v2760_v6 = vrot.slane %v2758_v61, 5  ;;  %v2772_v15 = vshll.u32 %v6256_v57, 16 }
  0xc0   : > { %v6293_v7 = vcombine.low %v2727_v62, %v2737_v5  ;;  %v2746_v13 = vrot.slane %v2745_v63, 4  ;;  %v2765_v16 = vrot.slane %v2763_v9, 4  ;;  %v2768_v18 = vrot.slane %v2766_v10, 5 }
  0xc1   : > { %v2755_v14 = vor.u32 %v2754_v0, %v2750_v60  ;;  %v2776_v21 = vshrl.u32 %v6256_v57, 16  ;;  %v2782_v22 = vshll.u32 %v6257_v8, 16  ;;  %v2774_v26 = vrot.slane %v2772_v15, 5  ;;  %v6264_v57 = vld [vmem:[%s7682_s23 + $0xc0] sm:$0xf] }
  0xc2   : > { %7235 = vmatmul.mubr.bf16.gmra.mxu1 %v7588_v17  ;;  %7282 = vmatprep.mubr.bf16.mxu0 %v6293_v7  ;;  %v2751_v24 = vsel %vm7772_vm5, %v2746_v13, %v2750_v60  ;;  %v2769_v1 = vor.u32 %v2768_v18, %v2765_v16  ;;  %v2787_v28 = vshrl.u32 %v6258_v23, 16  ;;  %v2790_v30 = vshll.u32 %v6258_v23, 16  ;;  %v6266_v8 = vld [vmem:[%s7682_s23 + $0xc8] sm:$0x1] }
  0xc3   : > { %7238 = vmatprep.mubr.bf16.mxu1 %v7591_v33  ;;  %v2756_v25 = vrot.slane %v2755_v14, 4  ;;  %v2778_v11 = vrot.slane %v2776_v21, 4  ;;  %v2784_v17 = vrot.slane %v2782_v22, 5  ;;  %v2796_v31 = vshll.u32 %v6259_v27, 16 }
  0xc4   : > { %v2800_v32 = vshrl.u32 %v6259_v27, 16  ;;  %v2770_v35 = vrot.slane %v2769_v1, 4  ;;  %v2789_v37 = vrot.slane %v2787_v28, 4  ;;  %v2792_v38 = vrot.slane %v2790_v30, 5  ;;  %v6308_v1 = vld [vmem:[%s7682_s23 + $0x10] sm:$0xf] }
  0xc5   : > { %v2761_v29 = vsel %vm7772_vm5, %v2756_v25, %v2760_v6  ;;  %v2779_v36 = vor.u32 %v2778_v11, %v2774_v26  ;;  %v2798_v39 = vrot.slane %v2796_v31, 5  ;;  %v2806_v41 = vshll.u32 %v6260_v20, 16  ;;  %v6265_v6 = vld [vmem:[%s7682_s23 + $0xc4] sm:$0xf]  ;;  %v6307_v20 = vld [vmem:[%s7682_s23 + $0xc] sm:$0xe] }
  0xc6   : > { %v6294_v33 = vcombine.low %v2751_v24, %v2761_v29  ;;  %v2802_v40 = vrot.slane %v2800_v32, 4  ;;  %v2775_v42 = vsel %vm7772_vm5, %v2770_v35, %v2774_v26  ;;  %v2793_v48 = vor.u32 %v2792_v38, %v2789_v37  ;;  %v6309_v29 = vld [vmem:[%s7682_s23 + $0x14] sm:$0x1]  ;;  %v6311_v38 = vld [vmem:[%s7682_s23 + $0x1c] sm:$0xf] }
  0xc7   : > { %v2780_v43 = vrot.slane %v2779_v36, 4  ;;  %v2808_v50 = vrot.slane %v2806_v41, 5  ;;  %v2811_v45 = vshrl.u32 %v6261_v44, 16  ;;  %v2814_v53 = vshll.u32 %v6261_v44, 16  ;;  %v6310_v36 = vld [vmem:[%s7682_s23 + $0x18] sm:$0xe] }
  0xc8   : > { %7283 = vmatmul.mubr.bf16.gmra.mxu0 %v6294_v33  ;;  %v2803_v49 = vor.u32 %v2802_v40, %v2798_v39  ;;  %v2820_v54 = vshll.u32 %v6262_v51, 16  ;;  %v2824_v55 = vshrl.u32 %v6262_v51, 16  ;;  %v2794_v59 = vrot.slane %v2793_v48, 4 }
  0xc9   : > { %v2785_v52 = vsel %vm7772_vm5, %v2780_v43, %v2784_v17  ;;  %v2813_v61 = vrot.slane %v2811_v45, 4  ;;  %v2816_v62 = vrot.slane %v2814_v53, 5  ;;  %v2830_v3 = vshll.u32 %v6263_v34, 16  ;;  %v6313_v34 = vld [vmem:[%s7682_s23 + $0x24] sm:$0xe] }
  0xca   : > { %7239 = vmatmul.mubr.bf16.gmra.mxu1 %v7592_v4  ;;  %v6295_v58 = vcombine.low %v2775_v42, %v2785_v52  ;;  %v2804_v60 = vrot.slane %v2803_v49, 4  ;;  %v2822_v63 = vrot.slane %v2820_v54, 5  ;;  %v2826_v0 = vrot.slane %v2824_v55, 4  ;;  %v6314_v55 = vld [vmem:[%s7682_s23 + $0x28] sm:$0xf] }
  0xcb   : > { %7242 = vmatprep.mubr.bf16.mxu1 %v7595_v12  ;;  %v2799_v4 = vsel %vm7772_vm5, %v2794_v59, %v2798_v39  ;;  %v2835_v9 = vshrl.u32 %v6264_v57, 16  ;;  %v2838_v10 = vshll.u32 %v6264_v57, 16  ;;  %v2817_v7 = vor.u32 %v2816_v62, %v2813_v61  ;;  %v6312_v39 = vld [vmem:[%s7682_s23 + $0x20] sm:$0x1]  ;;  %v7605_v62 = vld [vmem:[%s9462_s1 + $0x1f0] sm:$0xff]  }
  0xcc   : > { %7286 = vmatprep.mubr.bf16.mxu0 %v6295_v58  ;;  %v2809_v5 = vsel %vm7772_vm5, %v2804_v60, %v2808_v50  ;;  %v2827_v13 = vor.u32 %v2826_v0, %v2822_v63  ;;  %v2832_v14 = vrot.slane %v2830_v3, 5  ;;  %v2844_v18 = vshll.u32 %v6265_v6, 16  ;;  %v6315_v58 = vld [vmem:[%s7682_s23 + $0x2c] sm:$0x1]  ;;  %v6316_v0 = vld [vmem:[%s7682_s23 + $0x30] sm:$0xe] }
  0xcd   : > { %v6296_v12 = vcombine.low %v2799_v4, %v2809_v5  ;;  %v2837_v15 = vrot.slane %v2835_v9, 4  ;;  %v2840_v16 = vrot.slane %v2838_v10, 5  ;;  %v2848_v21 = vshrl.u32 %v6265_v6, 16  ;;  %v6317_v3 = vld [vmem:[%s7682_s23 + $0x34] sm:$0xf]  ;;  %v7600_v9 = vld [vmem:[%s7682_s23 + $0x24] sm:$0xff]  }
  0xce   : > { %v2818_v22 = vrot.slane %v2817_v7, 4  ;;  %v2828_v23 = vrot.slane %v2827_v13, 4  ;;  %v2854_v24 = vshll.u32 %v6266_v8, 16  ;;  %v2846_v26 = vrot.slane %v2844_v18, 5  ;;  %v6318_v6 = vld [vmem:[%s7682_s23 + $0x38] sm:$0x1] }
  0xcf   : > { %v2841_v25 = vor.u32 %v2840_v16, %v2837_v15  ;;  %v2850_v27 = vrot.slane %v2848_v21, 4  ;;  %v6355_v30 = vrot.slane %v6307_v20, 9  ;;  %v3342_v35 = vrot.slane %v6308_v1, 5  ;;  %v7603_v13 = vld [vmem:[%s7682_s23 + $0x30] sm:$0xff]   ;;  %v6319_v21 = vld [vmem:[%s7682_s23 + $0x3c] sm:$0xe] }
  0xd0   : > { %7287 = vmatmul.mubr.bf16.gmra.mxu0 %v6296_v12  ;;  %v2823_v11 = vsel %vm7772_vm5, %v2818_v22, %v2822_v63  ;;  %v2833_v17 = vsel %vm7772_vm5, %v2828_v23, %v2832_v14  ;;  %v2856_v28 = vrot.slane %v2854_v24, 5  ;;  %v3345_v37 = vrot.slane %v6309_v29, 5  ;;  %v7606_v18 = vld [vmem:[%s9462_s1 + $0x230] sm:$0xff]   ;;  %v6320_v22 = vld [vmem:[%s7682_s23 + $0x40] sm:$0xf]  ;;  %v7609_v20 = vld [vmem:[%s9462_s1 + $0x1e8] sm:$0xff]  }
  0xd1   : > { %v6297_v31 = vcombine.low %v2823_v11, %v2833_v17  ;;  %v2842_v32 = vrot.slane %v2841_v25, 4  ;;  %v2851_v33 = vor.u32 %v2850_v27, %v2846_v26  ;;  %v6356_v40 = vrot.slane %v6310_v36, 9  ;;  %v6321_v23 = vld [vmem:[%s7682_s23 + $0x44] sm:$0x1]  ;;  %v6322_v27 = vld [vmem:[%s7682_s23 + $0x48] sm:$0xe] }
  0xd2   : > { %7243 = vmatmul.mubr.bf16.gmra.mxu1 %v7596_v47  ;;  %v3343_v43 = vsel %vm7753_vm4, %v6355_v30, %v3342_v35  ;;  %v3344_v44 = vrot.slane %v3342_v35, 4  ;;  %v7599_v47 = vld [vmem:[%s7682_s23 + $0x18] sm:$0xff]   ;;  %v3349_v48 = vrot.slane %v6311_v38, 5  ;;  %v3352_v49 = vrot.slane %v6312_v39, 5  ;;  %v6324_v29 = vld [vmem:[%s7682_s23 + $0x50] sm:$0x1] }
  0xd3   : > { %7290 = vmatprep.mubr.bf16.mxu0 %v6297_v31  ;;  %v2847_v41 = vsel %vm7772_vm5, %v2842_v32, %v2846_v26  ;;  %v2852_v42 = vrot.slane %v2851_v33, 4  ;;  %v6357_v59 = vrot.slane %v6313_v34, 9  ;;  %v3356_v60 = vrot.slane %v6314_v55, 5  ;;  %v7613_v31 = vld [vmem:[%s9462_s1 + $0x1e0] sm:$0xff]  }
  0xd4   : > { %v3346_v51 = vsel %vm7753_vm4, %v3344_v44, %v3345_v37  ;;  %v3350_v53 = vsel %vm7753_vm4, %v6356_v40, %v3349_v48  ;;  %v3351_v54 = vrot.slane %v3349_v48, 4  ;;  %v3359_v61 = vrot.slane %v6315_v58, 5  ;;  %v7604_v40 = vld [vmem:[%s7682_s23 + $0x3c] sm:$0xff]   ;;  %v6325_v44 = vld [vmem:[%s7682_s23 + $0x54] sm:$0xe] }
  0xd5   : > { %v2857_v50 = vsel %vm7772_vm5, %v2852_v42, %v2856_v28  ;;  %v6387_v52 = vcombine.low %v3343_v43, %v3346_v51  ;;  %v3357_v4 = vsel %vm7753_vm4, %v6357_v59, %v3356_v60  ;;  %v3358_v5 = vrot.slane %v3356_v60, 4  ;;  %v6323_v28 = vld [vmem:[%s7682_s23 + $0x4c] sm:$0xf]  ;;  %v6327_v48 = vld [vmem:[%s7682_s23 + $0x5c] sm:$0x1] }
  0xd6   : > { %v6298_v45 = vcombine.low %v2847_v41, %v2857_v50  ;;  %v3353_v63 = vsel %vm7753_vm4, %v3351_v54, %v3352_v49  ;;  %v6358_v8 = vrot.slane %v6316_v0, 9  ;;  %v3363_v10 = vrot.slane %v6317_v3, 5  ;;  %v7610_v43 = vld [vmem:[%s9462_s1 + $0x228] sm:$0xff]   ;;  %v6328_v54 = vld [vmem:[%s7682_s23 + $0x60] sm:$0xe]  ;;  %v7617_v3 = vld [vmem:[%s9462_s1 + $0x1d8] sm:$0xff]  }
  0xd7   : > { %7310 = vmatprep.mubr.bf16.mxu1 %v6387_v52  ;;  %v6388_v57 = vcombine.low %v3350_v53, %v3353_v63  ;;  %v3366_v12 = vrot.slane %v6318_v6, 5  ;;  %v3360_v7 = vsel %vm7753_vm4, %v3358_v5, %v3359_v61  ;;  %v6359_v24 = vrot.slane %v6319_v21, 9  ;;  %v6329_v55 = vld [vmem:[%s7682_s23 + $0x64] sm:$0xf]  ;;  %v6330_v58 = vld [vmem:[%s7682_s23 + $0x68] sm:$0x1] }
  0xd8   : > { %7291 = vmatmul.mubr.bf16.gmra.mxu0 %v6298_v45  ;;  %v6389_v14 = vcombine.low %v3357_v4, %v3360_v7  ;;  %v3364_v15 = vsel %vm7753_vm4, %v6358_v8, %v3363_v10  ;;  %v3365_v16 = vrot.slane %v3363_v10, 4  ;;  %v3370_v25 = vrot.slane %v6320_v22, 5  ;;  %v7614_v0 = vld [vmem:[%s9462_s1 + $0x220] sm:$0xff]   ;;  %v7621_v8 = vld [vmem:[%s9462_s1 + $0x1d0] sm:$0xff]   ;;  %v7618_v7 = vld [vmem:[%s9462_s1 + $0x218] sm:$0xff]  }
  0xd9   : > { %7358 = vmatprep.mubr.bf16.mxu0 %v7599_v47  ;;  %v3373_v26 = vrot.slane %v6321_v23, 5  ;;  %v6360_v30 = vrot.slane %v6322_v27, 9  ;;  %v3377_v35 = vrot.slane %v6323_v28, 5  ;;  %v3380_v36 = vrot.slane %v6324_v29, 5  ;;  %v6326_v47 = vld [vmem:[%s7682_s23 + $0x58] sm:$0xf] }
  0xda   : > { %7311 = vmatmul.mubr.bf16.vlgmr.msra.gmra.mxu1 %v6388_v57  ;;  %v3371_v11 = vsel %vm7753_vm4, %v6359_v24, %v3370_v25  ;;  %v3372_v17 = vrot.slane %v3370_v25, 4  ;;  %v6361_v49 = vrot.slane %v6325_v44, 9  ;;  %v3384_v52 = vrot.slane %v6326_v47, 5  ;;  %v7608_v21 = vld [vmem:[%s7682_s23 + $0x54] sm:$0xff]   ;;  %v7611_v25 = vld [vmem:[%s7682_s23 + $0x60] sm:$0xff]  }
  0xdb   : > { %7391 = vmatpush3.bf16.msra.mxu1 %v8241_v2  ;;  %7314 = vmatprep.mubr.bf16.mxu1 %v6389_v14  ;;  %v3367_v2 = vsel %vm7753_vm4, %v3365_v16, %v3366_v12  ;;  %v3379_v42 = vrot.slane %v3377_v35, 4  ;;  %v3378_v34 = vsel %vm7753_vm4, %v6360_v30, %v3377_v35  ;;  %v3387_v53 = vrot.slane %v6327_v48, 5  ;;  %v6331_v14 = vld [vmem:[%s7682_s23 + $0x6c] sm:$0xe]  ;;  %v6333_v22 = vld [vmem:[%s7682_s23 + $0x74] sm:$0x1] }
  0xdc   : > { %7392 = vmatprep.subr.bf16.mxu1 %v7605_v62  ;;  %v6390_v1 = vcombine.low %v3364_v15, %v3367_v2  ;;  %v3374_v37 = vsel %vm7753_vm4, %v3372_v17, %v3373_v26  ;;  %v3385_v61 = vsel %vm7753_vm4, %v6361_v49, %v3384_v52  ;;  %v3391_v63 = vrot.slane %v6329_v55, 5  ;;  %v6332_v15 = vld [vmem:[%s7682_s23 + $0x70] sm:$0xf]  ;;  %v6334_v26 = vld [vmem:[%s7682_s23 + $0x78] sm:$0xe]  ;;  %v7629_v49 = vld [vmem:[%s9462_s1 + $0x1c0] sm:$0xff]  }
  0xdd   : > { %v6391_v41 = vcombine.low %v3371_v11, %v3374_v37  ;;  %v3381_v45 = vsel %vm7753_vm4, %v3379_v42, %v3380_v36  ;;  %v6362_v4 = vrot.slane %v6328_v54, 9  ;;  %v3394_v12 = vrot.slane %v6330_v58, 5  ;;  %v6335_v28 = vld [vmem:[%s7682_s23 + $0x7c] sm:$0xf]  ;;  %v6336_v29 = vld [vmem:[%s7682_s23 + $0x80] sm:$0x1] }
  0xde   : > { %v6392_v57 = vcombine.low %v3378_v34, %v3381_v45  ;;  %v3393_v10 = vrot.slane %v3391_v63, 4  ;;  %v6363_v23 = vrot.slane %v6331_v14, 9  ;;  %v3398_v24 = vrot.slane %v6332_v15, 5  ;;  %v7622_v30 = vld [vmem:[%s9462_s1 + $0x210] sm:$0xff]   ;;  %v7626_v55 = vld [vmem:[%s9462_s1 + $0x208] sm:$0xff]   ;;  %v7630_v15 = vld [vmem:[%s9462_s1 + $0x200] sm:$0xff]  }
  0xdf   : > { %7393 = vmatpush3.bf16.msra.mxu1 %v7605_v62  ;;  %v3386_v62 = vrot.slane %v3384_v52, 4  ;;  %v3401_v2 = vrot.slane %v6333_v22, 5  ;;  %v3405_v35 = vrot.slane %v6335_v28, 5  ;;  %v3408_v44 = vrot.slane %v6336_v29, 5  ;;  %v6338_v52 = vld [vmem:[%s7682_s23 + $0x88] sm:$0xf] }
  0xe0   : > { %7359 = vmatmul.mubr.bf16.vlgmr.msra.gmra.mxu0 %v7600_v9  ;;  %7394 = vmatprep.subr.bf16.mxu1 %v7609_v20  ;;  %v3395_v11 = vsel %vm7753_vm4, %v3393_v10, %v3394_v12  ;;  %v3400_v17 = vrot.slane %v3398_v24, 4  ;;  %v3412_v58 = vrot.slane %v6338_v52, 5  ;;  %v6345_v28 = vld [vmem:[%s7682_s23 + $0xa4] sm:$0x1] }
  0xe1   : > { %7439 = vmatpush3.bf16.msra.mxu0 %v8248_v19  ;;  %7362 = vmatprep.mubr.bf16.mxu0 %v7603_v13  ;;  %v7607_v19 = vld [vmem:[%s7682_s23 + $0x48] sm:$0xff]   ;;  %v3388_v9 = vsel %vm7753_vm4, %v3386_v62, %v3387_v53  ;;  %v3407_v45 = vrot.slane %v3405_v35, 4 }
  0xe2   : > { %7440 = vmatprep.subr.bf16.mxu0 %v7606_v18  ;;  %7315 = vmatmul.mubr.bf16.gmra.mxu1 %v6390_v1  ;;  %v6393_v13 = vcombine.low %v3385_v61, %v3388_v9  ;;  %v3392_v1 = vsel %vm7753_vm4, %v6362_v4, %v3391_v63  ;;  %v6339_v53 = vld [vmem:[%s7682_s23 + $0x8c] sm:$0x1]  ;;  %v3414_v9 = vrot.slane %v3412_v58, 4 }
  0xe3   : > { %7318 = vmatprep.mubr.bf16.mxu1 %v6391_v41  ;;  %7395 = vmatpush3.bf16.msra.mxu1 %v7609_v20  ;;  %v3402_v41 = vsel %vm7753_vm4, %v3400_v17, %v3401_v2  ;;  %v6394_v42 = vcombine.low %v3392_v1, %v3395_v11  ;;  %v3415_v61 = vrot.slane %v6339_v53, 5  ;;  %v7612_v4 = vld [vmem:[%s7682_s23 + $0x6c] sm:$0xff]   ;;  %v3409_v14 = vsel %vm7753_vm4, %v3407_v45, %v3408_v44  ;;  %v6344_v1 = vld [vmem:[%s7682_s23 + $0xa0] sm:$0xf] }
  0xe4   : > { %7396 = vmatprep.subr.bf16.mxu1 %v7613_v31  ;;  %v3426_v29 = vrot.slane %v6344_v1, 5  ;;  %v6347_v44 = vld [vmem:[%s7682_s23 + $0xac] sm:$0xf] }
  0xe5   : > { %7441 = vmatpush3.bf16.msra.mxu0 %v7606_v18  ;;  %v3416_v22 = vsel %vm7753_vm4, %v3414_v9, %v3415_v61  ;;  %v3433_v53 = vrot.slane %v6347_v44, 5  ;;  %v7619_v9 = vld [vmem:[%s7682_s23 + $0x90] sm:$0xff]  }
  0xe6   : > { %7442 = vmatprep.subr.bf16.mxu0 %v7610_v43 }
  0xe7   : > { %7397 = vmatpush3.bf16.msra.mxu1 %v7613_v31  ;;  %v3399_v31 = vsel %vm7753_vm4, %v6363_v23, %v3398_v24 }
  0xe8   : > { %7363 = vmatmul.mubr.bf16.gmra.mxu0 %v7604_v40  ;;  %7398 = vmatprep.subr.bf16.mxu1 %v7617_v3  ;;  %v7625_v40 = vld [vmem:[%s9462_s1 + $0x1c8] sm:$0xff]   ;;  %v6395_v34 = vcombine.low %v3399_v31, %v3402_v41  ;;  %v3429_v41 = vrot.slane %v6345_v28, 5  ;;  %v6352_v28 = vld [vmem:[%s7682_s23 + $0xc0] sm:$0xe] }
  0xe9   : > { %7366 = vmatprep.mubr.bf16.mxu0 %v7607_v19  ;;  %7443 = vmatpush3.bf16.msra.mxu0 %v7610_v43  ;;  %v6364_v43 = vrot.slane %v6334_v26, 9  ;;  %v6337_v19 = vld [vmem:[%s7682_s23 + $0x84] sm:$0xe]  ;;  %v6343_v26 = vld [vmem:[%s7682_s23 + $0x9c] sm:$0xe] }
  0xea   : > { %7444 = vmatprep.subr.bf16.mxu0 %v7614_v0  ;;  %7319 = vmatmul.mubr.bf16.gmra.mxu1 %v6392_v57  ;;  %v6365_v54 = vrot.slane %v6337_v19, 9  ;;  %v6342_v57 = vld [vmem:[%s7682_s23 + $0x98] sm:$0x1]  ;;  %v6348_v19 = vld [vmem:[%s7682_s23 + $0xb0] sm:$0x1] }
  0xeb   : > { %7322 = vmatprep.mubr.bf16.mxu1 %v6393_v13  ;;  %7399 = vmatpush3.bf16.msra.mxu1 %v7617_v3  ;;  %v6341_v3 = vld [vmem:[%s7682_s23 + $0x94] sm:$0xf]  ;;  %v3406_v13 = vsel %vm7753_vm4, %v6364_v43, %v3405_v35  ;;  %v3422_v24 = vrot.slane %v6342_v57, 5  ;;  %v3428_v43 = vrot.slane %v3426_v29, 4 }
  0xec   : > { %v8359_v32 = vpop.f32.mrf.mxu0  ;;  %v8361_v33 = vpop.f32.mrf.mxu1  ;;  %7400 = vmatprep.subr.bf16.mxu1 %v7621_v8  ;;  %v3419_v10 = vrot.slane %v6341_v3, 5  ;;  %v6396_v11 = vcombine.low %v3406_v13, %v3409_v14  ;;  %v6351_v13 = vld [vmem:[%s7682_s23 + $0xbc] sm:$0x1] }
  0xed   : > { %7445 = vmatpush3.bf16.msra.mxu0 %v7614_v0  ;;  %v6340_v0 = vld [vmem:[%s7682_s23 + $0x90] sm:$0xe]  ;;  %v3430_v57 = vsel %vm7753_vm4, %v3428_v43, %v3429_v41  ;;  %v6370_v43 = vrot.slane %v6352_v28, 9 }
  0xee   : > { %v8366_v38 = vpop.f32.mrf.mxu0  ;;  %v8368_v39 = vpop.f32.mrf.mxu1  ;;  %7446 = vmatprep.subr.bf16.mxu0 %v7618_v7  ;;  %v6366_v23 = vrot.slane %v6340_v0, 9  ;;  %v3421_v17 = vrot.slane %v3419_v10, 4 }
  0xef   : > { %7401 = vmatpush3.bf16.msra.mxu1 %v7621_v8  ;;  %v7615_v8 = vld [vmem:[%s7682_s23 + $0x78] sm:$0xff]  }
  0xf0   : > { %v8378_v50 = vpop.f32.mrf.mxu0  ;;  %v8380_v51 = vpop.f32.mrf.mxu1  ;;  %7367 = vmatmul.mubr.bf16.gmra.mxu0 %v7608_v21  ;;  %7402 = vmatprep.subr.bf16.mxu1 %v7625_v40  ;;  %v3413_v21 = vsel %vm7753_vm4, %v6365_v54, %v3412_v58  ;;  %v3436_v54 = vrot.slane %v6348_v19, 5  ;;  %v3423_v0 = vsel %vm7753_vm4, %v3421_v17, %v3422_v24  ;;  %v3443_v24 = vrot.slane %v6351_v13, 5 }
  0xf1   : > { %7370 = vmatprep.mubr.bf16.mxu0 %v7611_v25  ;;  %7447 = vmatpush3.bf16.msra.mxu0 %v7618_v7 }
  0xf2   : > { %v8389_v59 = vpop.f32.mrf.mxu0  ;;  %v8391_v60 = vpop.f32.mrf.mxu1  ;;  %7448 = vmatprep.subr.bf16.mxu0 %v7622_v30  ;;  %7323 = vmatmul.mubr.bf16.gmra.mxu1 %v6394_v42  ;;  %v6346_v42 = vld [vmem:[%s7682_s23 + $0xa8] sm:$0xe] }
  0xf3   : > { %7326 = vmatprep.mubr.bf16.mxu1 %v6395_v34  ;;  %7403 = vmatpush3.bf16.msra.mxu1 %v7625_v40  ;;  %v6367_v40 = vrot.slane %v6343_v26, 9  ;;  %v6368_v34 = vrot.slane %v6346_v42, 9 }
  0xf4   : > { %v8401_v5 = vpop.f32.mrf.mxu0  ;;  %v8403_v6 = vpop.f32.mrf.mxu1  ;;  %7404 = vmatprep.subr.bf16.mxu1 %v7629_v49 }
  0xf5   : > { %7449 = vmatpush3.bf16.msra.mxu0 %v7622_v30  ;;  %v6397_v30 = vcombine.low %v3413_v21, %v3416_v22  ;;  %v3427_v3 = vsel %vm7753_vm4, %v6367_v40, %v3426_v29  ;;  %v6353_v29 = vld [vmem:[%s7682_s23 + $0xc4] sm:$0xf] }
  0xf6   : > { %v8415_v16 = vpop.f32.mrf.mxu0  ;;  %v8417_v18 = vpop.f32.mrf.mxu1  ;;  %7450 = vmatprep.subr.bf16.mxu0 %v7626_v55  ;;  %v6399_v1 = vcombine.low %v3427_v3, %v3430_v57  ;;  %v3447_v44 = vrot.slane %v6353_v29, 5 }
  0xf7   : > { %7405 = vmatpush3.bf16.msra.mxu1 %v7629_v49  ;;  %v3420_v49 = vsel %vm7753_vm4, %v6366_v23, %v3419_v10  ;;  %v6350_v10 = vld [vmem:[%s7682_s23 + $0xb8] sm:$0xf] }
  0xf8   : > { %v8423_v27 = vpop.f32.mrf.mxu0  ;;  %v8425_v20 = vpop.f32.mrf.mxu1  ;;  %7371 = vmatmul.mubr.bf16.gmra.mxu0 %v7612_v4  ;;  %v3435_v4 = vrot.slane %v3433_v53, 4  ;;  %v3440_v23 = vrot.slane %v6350_v10, 5  ;;  %v6398_v26 = vcombine.low %v3420_v49, %v3423_v0  ;;  %v7620_v49 = vld [vmem:[%s7682_s23 + $0x9c] sm:$0xff]   ;;  %v8546_v0 = vsel %vm7753_vm4, %v6370_v43, %v3447_v44 }
  0xf9   : > { %9469 = vst [vmem:[#allocation3_spill] sm:$0xff] %v8425_v20  ;;  %7374 = vmatprep.mubr.bf16.mxu0 %v7615_v8  ;;  %7451 = vmatpush3.bf16.msra.mxu0 %v7626_v55  ;;  %v7616_v55 = vld [vmem:[%s7682_s23 + $0x84] sm:$0xff]   ;;  %v6349_v8 = vld [vmem:[%s7682_s23 + $0xb4] sm:$0xe]  ;;  %v3449_v3 = vrot.slane %v3447_v44, 4 }
  0xfa   : > { %v8438_v36 = vpop.f32.mrf.mxu0  ;;  %v8440_v37 = vpop.f32.mrf.mxu1  ;;  %7452 = vmatprep.subr.bf16.mxu0 %v7630_v15  ;;  %7327 = vmatmul.mubr.bf16.gmra.mxu1 %v6396_v11  ;;  %v6369_v14 = vrot.slane %v6349_v8, 9  ;;  %v8525_v11 = vsel %vm7753_vm4, %v6368_v34, %v3433_v53  ;;  %v8529_v17 = vsel %vm7753_vm4, %v3435_v4, %v3436_v54  ;;  %v3442_v42 = vrot.slane %v3440_v23, 4  ;;  %v6483_v8 = vld [vmem:[%s7682_s23 + $0x18] sm:$0xf] }
  0xfb   : > { %9470 = vst [vmem:[#allocation4_spill] sm:$0xff] %v8440_v37  ;;  %7330 = vmatprep.mubr.bf16.mxu1 %v6397_v30  ;;  %v6493_v37 = vld [vmem:[%s7682_s23 + $0x40] sm:$0xf] }
  0xfc   : > { %v8448_v47 = vpop.f32.mrf.mxu0  ;;  %v8450_v48 = vpop.f32.mrf.mxu1  ;;  %v8536_v41 = vsel %vm7753_vm4, %v6369_v14, %v3440_v23  ;;  %v7623_v23 = vld [vmem:[%s7682_s23 + $0xa8] sm:$0xff]  }
  0xfd   : > { %9471 = vst [vmem:[#allocation5_spill] sm:$0xff] %v8450_v48  ;;  %7453 = vmatpush3.bf16.msra.mxu0 %v7630_v15  ;;  %v6354_v15 = vld [vmem:[%s7682_s23 + $0xc8] sm:$0x1] }
  0xfe   : > { %v8460_v62 = vpop.f32.mrf.mxu0  ;;  %v8462_v63 = vpop.f32.mrf.mxu1  ;;  %v3450_v19 = vrot.slane %v6354_v15, 5 }
  0xff   : > { %9472 = vst [vmem:[#allocation6_spill] sm:$0xff] %v8462_v63 }
 0x100   : > { %v8469_v12 = vpop.f32.mrf.mxu0  ;;  %v8471_v7 = vpop.f32.mrf.mxu1  ;;  %7375 = vmatmul.mubr.bf16.gmra.mxu0 %v7616_v55  ;;  %v8542_v55 = vsel %vm7753_vm4, %v3442_v42, %v3443_v24  ;;  %v6485_v24 = vld [vmem:[%s7682_s23 + $0x20] sm:$0x1] }
 0x101   : > { %9473 = vst [vmem:[#allocation7_spill] sm:$0xff] %v8471_v7  ;;  %7378 = vmatprep.mubr.bf16.mxu0 %v7619_v9  ;;  %v6401_v4 = vcombine.low %v8536_v41, %v8542_v55  ;;  %v6484_v9 = vld [vmem:[%s7682_s23 + $0x1c] sm:$0xf]  ;;  %v4357_v15 = vshll.u32 %v6485_v24, 16  ;;  %v6486_v24 = vld [vmem:[%s7682_s23 + $0x24] sm:$0xf] }
 0x102   : > { %v8484_v25 = vpop.f32.mrf.mxu0  ;;  %v8486_v2 = vpop.f32.mrf.mxu1  ;;  %7331 = vmatmul.mubr.bf16.gmra.mxu1 %v6398_v26  ;;  %v4338_v26 = vshrl.u32 %v6483_v8, 16  ;;  %v4351_v29 = vshrl.u32 %v6484_v9, 16 }
 0x103   : > { %9474 = vst [vmem:[#allocation8_spill] sm:$0xff] %v8486_v2  ;;  %7334 = vmatprep.mubr.bf16.mxu1 %v6399_v1  ;;  %v6489_v2 = vld [vmem:[%s7682_s23 + $0x30] sm:$0xf] }
 0x104   : > { %v8491_v31 = vpop.f32.mrf.mxu0  ;;  %v8493_v35 = vpop.f32.mrf.mxu1  ;;  %v4340_v43 = vrot.slane %v4338_v26, 4  ;;  %v4353_v55 = vrot.slane %v4351_v29, 4  ;;  %v4362_v26 = vshrl.u32 %v6486_v24, 16 }
 0x105   : > { %9475 = vst [vmem:[#allocation9_spill] sm:$0xff] %v8493_v35 }
 0x106   : > { %v8498_v45 = vpop.f32.mrf.mxu0  ;;  %v8500_v52 = vpop.f32.mrf.mxu1 }
 0x107   : > { %9476 = vst [vmem:[#allocation10_spill] sm:$0xff] %v8500_v52 }
 0x108   : > { %v8504_v58 = vpop.f32.mrf.mxu0  ;;  %v8506_v61 = vpop.f32.mrf.mxu1  ;;  %7379 = vmatmul.mubr.bf16.gmra.mxu0 %v7620_v49 }
 0x109   : > { %9477 = vst [vmem:[#allocation11_spill] sm:$0xff] %v8506_v61  ;;  %7382 = vmatprep.mubr.bf16.mxu0 %v7623_v23 }
 0x10a   : > { %v8519_v21 = vpop.f32.mrf.mxu0  ;;  %v8521_v22 = vpop.f32.mrf.mxu1 }
 0x10b   : > { %9478 = vst [vmem:[#allocation12_spill] sm:$0xff] %v8521_v22  ;;  %v4364_v22 = vrot.slane %v4362_v26, 4 }
 0x10c   : > { %v7120_v30 = vpop.f32.mrf.mxu1  ;;  %v7168_v40 = vpop.f32.mrf.mxu0 }
 0x10d   : > { %v1316_v34 = vadd.f32 %v7120_v30, %v8359_v32  ;;  %v6400_v32 = vcombine.low %v8525_v11, %v8529_v17  ;;  %v4341_v11 = vshll.u32 %v6483_v8, 16  ;;  %v4347_v17 = vshll.u32 %v6484_v9, 16  ;;  %v6571_v30 = vld [vmem:[%s7682_s23 + $0x18] sm:$0xe] }
 0x10e   : > { %v1155_v53 = vpop.f32.mrf.mxu1  ;;  %v1752_v54 = vpop.f32.mrf.mxu0 }
 0x10f   : > { %v1314_v57 = vadd.f32 %v1155_v53, %v8366_v38  ;;  %v8555_v10 = vadd.f32 %v7168_v40, %v1316_v34  ;;  %v8562_v38 = vsel %vm7753_vm4, %v3449_v3, %v3450_v19  ;;  %v6572_v40 = vld [vmem:[%s7682_s23 + $0x1c] sm:$0xf]  ;;  %v4343_v44 = vrot.slane %v4341_v11, 5  ;;  %v6573_v34 = vld [vmem:[%s7682_s23 + $0x20] sm:$0x1]  ;;  %7335 = vmatmul.mubr.bf16.gmra.mxu1 %v6400_v32 }
 0x110   : > { %v7121_v13 = vpop.f32.mrf.mxu1  ;;  %v8557_v14 = vpop.f32.mrf.mxu0  ;;  %v4349_v19 = vrot.slane %v4347_v17, 5  ;;  %v6619_v53 = vrot.slane %v6571_v30, 9  ;;  %v4359_v3 = vrot.slane %v4357_v15, 5  ;;  %v5205_v8 = vrot.slane %v6572_v40, 5  ;;  %7338 = vmatprep.mubr.bf16.mxu1 %v6401_v4 }
 0x111   : > { %9479 = vst [vmem:[#allocation13_spill] sm:$0xff] %v8555_v10  ;;  %v8569_v41 = vadd.f32 %v1752_v54, %v1314_v57  ;;  %v5208_v9 = vrot.slane %v6573_v34, 5  ;;  %v4344_v57 = vor.u32 %v4343_v44, %v4340_v43  ;;  %v6488_v10 = vld [vmem:[%s7682_s23 + $0x2c] sm:$0x1]  ;;  %v4365_v11 = vshll.u32 %v6486_v24, 16 }
 0x112   : > { %v8571_v1 = vpop.f32.mrf.mxu1  ;;  %v8573_v42 = vpop.f32.mrf.mxu0  ;;  %v1317_v17 = vadd.f32 %v7121_v13, %v8378_v50  ;;  %v4354_v29 = vor.u32 %v4353_v55, %v4349_v19  ;;  %v8586_v15 = vsel %vm7753_vm4, %v6619_v53, %v5205_v8  ;;  %v5207_v30 = vrot.slane %v5205_v8, 4  ;;  %v6574_v34 = vld [vmem:[%s7682_s23 + $0x24] sm:$0xe]  ;;  %v6575_v50 = vld [vmem:[%s7682_s23 + $0x28] sm:$0xf] }
 0x113   : > { %9480 = vst [vmem:[#allocation14_spill] sm:$0xff] %v8569_v41  ;;  %v6487_v41 = vld [vmem:[%s7682_s23 + $0x28] sm:$0xf]  ;;  %v4345_v44 = vrot.slane %v4344_v57, 4  ;;  %v4367_v24 = vrot.slane %v4365_v11, 5  ;;  %v4381_v55 = vshll.u32 %v6488_v10, 16 }
 0x114   : > { %v8577_v28 = vpop.f32.mrf.mxu1  ;;  %v8579_v54 = vpop.f32.mrf.mxu0  ;;  %v4371_v40 = vshll.u32 %v6487_v41, 16  ;;  %v4375_v61 = vshrl.u32 %v6487_v41, 16  ;;  %v4355_v13 = vrot.slane %v4354_v29, 4  ;;  %v8596_v23 = vsel %vm7753_vm4, %v5207_v30, %v5208_v9  ;;  %v6576_v8 = vld [vmem:[%s7682_s23 + $0x2c] sm:$0x1]  ;;  %v7624_v57 = vld [vmem:[%s7682_s23 + $0xb4] sm:$0xff]  }
 0x115   : > { %v4350_v41 = vsel %vm7772_vm5, %v4345_v44, %v4349_v19  ;;  %v4368_v26 = vor.u32 %v4367_v24, %v4364_v22  ;;  %v7627_v11 = vld [vmem:[%s7682_s23 + $0xc0] sm:$0xff]   ;;  %v4383_v29 = vrot.slane %v4381_v55, 5  ;;  %v6620_v30 = vrot.slane %v6574_v34, 9  ;;  %v6490_v22 = vld [vmem:[%s7682_s23 + $0x34] sm:$0xf]  ;;  %7383 = vmatmul.mubr.bf16.gmra.mxu0 %v7624_v57 }
 0x116   : > { %v8589_v49 = vpop.f32.mrf.mxu1  ;;  %v8591_v43 = vpop.f32.mrf.mxu0  ;;  %v4373_v53 = vrot.slane %v4371_v40, 5  ;;  %v4377_v9 = vrot.slane %v4375_v61, 4  ;;  %v4360_v10 = vsel %vm7772_vm5, %v4355_v13, %v4359_v3  ;;  %v5212_v40 = vrot.slane %v6575_v50, 5  ;;  %v6491_v50 = vld [vmem:[%s7682_s23 + $0x38] sm:$0x1]  ;;  %7386 = vmatprep.mubr.bf16.mxu0 %v7627_v11 }
 0x117   : > { %v6547_v19 = vcombine.low %v4350_v41, %v4360_v10  ;;  %v4369_v44 = vrot.slane %v4368_v26, 4  ;;  %v5215_v32 = vrot.slane %v6576_v8, 5  ;;  %v8622_v24 = vadd.f32 %v8557_v14, %v1317_v17  ;;  %v6577_v14 = vld [vmem:[%s7682_s23 + $0x30] sm:$0xe]  ;;  %v6579_v57 = vld [vmem:[%s7682_s23 + $0x38] sm:$0x1] }
 0x118   : > { %v8599_v52 = vpop.f32.mrf.mxu1  ;;  %v8601_v35 = vpop.f32.mrf.mxu0  ;;  %v4378_v63 = vor.u32 %v4377_v9, %v4373_v53  ;;  %v8619_v61 = vsel %vm7753_vm4, %v6620_v30, %v5212_v40  ;;  %v5214_v3 = vrot.slane %v5212_v40, 4  ;;  %v1315_v34 = vadd.f32 %v8571_v1, %v8389_v59  ;;  %v6578_v30 = vld [vmem:[%s7682_s23 + $0x34] sm:$0xf] }
 0x119   : > { %9481 = vst [vmem:[#allocation15_spill] sm:$0xff] %v8622_v24  ;;  %v4374_v8 = vsel %vm7772_vm5, %v4369_v44, %v4373_v53  ;;  %v4386_v26 = vshrl.u32 %v6489_v2, 16  ;;  %v4389_v9 = vshll.u32 %v6489_v2, 16  ;;  %v4395_v1 = vshll.u32 %v6490_v22, 16 }
 0x11a   : > { %v8612_v7 = vpop.f32.mrf.mxu1  ;;  %v8614_v4 = vpop.f32.mrf.mxu0  ;;  %v4379_v41 = vrot.slane %v4378_v63, 4  ;;  %v8636_v17 = vsel %vm7753_vm4, %v5214_v3, %v5215_v32  ;;  %v8639_v59 = vadd.f32 %v8573_v42, %v1315_v34  ;;  %v4399_v10 = vshrl.u32 %v6490_v22, 16  ;;  %v6492_v42 = vld [vmem:[%s7682_s23 + $0x3c] sm:$0xf] }
 0x11b   : > { %v4388_v32 = vrot.slane %v4386_v26, 4  ;;  %v4391_v11 = vrot.slane %v4389_v9, 5  ;;  %v9483_v44 = vcombine.low %v8546_v0, %v8562_v38  ;;  %v4397_v3 = vrot.slane %v4395_v1, 5 }
 0x11c   : > { %v8627_v13 = vpop.f32.mrf.mxu1  ;;  %v8629_v55 = vpop.f32.mrf.mxu0  ;;  %9482 = vst [vmem:[#allocation16_spill] sm:$0xff] %v8639_v59  ;;  %v4384_v2 = vsel %vm7772_vm5, %v4379_v41, %v4383_v29  ;;  %v4401_v34 = vrot.slane %v4399_v10, 4  ;;  %v4405_v59 = vshll.u32 %v6491_v50, 16  ;;  %v7628_v29 = vld [vmem:[%s7682_s23 + $0xcc] sm:$0xff]   ;;  %v6621_v26 = vrot.slane %v6577_v14, 9 }
 0x11d   : > { %7339 = vmatmul.mubr.bf16.gmra.mxu1 %v9483_v44  ;;  %v6548_v22 = vcombine.low %v4374_v8, %v4384_v2  ;;  %v4392_v41 = vor.u32 %v4391_v11, %v4388_v32  ;;  %v5219_v53 = vrot.slane %v6578_v30, 5  ;;  %v5222_v9 = vrot.slane %v6579_v57, 5  ;;  %v6580_v32 = vld [vmem:[%s7682_s23 + $0x3c] sm:$0xe]  ;;  %7387 = vmatmul.mubr.bf16.gmra.mxu0 %v7628_v29  ;;  %v6581_v44 = vld [vmem:[%s7682_s23 + $0x40] sm:$0xf] }
 0x11e   : > { %v8643_v40 = vpop.f32.mrf.mxu1  ;;  %v8645_v63 = vpop.f32.mrf.mxu0  ;;  %7406 = vmatprep.mubr.bf16.mxu1 %v6547_v19  ;;  %v4402_v20 = vor.u32 %v4401_v34, %v4397_v3  ;;  %v4407_v0 = vrot.slane %v4405_v59, 5  ;;  %v1320_v38 = vadd.f32 %v8577_v28, %v8401_v5  ;;  %v4410_v8 = vshrl.u32 %v6492_v42, 16  ;;  %v6494_v19 = vld [vmem:[%s7682_s23 + $0x44] sm:$0x1] }
 0x11f   : > { %v4393_v50 = vrot.slane %v4392_v41, 4  ;;  %v8665_v1 = vsel %vm7753_vm4, %v6621_v26, %v5219_v53  ;;  %v5221_v10 = vrot.slane %v5219_v53, 4  ;;  %v4413_v14 = vshll.u32 %v6492_v42, 16 }
 0x120   : > { %v8655_v24 = vpop.f32.mrf.mxu1  ;;  %v8657_v48 = vpop.f32.mrf.mxu0  ;;  %v4403_v30 = vrot.slane %v4402_v20, 4  ;;  %v8669_v57 = vadd.f32 %v8579_v54, %v1320_v38  ;;  %v4412_v2 = vrot.slane %v4410_v8, 4  ;;  %v4419_v59 = vshll.u32 %v6493_v37, 16  ;;  %v6582_v54 = vld [vmem:[%s7682_s23 + $0x44] sm:$0x1] }
 0x121   : > { %v4398_v28 = vsel %vm7772_vm5, %v4393_v50, %v4397_v3  ;;  %v5223_v53 = vsel %vm7753_vm4, %v5221_v10, %v5222_v9  ;;  %v4415_v42 = vrot.slane %v4413_v14, 5  ;;  %v4423_v20 = vshrl.u32 %v6493_v37, 16  ;;  %v6495_v10 = vld [vmem:[%s7682_s23 + $0x48] sm:$0xf] }
 0x122   : > { %9484 = vst [vmem:[#allocation17_spill] sm:$0xff] %v8669_v57  ;;  %v8672_v11 = vpop.f32.mrf.mxu1  ;;  %v8674_v5 = vpop.f32.mrf.mxu0  ;;  %v9485_v34 = vcombine.low %v8586_v15, %v8596_v23  ;;  %v4408_v41 = vsel %vm7772_vm5, %v4403_v30, %v4407_v0  ;;  %v6653_v29 = vcombine.low %v8665_v1, %v5223_v53  ;;  %v4421_v26 = vrot.slane %v4419_v59, 5 }
 0x123   : > { %v4429_v38 = vshll.u32 %v6494_v19, 16  ;;  %v6549_v8 = vcombine.low %v4398_v28, %v4408_v41  ;;  %v4416_v3 = vor.u32 %v4415_v42, %v4412_v2  ;;  %v4425_v50 = vrot.slane %v4423_v20, 4  ;;  %v6496_v2 = vld [vmem:[%s7682_s23 + $0x4c] sm:$0xf]  ;;  %v6583_v20 = vld [vmem:[%s7682_s23 + $0x48] sm:$0xe] }
 0x124   : > { %7454 = vmatprep.mubr.bf16.mxu0 %v9485_v34  ;;  %v6622_v9 = vrot.slane %v6580_v32, 9  ;;  %v5226_v14 = vrot.slane %v6581_v44, 5  ;;  %v5229_v57 = vrot.slane %v6582_v54, 5  ;;  %v1318_v15 = vadd.f32 %v8589_v49, %v8415_v16  ;;  %v8691_v23 = vpop.f32.mrf.mxu1  ;;  %v8693_v0 = vpop.f32.mrf.mxu0  ;;  %v6497_v32 = vld [vmem:[%s7682_s23 + $0x50] sm:$0x1] }
 0x125   : > { %7407 = vmatmul.mubr.bf16.vlgmr.msra.gmra.mxu1 %v6548_v22  ;;  %v4431_v37 = vrot.slane %v4429_v38, 5  ;;  %v4417_v1 = vrot.slane %v4416_v3, 4  ;;  %v4426_v19 = vor.u32 %v4425_v50, %v4421_v26  ;;  %v1321_v30 = vadd.f32 %v8599_v52, %v8423_v27  ;;  %v6585_v38 = vld [vmem:[%s7682_s23 + $0x50] sm:$0x1] }
 0x126   : > { %7410 = vmatprep.mubr.bf16.mxu1 %v6549_v8  ;;  %v1319_v22 = vadd.f32 %v8612_v7, %v8438_v36  ;;  %v8702_v59 = vsel %vm7753_vm4, %v6622_v9, %v5226_v14  ;;  %v5228_v16 = vrot.slane %v5226_v14, 4  ;;  %v8705_v49 = vadd.f32 %v8591_v43, %v1318_v15  ;;  %v8708_v53 = vpop.f32.mrf.mxu1  ;;  %v8710_v42 = vpop.f32.mrf.mxu0  ;;  %v6584_v43 = vld [vmem:[%s7682_s23 + $0x4c] sm:$0xf]  ;;  %v6498_v9 = vld [vmem:[%s7682_s23 + $0x54] sm:$0xf] }
 0x127   : > { %v4434_v28 = vshrl.u32 %v6495_v10, 16  ;;  %v4422_v27 = vsel %vm7772_vm5, %v4417_v1, %v4421_v26  ;;  %v4427_v36 = vrot.slane %v4426_v19, 4  ;;  %v8715_v7 = vadd.f32 %v8601_v35, %v1321_v30  ;;  %v6499_v19 = vld [vmem:[%s7682_s23 + $0x58] sm:$0xf] }
 0x128   : > { %v8718_v52 = vadd.f32 %v8614_v4, %v1319_v22  ;;  %v5230_v44 = vsel %vm7753_vm4, %v5228_v16, %v5229_v57  ;;  %v4437_v34 = vshll.u32 %v6495_v10, 16  ;;  %v4443_v41 = vshll.u32 %v6496_v2, 16  ;;  %v8725_v8 = vpop.f32.mrf.mxu1  ;;  %v8727_v26 = vpop.f32.mrf.mxu0 }
 0x129   : > { %v4436_v54 = vrot.slane %v4434_v28, 4  ;;  %v9486_v35 = vcombine.low %v8619_v61, %v8636_v17  ;;  %v4432_v4 = vsel %vm7772_vm5, %v4427_v36, %v4431_v37  ;;  %v6654_v3 = vcombine.low %v8702_v59, %v5230_v44  ;;  %v6586_v44 = vld [vmem:[%s7682_s23 + $0x54] sm:$0xe] }
 0x12a   : > { %v4447_v50 = vshrl.u32 %v6496_v2, 16  ;;  %v4453_v57 = vshll.u32 %v6497_v32, 16  ;;  %v6550_v10 = vcombine.low %v4422_v27, %v4432_v4  ;;  %v4439_v14 = vrot.slane %v4437_v34, 5  ;;  %v8741_v32 = vpop.f32.mrf.mxu0 }
 0x12b   : > { %7455 = vmatmul.mubr.bf16.vlgmr.msra.gmra.mxu0 %v9486_v35  ;;  %v4445_v15 = vrot.slane %v4443_v41, 5  ;;  %v6623_v1 = vrot.slane %v6583_v20, 9  ;;  %v5233_v61 = vrot.slane %v6584_v43, 5  ;;  %v5236_v17 = vrot.slane %v6585_v38, 5  ;;  %v6500_v20 = vld [vmem:[%s7682_s23 + $0x5c] sm:$0x1] }
 0x12c   : > { %7458 = vmatprep.mubr.bf16.mxu0 %v6653_v29  ;;  %v4449_v30 = vrot.slane %v4447_v50, 4  ;;  %v4455_v22 = vrot.slane %v4453_v57, 5  ;;  %v4440_v16 = vor.u32 %v4439_v14, %v4436_v54  ;;  %v1324_v37 = vadd.f32 %v8627_v13, %v8448_v47  ;;  %v8739_v29 = vpop.f32.mrf.mxu1  ;;  %v6587_v41 = vld [vmem:[%s7682_s23 + $0x58] sm:$0xf]  ;;  %v6588_v57 = vld [vmem:[%s7682_s23 + $0x5c] sm:$0x1] }
 0x12d   : > { %7411 = vmatmul.mubr.bf16.gmra.mxu1 %v6550_v10  ;;  %v4458_v2 = vshrl.u32 %v6498_v9, 16  ;;  %v4461_v59 = vshll.u32 %v6498_v9, 16  ;;  %v5234_v27 = vsel %vm7753_vm4, %v6623_v1, %v5233_v61  ;;  %v5235_v36 = vrot.slane %v5233_v61, 4 }
 0x12e   : > { %v4450_v28 = vor.u32 %v4449_v30, %v4445_v15  ;;  %v4467_v43 = vshll.u32 %v6499_v19, 16  ;;  %v4441_v54 = vrot.slane %v4440_v16, 4  ;;  %v8748_v34 = vadd.f32 %v8629_v55, %v1324_v37  ;;  %v8758_v55 = vpop.f32.mrf.mxu0 }
 0x12f   : > { %v4460_v47 = vrot.slane %v4458_v2, 4  ;;  %v4463_v13 = vrot.slane %v4461_v59, 5  ;;  %v5237_v35 = vsel %vm7753_vm4, %v5235_v36, %v5236_v17  ;;  %v4471_v50 = vshrl.u32 %v6499_v19, 16  ;;  %v6501_v2 = vld [vmem:[%s7682_s23 + $0x60] sm:$0xf] }
 0x130   : > { %v4451_v38 = vrot.slane %v4450_v28, 4  ;;  %v4469_v4 = vrot.slane %v4467_v43, 5  ;;  %v4446_v9 = vsel %vm7772_vm5, %v4441_v54, %v4445_v15  ;;  %v6655_v10 = vcombine.low %v5234_v27, %v5237_v35  ;;  %v8756_v30 = vpop.f32.mrf.mxu1  ;;  %v8765_v36 = vpop.f32.mrf.mxu0 }
 0x131   : > { %v4464_v14 = vor.u32 %v4463_v13, %v4460_v47  ;;  %v4477_v1 = vshll.u32 %v6500_v20, 16  ;;  %v4473_v16 = vrot.slane %v4471_v50, 4  ;;  %v6624_v37 = vrot.slane %v6586_v44, 9  ;;  %v6502_v13 = vld [vmem:[%s7682_s23 + $0x64] sm:$0xf] }
 0x132   : > { %v4456_v61 = vsel %vm7772_vm5, %v4451_v38, %v4455_v22  ;;  %v5240_v17 = vrot.slane %v6587_v41, 5  ;;  %v5243_v28 = vrot.slane %v6588_v57, 5  ;;  %v8763_v27 = vpop.f32.mrf.mxu1  ;;  %v1322_v43 = vadd.f32 %v8643_v40, %v8460_v62  ;;  %v6503_v41 = vld [vmem:[%s7682_s23 + $0x68] sm:$0x1]  ;;  %v8781_v50 = vpop.f32.mrf.mxu0 }
 0x133   : > { %7459 = vmatmul.mubr.bf16.gmra.mxu0 %v6654_v3  ;;  %v6551_v19 = vcombine.low %v4446_v9, %v4456_v61  ;;  %v4465_v15 = vrot.slane %v4464_v14, 4  ;;  %v4479_v59 = vrot.slane %v4477_v1, 5  ;;  %v4474_v20 = vor.u32 %v4473_v16, %v4469_v4  ;;  %v6591_v14 = vld [vmem:[%s7682_s23 + $0x68] sm:$0x1] }
 0x134   : > { %7462 = vmatprep.mubr.bf16.mxu0 %v6655_v10  ;;  %v5241_v3 = vsel %vm7753_vm4, %v6624_v37, %v5240_v17  ;;  %v5242_v22 = vrot.slane %v5240_v17, 4  ;;  %v1325_v54 = vadd.f32 %v8655_v24, %v8469_v12  ;;  %v1323_v47 = vadd.f32 %v8672_v11, %v8484_v25  ;;  %v8779_v35 = vpop.f32.mrf.mxu1  ;;  %v6589_v12 = vld [vmem:[%s7682_s23 + $0x60] sm:$0xe]  ;;  %v6590_v24 = vld [vmem:[%s7682_s23 + $0x64] sm:$0xf] }
 0x135   : > { %7414 = vmatprep.mubr.bf16.mxu1 %v6551_v19  ;;  %v4470_v44 = vsel %vm7772_vm5, %v4465_v15, %v4469_v4  ;;  %v4482_v38 = vshrl.u32 %v6501_v2, 16  ;;  %v4475_v57 = vrot.slane %v4474_v20, 4  ;;  %v8786_v40 = vadd.f32 %v8645_v63, %v1322_v43  ;;  %v6504_v15 = vld [vmem:[%s7682_s23 + $0x6c] sm:$0xf] }
 0x136   : > { %v5244_v62 = vsel %vm7753_vm4, %v5242_v22, %v5243_v28  ;;  %v4485_v4 = vshll.u32 %v6501_v2, 16  ;;  %v8791_v11 = vadd.f32 %v8657_v48, %v1325_v54  ;;  %v8794_v9 = vadd.f32 %v8674_v5, %v1323_v47  ;;  %v8800_v48 = vpop.f32.mrf.mxu1  ;;  %v8802_v28 = vpop.f32.mrf.mxu0  ;;  %v6505_v22 = vld [vmem:[%s7682_s23 + $0x70] sm:$0xf] }
 0x137   : > { %v6656_v25 = vcombine.low %v5241_v3, %v5244_v62  ;;  %v4484_v10 = vrot.slane %v4482_v38, 4  ;;  %v4480_v1 = vsel %vm7772_vm5, %v4475_v57, %v4479_v59  ;;  %v4491_v63 = vshll.u32 %v6502_v13, 16 }
 0x138   : > { %9487 = vst [vmem:[#allocation18_spill] sm:$0xff] %v8794_v9  ;;  %v4487_v61 = vrot.slane %v4485_v4, 5  ;;  %v4495_v16 = vshrl.u32 %v6502_v13, 16  ;;  %v6552_v37 = vcombine.low %v4470_v44, %v4480_v1  ;;  %v4501_v17 = vshll.u32 %v6503_v41, 16  ;;  %v6506_v13 = vld [vmem:[%s7682_s23 + $0x74] sm:$0x1] }
 0x139   : > { %v6625_v2 = vrot.slane %v6589_v12, 9  ;;  %v5247_v19 = vrot.slane %v6590_v24, 5  ;;  %v4493_v20 = vrot.slane %v4491_v63, 5  ;;  %v5250_v59 = vrot.slane %v6591_v14, 5  ;;  %v6592_v4 = vld [vmem:[%s7682_s23 + $0x6c] sm:$0xe] }
 0x13a   : > { %v4488_v5 = vor.u32 %v4487_v61, %v4484_v10  ;;  %v4497_v3 = vrot.slane %v4495_v16, 4  ;;  %7415 = vmatmul.mubr.bf16.gmra.mxu1 %v6552_v37  ;;  %v4503_v43 = vrot.slane %v4501_v17, 5  ;;  %v1328_v47 = vadd.f32 %v8691_v23, %v8491_v31  ;;  %v6593_v14 = vld [vmem:[%s7682_s23 + $0x70] sm:$0xf]  ;;  %v6594_v1 = vld [vmem:[%s7682_s23 + $0x74] sm:$0x1]  ;;  %v8818_v61 = vpop.f32.mrf.mxu1  ;;  %v8820_v63 = vpop.f32.mrf.mxu0 }
 0x13b   : > { %7463 = vmatmul.mubr.bf16.gmra.mxu0 %v6656_v25  ;;  %v5248_v44 = vsel %vm7753_vm4, %v6625_v2, %v5247_v19  ;;  %v5249_v54 = vrot.slane %v5247_v19, 4  ;;  %v4506_v57 = vshrl.u32 %v6504_v15, 16  ;;  %v4509_v62 = vshll.u32 %v6504_v15, 16 }
 0x13c   : > { %v4489_v41 = vrot.slane %v4488_v5, 4  ;;  %v4498_v38 = vor.u32 %v4497_v3, %v4493_v20  ;;  %v8814_v24 = vadd.f32 %v8693_v0, %v1328_v47  ;;  %v4515_v25 = vshll.u32 %v6505_v22, 16  ;;  %v8824_v15 = vpop.f32.mrf.mxu1  ;;  %v8826_v5 = vpop.f32.mrf.mxu0 }
 0x13d   : > { %v5251_v12 = vsel %vm7753_vm4, %v5249_v54, %v5250_v59  ;;  %v4519_v10 = vshrl.u32 %v6505_v22, 16  ;;  %v4508_v37 = vrot.slane %v4506_v57, 4  ;;  %v4511_v17 = vrot.slane %v4509_v62, 5 }
 0x13e   : > { %9488 = vst [vmem:[#allocation19_spill] sm:$0xff] %v8814_v24  ;;  %v4494_v31 = vsel %vm7772_vm5, %v4489_v41, %v4493_v20  ;;  %v4499_v23 = vrot.slane %v4498_v38, 4  ;;  %v6657_v16 = vcombine.low %v5248_v44, %v5251_v12  ;;  %v4517_v2 = vrot.slane %v4515_v25, 5  ;;  %v6507_v20 = vld [vmem:[%s7682_s23 + $0x78] sm:$0xf]  ;;  %v8831_v57 = vpop.f32.mrf.mxu1 }
 0x13f   : > { %v4521_v19 = vrot.slane %v4519_v10, 4  ;;  %v4525_v0 = vshll.u32 %v6506_v13, 16  ;;  %v6626_v59 = vrot.slane %v6592_v4, 9  ;;  %v5254_v22 = vrot.slane %v6593_v14, 5  ;;  %v8833_v13 = vpop.f32.mrf.mxu0  ;;  %v6508_v25 = vld [vmem:[%s7682_s23 + $0x7c] sm:$0xf] }
 0x140   : > { %v4504_v3 = vsel %vm7772_vm5, %v4499_v23, %v4503_v43  ;;  %7466 = vmatprep.mubr.bf16.mxu0 %v6657_v16  ;;  %v5257_v54 = vrot.slane %v6594_v1, 5  ;;  %v4512_v47 = vor.u32 %v4511_v17, %v4508_v37  ;;  %v1326_v4 = vadd.f32 %v8708_v53, %v8498_v45  ;;  %v6595_v53 = vld [vmem:[%s7682_s23 + $0x78] sm:$0xe] }
 0x141   : > { %v6553_v44 = vcombine.low %v4494_v31, %v4504_v3  ;;  %v4522_v41 = vor.u32 %v4521_v19, %v4517_v2  ;;  %v4527_v38 = vrot.slane %v4525_v0, 5  ;;  %v5255_v62 = vsel %vm7753_vm4, %v6626_v59, %v5254_v22  ;;  %v6509_v31 = vld [vmem:[%s7682_s23 + $0x80] sm:$0x1]  ;;  %v8865_v3 = vpop.f32.mrf.mxu0 }
 0x142   : > { %v5256_v43 = vrot.slane %v5254_v22, 4  ;;  %v1329_v12 = vadd.f32 %v8725_v8, %v8504_v58  ;;  %v4513_v10 = vrot.slane %v4512_v47, 4  ;;  %v1327_v1 = vadd.f32 %v8739_v29, %v8519_v21  ;;  %v6596_v8 = vld [vmem:[%s7682_s23 + $0x7c] sm:$0xf]  ;;  %v6597_v0 = vld [vmem:[%s7682_s23 + $0x80] sm:$0x1] }
 0x143   : > { %7418 = vmatprep.mubr.bf16.mxu1 %v6553_v44  ;;  %v4523_v14 = vrot.slane %v4522_v41, 4  ;;  %v4530_v23 = vshrl.u32 %v6507_v20, 16  ;;  %v8848_v37 = vadd.f32 %v8710_v42, %v1326_v4  ;;  %v4533_v58 = vshll.u32 %v6507_v20, 16  ;;  %v8863_v42 = vpop.f32.mrf.mxu1  ;;  %v6510_v41 = vld [vmem:[%s7682_s23 + $0x84] sm:$0xf] }
 0x144   : > { %v5258_v16 = vsel %vm7753_vm4, %v5256_v43, %v5257_v54  ;;  %v8851_v45 = vadd.f32 %v8727_v26, %v1329_v12  ;;  %v4518_v17 = vsel %vm7772_vm5, %v4513_v10, %v4517_v2  ;;  %v8860_v19 = vadd.f32 %v8741_v32, %v1327_v1  ;;  %v6511_v4 = vld [vmem:[%s7682_s23 + $0x88] sm:$0xf]  ;;  %v6512_v1 = vld [vmem:[%s7682_s23 + $0x8c] sm:$0x1] }
 0x145   : > { %9489 = vst [vmem:[#allocation20_spill] sm:$0xff] %v8848_v37  ;;  %v4528_v21 = vsel %vm7772_vm5, %v4523_v14, %v4527_v38  ;;  %v6658_v29 = vcombine.low %v5255_v62, %v5258_v16  ;;  %v4532_v59 = vrot.slane %v4530_v23, 4  ;;  %v4535_v22 = vrot.slane %v4533_v58, 5 }
 0x146   : > { %9490 = vst [vmem:[#allocation21_spill] sm:$0xff] %v8851_v45  ;;  %9491 = vst [vmem:[#allocation22_spill] sm:$0xff] %v8860_v19  ;;  %v6554_v26 = vcombine.low %v4518_v17, %v4528_v21  ;;  %v4539_v54 = vshll.u32 %v6508_v25, 16  ;;  %v4543_v2 = vshrl.u32 %v6508_v25, 16  ;;  %v4549_v20 = vshll.u32 %v6509_v31, 16  ;;  %v8874_v31 = vpop.f32.mrf.mxu1  ;;  %v8876_v23 = vpop.f32.mrf.mxu0 }
 0x147   : > { %7467 = vmatmul.mubr.bf16.gmra.mxu0 %v6658_v29  ;;  %v6627_v44 = vrot.slane %v6595_v53, 9  ;;  %v5261_v47 = vrot.slane %v6596_v8, 5  ;;  %v4536_v32 = vor.u32 %v4535_v22, %v4532_v59  ;;  %v5264_v62 = vrot.slane %v6597_v0, 5  ;;  %v6599_v0 = vld [vmem:[%s7682_s23 + $0x88] sm:$0xf] }
 0x148   : > { %7419 = vmatmul.mubr.bf16.gmra.mxu1 %v6554_v26  ;;  %v4541_v38 = vrot.slane %v4539_v54, 5  ;;  %v1332_v43 = vadd.f32 %v8756_v30, %v8361_v33  ;;  %v4545_v12 = vrot.slane %v4543_v2, 4  ;;  %v4551_v10 = vrot.slane %v4549_v20, 5  ;;  %v6598_v30 = vld [vmem:[%s7682_s23 + $0x84] sm:$0xe]  ;;  %v8886_v59 = vpop.f32.mrf.mxu1  ;;  %v8888_v22 = vpop.f32.mrf.mxu0 }
 0x149   : > { %v5262_v25 = vsel %vm7753_vm4, %v6627_v44, %v5261_v47  ;;  %v5263_v14 = vrot.slane %v5261_v47, 4  ;;  %v4537_v16 = vrot.slane %v4536_v32, 4  ;;  %v4554_v53 = vshrl.u32 %v6510_v41, 16  ;;  %v6600_v26 = vld [vmem:[%s7682_s23 + $0x8c] sm:$0x1] }
 0x14a   : > { %v8879_v58 = vadd.f32 %v8758_v55, %v1332_v43  ;;  %v4557_v33 = vshll.u32 %v6510_v41, 16  ;;  %v4546_v8 = vor.u32 %v4545_v12, %v4541_v38  ;;  %v4563_v21 = vshll.u32 %v6511_v4, 16  ;;  %v8894_v43 = vpop.f32.mrf.mxu0 }
 0x14b   : > { %v5265_v17 = vsel %vm7753_vm4, %v5263_v14, %v5264_v62  ;;  %v4567_v29 = vshrl.u32 %v6511_v4, 16  ;;  %v4542_v54 = vsel %vm7772_vm5, %v4537_v16, %v4541_v38  ;;  %v4556_v2 = vrot.slane %v4554_v53, 4  ;;  %v8892_v62 = vpop.f32.mrf.mxu1 }
 0x14c   : > { %9492 = vst [vmem:[#allocation23_spill] sm:$0xff] %v8879_v58  ;;  %v6659_v55 = vcombine.low %v5262_v25, %v5265_v17  ;;  %v4559_v20 = vrot.slane %v4557_v33, 5  ;;  %v4547_v44 = vrot.slane %v4546_v8, 4  ;;  %v4565_v47 = vrot.slane %v4563_v21, 5 }
 0x14d   : > { %v4569_v41 = vrot.slane %v4567_v29, 4  ;;  %v4573_v32 = vshll.u32 %v6512_v1, 16  ;;  %v6628_v12 = vrot.slane %v6598_v30, 9  ;;  %v5268_v14 = vrot.slane %v6599_v0, 5  ;;  %v6513_v1 = vld [vmem:[%s7682_s23 + $0x90] sm:$0xf] }
 0x14e   : > { %7470 = vmatprep.mubr.bf16.mxu0 %v6659_v55  ;;  %v4560_v4 = vor.u32 %v4559_v20, %v4556_v2  ;;  %v5271_v58 = vrot.slane %v6600_v26, 5  ;;  %v4552_v38 = vsel %vm7772_vm5, %v4547_v44, %v4551_v10  ;;  %v1330_v53 = vadd.f32 %v8763_v27, %v8368_v39  ;;  %v6514_v39 = vld [vmem:[%s7682_s23 + $0x94] sm:$0xf]  ;;  %v6515_v27 = vld [vmem:[%s7682_s23 + $0x98] sm:$0x1]  ;;  %v8912_v26 = vpop.f32.mrf.mxu1 }
 0x14f   : > { %v4570_v25 = vor.u32 %v4569_v41, %v4565_v47  ;;  %v4575_v16 = vrot.slane %v4573_v32, 5  ;;  %v6555_v33 = vcombine.low %v4542_v54, %v4552_v38  ;;  %v5269_v17 = vsel %vm7753_vm4, %v6628_v12, %v5268_v14  ;;  %v8914_v54 = vpop.f32.mrf.mxu0  ;;  %v6603_v32 = vld [vmem:[%s7682_s23 + $0x98] sm:$0x1] }
 0x150   : > { %v4561_v8 = vrot.slane %v4560_v4, 4  ;;  %v5270_v30 = vrot.slane %v5268_v14, 4  ;;  %v8904_v29 = vadd.f32 %v8765_v36, %v1330_v53  ;;  %v1333_v10 = vadd.f32 %v8779_v35, %v8380_v51  ;;  %v6601_v51 = vld [vmem:[%s7682_s23 + $0x90] sm:$0xe]  ;;  %v6602_v35 = vld [vmem:[%s7682_s23 + $0x94] sm:$0xf] }
 0x151   : > { %v4571_v21 = vrot.slane %v4570_v25, 4  ;;  %v1331_v0 = vadd.f32 %v8800_v48, %v8391_v60  ;;  %7422 = vmatprep.mubr.bf16.mxu1 %v6555_v33  ;;  %v4578_v2 = vshrl.u32 %v6513_v1, 16  ;;  %v4581_v20 = vshll.u32 %v6513_v1, 16 }
 0x152   : > { %9493 = vst [vmem:[#allocation24_spill] sm:$0xff] %v8904_v29  ;;  %v4566_v55 = vsel %vm7772_vm5, %v4561_v8, %v4565_v47  ;;  %v5272_v36 = vsel %vm7753_vm4, %v5270_v30, %v5271_v58  ;;  %v8925_v44 = vadd.f32 %v8781_v50, %v1333_v10  ;;  %v4587_v12 = vshll.u32 %v6514_v39, 16  ;;  %v8932_v1 = vpop.f32.mrf.mxu1  ;;  %v8934_v50 = vpop.f32.mrf.mxu0  ;;  %v6517_v30 = vld [vmem:[%s7682_s23 + $0xa0] sm:$0xf] }
 0x153   : > { %v4576_v60 = vsel %vm7772_vm5, %v4571_v21, %v4575_v16  ;;  %v6660_v48 = vcombine.low %v5269_v17, %v5272_v36  ;;  %v8928_v41 = vadd.f32 %v8802_v28, %v1331_v0  ;;  %v4580_v4 = vrot.slane %v4578_v2, 4  ;;  %v6516_v16 = vld [vmem:[%s7682_s23 + $0x9c] sm:$0xf] }
 0x154   : > { %9494 = vst [vmem:[#allocation25_spill] sm:$0xff] %v8925_v44  ;;  %v6556_v47 = vcombine.low %v4566_v55, %v4576_v60  ;;  %v4583_v58 = vrot.slane %v4581_v20, 5  ;;  %v4591_v14 = vshrl.u32 %v6514_v39, 16  ;;  %v4597_v38 = vshll.u32 %v6515_v27, 16  ;;  %v6518_v27 = vld [vmem:[%s7682_s23 + $0xa4] sm:$0x1]  ;;  %v8942_v55 = vpop.f32.mrf.mxu1  ;;  %v8944_v36 = vpop.f32.mrf.mxu0 }
 0x155   : > { %9495 = vst [vmem:[#allocation26_spill] sm:$0xff] %v8928_v41  ;;  %7471 = vmatmul.mubr.bf16.gmra.mxu0 %v6660_v48  ;;  %v6629_v25 = vrot.slane %v6601_v51, 9  ;;  %v5275_v53 = vrot.slane %v6602_v35, 5  ;;  %v4589_v33 = vrot.slane %v4587_v12, 5  ;;  %v5278_v8 = vrot.slane %v6603_v32, 5 }
 0x156   : > { %7423 = vmatmul.mubr.bf16.gmra.mxu1 %v6556_v47  ;;  %v4584_v28 = vor.u32 %v4583_v58, %v4580_v4  ;;  %v1336_v17 = vadd.f32 %v8818_v61, %v8403_v6  ;;  %v4593_v21 = vrot.slane %v4591_v14, 4  ;;  %v4599_v10 = vrot.slane %v4597_v38, 5  ;;  %v6604_v61 = vld [vmem:[%s7682_s23 + $0x9c] sm:$0xe]  ;;  %v6605_v47 = vld [vmem:[%s7682_s23 + $0xa0] sm:$0xf]  ;;  %v8954_v58 = vpop.f32.mrf.mxu1  ;;  %v8956_v12 = vpop.f32.mrf.mxu0 }
 0x157   : > { %v5276_v0 = vsel %vm7753_vm4, %v6629_v25, %v5275_v53  ;;  %v5277_v39 = vrot.slane %v5275_v53, 4  ;;  %v4602_v51 = vshrl.u32 %v6516_v16, 16  ;;  %v4605_v6 = vshll.u32 %v6516_v16, 16  ;;  %v6606_v4 = vld [vmem:[%s7682_s23 + $0xa4] sm:$0x1] }
 0x158   : > { %v4585_v2 = vrot.slane %v4584_v28, 4  ;;  %v8947_v20 = vadd.f32 %v8820_v63, %v1336_v17  ;;  %v4594_v35 = vor.u32 %v4593_v21, %v4589_v33  ;;  %v4611_v48 = vshll.u32 %v6517_v30, 16  ;;  %v8962_v41 = vpop.f32.mrf.mxu0 }
 0x159   : > { %v5279_v60 = vsel %vm7753_vm4, %v5277_v39, %v5278_v8  ;;  %v4615_v32 = vshrl.u32 %v6517_v30, 16  ;;  %v4604_v38 = vrot.slane %v4602_v51, 4  ;;  %v4607_v25 = vrot.slane %v4605_v6, 5  ;;  %v8960_v8 = vpop.f32.mrf.mxu1 }
 0x15a   : > { %9496 = vst [vmem:[#allocation27_spill] sm:$0xff] %v8947_v20  ;;  %v4590_v14 = vsel %vm7772_vm5, %v4585_v2, %v4589_v33  ;;  %v6661_v63 = vcombine.low %v5276_v0, %v5279_v60  ;;  %v4595_v53 = vrot.slane %v4594_v35, 4  ;;  %v4613_v16 = vrot.slane %v4611_v48, 5 }
 0x15b   : > { %v4617_v28 = vrot.slane %v4615_v32, 4  ;;  %v4621_v17 = vshll.u32 %v6518_v27, 16  ;;  %v4608_v30 = vor.u32 %v4607_v25, %v4604_v38  ;;  %v6630_v21 = vrot.slane %v6604_v61, 9  ;;  %v6519_v27 = vld [vmem:[%s7682_s23 + $0xa8] sm:$0xf]  ;;  %v8969_v6 = vpop.f32.mrf.mxu1 }
 0x15c   : > { %7474 = vmatprep.mubr.bf16.mxu0 %v6661_v63  ;;  %v5282_v39 = vrot.slane %v6605_v47, 5  ;;  %v5285_v20 = vrot.slane %v6606_v4, 5  ;;  %v4600_v33 = vsel %vm7772_vm5, %v4595_v53, %v4599_v10  ;;  %v1334_v51 = vadd.f32 %v8824_v15, %v8417_v18  ;;  %v9498_v10 = vld [vmem:[#allocation3_spill] sm:$0xff]  ;;  %v9499_v63 = vld [vmem:[#allocation4_spill] sm:$0xff] }
 0x15d   : > { %v4618_v0 = vor.u32 %v4617_v28, %v4613_v16  ;;  %v4623_v2 = vrot.slane %v4621_v17, 5  ;;  %v6557_v35 = vcombine.low %v4590_v14, %v4600_v33  ;;  %v4609_v61 = vrot.slane %v4608_v30, 4  ;;  %v6520_v15 = vld [vmem:[%s7682_s23 + $0xac] sm:$0xf]  ;;  %v6521_v14 = vld [vmem:[%s7682_s23 + $0xb0] sm:$0x1]  ;;  %v8982_v38 = vpop.f32.mrf.mxu1 }
 0x15e   : > { %v5283_v60 = vsel %vm7753_vm4, %v6630_v21, %v5282_v39  ;;  %v5284_v48 = vrot.slane %v5282_v39, 4  ;;  %v8974_v47 = vadd.f32 %v8826_v5, %v1334_v51  ;;  %v1337_v4 = vadd.f32 %v8831_v57, %v9498_v10  ;;  %v6607_v17 = vld [vmem:[%s7682_s23 + $0xa8] sm:$0xe]  ;;  %v6608_v30 = vld [vmem:[%s7682_s23 + $0xac] sm:$0xf]  ;;  %v8990_v57 = vpop.f32.mrf.mxu0 }
 0x15f   : > { %v4619_v32 = vrot.slane %v4618_v0, 4  ;;  %v1335_v18 = vadd.f32 %v8863_v42, %v9499_v63  ;;  %7426 = vmatprep.mubr.bf16.mxu1 %v6557_v35  ;;  %v4614_v25 = vsel %vm7772_vm5, %v4609_v61, %v4613_v16  ;;  %v4626_v5 = vshrl.u32 %v6519_v27, 16  ;;  %v6609_v16 = vld [vmem:[%s7682_s23 + $0xb0] sm:$0x1]  ;;  %v9001_v0 = vpop.f32.mrf.mxu1 }
 0x160   : > { %9497 = vst [vmem:[#allocation28_spill] sm:$0xff] %v8974_v47  ;;  %v5286_v53 = vsel %vm7753_vm4, %v5284_v48, %v5285_v20  ;;  %v4629_v28 = vshll.u32 %v6519_v27, 16  ;;  %v8995_v39 = vadd.f32 %v8833_v13, %v1337_v4  ;;  %v4635_v35 = vshll.u32 %v6520_v15, 16  ;;  %v9003_v61 = vpop.f32.mrf.mxu0 }
 0x161   : > { %v4624_v42 = vsel %vm7772_vm5, %v4619_v32, %v4623_v2  ;;  %v6662_v21 = vcombine.low %v5283_v60, %v5286_v53  ;;  %v8998_v33 = vadd.f32 %v8865_v3, %v1335_v18  ;;  %v4628_v51 = vrot.slane %v4626_v5, 4  ;;  %v6522_v32 = vld [vmem:[%s7682_s23 + $0xb4] sm:$0xf]  ;;  %v9006_v10 = vpop.f32.mrf.mxu1  ;;  %v6523_v53 = vld [vmem:[%s7682_s23 + $0xb8] sm:$0xf] }
 0x162   : > { %9500 = vst [vmem:[#allocation3_spill] sm:$0xff] %v8995_v39  ;;  %v6558_v20 = vcombine.low %v4614_v25, %v4624_v42  ;;  %v4631_v27 = vrot.slane %v4629_v28, 5  ;;  %v4639_v2 = vshrl.u32 %v6520_v15, 16  ;;  %v4645_v48 = vshll.u32 %v6521_v14, 16  ;;  %v9502_v18 = vld [vmem:[#allocation5_spill] sm:$0xff]  ;;  %v9011_v5 = vpop.f32.mrf.mxu0 }
 0x163   : > { %9501 = vst [vmem:[#allocation4_spill] sm:$0xff] %v8998_v33  ;;  %7475 = vmatmul.mubr.bf16.gmra.mxu0 %v6662_v21  ;;  %v6631_v60 = vrot.slane %v6607_v17, 9  ;;  %v5289_v13 = vrot.slane %v6608_v30, 5  ;;  %v4637_v4 = vrot.slane %v4635_v35, 5  ;;  %v5292_v63 = vrot.slane %v6609_v16, 5  ;;  %v9016_v42 = vpop.f32.mrf.mxu1 }
 0x164   : > { %7427 = vmatmul.mubr.bf16.gmra.mxu1 %v6558_v20  ;;  %v4632_v3 = vor.u32 %v4631_v27, %v4628_v51  ;;  %v1340_v25 = vadd.f32 %v8874_v31, %v9502_v18  ;;  %v4641_v28 = vrot.slane %v4639_v2, 4  ;;  %v4647_v15 = vrot.slane %v4645_v48, 5  ;;  %v6524_v30 = vld [vmem:[%s7682_s23 + $0xbc] sm:$0x1]  ;;  %v6610_v51 = vld [vmem:[%s7682_s23 + $0xb4] sm:$0xe]  ;;  %v9022_v27 = vpop.f32.mrf.mxu0 }
 0x165   : > { %v5290_v14 = vsel %vm7753_vm4, %v6631_v60, %v5289_v13  ;;  %v5291_v17 = vrot.slane %v5289_v13, 4  ;;  %v4650_v20 = vshrl.u32 %v6522_v32, 16  ;;  %v4653_v31 = vshll.u32 %v6522_v32, 16  ;;  %v6611_v60 = vld [vmem:[%s7682_s23 + $0xb8] sm:$0xf]  ;;  %v9028_v33 = vpop.f32.mrf.mxu1 }
 0x166   : > { %v4633_v21 = vrot.slane %v4632_v3, 4  ;;  %v9019_v16 = vadd.f32 %v8876_v23, %v1340_v25  ;;  %v4642_v35 = vor.u32 %v4641_v28, %v4637_v4  ;;  %v4659_v48 = vshll.u32 %v6523_v53, 16  ;;  %v6612_v13 = vld [vmem:[%s7682_s23 + $0xbc] sm:$0x1]  ;;  %v9034_v19 = vpop.f32.mrf.mxu0 }
 0x167   : > { %v5293_v2 = vsel %vm7753_vm4, %v5291_v17, %v5292_v63  ;;  %v4663_v18 = vshrl.u32 %v6523_v53, 16  ;;  %v4652_v25 = vrot.slane %v4650_v20, 4  ;;  %v4669_v28 = vshll.u32 %v6524_v30, 16  ;;  %v9032_v44 = vpop.f32.mrf.mxu1  ;;  %v9504_v20 = vld [vmem:[#allocation6_spill] sm:$0xff]  ;;  %v6525_v30 = vld [vmem:[%s7682_s23 + $0xc0] sm:$0xf] }
 0x168   : > { %9503 = vst [vmem:[#allocation5_spill] sm:$0xff] %v9019_v16  ;;  %v4638_v3 = vsel %vm7772_vm5, %v4633_v21, %v4637_v4  ;;  %v6663_v23 = vcombine.low %v5290_v14, %v5293_v2  ;;  %v4655_v16 = vrot.slane %v4653_v31, 5  ;;  %v4643_v32 = vrot.slane %v4642_v35, 4 }
 0x169   : > { %v4661_v39 = vrot.slane %v4659_v48, 5  ;;  %v4665_v47 = vrot.slane %v4663_v18, 4  ;;  %v6632_v53 = vrot.slane %v6610_v51, 9  ;;  %v5296_v17 = vrot.slane %v6611_v60, 5  ;;  %v9041_v35 = vpop.f32.mrf.mxu1  ;;  %v9045_v18 = vpop.f32.mrf.mxu0  ;;  %v9506_v60 = vld [vmem:[#allocation7_spill] sm:$0xff] }
 0x16a   : > { %7478 = vmatprep.mubr.bf16.mxu0 %v6663_v23  ;;  %v4656_v63 = vor.u32 %v4655_v16, %v4652_v25  ;;  %v5299_v29 = vrot.slane %v6612_v13, 5  ;;  %v4648_v4 = vsel %vm7772_vm5, %v4643_v32, %v4647_v15  ;;  %v4671_v21 = vrot.slane %v4669_v28, 5  ;;  %v9507_v13 = vld [vmem:[#allocation8_spill] sm:$0xff] }
 0x16b   : > { %v4666_v14 = vor.u32 %v4665_v47, %v4661_v39  ;;  %v1338_v31 = vadd.f32 %v8886_v59, %v9504_v20  ;;  %v6559_v2 = vcombine.low %v4638_v3, %v4648_v4  ;;  %v5297_v51 = vsel %vm7753_vm4, %v6632_v53, %v5296_v17  ;;  %v6526_v3 = vld [vmem:[%s7682_s23 + $0xc4] sm:$0xf]  ;;  %v6527_v25 = vld [vmem:[%s7682_s23 + $0xc8] sm:$0x1]  ;;  %v9056_v32 = vpop.f32.mrf.mxu1 }
 0x16c   : > { %v4657_v16 = vrot.slane %v4656_v63, 4  ;;  %v5298_v48 = vrot.slane %v5296_v17, 4  ;;  %v1341_v59 = vadd.f32 %v8892_v62, %v9506_v60  ;;  %v1339_v23 = vadd.f32 %v8912_v26, %v9507_v13  ;;  %v6613_v17 = vld [vmem:[%s7682_s23 + $0xc0] sm:$0xe]  ;;  %v6614_v4 = vld [vmem:[%s7682_s23 + $0xc4] sm:$0xf]  ;;  %v9064_v62 = vpop.f32.mrf.mxu0 }
 0x16d   : > { %v4667_v15 = vrot.slane %v4666_v14, 4  ;;  %v9048_v47 = vadd.f32 %v8888_v22, %v1338_v31  ;;  %7430 = vmatprep.mubr.bf16.mxu1 %v6559_v2  ;;  %v4674_v22 = vshrl.u32 %v6525_v30, 16  ;;  %v4677_v53 = vshll.u32 %v6525_v30, 16  ;;  %v9075_v2 = vpop.f32.mrf.mxu1 }
 0x16e   : > { %v4662_v28 = vsel %vm7772_vm5, %v4657_v16, %v4661_v39  ;;  %v5300_v63 = vsel %vm7753_vm4, %v5298_v48, %v5299_v29  ;;  %v9069_v20 = vadd.f32 %v8894_v43, %v1341_v59  ;;  %v9072_v31 = vadd.f32 %v8914_v54, %v1339_v23  ;;  %v6615_v39 = vld [vmem:[%s7682_s23 + $0xc8] sm:$0x1]  ;;  %v9077_v60 = vpop.f32.mrf.mxu0  ;;  %v6528_v59 = vld [vmem:[%s7682_s23 + $0xcc] sm:$0xf] }
 0x16f   : > { %9505 = vst [vmem:[#allocation6_spill] sm:$0xff] %v9048_v47  ;;  %v4672_v26 = vsel %vm7772_vm5, %v4667_v15, %v4671_v21  ;;  %v6664_v14 = vcombine.low %v5297_v51, %v5300_v63  ;;  %v4676_v30 = vrot.slane %v4674_v22, 4  ;;  %v4679_v16 = vrot.slane %v4677_v53, 5  ;;  %v9080_v13 = vpop.f32.mrf.mxu1  ;;  %v9511_v63 = vld [vmem:[#allocation9_spill] sm:$0xff] }
 0x170   : > { %9508 = vst [vmem:[#allocation7_spill] sm:$0xff] %v9069_v20  ;;  %9509 = vst [vmem:[#allocation8_spill] sm:$0xff] %v9072_v31  ;;  %v6560_v29 = vcombine.low %v4662_v28, %v4672_v26  ;;  %v4683_v48 = vshll.u32 %v6526_v3, 16  ;;  %v4687_v21 = vshrl.u32 %v6526_v3, 16  ;;  %v4693_v51 = vshll.u32 %v6527_v25, 16 }
 0x171   : > { %7479 = vmatmul.mubr.bf16.gmra.mxu0 %v6664_v14  ;;  %v6633_v15 = vrot.slane %v6613_v17, 9  ;;  %v5303_v43 = vrot.slane %v6614_v4, 5  ;;  %9510 = vst [vmem:[#allocation29_spill] sm:$0xff] %v9080_v13  ;;  %v4680_v54 = vor.u32 %v4679_v16, %v4676_v30  ;;  %v5306_v28 = vrot.slane %v6615_v39, 5  ;;  %v6529_v53 = vld [vmem:[%s7682_s23 + $0xd0] sm:$0xf]  ;;  %v9088_v4 = vpop.f32.mrf.mxu0 }
 0x172   : > { %7431 = vmatmul.mubr.bf16.gmra.mxu1 %v6560_v29  ;;  %v4685_v23 = vrot.slane %v4683_v48, 5  ;;  %v1344_v22 = vadd.f32 %v8932_v1, %v9511_v63  ;;  %v4689_v26 = vrot.slane %v4687_v21, 4  ;;  %v4695_v14 = vrot.slane %v4693_v51, 5  ;;  %v6530_v17 = vld [vmem:[%s7682_s23 + $0xd4] sm:$0x1]  ;;  %v9090_v29 = vpop.f32.mrf.mxu1 }
 0x173   : > { %v5304_v3 = vsel %vm7753_vm4, %v6633_v15, %v5303_v43  ;;  %v5305_v25 = vrot.slane %v5303_v43, 4  ;;  %9512 = vst [vmem:[#allocation9_spill] sm:$0xff] %v9090_v29  ;;  %v4681_v30 = vrot.slane %v4680_v54, 4  ;;  %v4698_v16 = vshrl.u32 %v6528_v59, 16  ;;  %v6616_v48 = vld [vmem:[%s7682_s23 + $0xcc] sm:$0xe]  ;;  %v9100_v20 = vpop.f32.mrf.mxu0 }
 0x174   : > { %v9093_v39 = vadd.f32 %v8934_v50, %v1344_v22  ;;  %v4701_v1 = vshll.u32 %v6528_v59, 16  ;;  %v4690_v21 = vor.u32 %v4689_v26, %v4685_v23  ;;  %v4707_v63 = vshll.u32 %v6529_v53, 16  ;;  %v6617_v15 = vld [vmem:[%s7682_s23 + $0xd0] sm:$0xf]  ;;  %v6618_v43 = vld [vmem:[%s7682_s23 + $0xd4] sm:$0x1]  ;;  %v9102_v47 = vpop.f32.mrf.mxu1 }
 0x175   : > { %v5307_v51 = vsel %vm7753_vm4, %v5305_v25, %v5306_v28  ;;  %v4711_v31 = vshrl.u32 %v6529_v53, 16  ;;  %9514 = vst [vmem:[#allocation31_spill] sm:$0xff] %v9102_v47  ;;  %v4686_v54 = vsel %vm7772_vm5, %v4681_v30, %v4685_v23  ;;  %v4700_v22 = vrot.slane %v4698_v16, 4  ;;  %v9106_v24 = vpop.f32.mrf.mxu0 }
 0x176   : > { %9513 = vst [vmem:[#allocation30_spill] sm:$0xff] %v9093_v39  ;;  %v6665_v50 = vcombine.low %v5304_v3, %v5307_v51  ;;  %v4703_v39 = vrot.slane %v4701_v1, 5  ;;  %v4691_v59 = vrot.slane %v4690_v21, 4  ;;  %v4709_v45 = vrot.slane %v4707_v63, 5  ;;  %v2251_v28 = vpop.f32.mrf.mxu1  ;;  %v9515_v3 = vld [vmem:[#allocation10_spill] sm:$0xff]  ;;  %v9516_v63 = vld [vmem:[#allocation11_spill] sm:$0xff] }
 0x177   : > { %v4713_v26 = vrot.slane %v4711_v31, 4  ;;  %v4717_v37 = vshll.u32 %v6530_v17, 16  ;;  %v6634_v25 = vrot.slane %v6616_v48, 9  ;;  %v5310_v29 = vrot.slane %v6617_v15, 5  ;;  %v3056_v16 = vpop.f32.mrf.mxu0  ;;  %v9517_v15 = vld [vmem:[#allocation12_spill] sm:$0xff] }
 0x178   : > { %7482 = vmatprep.mubr.bf16.mxu0 %v6665_v50  ;;  %v4704_v53 = vor.u32 %v4703_v39, %v4700_v22  ;;  %v5313_v9 = vrot.slane %v6618_v43, 5  ;;  %v4696_v47 = vsel %vm7772_vm5, %v4691_v59, %v4695_v14  ;;  %v1342_v30 = vadd.f32 %v8942_v55, %v9515_v3  ;;  %v7229_v1 = vpop.f32.mrf.mxu1 }
 0x179   : > { %v4714_v13 = vor.u32 %v4713_v26, %v4709_v45  ;;  %v4719_v23 = vrot.slane %v4717_v37, 5  ;;  %v6561_v31 = vcombine.low %v4686_v54, %v4696_v47  ;;  %v5311_v21 = vsel %vm7753_vm4, %v6634_v25, %v5310_v29  ;;  %v9518_v54 = vld [vmem:[#allocation13_spill] sm:$0xff]  ;;  %v9521_v26 = vld [vmem:[#allocation16_spill] sm:$0xff] }
 0x17a   : > { %v4705_v17 = vrot.slane %v4704_v53, 4  ;;  %v5312_v51 = vrot.slane %v5310_v29, 4  ;;  %v9115_v48 = vadd.f32 %v8944_v36, %v1342_v30  ;;  %v1345_v14 = vadd.f32 %v8954_v58, %v9516_v63  ;;  %v2254_v43 = vpop.f32.mrf.mxu1  ;;  %v9519_v29 = vld [vmem:[#allocation14_spill] sm:$0xff]  ;;  %v9522_v53 = vld [vmem:[#allocation17_spill] sm:$0xff]  ;;  %v9526_v30 = vld [vmem:[#allocation19_spill] sm:$0xff] }
 0x17b   : > { %v4715_v39 = vrot.slane %v4714_v13, 4  ;;  %v1343_v37 = vadd.f32 %v8960_v8, %v9517_v15  ;;  %7434 = vmatprep.mubr.bf16.mxu1 %v6561_v31  ;;  %v2364_v13 = vadd.f32 %v8969_v6, %v9518_v54  ;;  %v2362_v36 = vadd.f32 %v8982_v38, %v9519_v29  ;;  %v9520_v38 = vld [vmem:[#allocation15_spill] sm:$0xff] }
 0x17c   : > { %v4710_v55 = vsel %vm7772_vm5, %v4705_v17, %v4709_v45  ;;  %v5314_v47 = vsel %vm7753_vm4, %v5312_v51, %v5313_v9  ;;  %v9132_v8 = vadd.f32 %v8956_v12, %v1345_v14  ;;  %v7276_v45 = vpop.f32.mrf.mxu0  ;;  %v7232_v59 = vpop.f32.mrf.mxu1  ;;  %v2365_v56 = vadd.f32 %v9001_v0, %v9520_v38  ;;  %v9528_v17 = vld [vmem:[#allocation20_spill] sm:$0xff]  ;;  %v9529_v51 = vld [vmem:[#allocation21_spill] sm:$0xff]  ;;  %v9531_v15 = vld [vmem:[#allocation23_spill] sm:$0xff] }
 0x17d   : > { %v4720_v58 = vsel %vm7772_vm5, %v4715_v39, %v4719_v23  ;;  %v6666_v50 = vcombine.low %v5311_v21, %v5314_v47  ;;  %v9135_v22 = vadd.f32 %v8962_v41, %v1343_v37  ;;  %v9138_v9 = vadd.f32 %v8990_v57, %v2364_v13 }
 0x17e   : > { %v6562_v46 = vcombine.low %v4710_v55, %v4720_v58  ;;  %v9141_v6 = vadd.f32 %v9003_v61, %v2362_v36  ;;  %v2363_v12 = vadd.f32 %v9006_v10, %v9521_v26  ;;  %v2368_v41 = vadd.f32 %v9016_v42, %v9522_v53  ;;  %v3069_v23 = vpop.f32.mrf.mxu0  ;;  %v2267_v3 = vpop.f32.mrf.mxu1  ;;  %v9533_v36 = vld [vmem:[#allocation25_spill] sm:$0xff]  ;;  %v9534_v58 = vld [vmem:[#allocation26_spill] sm:$0xff] }
 0x17f   : > { %7483 = vmatmul.mubr.bf16.gmra.mxu0 %v6666_v50  ;;  %v2366_v25 = vadd.f32 %v9028_v33, %v8705_v49  ;;  %v2369_v57 = vadd.f32 %v9032_v44, %v8715_v7  ;;  %v9154_v61 = vadd.f32 %v9011_v5, %v2365_v56  ;;  %v2367_v0 = vadd.f32 %v9041_v35, %v8718_v52 }
 0x180   : > { %7435 = vmatmul.mubr.bf16.gmra.mxu1 %v6562_v46  ;;  %v2372_v10 = vadd.f32 %v9056_v32, %v8748_v34  ;;  %v2370_v42 = vadd.f32 %v9075_v2, %v8786_v40  ;;  %v9163_v49 = vadd.f32 %v9022_v27, %v2363_v12  ;;  %v9166_v7 = vadd.f32 %v9034_v19, %v2368_v41  ;;  %v7277_v5 = vpop.f32.mrf.mxu0  ;;  %v7233_v52 = vpop.f32.mrf.mxu1  ;;  %v9523_v19 = vld [vmem:[#allocation29_spill] sm:$0xff]  ;;  %v9524_v32 = vld [vmem:[#allocation18_spill] sm:$0xff]  ;;  %v9537_v41 = vld [vmem:[#allocation3_spill] sm:$0xff] }
 0x181   : > { %v9169_v44 = vadd.f32 %v9045_v18, %v2366_v25  ;;  %v9172_v33 = vadd.f32 %v9064_v62, %v2369_v57  ;;  %v9175_v35 = vadd.f32 %v9077_v60, %v2367_v0  ;;  %v2373_v27 = vadd.f32 %v9523_v19, %v8791_v11  ;;  %v9525_v18 = vld [vmem:[#allocation9_spill] sm:$0xff]  ;;  %v9527_v62 = vld [vmem:[#allocation31_spill] sm:$0xff]  ;;  %v9532_v11 = vld [vmem:[#allocation24_spill] sm:$0xff] }
 0x182   : > { %v9178_v34 = vadd.f32 %v9088_v4, %v2372_v10  ;;  %v9181_v40 = vadd.f32 %v9100_v20, %v2370_v42  ;;  %v2371_v2 = vadd.f32 %v9525_v18, %v9524_v32  ;;  %v2376_v31 = vadd.f32 %v9527_v62, %v9526_v30  ;;  %v3072_v39 = vpop.f32.mrf.mxu0  ;;  %v2270_v63 = vpop.f32.mrf.mxu1  ;;  %v9530_v20 = vld [vmem:[#allocation22_spill] sm:$0xff]  ;;  %v9538_v0 = vld [vmem:[#allocation4_spill] sm:$0xff]  ;;  %v9539_v19 = vld [vmem:[#allocation5_spill] sm:$0xff] }
 0x183   : > { %v2374_v21 = vadd.f32 %v2251_v28, %v9528_v17  ;;  %v2377_v60 = vadd.f32 %v7229_v1, %v9529_v51  ;;  %v9192_v4 = vadd.f32 %v9106_v24, %v2373_v27  ;;  %v2375_v14 = vadd.f32 %v2254_v43, %v9530_v20  ;;  %v9535_v43 = vld [vmem:[#allocation27_spill] sm:$0xff]  ;;  %v9542_v20 = vld [vmem:[#allocation8_spill] sm:$0xff] }
 0x184   : > { %v2380_v37 = vadd.f32 %v7232_v59, %v9531_v15  ;;  %v2378_v55 = vadd.f32 %v2267_v3, %v9532_v11  ;;  %v9197_v47 = vadd.f32 %v3056_v16, %v2371_v2  ;;  %v9199_v54 = vadd.f32 %v7276_v45, %v2376_v31  ;;  %v7236_v1 = vpop.f32.mrf.mxu1  ;;  %v7280_v59 = vpop.f32.mrf.mxu0  ;;  %v9536_v16 = vld [vmem:[#allocation28_spill] sm:$0xff]  ;;  %v9540_v2 = vld [vmem:[#allocation6_spill] sm:$0xff] }
 0x185   : > { %v9201_v13 = vadd.f32 %v3069_v23, %v2374_v21  ;;  %v9203_v28 = vadd.f32 %v7277_v5, %v2377_v60  ;;  %v9205_v29 = vadd.f32 %v3072_v39, %v2375_v14  ;;  %v2381_v24 = vadd.f32 %v7233_v52, %v9533_v36  ;;  %v9541_v21 = vld [vmem:[#allocation7_spill] sm:$0xff] }
 0x186   : > { %v2379_v50 = vadd.f32 %v2270_v63, %v9534_v58  ;;  %v2384_v46 = vadd.f32 %v7236_v1, %v9535_v43  ;;  %v2283_v38 = vpop.f32.mrf.mxu1  ;;  %v9210_v56 = vadd.f32 %v7280_v59, %v2380_v37  ;;  %v3085_v26 = vpop.f32.mrf.mxu0 }
 0x187   : > { %v2382_v45 = vadd.f32 %v2283_v38, %v9536_v16  ;;  %v9213_v53 = vadd.f32 %v3085_v26, %v2378_v55  ;;  %v9543_v55 = vld [vmem:[#allocation30_spill] sm:$0xff] }
 0x188   : > { %v7237_v12 = vpop.f32.mrf.mxu1  ;;  %v7281_v57 = vpop.f32.mrf.mxu0 }
 0x189   : > { %v2385_v25 = vadd.f32 %v7237_v12, %v9537_v41  ;;  %v9216_v3 = vadd.f32 %v7281_v57, %v2381_v24 }
 0x18a   : > { %v2286_v23 = vpop.f32.mrf.mxu1  ;;  %v3088_v42 = vpop.f32.mrf.mxu0 }
 0x18b   : > { %v2383_v10 = vadd.f32 %v2286_v23, %v9538_v0  ;;  %v9219_v52 = vadd.f32 %v3088_v42, %v2379_v50 }
 0x18c   : > { %v7240_v5 = vpop.f32.mrf.mxu1  ;;  %v7284_v18 = vpop.f32.mrf.mxu0 }
 0x18d   : > { %v2388_v27 = vadd.f32 %v7240_v5, %v9539_v19  ;;  %v9223_v62 = vadd.f32 %v7284_v18, %v2384_v46 }
 0x18e   : > { %v2299_v32 = vpop.f32.mrf.mxu1  ;;  %v3101_v17 = vpop.f32.mrf.mxu0 }
 0x18f   : > { %v2386_v30 = vadd.f32 %v2299_v32, %v9540_v2  ;;  %v9226_v60 = vadd.f32 %v3101_v17, %v2382_v45 }
 0x190   : > { %v7241_v31 = vpop.f32.mrf.mxu1  ;;  %v7285_v63 = vpop.f32.mrf.mxu0 }
 0x191   : > { %v2389_v51 = vadd.f32 %v7241_v31, %v9541_v21  ;;  %v9229_v15 = vadd.f32 %v7285_v63, %v2385_v25 }
 0x192   : > { %v2302_v39 = vpop.f32.mrf.mxu1  ;;  %v3104_v11 = vpop.f32.mrf.mxu0 }
 0x193   : > { %v2387_v14 = vadd.f32 %v2302_v39, %v9542_v20  ;;  %v9232_v36 = vadd.f32 %v3104_v11, %v2383_v10 }
 0x194   : > { %v7244_v37 = vpop.f32.mrf.mxu1  ;;  %v7288_v58 = vpop.f32.mrf.mxu0 }
 0x195   : > { %v2392_v1 = vadd.f32 %v7244_v37, %v9543_v55  ;;  %v9235_v43 = vadd.f32 %v7288_v58, %v2388_v27 }
 0x196   : > { %v2315_v24 = vpop.f32.mrf.mxu1  ;;  %v3117_v59 = vpop.f32.mrf.mxu0 }
 0x197   : > { %v2390_v50 = vadd.f32 %v2315_v24, %v9115_v48  ;;  %v9238_v16 = vadd.f32 %v3117_v59, %v2386_v30 }
 0x198   : > { %v7245_v46 = vpop.f32.mrf.mxu1  ;;  %v7289_v26 = vpop.f32.mrf.mxu0 }
 0x199   : > { %v2393_v38 = vadd.f32 %v7245_v46, %v9132_v8  ;;  %v9241_v41 = vadd.f32 %v7289_v26, %v2389_v51 }
 0x19a   : > { %v2318_v45 = vpop.f32.mrf.mxu1  ;;  %v3120_v25 = vpop.f32.mrf.mxu0 }
 0x19b   : > { %v2391_v12 = vadd.f32 %v2318_v45, %v9135_v22  ;;  %v9243_v57 = vadd.f32 %v3120_v25, %v2387_v14 }
 0x19c   : > { %v7292_v23 = vpop.f32.mrf.mxu0  ;;  %v7312_v42 = vpop.f32.mrf.mxu1 }
 0x19d   : > { %v9245_v0 = vadd.f32 %v7292_v23, %v2392_v1  ;;  %v3776_v8 = vadd.f32 %v7312_v42, %v9138_v9 }
 0x19e   : > { %v3133_v48 = vpop.f32.mrf.mxu0  ;;  %v3615_v27 = vpop.f32.mrf.mxu1 }
 0x19f   : > { %v9247_v10 = vadd.f32 %v3133_v48, %v2390_v50  ;;  %v3774_v22 = vadd.f32 %v3615_v27, %v9141_v6 }
 0x1a0   : > { %v7293_v5 = vpop.f32.mrf.mxu0  ;;  %v9255_v2 = vpop.f32.mrf.mxu1 }
 0x1a1   : > { %v9250_v19 = vadd.f32 %v7293_v5, %v2393_v38 }
 0x1a2   : > { %v3136_v32 = vpop.f32.mrf.mxu0  ;;  %v9259_v17 = vpop.f32.mrf.mxu1 }
 0x1a3   : > { %v9253_v18 = vadd.f32 %v3136_v32, %v2391_v12 }
 0x1a4   : > { %v7360_v30 = vpop.f32.mrf.mxu0  ;;  %v7316_v39 = vpop.f32.mrf.mxu1 }
 0x1a5   : > { %v9257_v31 = vadd.f32 %v7360_v30, %v3776_v8  ;;  %v3780_v63 = vadd.f32 %v7316_v39, %v9166_v7 }
 0x1a6   : > { %v4066_v21 = vpop.f32.mrf.mxu0  ;;  %v3631_v20 = vpop.f32.mrf.mxu1 }
 0x1a7   : > { %v9261_v51 = vadd.f32 %v4066_v21, %v3774_v22  ;;  %v3778_v6 = vadd.f32 %v3631_v20, %v9169_v44 }
 0x1a8   : > { %v9263_v9 = vpop.f32.mrf.mxu0  ;;  %v9269_v37 = vpop.f32.mrf.mxu1 }
 0x1aa   : > { %v9266_v14 = vpop.f32.mrf.mxu0  ;;  %v9273_v1 = vpop.f32.mrf.mxu1 }
 0x1ac   : > { %v7364_v11 = vpop.f32.mrf.mxu0  ;;  %v7320_v50 = vpop.f32.mrf.mxu1 }
 0x1ad   : > { %v9271_v55 = vadd.f32 %v7364_v11, %v3780_v63  ;;  %v3784_v7 = vadd.f32 %v7320_v50, %v9178_v34 }
 0x1ae   : > { %v4082_v24 = vpop.f32.mrf.mxu0  ;;  %v3647_v59 = vpop.f32.mrf.mxu1 }
 0x1af   : > { %v9275_v58 = vadd.f32 %v4082_v24, %v3778_v6  ;;  %v3782_v44 = vadd.f32 %v3647_v59, %v9181_v40 }
 0x1b0   : > { %v9277_v46 = vpop.f32.mrf.mxu0  ;;  %v9283_v45 = vpop.f32.mrf.mxu1 }
 0x1b2   : > { %v9280_v38 = vpop.f32.mrf.mxu0  ;;  %v9287_v25 = vpop.f32.mrf.mxu1 }
 0x1b4   : > { %v7368_v26 = vpop.f32.mrf.mxu0  ;;  %v7324_v42 = vpop.f32.mrf.mxu1 }
 0x1b5   : > { %v9285_v12 = vadd.f32 %v7368_v26, %v3784_v7  ;;  %v3788_v34 = vadd.f32 %v7324_v42, %v9199_v54 }
 0x1b6   : > { %v4098_v23 = vpop.f32.mrf.mxu0  ;;  %v3663_v8 = vpop.f32.mrf.mxu1 }
 0x1b7   : > { %v9289_v48 = vadd.f32 %v4098_v23, %v3782_v44  ;;  %v3786_v40 = vadd.f32 %v3663_v8, %v9201_v13 }
 0x1b8   : > { %v9291_v5 = vpop.f32.mrf.mxu0  ;;  %v7325_v32 = vpop.f32.mrf.mxu1 }
 0x1b9   : > { %v3789_v30 = vadd.f32 %v7325_v32, %v9203_v28 }
 0x1ba   : > { %v9294_v27 = vpop.f32.mrf.mxu0  ;;  %v3666_v39 = vpop.f32.mrf.mxu1 }
 0x1bb   : > { %v3787_v20 = vadd.f32 %v3666_v39, %v9205_v29 }
 0x1bc   : > { %v7372_v22 = vpop.f32.mrf.mxu0  ;;  %v7328_v11 = vpop.f32.mrf.mxu1 }
 0x1bd   : > { %v9298_v21 = vadd.f32 %v7372_v22, %v3788_v34  ;;  %v3792_v54 = vadd.f32 %v7328_v11, %v9210_v56 }
 0x1be   : > { %v4114_v63 = vpop.f32.mrf.mxu0  ;;  %v3679_v7 = vpop.f32.mrf.mxu1 }
 0x1bf   : > { %v9301_v6 = vadd.f32 %v4114_v63, %v3786_v40  ;;  %v3790_v59 = vadd.f32 %v3679_v7, %v9213_v53 }
 0x1c0   : > { %v7373_v24 = vpop.f32.mrf.mxu0  ;;  %v7329_v28 = vpop.f32.mrf.mxu1 }
 0x1c1   : > { %v9304_v50 = vadd.f32 %v7373_v24, %v3789_v30  ;;  %v3793_v23 = vadd.f32 %v7329_v28, %v9216_v3 }
 0x1c2   : > { %v4117_v13 = vpop.f32.mrf.mxu0  ;;  %v3682_v29 = vpop.f32.mrf.mxu1 }
 0x1c3   : > { %v9307_v44 = vadd.f32 %v4117_v13, %v3787_v20  ;;  %v3791_v8 = vadd.f32 %v3682_v29, %v9219_v52 }
 0x1c4   : > { %v7376_v26 = vpop.f32.mrf.mxu0  ;;  %v7332_v56 = vpop.f32.mrf.mxu1 }
 0x1c5   : > { %v9310_v42 = vadd.f32 %v7376_v26, %v3792_v54  ;;  %v3796_v22 = vadd.f32 %v7332_v56, %v9223_v62 }
 0x1c6   : > { %v4130_v34 = vpop.f32.mrf.mxu0  ;;  %v3695_v53 = vpop.f32.mrf.mxu1 }
 0x1c7   : > { %v9313_v40 = vadd.f32 %v4130_v34, %v3790_v59  ;;  %v3794_v63 = vadd.f32 %v3695_v53, %v9226_v60 }
 0x1c8   : > { %v7377_v32 = vpop.f32.mrf.mxu0  ;;  %v7333_v3 = vpop.f32.mrf.mxu1 }
 0x1c9   : > { %v9316_v30 = vadd.f32 %v7377_v32, %v3793_v23  ;;  %v3797_v24 = vadd.f32 %v7333_v3, %v9229_v15 }
 0x1ca   : > { %v4133_v39 = vpop.f32.mrf.mxu0  ;;  %v3698_v52 = vpop.f32.mrf.mxu1 }
 0x1cb   : > { %v9319_v20 = vadd.f32 %v4133_v39, %v3791_v8  ;;  %v3795_v13 = vadd.f32 %v3698_v52, %v9232_v36 }
 0x1cc   : > { %v7380_v11 = vpop.f32.mrf.mxu0 }
 0x1cd   : > { %v9322_v54 = vadd.f32 %v7380_v11, %v3796_v22 }
 0x1ce   : > { %v4146_v7 = vpop.f32.mrf.mxu0 }
 0x1cf   : > { %v9325_v59 = vadd.f32 %v4146_v7, %v3794_v63  ;;  %v7336_v62 = vpop.f32.mrf.mxu1 }
 0x1d0   : > { %v7381_v28 = vpop.f32.mrf.mxu0  ;;  %v3800_v26 = vadd.f32 %v7336_v62, %v9235_v43 }
 0x1d1   : > { %v9328_v23 = vadd.f32 %v7381_v28, %v3797_v24  ;;  %v3711_v60 = vpop.f32.mrf.mxu1 }
 0x1d2   : > { %v4149_v29 = vpop.f32.mrf.mxu0  ;;  %v3798_v34 = vadd.f32 %v3711_v60, %v9238_v16 }
 0x1d3   : > { %v9331_v8 = vadd.f32 %v4149_v29, %v3795_v13  ;;  %v7337_v15 = vpop.f32.mrf.mxu1 }
 0x1d4   : > { %v3801_v32 = vadd.f32 %v7337_v15, %v9241_v41 }
 0x1d5   : > { %v7384_v56 = vpop.f32.mrf.mxu0  ;;  %v3714_v36 = vpop.f32.mrf.mxu1 }
 0x1d6   : > { %v9334_v22 = vadd.f32 %v7384_v56, %v3800_v26  ;;  %v3799_v39 = vadd.f32 %v3714_v36, %v9243_v57 }
 0x1d7   : > { %v4162_v53 = vpop.f32.mrf.mxu0 }
 0x1d8   : > { %v9337_v63 = vadd.f32 %v4162_v53, %v3798_v34 }
 0x1d9   : > { %v7385_v3 = vpop.f32.mrf.mxu0 }
 0x1da   : > { %v9340_v24 = vadd.f32 %v7385_v3, %v3801_v32 }
 0x1db   : > { %v4165_v52 = vpop.f32.mrf.mxu0 }
 0x1dc   : > { %v9343_v13 = vadd.f32 %v4165_v52, %v3799_v39 }
 0x1dd   : > { %v7340_v43 = vpop.f32.mrf.mxu1  ;;  %v7388_v62 = vpop.f32.mrf.mxu0 }
 0x1de   : > { %v3804_v11 = vadd.f32 %v7340_v43, %v9245_v0  ;;  %v3777_v0 = vadd.f32 %v9255_v2, %v9154_v61 }
 0x1df   : > { %v3727_v16 = vpop.f32.mrf.mxu1  ;;  %v4178_v60 = vpop.f32.mrf.mxu0 }
 0x1e0   : > { %v3802_v7 = vadd.f32 %v3727_v16, %v9247_v10  ;;  %v9346_v26 = vadd.f32 %v7388_v62, %v3804_v11  ;;  %v3775_v10 = vadd.f32 %v9259_v17, %v9163_v49  ;;  %v4228_v39 = vadd.f32 %v9263_v9, %v3777_v0  ;;  %v9366_v49 = vld [vmem:[%s9463_s2] ss:$0 sm:$0xff] }
 0x1e1   : > { %v7341_v41 = vpop.f32.mrf.mxu1  ;;  %v7389_v56 = vpop.f32.mrf.mxu0  ;;  %v3781_v9 = vadd.f32 %v9269_v37, %v9172_v33 }
 0x1e2   : > { %v3805_v28 = vadd.f32 %v7341_v41, %v9250_v19  ;;  %v9351_v34 = vadd.f32 %v4178_v60, %v3802_v7  ;;  %v4226_v3 = vadd.f32 %v9266_v14, %v3775_v10  ;;  %v3779_v41 = vadd.f32 %v9273_v1, %v9175_v35 }
 0x1e3   : > { %v3730_v57 = vpop.f32.mrf.mxu1  ;;  %v4181_v53 = vpop.f32.mrf.mxu0 }
 0x1e4   : > { %v3803_v29 = vadd.f32 %v3730_v57, %v9253_v18  ;;  %v9355_v32 = vadd.f32 %v7389_v56, %v3805_v28  ;;  %v4230_v35 = vadd.f32 %v9280_v38, %v3779_v41  ;;  %v3785_v41 = vadd.f32 %v9283_v45, %v9192_v4 }
 0x1e5   : > { %v7408_v15 = vpop.f32.mrf.mxu1 }
 0x1e6   : > { %v5045_v19 = vadd.f32 %v7408_v15, %v9257_v31  ;;  %v9359_v43 = vadd.f32 %v4181_v53, %v3803_v29  ;;  %v4232_v15 = vadd.f32 %v9277_v46, %v3781_v9  ;;  %v4236_v4 = vadd.f32 %v9291_v5, %v3785_v41 }
 0x1e7   : > { %v4884_v36 = vpop.f32.mrf.mxu1 }
 0x1e8   : > { %v5043_v18 = vadd.f32 %v4884_v36, %v9261_v51 }
 0x1e9   : > { %v7409_v61 = vpop.f32.mrf.mxu1 }
 0x1ea   : > { %v5046_v17 = vadd.f32 %v7409_v61, %v4228_v39 }
 0x1eb   : > { %v7456_v2 = vpop.f32.mrf.mxu0  ;;  %v4887_v31 = vpop.f32.mrf.mxu1 }
 0x1ec   : > { %v5639_v11 = vadd.f32 %v7456_v2, %v5045_v19  ;;  %v5044_v7 = vadd.f32 %v4887_v31, %v4226_v3 }
 0x1ed   : > { %v5478_v16 = vpop.f32.mrf.mxu0  ;;  %v7412_v51 = vpop.f32.mrf.mxu1 }
 0x1ee   : > { %v5637_v52 = vadd.f32 %v5478_v16, %v5043_v18  ;;  %v5742_v14 = vadd.f32 %v9366_v49, %v5639_v11  ;;  %v5049_v57 = vadd.f32 %v7412_v51, %v9271_v55 }
 0x1ef   : > { %v7457_v62 = vpop.f32.mrf.mxu0  ;;  %v4900_v60 = vpop.f32.mrf.mxu1 }
 0x1f0   : > { %v5640_v28 = vadd.f32 %v7457_v62, %v5046_v17  ;;  %v5740_v29 = vadd.f32 %v9366_v49, %v5637_v52  ;;  %v5047_v56 = vadd.f32 %v4900_v60, %v9275_v58  ;;  %v5774_v1 = vmax.f32 %v5742_v14, 0.0 }
 0x1f1   : > { %v5481_v0 = vpop.f32.mrf.mxu0  ;;  %v7413_v10 = vpop.f32.mrf.mxu1 }
 0x1f2   : > { %v5743_v33 = vadd.f32 %v9366_v49, %v5640_v28  ;;  %v5638_v37 = vadd.f32 %v5481_v0, %v5044_v7  ;;  %v5050_v39 = vadd.f32 %v7413_v10, %v4232_v15  ;;  %v5772_v61 = vmax.f32 %v5740_v29, 0.0 }
 0x1f3   : > { %v7460_v19 = vpop.f32.mrf.mxu0  ;;  %v4903_v18 = vpop.f32.mrf.mxu1  ;;  %v3783_v29 = vadd.f32 %v9287_v25, %v9197_v47 }
 0x1f4   : > { %v5775_v36 = vmax.f32 %v5743_v33, 0.0  ;;  %v5741_v55 = vadd.f32 %v9366_v49, %v5638_v37  ;;  %v5643_v53 = vadd.f32 %v7460_v19, %v5049_v57  ;;  %v5048_v3 = vadd.f32 %v4903_v18, %v4230_v35 }
 0x1f5   : > { %v5494_v58 = vpop.f32.mrf.mxu0 }
 0x1f6   : > { %v6751_v46 = vpack.c.bf16 %v5775_v36, %v5774_v1  ;;  %v5773_v2 = vmax.f32 %v5741_v55, 0.0  ;;  %v5641_v38 = vadd.f32 %v5494_v58, %v5047_v56  ;;  %v5746_v31 = vadd.f32 %v9366_v49, %v5643_v53 }
 0x1f7   : > { %v7461_v11 = vpop.f32.mrf.mxu0  ;;  %v4234_v55 = vadd.f32 %v9294_v27, %v3783_v29 }
 0x1f8   : > { %6823 = vst [vmem:[%s9384_s13 + $0x8] sm:$0xff] %v6751_v46   ;;  %v6746_v17 = vpack.c.bf16 %v5773_v2, %v5772_v61  ;;  %v5644_v16 = vadd.f32 %v7461_v11, %v5050_v39  ;;  %v5744_v52 = vadd.f32 %v9366_v49, %v5641_v38  ;;  %v5778_v62 = vmax.f32 %v5746_v31, 0.0 }
 0x1f9   : > { %v5497_v9 = vpop.f32.mrf.mxu0 }
 0x1fa   : > { %6747 = vst [vmem:[%s9384_s13] sm:$0xff] %v6746_v17   ;;  %v5747_v7 = vadd.f32 %v9366_v49, %v5644_v16  ;;  %v5642_v51 = vadd.f32 %v5497_v9, %v5048_v3  ;;  %v7416_v60 = vpop.f32.mrf.mxu1  ;;  %v5776_v33 = vmax.f32 %v5744_v52, 0.0 }
 0x1fb   : > { %v7464_v14 = vpop.f32.mrf.mxu0  ;;  %v5053_v0 = vadd.f32 %v7416_v60, %v9285_v12 }
 0x1fc   : > { %v5779_v28 = vmax.f32 %v5747_v7, 0.0  ;;  %v5745_v57 = vadd.f32 %v9366_v49, %v5642_v51  ;;  %v4916_v10 = vpop.f32.mrf.mxu1 }
 0x1fd   : > { %v5510_v15 = vpop.f32.mrf.mxu0  ;;  %v5647_v45 = vadd.f32 %v7464_v14, %v5053_v0  ;;  %v5051_v35 = vadd.f32 %v4916_v10, %v9289_v48 }
 0x1fe   : > { %v6761_v37 = vpack.c.bf16 %v5779_v28, %v5778_v62  ;;  %v5777_v56 = vmax.f32 %v5745_v57, 0.0  ;;  %v7417_v19 = vpop.f32.mrf.mxu1 }
 0x1ff   : > { %v7465_v36 = vpop.f32.mrf.mxu0  ;;  %v5645_v47 = vadd.f32 %v5510_v15, %v5051_v35  ;;  %v5054_v25 = vadd.f32 %v7417_v19, %v4236_v4  ;;  %v5750_v53 = vadd.f32 %v9366_v49, %v5647_v45 }
 0x200   : > { %6825 = vst [vmem:[%s9384_s13 + $0x18] sm:$0xff] %v6761_v37   ;;  %v6756_v1 = vpack.c.bf16 %v5777_v56, %v5776_v33  ;;  %v4919_v12 = vpop.f32.mrf.mxu1 }
 0x201   : > { %v5648_v39 = vadd.f32 %v7465_v36, %v5054_v25  ;;  %v5052_v18 = vadd.f32 %v4919_v12, %v4234_v55  ;;  %v5513_v61 = vpop.f32.mrf.mxu0  ;;  %v5748_v5 = vadd.f32 %v9366_v49, %v5645_v47  ;;  %v5782_v46 = vmax.f32 %v5750_v53, 0.0 }
 0x202   : > { %6824 = vst [vmem:[%s9384_s13 + $0x10] sm:$0xff] %v6756_v1  }
 0x203   : > { %v5751_v48 = vadd.f32 %v9366_v49, %v5648_v39  ;;  %v5646_v58 = vadd.f32 %v5513_v61, %v5052_v18  ;;  %v5780_v3 = vmax.f32 %v5748_v5, 0.0 }
 0x205   : > { %v5783_v2 = vmax.f32 %v5751_v48, 0.0  ;;  %v5749_v27 = vadd.f32 %v9366_v49, %v5646_v58 }
 0x207   : > { %v7468_v38 = vpop.f32.mrf.mxu0  ;;  %v6771_v11 = vpack.c.bf16 %v5783_v2, %v5782_v46  ;;  %v5781_v17 = vmax.f32 %v5749_v27, 0.0 }
 0x208   : > { %v7420_v31 = vpop.f32.mrf.mxu1 }
 0x209   : > { %v5057_v16 = vadd.f32 %v7420_v31, %v9298_v21  ;;  %v5526_v9 = vpop.f32.mrf.mxu0  ;;  %6827 = vst [vmem:[%s9384_s13 + $0x28] sm:$0xff] %v6771_v11   ;;  %v6766_v52 = vpack.c.bf16 %v5781_v17, %v5780_v3 }
 0x20a   : > { %v4932_v7 = vpop.f32.mrf.mxu1 }
 0x20b   : > { %v5651_v51 = vadd.f32 %v7468_v38, %v5057_v16  ;;  %v5055_v41 = vadd.f32 %v4932_v7, %v9301_v6  ;;  %6826 = vst [vmem:[%s9384_s13 + $0x20] sm:$0xff] %v6766_v52   ;;  %v7469_v62 = vpop.f32.mrf.mxu0 }
 0x20c   : > { %v7421_v14 = vpop.f32.mrf.mxu1 }
 0x20d   : > { %v5649_v28 = vadd.f32 %v5526_v9, %v5055_v41  ;;  %v5058_v57 = vadd.f32 %v7421_v14, %v9304_v50  ;;  %v5754_v29 = vadd.f32 %v9366_v49, %v5651_v51  ;;  %v5529_v15 = vpop.f32.mrf.mxu0 }
 0x20e   : > { %v4935_v60 = vpop.f32.mrf.mxu1 }
 0x20f   : > { %v5652_v0 = vadd.f32 %v7469_v62, %v5058_v57  ;;  %v5056_v21 = vadd.f32 %v4935_v60, %v9307_v44  ;;  %v5752_v33 = vadd.f32 %v9366_v49, %v5649_v28  ;;  %v5786_v56 = vmax.f32 %v5754_v29, 0.0 }
 0x211   : > { %v5755_v37 = vadd.f32 %v9366_v49, %v5652_v0  ;;  %v5650_v6 = vadd.f32 %v5529_v15, %v5056_v21  ;;  %v5784_v45 = vmax.f32 %v5752_v33, 0.0 }
 0x213   : > { %v5787_v10 = vmax.f32 %v5755_v37, 0.0  ;;  %v5753_v4 = vadd.f32 %v9366_v49, %v5650_v6 }
 0x215   : > { %v6781_v50 = vpack.c.bf16 %v5787_v10, %v5786_v56  ;;  %v5785_v35 = vmax.f32 %v5753_v4, 0.0  ;;  %v7472_v1 = vpop.f32.mrf.mxu0 }
 0x216   : > { %v7424_v19 = vpop.f32.mrf.mxu1 }
 0x217   : > { %6829 = vst [vmem:[%s9384_s13 + $0x38] sm:$0xff] %v6781_v50   ;;  %v6776_v36 = vpack.c.bf16 %v5785_v35, %v5784_v45  ;;  %v5061_v44 = vadd.f32 %v7424_v19, %v9310_v42  ;;  %v5542_v55 = vpop.f32.mrf.mxu0 }
 0x218   : > { %v4948_v47 = vpop.f32.mrf.mxu1 }
 0x219   : > { %6828 = vst [vmem:[%s9384_s13 + $0x30] sm:$0xff] %v6776_v36   ;;  %v5655_v25 = vadd.f32 %v7472_v1, %v5061_v44  ;;  %v5059_v12 = vadd.f32 %v4948_v47, %v9313_v40  ;;  %v7473_v39 = vpop.f32.mrf.mxu0 }
 0x21a   : > { %v7425_v53 = vpop.f32.mrf.mxu1 }
 0x21b   : > { %v5653_v18 = vadd.f32 %v5542_v55, %v5059_v12  ;;  %v5062_v61 = vadd.f32 %v7425_v53, %v9316_v30  ;;  %v5758_v48 = vadd.f32 %v9366_v49, %v5655_v25  ;;  %v5545_v2 = vpop.f32.mrf.mxu0 }
 0x21c   : > { %v4951_v5 = vpop.f32.mrf.mxu1 }
 0x21d   : > { %v5656_v58 = vadd.f32 %v7473_v39, %v5062_v61  ;;  %v5060_v46 = vadd.f32 %v4951_v5, %v9319_v20  ;;  %v5756_v42 = vadd.f32 %v9366_v49, %v5653_v18  ;;  %v5790_v40 = vmax.f32 %v5758_v48, 0.0 }
 0x21f   : > { %v5759_v27 = vadd.f32 %v9366_v49, %v5656_v58  ;;  %v5654_v38 = vadd.f32 %v5545_v2, %v5060_v46  ;;  %v5788_v17 = vmax.f32 %v5756_v42, 0.0 }
 0x221   : > { %v5791_v3 = vmax.f32 %v5759_v27, 0.0  ;;  %v5757_v11 = vadd.f32 %v9366_v49, %v5654_v38 }
 0x223   : > { %v6791_v30 = vpack.c.bf16 %v5791_v3, %v5790_v40  ;;  %v5789_v31 = vmax.f32 %v5757_v11, 0.0  ;;  %v7476_v16 = vpop.f32.mrf.mxu0 }
 0x224   : > { %v7428_v9 = vpop.f32.mrf.mxu1 }
 0x225   : > { %6831 = vst [vmem:[%s9384_s13 + $0x48] sm:$0xff] %v6791_v30   ;;  %v6786_v52 = vpack.c.bf16 %v5789_v31, %v5788_v17  ;;  %v5065_v20 = vadd.f32 %v7428_v9, %v9322_v54  ;;  %v5558_v7 = vpop.f32.mrf.mxu0 }
 0x226   : > { %v4964_v51 = vpop.f32.mrf.mxu1 }
 0x227   : > { %6830 = vst [vmem:[%s9384_s13 + $0x40] sm:$0xff] %v6786_v52   ;;  %v5659_v41 = vadd.f32 %v7476_v16, %v5065_v20  ;;  %v5063_v14 = vadd.f32 %v4964_v51, %v9325_v59  ;;  %v7477_v28 = vpop.f32.mrf.mxu0 }
 0x228   : > { %v7429_v62 = vpop.f32.mrf.mxu1 }
 0x229   : > { %v5657_v57 = vadd.f32 %v5558_v7, %v5063_v14  ;;  %v5066_v60 = vadd.f32 %v7429_v62, %v9328_v23  ;;  %v5762_v0 = vadd.f32 %v9366_v49, %v5659_v41  ;;  %v5561_v33 = vpop.f32.mrf.mxu0 }
 0x22a   : > { %v4967_v29 = vpop.f32.mrf.mxu1 }
 0x22b   : > { %v5660_v21 = vadd.f32 %v7477_v28, %v5066_v60  ;;  %v5064_v15 = vadd.f32 %v4967_v29, %v9331_v8  ;;  %v5760_v54 = vadd.f32 %v9366_v49, %v5657_v57  ;;  %v5794_v59 = vmax.f32 %v5762_v0, 0.0 }
 0x22d   : > { %v5763_v37 = vadd.f32 %v9366_v49, %v5660_v21  ;;  %v5658_v6 = vadd.f32 %v5561_v33, %v5064_v15  ;;  %v5792_v4 = vmax.f32 %v5760_v54, 0.0 }
 0x22f   : > { %v5795_v56 = vmax.f32 %v5763_v37, 0.0  ;;  %v5761_v10 = vadd.f32 %v9366_v49, %v5658_v6 }
 0x231   : > { %v6801_v23 = vpack.c.bf16 %v5795_v56, %v5794_v59  ;;  %v5793_v45 = vmax.f32 %v5761_v10, 0.0  ;;  %v7480_v50 = vpop.f32.mrf.mxu0 }
 0x232   : > { %v7432_v35 = vpop.f32.mrf.mxu1 }
 0x233   : > { %6833 = vst [vmem:[%s9384_s13 + $0x58] sm:$0xff] %v6801_v23   ;;  %v6796_v1 = vpack.c.bf16 %v5793_v45, %v5792_v4  ;;  %v5069_v8 = vadd.f32 %v7432_v35, %v9334_v22  ;;  %v5574_v19 = vpop.f32.mrf.mxu0 }
 0x234   : > { %v4980_v36 = vpop.f32.mrf.mxu1 }
 0x235   : > { %6832 = vst [vmem:[%s9384_s13 + $0x50] sm:$0xff] %v6796_v1   ;;  %v5663_v44 = vadd.f32 %v7480_v50, %v5069_v8  ;;  %v5067_v55 = vadd.f32 %v4980_v36, %v9337_v63  ;;  %v7481_v25 = vpop.f32.mrf.mxu0 }
 0x236   : > { %v7433_v47 = vpop.f32.mrf.mxu1 }
 0x237   : > { %v5661_v12 = vadd.f32 %v5574_v19, %v5067_v55  ;;  %v5070_v53 = vadd.f32 %v7433_v47, %v9340_v24  ;;  %v5766_v18 = vadd.f32 %v9366_v49, %v5663_v44  ;;  %v5577_v48 = vpop.f32.mrf.mxu0 }
 0x238   : > { %v4983_v39 = vpop.f32.mrf.mxu1 }
 0x239   : > { %v5664_v61 = vadd.f32 %v7481_v25, %v5070_v53  ;;  %v5068_v5 = vadd.f32 %v4983_v39, %v9343_v13  ;;  %v5764_v22 = vadd.f32 %v9366_v49, %v5661_v12  ;;  %v5798_v63 = vmax.f32 %v5766_v18, 0.0 }
 0x23b   : > { %v5767_v58 = vadd.f32 %v9366_v49, %v5664_v61  ;;  %v5662_v46 = vadd.f32 %v5577_v48, %v5068_v5  ;;  %v5796_v27 = vmax.f32 %v5764_v22, 0.0 }
 0x23d   : > { %v5799_v2 = vmax.f32 %v5767_v58, 0.0  ;;  %v5765_v42 = vadd.f32 %v9366_v49, %v5662_v46 }
 0x23f   : > { %v6811_v24 = vpack.c.bf16 %v5799_v2, %v5798_v63  ;;  %v5797_v38 = vmax.f32 %v5765_v42, 0.0  ;;  %v7484_v40 = vpop.f32.mrf.mxu0 }
 0x240   : > { %v7436_v3 = vpop.f32.mrf.mxu1 }
 0x241   : > { %6835 = vst [vmem:[%s9384_s13 + $0x68] sm:$0xff] %v6811_v24   ;;  %v6806_v11 = vpack.c.bf16 %v5797_v38, %v5796_v27  ;;  %v5073_v13 = vadd.f32 %v7436_v3, %v9346_v26  ;;  %v5590_v17 = vpop.f32.mrf.mxu0 }
 0x242   : > { %v4996_v30 = vpop.f32.mrf.mxu1 }
 0x243   : > { %6834 = vst [vmem:[%s9384_s13 + $0x60] sm:$0xff] %v6806_v11   ;;  %v5667_v31 = vadd.f32 %v7484_v40, %v5073_v13  ;;  %v5071_v16 = vadd.f32 %v4996_v30, %v9351_v34  ;;  %v7485_v52 = vpop.f32.mrf.mxu0 }
 0x244   : > { %v7437_v9 = vpop.f32.mrf.mxu1 }
 0x245   : > { %v5665_v20 = vadd.f32 %v5590_v17, %v5071_v16  ;;  %v5074_v7 = vadd.f32 %v7437_v9, %v9355_v32  ;;  %v5770_v41 = vadd.f32 %v9366_v49, %v5667_v31  ;;  %v5593_v26 = vpop.f32.mrf.mxu0 }
 0x246   : > { %v4999_v51 = vpop.f32.mrf.mxu1 }
 0x247   : > { %v5668_v14 = vadd.f32 %v7485_v52, %v5074_v7  ;;  %v5072_v62 = vadd.f32 %v4999_v51, %v9359_v43  ;;  %v5768_v28 = vadd.f32 %v9366_v49, %v5665_v20  ;;  %v5802_v34 = vmax.f32 %v5770_v41, 0.0 }
 0x249   : > { %v5771_v57 = vadd.f32 %v9366_v49, %v5668_v14  ;;  %v5666_v60 = vadd.f32 %v5593_v26, %v5072_v62  ;;  %v5800_v21 = vmax.f32 %v5768_v28, 0.0 }
 0x24b   : > { %v5803_v29 = vmax.f32 %v5771_v57, 0.0  ;;  %v5769_v0 = vadd.f32 %v9366_v49, %v5666_v60 }
 0x24d   : > { %v6821_v15 = vpack.c.bf16 %v5803_v29, %v5802_v34  ;;  %v5801_v32 = vmax.f32 %v5769_v0, 0.0 }
 0x24f   : > { %6837 = vst [vmem:[%s9384_s13 + $0x78] sm:$0xff] %v6821_v15   ;;  %v6816_v33 = vpack.c.bf16 %v5801_v32, %v5800_v21 }
 0x251   : > { %6836 = vst [vmem:[%s9384_s13 + $0x70] sm:$0xff] %v6816_v33  }
 0x252 PF: > { %s13_s12 = sadd.s32 1, %s7637_s12  }
 0x253   : > { %p10_p4 = scmp.ge.s32.totalorder %s13_s12, 4  }
 0x255   :  { %12 = sbr.rel (!%p10_p4) target bundleno = 1 (0x1), region = 72 }

</bundles_post_ra>
